<compile_context>
chip_gen: v6e
topology: v6e:2x2x1
jax: 0.10.0
libtpu: 0.0.40
codegen_flags: <defaults>
</compile_context>

<pallas_src>
import jax
import jax.numpy as jnp
from jax.experimental import pallas as pl
from jax.experimental.pallas import tpu as pltpu

# ----------------------------- config ---------------------------------------
B = 2                        # batch
T = 3                        # time steps
C, HI, WI = 3, 16, 16
CHW = C * HI * WI            # 768
FEAT = 2048                  # resnet50 fc.in_features
FC_H1 = 512
FC_H2 = 512
EMBED = 300                  # cnn_embed_dim
EMBED_PAD = 384              # padded to 3x128 lanes (zero padding, inert)
LSTM_H = 256                 # hidden_lstm
LSTM_LAYERS = 3
GATES = 4 * LSTM_H           # 1024
FC_DIM = 128                 # hidden_fc_dim
DROP_P = 0.3
BN_EPS = 1e-5

_RESIDENT = pl.BlockSpec(memory_space=pltpu.MemorySpace.VMEM)  # whole array in VMEM


# ----------------------------- kernels ---------------------------------------
def frame_head_kernel(x_ref,                       # (B, CHW)      this frame
                      wf_ref,                      # (CHW, FEAT)   bf16
                      w1_ref, b1_ref, g1_ref, be1_ref,
                      w2_ref, b2_ref, g2_ref, be2_ref,
                      w3_ref, b3_ref,              # (FC_H2, EMBED_PAD)
                      wih0_ref, bl0_ref,           # LSTM layer-0 input proj
                      mask_ref,                    # (B, FC_H2) scaled keep mask
                      out_ref):                    # (B, 4H)
    x = x_ref[...]

    # TODO(synk): linear stand-in for the frozen ResNet50 backbone.
    feat = jnp.dot(x.astype(jnp.bfloat16), wf_ref[...],
                   preferred_element_type=jnp.float32)            # (B, FEAT)

    # fc1 + bn1 (training: per-frame batch statistics) + relu
    h1 = jnp.dot(feat.astype(jnp.bfloat16), w1_ref[...],
                 preferred_element_type=jnp.float32) + b1_ref[...]
    m1 = jnp.mean(h1, axis=0, keepdims=True)
    v1 = jnp.mean((h1 - m1) ** 2, axis=0, keepdims=True)
    h1 = g1_ref[...] * (h1 - m1) * jax.lax.rsqrt(v1 + BN_EPS) + be1_ref[...]
    h1 = jnp.maximum(h1, 0.0)

    # fc2 + bn2 + relu
    h2 = jnp.dot(h1.astype(jnp.bfloat16), w2_ref[...],
                 preferred_element_type=jnp.float32) + b2_ref[...]
    m2 = jnp.mean(h2, axis=0, keepdims=True)
    v2 = jnp.mean((h2 - m2) ** 2, axis=0, keepdims=True)
    h2 = g2_ref[...] * (h2 - m2) * jax.lax.rsqrt(v2 + BN_EPS) + be2_ref[...]
    h2 = jnp.maximum(h2, 0.0)

    # F.dropout(x, p) -- active (training); inverted-dropout keep mask (scaled)
    h2 = h2 * mask_ref[...]

    # fc3 -> embedding (padded to 384 lanes; pad cols are exactly zero)
    e = jnp.dot(h2.astype(jnp.bfloat16), w3_ref[...],
                preferred_element_type=jnp.float32) + b3_ref[...]

    # Hoisted LSTM layer-0 input projection: x_t @ W_ih0 + (b_ih0 + b_hh0)
    out_ref[...] = jnp.dot(e.astype(jnp.bfloat16), wih0_ref[...],
                           preferred_element_type=jnp.float32) + bl0_ref[...]


def _lstm_cell(gates, c):
    """PyTorch gate order i, f, g, o; returns (h_new, c_new)."""
    H = LSTM_H
    i = jax.nn.sigmoid(gates[:, 0:H])
    f = jax.nn.sigmoid(gates[:, H:2 * H])
    g = jnp.tanh(gates[:, 2 * H:3 * H])
    o = jax.nn.sigmoid(gates[:, 3 * H:4 * H])
    c_new = f * c + i * g
    h_new = o * jnp.tanh(c_new)
    return h_new, c_new


def lstm_fc4_kernel(xw0_ref,                       # (T, B, 4H) layer-0 input proj
                    whh0_ref,
                    wih1_ref, whh1_ref, bl1_ref,
                    wih2_ref, whh2_ref, bl2_ref,
                    w4_ref, b4_ref,
                    mask4_ref,                     # (B, FC_DIM) scaled keep mask
                    out_ref):                      # (B, FC_DIM)
    whh0 = whh0_ref[...]
    wih1, whh1, bl1 = wih1_ref[...], whh1_ref[...], bl1_ref[...]
    wih2, whh2, bl2 = wih2_ref[...], whh2_ref[...], bl2_ref[...]

    zeros = jnp.zeros((B, LSTM_H), jnp.float32)
    h0 = c0 = h1 = c1 = h2 = c2 = zeros

    # T is a compile-time constant -> fully unrolled recurrence, all state in
    # registers/VMEM; weights loaded once from the resident VMEM operands.
    for t in range(T):
        g0 = xw0_ref[t] + jnp.dot(h0.astype(jnp.bfloat16), whh0,
                                  preferred_element_type=jnp.float32)
        h0, c0 = _lstm_cell(g0, c0)

        g1 = (jnp.dot(h0.astype(jnp.bfloat16), wih1,
                      preferred_element_type=jnp.float32)
              + jnp.dot(h1.astype(jnp.bfloat16), whh1,
                        preferred_element_type=jnp.float32) + bl1)
        h1, c1 = _lstm_cell(g1, c1)

        g2 = (jnp.dot(h1.astype(jnp.bfloat16), wih2,
                      preferred_element_type=jnp.float32)
              + jnp.dot(h2.astype(jnp.bfloat16), whh2,
                        preferred_element_type=jnp.float32) + bl2)
        h2, c2 = _lstm_cell(g2, c2)

    # fc4 + relu + dropout on LSTM_out[:, -1, :]
    y = jnp.dot(h2.astype(jnp.bfloat16), w4_ref[...],
                preferred_element_type=jnp.float32) + b4_ref[...]
    y = jnp.maximum(y, 0.0)
    out_ref[...] = y * mask4_ref[...]


# ----------------------------- wrappers ---------------------------------------
def run_frame_head(x_seq, p, keep1):
    """x_seq: (T, B, CHW) f32 -> (T, B, 4H) f32 (LSTM layer-0 pre-activations)."""
    t = x_seq.shape[0]
    blk = lambda shape: pl.BlockSpec(shape, lambda i: (i, 0, 0))
    return pl.pallas_call(
        frame_head_kernel,
        out_shape=jax.ShapeDtypeStruct((t, B, GATES), jnp.float32),
        grid=(t,),
        in_specs=[blk((None, B, CHW))] + [_RESIDENT] * 13 + [blk((None, B, FC_H2))],
        out_specs=blk((None, B, GATES)),
        compiler_params=pltpu.CompilerParams(
            dimension_semantics=("parallel",),
            vmem_limit_bytes=48 * 1024 * 1024),
    )(x_seq,
      p["w_feat"],
      p["w1"], p["b1"], p["g1"], p["be1"],
      p["w2"], p["b2"], p["g2"], p["be2"],
      p["w3"], p["b3"],
      p["wih0"], p["bl0"],
      keep1)


def run_lstm_fc4(xw0_seq, p, keep4):
    return pl.pallas_call(
        lstm_fc4_kernel,
        out_shape=jax.ShapeDtypeStruct((B, FC_DIM), jnp.float32),
        in_specs=[_RESIDENT] * 11,
        out_specs=_RESIDENT,
        compiler_params=pltpu.CompilerParams(
            vmem_limit_bytes=48 * 1024 * 1024),
    )(xw0_seq,
      p["whh0"],
      p["wih1"], p["whh1"], p["bl1"],
      p["wih2"], p["whh2"], p["bl2"],
      p["w4"], p["b4"],
      keep4)


def previous_guide_forward(x_3d, params, dropout_key):
    """x_3d: (B, T, C, H, W) f32 -> (B, FC_DIM) f32."""
    b, t = x_3d.shape[0], x_3d.shape[1]
    # (B, T, C, H, W) -> (T, B, C*H*W) row-major flatten (layout glue only)
    x_seq = jnp.transpose(x_3d, (1, 0, 2, 3, 4)).reshape(t, b, CHW)

    k1, k4 = jax.random.split(dropout_key)
    inv_keep = 1.0 / (1.0 - DROP_P)
    keep1 = jax.random.bernoulli(k1, 1.0 - DROP_P,
                                 (t, b, FC_H2)).astype(jnp.float32) * inv_keep
    keep4 = jax.random.bernoulli(k4, 1.0 - DROP_P,
                                 (b, FC_DIM)).astype(jnp.float32) * inv_keep

    xw0_seq = run_frame_head(x_seq, params, keep1)    # per-frame CNN head (fused)
    return run_lstm_fc4(xw0_seq, params, keep4)       # LSTM + fc4 head (fused)


# ----------------------------- parameter init ---------------------------------
def init_params(key):
    ks = jax.random.split(key, 10)

    def nrm_bf16(k, shape, scale):
        return (jax.random.normal(k, shape, jnp.float32) * scale).astype(jnp.bfloat16)

    p = {}
    p["w_feat"] = nrm_bf16(ks[0], (CHW, FEAT), 0.02)          # backbone stand-in
    p["w1"] = nrm_bf16(ks[1], (FEAT, FC_H1), 0.02)
    p["b1"] = jnp.zeros((1, FC_H1), jnp.float32)
    p["g1"] = jnp.ones((1, FC_H1), jnp.float32)
    p["be1"] = jnp.zeros((1, FC_H1), jnp.float32)
    p["w2"] = nrm_bf16(ks[2], (FC_H1, FC_H2), 0.02)
    p["b2"] = jnp.zeros((1, FC_H2), jnp.float32)
    p["g2"] = jnp.ones((1, FC_H2), jnp.float32)
    p["be2"] = jnp.zeros((1, FC_H2), jnp.float32)

    w3 = jax.random.normal(ks[3], (FC_H2, EMBED), jnp.float32) * 0.02
    p["w3"] = jnp.pad(w3, ((0, 0), (0, EMBED_PAD - EMBED))).astype(jnp.bfloat16)
    p["b3"] = jnp.zeros((1, EMBED_PAD), jnp.float32)

    # LSTM (bias = b_ih + b_hh combined per layer)
    scale = 1.0 / (LSTM_H ** 0.5)
    k0a, k0b, k0c = jax.random.split(ks[4], 3)
    wih0 = jax.random.uniform(k0a, (EMBED, GATES), jnp.float32, -scale, scale)
    p["wih0"] = jnp.pad(wih0, ((0, EMBED_PAD - EMBED), (0, 0))).astype(jnp.bfloat16)
    p["whh0"] = jax.random.uniform(k0b, (LSTM_H, GATES), jnp.float32,
                                   -scale, scale).astype(jnp.bfloat16)
    p["bl0"] = jax.random.uniform(k0c, (1, GATES), jnp.float32, -scale, scale)
    for layer in (1, 2):
        ka, kb, kc = jax.random.split(ks[4 + layer], 3)
        p[f"wih{layer}"] = jax.random.uniform(ka, (LSTM_H, GATES), jnp.float32,
                                              -scale, scale).astype(jnp.bfloat16)
        p[f"whh{layer}"] = jax.random.uniform(kb, (LSTM_H, GATES), jnp.float32,
                                              -scale, scale).astype(jnp.bfloat16)
        p[f"bl{layer}"] = jax.random.uniform(kc, (1, GATES), jnp.float32,
                                             -scale, scale)

    p["w4"] = nrm_bf16(ks[7], (LSTM_H, FC_DIM), 0.05)
    p["b4"] = jnp.zeros((1, FC_DIM), jnp.float32)
    return p


# ----------------------------- main --------------------------------------------
if __name__ == "__main__":
    key = jax.random.PRNGKey(0)
    k_x, k_p, k_drop = jax.random.split(key, 3)
    x_3d = jax.random.normal(k_x, (B, T, C, HI, WI), jnp.float32)
    params = init_params(k_p)

    out = previous_guide_forward(x_3d, params, k_drop)
    out = jax.block_until_ready(out)

    assert out.shape == (B, FC_DIM), out.shape
    assert out.dtype == jnp.float32
    assert bool(jnp.all(jnp.isfinite(out)))
    print("KERNEL_OK")
</pallas_src>

<mosaic_0001>
module attributes {stable_mosaic.version = 11 : i64} {
  func.func @frame_head_kernel(%arg0: i32, %arg1: memref<1x2x768xf32, #tpu.memory_space<vmem>>, %arg2: memref<768x2048xbf16, #tpu.memory_space<vmem>>, %arg3: memref<2048x512xbf16, #tpu.memory_space<vmem>>, %arg4: memref<1x512xf32, #tpu.memory_space<vmem>>, %arg5: memref<1x512xf32, #tpu.memory_space<vmem>>, %arg6: memref<1x512xf32, #tpu.memory_space<vmem>>, %arg7: memref<512x512xbf16, #tpu.memory_space<vmem>>, %arg8: memref<1x512xf32, #tpu.memory_space<vmem>>, %arg9: memref<1x512xf32, #tpu.memory_space<vmem>>, %arg10: memref<1x512xf32, #tpu.memory_space<vmem>>, %arg11: memref<512x384xbf16, #tpu.memory_space<vmem>>, %arg12: memref<1x384xf32, #tpu.memory_space<vmem>>, %arg13: memref<384x1024xbf16, #tpu.memory_space<vmem>>, %arg14: memref<1x1024xf32, #tpu.memory_space<vmem>>, %arg15: memref<1x2x512xf32, #tpu.memory_space<vmem>>, %arg16: memref<1x2x1024xf32, #tpu.memory_space<vmem>>) attributes {dimension_semantics = [#tpu.dimension_semantics<parallel>], iteration_bounds = array<i64: 3>, scalar_prefetch = 0 : i64, scratch_operands = 0 : i64, tpu.core_type = #tpu.core_type<tc>, window_params = [{transform_indices = @transform_0, window_bounds = array<i64: 1, 2, 768>}, {pipeline_mode = #tpu.pipeline_mode<synchronous>, transform_indices = @transform_1, window_bounds = array<i64: 768, 2048>}, {pipeline_mode = #tpu.pipeline_mode<synchronous>, transform_indices = @transform_2, window_bounds = array<i64: 2048, 512>}, {pipeline_mode = #tpu.pipeline_mode<synchronous>, transform_indices = @transform_3, window_bounds = array<i64: 1, 512>}, {pipeline_mode = #tpu.pipeline_mode<synchronous>, transform_indices = @transform_4, window_bounds = array<i64: 1, 512>}, {pipeline_mode = #tpu.pipeline_mode<synchronous>, transform_indices = @transform_5, window_bounds = array<i64: 1, 512>}, {pipeline_mode = #tpu.pipeline_mode<synchronous>, transform_indices = @transform_6, window_bounds = array<i64: 512, 512>}, {pipeline_mode = #tpu.pipeline_mode<synchronous>, transform_indices = @transform_7, window_bounds = array<i64: 1, 512>}, {pipeline_mode = #tpu.pipeline_mode<synchronous>, transform_indices = @transform_8, window_bounds = array<i64: 1, 512>}, {pipeline_mode = #tpu.pipeline_mode<synchronous>, transform_indices = @transform_9, window_bounds = array<i64: 1, 512>}, {pipeline_mode = #tpu.pipeline_mode<synchronous>, transform_indices = @transform_10, window_bounds = array<i64: 512, 384>}, {pipeline_mode = #tpu.pipeline_mode<synchronous>, transform_indices = @transform_11, window_bounds = array<i64: 1, 384>}, {pipeline_mode = #tpu.pipeline_mode<synchronous>, transform_indices = @transform_12, window_bounds = array<i64: 384, 1024>}, {pipeline_mode = #tpu.pipeline_mode<synchronous>, transform_indices = @transform_13, window_bounds = array<i64: 1, 1024>}, {transform_indices = @transform_14, window_bounds = array<i64: 1, 2, 512>}, {transform_indices = @transform_15, window_bounds = array<i64: 1, 2, 1024>}]} {
    %c0 = arith.constant 0 : index
    %c0_0 = arith.constant 0 : index
    %c0_1 = arith.constant 0 : index
    %0 = vector.load %arg1[%c0, %c0_0, %c0_1] : memref<1x2x768xf32, #tpu.memory_space<vmem>>, vector<1x2x768xf32>
    %1 = vector.shape_cast %0 : vector<1x2x768xf32> to vector<2x768xf32>
    %2 = arith.truncf %1 : vector<2x768xf32> to vector<2x768xbf16>
    %c0_2 = arith.constant 0 : index
    %c0_3 = arith.constant 0 : index
    %3 = vector.load %arg2[%c0_2, %c0_3] : memref<768x2048xbf16, #tpu.memory_space<vmem>>, vector<768x2048xbf16>
    %cst = arith.constant dense<0.000000e+00> : vector<2x2048xf32>
    %4 = tpu.matmul %2, %3, %cst {dimension_numbers = #tpu.dot_dimension_numbers<[1], [0], [0], [1], [0, 0, 1, 1], [], []>} : vector<2x768xbf16>, vector<768x2048xbf16>, vector<2x2048xf32> -> vector<2x2048xf32>
    %5 = arith.truncf %4 : vector<2x2048xf32> to vector<2x2048xbf16>
    %c0_4 = arith.constant 0 : index
    %c0_5 = arith.constant 0 : index
    %6 = vector.load %arg3[%c0_4, %c0_5] : memref<2048x512xbf16, #tpu.memory_space<vmem>>, vector<2048x512xbf16>
    %cst_6 = arith.constant dense<0.000000e+00> : vector<2x512xf32>
    %7 = tpu.matmul %5, %6, %cst_6 {dimension_numbers = #tpu.dot_dimension_numbers<[1], [0], [0], [1], [0, 0, 1, 1], [], []>} : vector<2x2048xbf16>, vector<2048x512xbf16>, vector<2x512xf32> -> vector<2x512xf32>
    %c0_7 = arith.constant 0 : index
    %c0_8 = arith.constant 0 : index
    %8 = vector.load %arg4[%c0_7, %c0_8] : memref<1x512xf32, #tpu.memory_space<vmem>>, vector<1x512xf32>
    %9 = vector.broadcast %8 : vector<1x512xf32> to vector<2x512xf32>
    %10 = arith.addf %7, %9 : vector<2x512xf32>
    %cst_9 = arith.constant dense<0.000000e+00> : vector<512xf32>
    %11 = vector.multi_reduction <add>, %10, %cst_9 [0] : vector<2x512xf32> to vector<512xf32>
    %12 = vector.shape_cast %11 : vector<512xf32> to vector<1x512xf32>
    %cst_10 = arith.constant 2.000000e+00 : f32
    %13 = vector.broadcast %cst_10 : f32 to vector<1x512xf32>
    %14 = arith.divf %12, %13 : vector<1x512xf32>
    %15 = vector.broadcast %14 : vector<1x512xf32> to vector<2x512xf32>
    %16 = arith.subf %10, %15 : vector<2x512xf32>
    %17 = arith.mulf %16, %16 : vector<2x512xf32>
    %cst_11 = arith.constant dense<0.000000e+00> : vector<512xf32>
    %18 = vector.multi_reduction <add>, %17, %cst_11 [0] : vector<2x512xf32> to vector<512xf32>
    %19 = vector.shape_cast %18 : vector<512xf32> to vector<1x512xf32>
    %cst_12 = arith.constant 2.000000e+00 : f32
    %20 = vector.broadcast %cst_12 : f32 to vector<1x512xf32>
    %21 = arith.divf %19, %20 : vector<1x512xf32>
    %c0_13 = arith.constant 0 : index
    %c0_14 = arith.constant 0 : index
    %22 = vector.load %arg5[%c0_13, %c0_14] : memref<1x512xf32, #tpu.memory_space<vmem>>, vector<1x512xf32>
    %23 = vector.broadcast %14 : vector<1x512xf32> to vector<2x512xf32>
    %24 = arith.subf %10, %23 : vector<2x512xf32>
    %25 = vector.broadcast %22 : vector<1x512xf32> to vector<2x512xf32>
    %26 = arith.mulf %25, %24 : vector<2x512xf32>
    %cst_15 = arith.constant 9.99999974E-6 : f32
    %27 = vector.broadcast %cst_15 : f32 to vector<1x512xf32>
    %28 = arith.addf %21, %27 : vector<1x512xf32>
    %29 = math.rsqrt %28 : vector<1x512xf32>
    %30 = vector.broadcast %29 : vector<1x512xf32> to vector<2x512xf32>
    %31 = arith.mulf %26, %30 : vector<2x512xf32>
    %c0_16 = arith.constant 0 : index
    %c0_17 = arith.constant 0 : index
    %32 = vector.load %arg6[%c0_16, %c0_17] : memref<1x512xf32, #tpu.memory_space<vmem>>, vector<1x512xf32>
    %33 = vector.broadcast %32 : vector<1x512xf32> to vector<2x512xf32>
    %34 = arith.addf %31, %33 : vector<2x512xf32>
    %cst_18 = arith.constant 0.000000e+00 : f32
    %35 = vector.broadcast %cst_18 : f32 to vector<2x512xf32>
    %36 = arith.maximumf %34, %35 : vector<2x512xf32>
    %37 = arith.truncf %36 : vector<2x512xf32> to vector<2x512xbf16>
    %c0_19 = arith.constant 0 : index
    %c0_20 = arith.constant 0 : index
    %38 = vector.load %arg7[%c0_19, %c0_20] : memref<512x512xbf16, #tpu.memory_space<vmem>>, vector<512x512xbf16>
    %cst_21 = arith.constant dense<0.000000e+00> : vector<2x512xf32>
    %39 = tpu.matmul %37, %38, %cst_21 {dimension_numbers = #tpu.dot_dimension_numbers<[1], [0], [0], [1], [0, 0, 1, 1], [], []>} : vector<2x512xbf16>, vector<512x512xbf16>, vector<2x512xf32> -> vector<2x512xf32>
    %c0_22 = arith.constant 0 : index
    %c0_23 = arith.constant 0 : index
    %40 = vector.load %arg8[%c0_22, %c0_23] : memref<1x512xf32, #tpu.memory_space<vmem>>, vector<1x512xf32>
    %41 = vector.broadcast %40 : vector<1x512xf32> to vector<2x512xf32>
    %42 = arith.addf %39, %41 : vector<2x512xf32>
    %cst_24 = arith.constant dense<0.000000e+00> : vector<512xf32>
    %43 = vector.multi_reduction <add>, %42, %cst_24 [0] : vector<2x512xf32> to vector<512xf32>
    %44 = vector.shape_cast %43 : vector<512xf32> to vector<1x512xf32>
    %cst_25 = arith.constant 2.000000e+00 : f32
    %45 = vector.broadcast %cst_25 : f32 to vector<1x512xf32>
    %46 = arith.divf %44, %45 : vector<1x512xf32>
    %47 = vector.broadcast %46 : vector<1x512xf32> to vector<2x512xf32>
    %48 = arith.subf %42, %47 : vector<2x512xf32>
    %49 = arith.mulf %48, %48 : vector<2x512xf32>
    %cst_26 = arith.constant dense<0.000000e+00> : vector<512xf32>
    %50 = vector.multi_reduction <add>, %49, %cst_26 [0] : vector<2x512xf32> to vector<512xf32>
    %51 = vector.shape_cast %50 : vector<512xf32> to vector<1x512xf32>
    %cst_27 = arith.constant 2.000000e+00 : f32
    %52 = vector.broadcast %cst_27 : f32 to vector<1x512xf32>
    %53 = arith.divf %51, %52 : vector<1x512xf32>
    %c0_28 = arith.constant 0 : index
    %c0_29 = arith.constant 0 : index
    %54 = vector.load %arg9[%c0_28, %c0_29] : memref<1x512xf32, #tpu.memory_space<vmem>>, vector<1x512xf32>
    %55 = vector.broadcast %46 : vector<1x512xf32> to vector<2x512xf32>
    %56 = arith.subf %42, %55 : vector<2x512xf32>
    %57 = vector.broadcast %54 : vector<1x512xf32> to vector<2x512xf32>
    %58 = arith.mulf %57, %56 : vector<2x512xf32>
    %cst_30 = arith.constant 9.99999974E-6 : f32
    %59 = vector.broadcast %cst_30 : f32 to vector<1x512xf32>
    %60 = arith.addf %53, %59 : vector<1x512xf32>
    %61 = math.rsqrt %60 : vector<1x512xf32>
    %62 = vector.broadcast %61 : vector<1x512xf32> to vector<2x512xf32>
    %63 = arith.mulf %58, %62 : vector<2x512xf32>
    %c0_31 = arith.constant 0 : index
    %c0_32 = arith.constant 0 : index
    %64 = vector.load %arg10[%c0_31, %c0_32] : memref<1x512xf32, #tpu.memory_space<vmem>>, vector<1x512xf32>
    %65 = vector.broadcast %64 : vector<1x512xf32> to vector<2x512xf32>
    %66 = arith.addf %63, %65 : vector<2x512xf32>
    %cst_33 = arith.constant 0.000000e+00 : f32
    %67 = vector.broadcast %cst_33 : f32 to vector<2x512xf32>
    %68 = arith.maximumf %66, %67 : vector<2x512xf32>
    %c0_34 = arith.constant 0 : index
    %c0_35 = arith.constant 0 : index
    %c0_36 = arith.constant 0 : index
    %69 = vector.load %arg15[%c0_34, %c0_35, %c0_36] : memref<1x2x512xf32, #tpu.memory_space<vmem>>, vector<1x2x512xf32>
    %70 = vector.shape_cast %69 : vector<1x2x512xf32> to vector<2x512xf32>
    %71 = arith.mulf %68, %70 : vector<2x512xf32>
    %72 = arith.truncf %71 : vector<2x512xf32> to vector<2x512xbf16>
    %c0_37 = arith.constant 0 : index
    %c0_38 = arith.constant 0 : index
    %73 = vector.load %arg11[%c0_37, %c0_38] : memref<512x384xbf16, #tpu.memory_space<vmem>>, vector<512x384xbf16>
    %cst_39 = arith.constant dense<0.000000e+00> : vector<2x384xf32>
    %74 = tpu.matmul %72, %73, %cst_39 {dimension_numbers = #tpu.dot_dimension_numbers<[1], [0], [0], [1], [0, 0, 1, 1], [], []>} : vector<2x512xbf16>, vector<512x384xbf16>, vector<2x384xf32> -> vector<2x384xf32>
    %c0_40 = arith.constant 0 : index
    %c0_41 = arith.constant 0 : index
    %75 = vector.load %arg12[%c0_40, %c0_41] : memref<1x384xf32, #tpu.memory_space<vmem>>, vector<1x384xf32>
    %76 = vector.broadcast %75 : vector<1x384xf32> to vector<2x384xf32>
    %77 = arith.addf %74, %76 : vector<2x384xf32>
    %78 = arith.truncf %77 : vector<2x384xf32> to vector<2x384xbf16>
    %c0_42 = arith.constant 0 : index
    %c0_43 = arith.constant 0 : index
    %79 = vector.load %arg13[%c0_42, %c0_43] : memref<384x1024xbf16, #tpu.memory_space<vmem>>, vector<384x1024xbf16>
    %cst_44 = arith.constant dense<0.000000e+00> : vector<2x1024xf32>
    %80 = tpu.matmul %78, %79, %cst_44 {dimension_numbers = #tpu.dot_dimension_numbers<[1], [0], [0], [1], [0, 0, 1, 1], [], []>} : vector<2x384xbf16>, vector<384x1024xbf16>, vector<2x1024xf32> -> vector<2x1024xf32>
    %c0_45 = arith.constant 0 : index
    %c0_46 = arith.constant 0 : index
    %81 = vector.load %arg14[%c0_45, %c0_46] : memref<1x1024xf32, #tpu.memory_space<vmem>>, vector<1x1024xf32>
    %82 = vector.broadcast %81 : vector<1x1024xf32> to vector<2x1024xf32>
    %83 = arith.addf %80, %82 : vector<2x1024xf32>
    %c0_47 = arith.constant 0 : index
    %c0_48 = arith.constant 0 : index
    %c0_49 = arith.constant 0 : index
    %84 = vector.load %arg16[%c0_47, %c0_48, %c0_49] : memref<1x2x1024xf32, #tpu.memory_space<vmem>>, vector<1x2x1024xf32>
    %85 = vector.shape_cast %84 : vector<1x2x1024xf32> to vector<2x1024xf32>
    %86 = vector.shape_cast %83 : vector<2x1024xf32> to vector<1x2x1024xf32>
    tpu.vector_store %arg16[%c0_47, %c0_48, %c0_49], %86 {strides = array<i32>} : memref<1x2x1024xf32, #tpu.memory_space<vmem>>, vector<1x2x1024xf32>,
    return
  }
  func.func @transform_0(%arg0: i32) -> (i32, i32, i32) {
    %c0_i32 = arith.constant 0 : i32
    %c0_i32_0 = arith.constant 0 : i32
    %c0_i32_1 = arith.constant 0 : i32
    return %arg0, %c0_i32, %c0_i32_0 : i32, i32, i32
  }
  func.func @transform_1(%arg0: i32) -> (i32, i32) {
    %c0_i32 = arith.constant 0 : i32
    %c0_i32_0 = arith.constant 0 : i32
    %c0_i32_1 = arith.constant 0 : i32
    return %c0_i32, %c0_i32_0 : i32, i32
  }
  func.func @transform_2(%arg0: i32) -> (i32, i32) {
    %c0_i32 = arith.constant 0 : i32
    %c0_i32_0 = arith.constant 0 : i32
    %c0_i32_1 = arith.constant 0 : i32
    return %c0_i32, %c0_i32_0 : i32, i32
  }
  func.func @transform_3(%arg0: i32) -> (i32, i32) {
    %c0_i32 = arith.constant 0 : i32
    %c0_i32_0 = arith.constant 0 : i32
    %c0_i32_1 = arith.constant 0 : i32
    return %c0_i32, %c0_i32_0 : i32, i32
  }
  func.func @transform_4(%arg0: i32) -> (i32, i32) {
    %c0_i32 = arith.constant 0 : i32
    %c0_i32_0 = arith.constant 0 : i32
    %c0_i32_1 = arith.constant 0 : i32
    return %c0_i32, %c0_i32_0 : i32, i32
  }
  func.func @transform_5(%arg0: i32) -> (i32, i32) {
    %c0_i32 = arith.constant 0 : i32
    %c0_i32_0 = arith.constant 0 : i32
    %c0_i32_1 = arith.constant 0 : i32
    return %c0_i32, %c0_i32_0 : i32, i32
  }
  func.func @transform_6(%arg0: i32) -> (i32, i32) {
    %c0_i32 = arith.constant 0 : i32
    %c0_i32_0 = arith.constant 0 : i32
    %c0_i32_1 = arith.constant 0 : i32
    return %c0_i32, %c0_i32_0 : i32, i32
  }
  func.func @transform_7(%arg0: i32) -> (i32, i32) {
    %c0_i32 = arith.constant 0 : i32
    %c0_i32_0 = arith.constant 0 : i32
    %c0_i32_1 = arith.constant 0 : i32
    return %c0_i32, %c0_i32_0 : i32, i32
  }
  func.func @transform_8(%arg0: i32) -> (i32, i32) {
    %c0_i32 = arith.constant 0 : i32
    %c0_i32_0 = arith.constant 0 : i32
    %c0_i32_1 = arith.constant 0 : i32
    return %c0_i32, %c0_i32_0 : i32, i32
  }
  func.func @transform_9(%arg0: i32) -> (i32, i32) {
    %c0_i32 = arith.constant 0 : i32
    %c0_i32_0 = arith.constant 0 : i32
    %c0_i32_1 = arith.constant 0 : i32
    return %c0_i32, %c0_i32_0 : i32, i32
  }
  func.func @transform_10(%arg0: i32) -> (i32, i32) {
    %c0_i32 = arith.constant 0 : i32
    %c0_i32_0 = arith.constant 0 : i32
    %c0_i32_1 = arith.constant 0 : i32
    return %c0_i32, %c0_i32_0 : i32, i32
  }
  func.func @transform_11(%arg0: i32) -> (i32, i32) {
    %c0_i32 = arith.constant 0 : i32
    %c0_i32_0 = arith.constant 0 : i32
    %c0_i32_1 = arith.constant 0 : i32
    return %c0_i32, %c0_i32_0 : i32, i32
  }
  func.func @transform_12(%arg0: i32) -> (i32, i32) {
    %c0_i32 = arith.constant 0 : i32
    %c0_i32_0 = arith.constant 0 : i32
    %c0_i32_1 = arith.constant 0 : i32
    return %c0_i32, %c0_i32_0 : i32, i32
  }
  func.func @transform_13(%arg0: i32) -> (i32, i32) {
    %c0_i32 = arith.constant 0 : i32
    %c0_i32_0 = arith.constant 0 : i32
    %c0_i32_1 = arith.constant 0 : i32
    return %c0_i32, %c0_i32_0 : i32, i32
  }
  func.func @transform_14(%arg0: i32) -> (i32, i32, i32) {
    %c0_i32 = arith.constant 0 : i32
    %c0_i32_0 = arith.constant 0 : i32
    %c0_i32_1 = arith.constant 0 : i32
    return %arg0, %c0_i32, %c0_i32_0 : i32, i32, i32
  }
  func.func @transform_15(%arg0: i32) -> (i32, i32, i32) {
    %c0_i32 = arith.constant 0 : i32
    %c0_i32_0 = arith.constant 0 : i32
    %c0_i32_1 = arith.constant 0 : i32
    return %arg0, %c0_i32, %c0_i32_0 : i32, i32, i32
  }
}

</mosaic_0001>

<bundles_post_ra>
// kernel: tpu_custom_call.1
= control target key start
LH: loop header
LB: loop body
LE: loop exit
PB: predicated region body
PF: predicated region fallthrough
CT: control target
= control target key end

     0   :  { %s18517_s0 = inlined_call_operand.hbm [shape: f32[3,2,768], index: 0, kind: input, shape index: {}]   ;;  %s18518_s1 = inlined_call_operand.hbm [shape: bf16[768,2048], index: 1, kind: input, shape index: {}]   ;;  %s18519_s2 = inlined_call_operand.hbm [shape: bf16[2048,512], index: 2, kind: input, shape index: {}]   ;;  %s18520_s3 = inlined_call_operand.hbm [shape: f32[1,512], index: 3, kind: input, shape index: {}]   ;;  %s18521_s4 = inlined_call_operand.hbm [shape: f32[1,512], index: 4, kind: input, shape index: {}]   ;;  %s18522_s5 = inlined_call_operand.hbm [shape: f32[1,512], index: 5, kind: input, shape index: {}]   ;;  %s18523_s6 = inlined_call_operand.hbm [shape: bf16[512,512], index: 6, kind: input, shape index: {}]   ;;  %s18524_s7 = inlined_call_operand.hbm [shape: f32[1,512], index: 7, kind: input, shape index: {}]   ;;  %s18525_s8 = inlined_call_operand.hbm [shape: f32[1,512], index: 8, kind: input, shape index: {}]   ;;  %s18526_s9 = inlined_call_operand.hbm [shape: f32[1,512], index: 9, kind: input, shape index: {}]   ;;  %s18527_s10 = inlined_call_operand.hbm [shape: bf16[512,384], index: 10, kind: input, shape index: {}]   ;;  %s18528_s11 = inlined_call_operand.hbm [shape: f32[1,384], index: 11, kind: input, shape index: {}]   ;;  %s18529_s12 = inlined_call_operand.hbm [shape: bf16[384,1024], index: 12, kind: input, shape index: {}]   ;;  %s18530_s13 = inlined_call_operand.hbm [shape: f32[1,1024], index: 13, kind: input, shape index: {}]   ;;  %s18531_s14 = inlined_call_operand.hbm [shape: f32[3,2,512], index: 14, kind: input, shape index: {}]   ;;  %s18532_s15 = inlined_call_operand.hbm [shape: f32[3,2,1024], index: 15, kind: output, shape index: {}]  }
   0x1   :  { %18548 = sst [smem:[#allocation40_spill]] %s18517_s0 }
   0x2   :  { %18549 = sst [smem:[#allocation41_spill]] %s18518_s1 }
   0x3   :  { %18550 = sst [smem:[#allocation42_spill]] %s18519_s2 }
   0x4   :  { %18551 = sst [smem:[#allocation43_spill]] %s18520_s3 }
   0x5   :  { %18552 = sst [smem:[#allocation44_spill]] %s18522_s5 }
   0x6   :  { %18553 = sst [smem:[#allocation45_spill]] %s18524_s7 }
   0x7   :  { %18554 = sst [smem:[#allocation46_spill]] %s18526_s9 }
   0x8   :  { %18555 = sst [smem:[#allocation47_spill]] %s18528_s11 }
   0x9   :  { %18556 = sst [smem:[#allocation48_spill]] %s18531_s14 }
   0xa   :  { %18557 = sst [smem:[#allocation49_spill]] %s18532_s15 }
   0xb   :  { %20 = vsyncpa [#allocation3], 0 }
   0xc   :  { %22 = vsyncpa [#allocation3 + $0x1], 0 }
   0xd   :  { %23 = vsyncpa [#allocation6], 0 }
   0xe   :  { %24 = vsyncpa [#allocation9], 0 }
   0xf   :  { %25 = vsyncpa [#allocation12], 0 }
  0x10   :  { %26 = vsyncpa [#allocation15], 0 }
  0x11   :  { %27 = vsyncpa [#allocation18], 0 }
  0x12   :  { %28 = vsyncpa [#allocation21], 0 }
  0x13   :  { %29 = vsyncpa [#allocation24], 0 }
  0x14   :  { %30 = vsyncpa [#allocation4], 0 }
  0x15   :  { %32 = vsyncpa [#allocation4 + $0x1], 0  ;;  %s17693_s18 = smov 0   ;;  %s17695_s19 = smov 0  }
  0x16   :  { %s17697_s20 = smov 0   ;;  %s17699_s21 = smov 0  }
  0x17 LB: > { %s17587_s22 = smov [#allocation5]   ;;  %s17714_s24 = sadd.s32 4294967295, %s17585_s21   ;;  %s17585_s21 = sphi %s17699_s21, %s18603_s21   ;;  %s17581_s20 = sphi %s17697_s20, %s18607_s20   ;;  %s17577_s19 = sphi %s17695_s19, %s18606_s19   ;;  %s17573_s18 = sphi %s17693_s18, %s18605_s18  }
  0x18   : > { %s406_s23 = sshll.u32 %s17587_s22, 4  ;;  %p14010_p0 = scmp.ge.s32.totalorder %s17585_s21, 1  ;;  %s407_s23 = int_to_ptr.vmem [resolvable:$true] %s406_s23 }
  0x19   : > { %p18535_p1 = scmp.eq.s32.totalorder %s17714_s24, 0  ;;  %p394_p2 = scmp.lt.s32.totalorder %s17585_s21, 4 }
  0x1a   : > { %s17588_s26 = smov [#allocation8]   ;;  %s17589_s29 = smov [#allocation11]  }
  0x1b   : > { %p17719_p3 = pnand %p14010_p0, %p394_p2  ;;  %s433_s27 = sshll.u32 %s17588_s26, 4  ;;  %s434_s27 = int_to_ptr.vmem [resolvable:$true] %s433_s27 }
  0x1c   : > { %s455_s30 = sshll.u32 %s17589_s29, 4  ;;  %s17106_s17 = scalar_lea.vmem %s407_s23, 98304  ;;  %s17731_s30 = int_to_ptr.vmem [resolvable:$true] %s455_s30 }
  0x1d   : > { %s18558_s25 = scalar_select %p17719_p3, 1, 0 }
  0x1e   : > { %p15854_p4 = pneg %p17719_p3  ;;  %p17107_p7 = scmp.ne.s32.totalorder %s407_s23, %s17106_s17 }
  0x1f   : > { %18559 = sst [smem:[#allocation37_spill]] %s18558_s25  ;;  %p17114_p10 = scmp.lt.s32.totalorder %s407_s23, %s407_s23 }
  0x20   : > { %p17727_p5 = pnand %p15854_p4, %p18535_p1  ;;  %p17115_p11 = scmp.lt.s32.totalorder %s17106_s17, %s17106_s17 }
  0x22   : > { %s18560_s28 = scalar_select %p17727_p5, 1, 0 }
  0x23   : > { %p17735_p6 = pneg %p17727_p5  ;;  %p17116_p12 = por %p17115_p11, %p17114_p10 }
  0x25   : > { %p17109_p8 = pnand %p17107_p7, %p17735_p6 }
  0x27   : > { %p17110_p9 = pneg %p17109_p8 }
  0x29   : > { %p17117_p13 = pnand %p17116_p12, %p17110_p9 }
  0x2b   : > { %17120 = shalt.err (!%p17117_p13)
}
  0x2c   : > { %s17590_s22 = smov 1024   ;;  %s17591_s26 = smov 64  }
  0x2d   : > { %s18562_s1 = sld [smem:[#allocation41_spill]]  ;;  %s17132_s25 = scalar_lea.vmem %s434_s27, 64 }
  0x2e   : > { %p17133_p0 = scmp.ne.s32.totalorder %s434_s27, %s17132_s25  ;;  %p17140_p7 = scmp.lt.s32.totalorder %s434_s27, %s434_s27 }
  0x2f   : > { %p17141_p8 = scmp.lt.s32.totalorder %s17132_s25, %s17132_s25 }
  0x30   : > { %p17135_p2 = pnand %p17133_p0, %p17735_p6 }
  0x31   : > { %p17142_p1 = por %p17141_p8, %p17140_p7 }
  0x32   : > { %p17136_p4 = pneg %p17135_p2 }
  0x33   : > { %15857 = dma.hbm_to_vmem [thread:$0]  (!%p17727_p5), %s18562_s1, 98304, %s407_s23, [#allocation6], %s17590_s22, %s17590_s22, %s17591_s26  }
  0x34   : > { %p17143_p10 = pnand %p17142_p1, %p17136_p4 }
  0x36   : > { %17146 = shalt.err (!%p17143_p10)
}
  0x37   : > { %s18563_s3 = sld [smem:[#allocation43_spill]]  ;;  %s17158_s15 = scalar_lea.vmem %s17731_s30, 64 }
  0x38   : > { %p17159_p9 = scmp.ne.s32.totalorder %s17731_s30, %s17158_s15  ;;  %p17166_p13 = scmp.lt.s32.totalorder %s17731_s30, %s17731_s30 }
  0x39   : > { %p17167_p0 = scmp.lt.s32.totalorder %s17158_s15, %s17158_s15 }
  0x3a   : > { %p17161_p11 = pnand %p17159_p9, %p17735_p6 }
  0x3b   : > { %p17168_p1 = por %p17167_p0, %p17166_p13 }
  0x3c   : > { %p17162_p12 = pneg %p17161_p11 }
  0x3d   : > { %15863 = dma.hbm_to_vmem [thread:$0]  (!%p17727_p5), %s18563_s3, 64, %s434_s27, [#allocation9]  }
  0x3e   : > { %p17169_p2 = pnand %p17168_p1, %p17162_p12 }
  0x40   : > { %17172 = shalt.err (!%p17169_p2)
}
  0x41   : > { %s18564_s5 = sld [smem:[#allocation44_spill]]  ;;  %s17592_s25 = smov [#allocation14]  }
  0x42   : > { %s479_s27 = sshll.u32 %s17592_s25, 4  ;;  %s17593_s22 = smov [#allocation17]   ;;  %s480_s27 = int_to_ptr.vmem [resolvable:$true] %s479_s27 }
  0x43   : > { %s501_s26 = sshll.u32 %s17593_s22, 4  ;;  %s17184_s29 = scalar_lea.vmem %s480_s27, 64  ;;  %s502_s26 = int_to_ptr.vmem [resolvable:$true] %s501_s26 }
  0x44   : > { %p17185_p4 = scmp.ne.s32.totalorder %s480_s27, %s17184_s29  ;;  %p17192_p10 = scmp.lt.s32.totalorder %s480_s27, %s480_s27 }
  0x45   : > { %p17193_p9 = scmp.lt.s32.totalorder %s17184_s29, %s17184_s29 }
  0x46   : > { %p17187_p7 = pnand %p17185_p4, %p17735_p6 }
  0x47   : > { %15869 = dma.hbm_to_vmem [thread:$0]  (!%p17727_p5), %s18564_s5, 64, %s17731_s30, [#allocation12]  }
  0x48   : > { %p17188_p8 = pneg %p17187_p7  ;;  %p17194_p11 = por %p17193_p9, %p17192_p10 }
  0x4a   : > { %p17195_p12 = pnand %p17194_p11, %p17188_p8 }
  0x4c   : > { %17198 = shalt.err (!%p17195_p12)
}
  0x4d   : > { %s18565_s7 = sld [smem:[#allocation45_spill]]  ;;  %s17210_s30 = scalar_lea.vmem %s502_s26, 64 }
  0x4e   : > { %p17211_p13 = scmp.ne.s32.totalorder %s502_s26, %s17210_s30  ;;  %p17218_p2 = scmp.lt.s32.totalorder %s502_s26, %s502_s26 }
  0x4f   : > { %p17219_p4 = scmp.lt.s32.totalorder %s17210_s30, %s17210_s30 }
  0x50   : > { %p17213_p0 = pnand %p17211_p13, %p17735_p6 }
  0x51   : > { %p17220_p7 = por %p17219_p4, %p17218_p2 }
  0x52   : > { %p17214_p1 = pneg %p17213_p0 }
  0x53   : > { %15875 = dma.hbm_to_vmem [thread:$0]  (!%p17727_p5), %s18565_s7, 64, %s480_s27, [#allocation15]  }
  0x54   : > { %p17221_p3 = pnand %p17220_p7, %p17214_p1 }
  0x56   : > { %17224 = shalt.err (!%p17221_p3)
}
  0x57   : > { %s18566_s9 = sld [smem:[#allocation46_spill]]  ;;  %s17594_s25 = smov [#allocation20]  }
  0x58   : > { %s525_s27 = sshll.u32 %s17594_s25, 4  ;;  %s526_s27 = int_to_ptr.vmem [resolvable:$true] %s525_s27 }
  0x59   : > { %s17236_s22 = scalar_lea.vmem %s526_s27, 48  ;;  %s17243_s29 = scalar_lea.vmem %s526_s27, 64 }
  0x5a   : > { %p17237_p8 = scmp.ne.s32.totalorder %s526_s27, %s17236_s22  ;;  %p17244_p11 = scmp.lt.s32.totalorder %s526_s27, %s526_s27 }
  0x5b   : > { %p17245_p12 = scmp.lt.s32.totalorder %s17243_s29, %s17236_s22 }
  0x5c   : > { %p17239_p10 = pnand %p17237_p8, %p17735_p6 }
  0x5d   : > { %15881 = dma.hbm_to_vmem [thread:$0]  (!%p17727_p5), %s18566_s9, 64, %s502_s26, [#allocation18]  }
  0x5e   : > { %p17240_p9 = pneg %p17239_p10  ;;  %p17246_p13 = por %p17245_p12, %p17244_p11 }
  0x60   : > { %p17247_p3 = pnand %p17246_p13, %p17240_p9 }
  0x62   : > { %17250 = shalt.err (!%p17247_p3)
}
  0x63   : > { %s18567_s11 = sld [smem:[#allocation47_spill]]  ;;  %s14009_s26 = sadd.s32 4294967294, %s17585_s21  }
  0x64   : > { %s17788_s30 = sadd.s32 1, %s17585_s21   ;;  %s45_s23 = sadd.s32 1, %s17581_s20 }
  0x65   : > { %18568 = sst [smem:[#allocation38_spill]] %s17788_s30  ;;  %s42_s14 = ssub.s32 %s17585_s21, %s17788_s30 }
  0x66   : > { %p43_p0 = scmp.eq.s32.totalorder %s42_s14, 0  ;;  %p52_p1 = scmp.ne.s32.totalorder %s17581_s20, %s17577_s19 }
  0x67   : > { %p53_p2 = scmp.eq.s32.totalorder %s17585_s21, 0  ;;  %p58_p4 = scmp.ne.s32.totalorder %s17577_s19, %s17573_s18 }
  0x68   : > { %s17799_s25 = scalar_select %p43_p0, %s17581_s20, %s45_s23  }
  0x69   : > { %15887 = dma.hbm_to_vmem [thread:$0]  (!%p17727_p5), %s18567_s11, 48, %s526_s27, [#allocation21]  }
  0x6a   : > { %18569 = sst [smem:[#allocation39_spill]] %s17799_s25  ;;  %p54_p7 = por %p53_p2, %p52_p1 }
  0x6b   : > { %p18570_p8 = scmp.eq.s32.totalorder %s17714_s24, 0  ;;  %p381_p9 = scmp.eq.s32.totalorder %s17714_s24, 2 }
  0x6c   : > { %p387_p11 = scmp.eq.s32.totalorder %s14009_s26, 2  ;;  %p15918_p12 = scmp.lt.s32.totalorder %s17585_s21, 3 }
  0x6d   : > { %p17803_p10 = por %p18570_p8, %p58_p4  ;;  %s560_s27 = sand.u32 1, %s17585_s21  }
  0x6e   : > { %p17810_p13 = por %p381_p9, %p52_p1  ;;  %p17814_p3 = por %p387_p11, %p58_p4 }
  0x6f   : > { %s18571_s22 = scalar_select %p17803_p10, 1, 0 }
  0x70   : > { %s18572_s29 = scalar_select %p17810_p13, 1, 0 }
  0x71   : > { %s18573_s17 = scalar_select %p17814_p3, 1, 0 }
  0x72   : > { %s18538_s15 = sand.u32 1, %s17581_s20   ;;  %p17821_p0 = pnand %p15918_p12, %p54_p7 }
  0x73   : > { %s15793_s14 = smul.u32 12, %s18538_s15  ;;  %s18575_s0 = sld [smem:[#allocation40_spill]] }
  0x74   : > { %s18574_s23 = scalar_select %p17821_p0, 1, 0 }
  0x75   : > { %s15794_s26 = smul.u32 192, %s17585_s21  ;;  %s564_s7 = scalar_lea.vmem [#allocation2], %s15793_s14 }
  0x76   : > { %s572_s9 = sshll.u32 %s564_s7, 4  ;;  %s17595_s15 = smov [#allocation7]   ;;  %s17831_s9 = int_to_ptr.vmem [resolvable:$true] %s572_s9 }
  0x77   : > { %s419_s11 = sshll.u32 %s17595_s15, 4  ;;  %s17833_s25 = scalar_lea.sflag [#allocation3], %s560_s27  ;;  %s420_s11 = int_to_ptr.vmem [resolvable:$true] %s419_s11 }
  0x78   : > { %p18545_p2 = pneg %p17821_p0 }
  0x79   : > { %s17829_s5 = scalar_lea.hbm %s18575_s0, %s15794_s26  ;;  %s17256_s26 = scalar_lea.hbm %s18575_s0, 576 }
  0x7a   : > { %s17251_s30 = scalar_lea.hbm %s17829_s5, 192  ;;  %p17257_p8 = scmp.lt.s32.totalorder %s17829_s5, %s18575_s0 }
  0x7b   : > { %p17252_p1 = scmp.ne.s32.totalorder %s17829_s5, %s17251_s30  ;;  %p17258_p9 = scmp.lt.s32.totalorder %s17256_s26, %s17251_s30 }
  0x7d   : > { %p17254_p4 = pnand %p18545_p2, %p17252_p1  ;;  %p17259_p11 = por %p17258_p9, %p17257_p8 }
  0x7f   : > { %p17255_p7 = pneg %p17254_p4 }
  0x81   : > { %p17260_p12 = pnand %p17259_p11, %p17255_p7 }
  0x83   : > { %17263 = shalt.err (!%p17260_p12)
}
  0x84   : > { %s17264_s27 = scalar_lea.vmem %s17831_s9, 192  ;;  %s17596_s15 = smov [#allocation2]  }
  0x85   : > { %p17265_p3 = scmp.ne.s32.totalorder %s17831_s9, %s17264_s27  ;;  %s17269_s1 = sshll.u32 %s17596_s15, 4  ;;  %s17270_s1 = int_to_ptr.vmem [resolvable:$false] %s17269_s1 }
  0x86   : > { %s17271_s3 = scalar_lea.vmem %s17270_s1, 384  ;;  %p17272_p13 = scmp.lt.s32.totalorder %s17831_s9, %s17270_s1 }
  0x87   : > { %p17267_p1 = pnand %p17265_p3, %p18545_p2  ;;  %p17273_p10 = scmp.lt.s32.totalorder %s17271_s3, %s17264_s27 }
  0x89   : > { %p17268_p4 = pneg %p17267_p1  ;;  %p17274_p5 = por %p17273_p10, %p17272_p13 }
  0x8b   : > { %p17275_p8 = pnand %p17274_p5, %p17268_p4 }
  0x8d   : > { %17278 = shalt.err (!%p17275_p8)
}
  0x8e   : > { %15897 = dma.hbm_to_vmem [thread:$0]  (!%p17821_p0), %s17829_s5, 192, %s17831_s9, %s17833_s25  }
  0x8f   : > { %s17290_s30 = scalar_lea.vmem %s420_s11, 65536  ;;  %p17298_p11 = scmp.lt.s32.totalorder %s420_s11, %s420_s11 }
  0x90   : > { %p17291_p3 = scmp.ne.s32.totalorder %s420_s11, %s17290_s30  ;;  %p17299_p12 = scmp.lt.s32.totalorder %s17290_s30, %s17290_s30 }
  0x92   : > { %p17293_p7 = pnand %p17291_p3, %p17735_p6  ;;  %p17300_p1 = por %p17299_p12, %p17298_p11 }
  0x94   : > { %p17294_p9 = pneg %p17293_p7 }
  0x96   : > { %p17301_p2 = pnand %p17300_p1, %p17294_p9 }
  0x98   : > { %17304 = shalt.err (!%p17301_p2)
}
  0x99   : > { %s17597_s26 = smov 256   ;;  %s17598_s14 = smov 16  }
  0x9a   : > { %p18576_p5 = scmp.ne.s32.totalorder %s18560_s28, 0  ;;  %s18577_s2 = sld [smem:[#allocation42_spill]] }
  0x9b   : > { %s17599_s7 = smov [#allocation10]   ;;  %s17600_s15 = smov [#allocation13]  }
  0x9c   : > { %s444_s27 = sshll.u32 %s17599_s7, 4  ;;  %s465_s1 = sshll.u32 %s17600_s15, 4  ;;  %s445_s27 = int_to_ptr.vmem [resolvable:$true] %s444_s27  ;;  %s466_s1 = int_to_ptr.vmem [resolvable:$true] %s465_s1 }
  0x9d   : > { %s17316_s3 = scalar_lea.vmem %s445_s27, 64  ;;  %p17324_p4 = scmp.lt.s32.totalorder %s445_s27, %s445_s27 }
  0x9e   : > { %p17317_p10 = scmp.ne.s32.totalorder %s445_s27, %s17316_s3  ;;  %p17325_p8 = scmp.lt.s32.totalorder %s17316_s3, %s17316_s3 }
  0xa0   : > { %15860 = dma.hbm_to_vmem [thread:$0]  (!%p18576_p5), %s18577_s2, 65536, %s420_s11, [#allocation6], %s17597_s26, %s17597_s26, %s17598_s14  }
  0xa1   : > { %p17319_p13 = pnand %p17317_p10, %p17735_p6  ;;  %p17326_p3 = por %p17325_p8, %p17324_p4 }
  0xa3   : > { %p17320_p2 = pneg %p17319_p13 }
  0xa5   : > { %p17327_p7 = pnand %p17326_p3, %p17320_p2 }
  0xa7   : > { %17330 = shalt.err (!%p17327_p7)
}
  0xa8   : > { %15866 = dma.hbm_to_vmem [thread:$0]  (!%p18576_p5), %s18521_s4, 64, %s445_s27, [#allocation9]  }
  0xa9   : > { %s17342_s11 = scalar_lea.vmem %s466_s1, 16384  ;;  %p17350_p1 = scmp.lt.s32.totalorder %s466_s1, %s466_s1 }
  0xaa   : > { %p17343_p9 = scmp.ne.s32.totalorder %s466_s1, %s17342_s11  ;;  %p17351_p10 = scmp.lt.s32.totalorder %s17342_s11, %s17342_s11 }
  0xac   : > { %p17345_p11 = pnand %p17343_p9, %p17735_p6  ;;  %p17352_p13 = por %p17351_p10, %p17350_p1 }
  0xae   : > { %p17346_p12 = pneg %p17345_p11 }
  0xb0   : > { %p17353_p0 = pnand %p17352_p13, %p17346_p12 }
  0xb2   : > { %17356 = shalt.err (!%p17353_p0)
}
  0xb3   : > { %15872 = dma.hbm_to_vmem [thread:$0]  (!%p18576_p5), %s18523_s6, 16384, %s466_s1, [#allocation12], %s17597_s26, %s17597_s26, %s17598_s14  }
  0xb4   : > { %s17601_s27 = smov [#allocation16]   ;;  %s17602_s3 = smov [#allocation19]  }
  0xb5   : > { %s490_s15 = sshll.u32 %s17601_s27, 4  ;;  %s511_s30 = sshll.u32 %s17602_s3, 4  ;;  %s491_s15 = int_to_ptr.vmem [resolvable:$true] %s490_s15  ;;  %s512_s30 = int_to_ptr.vmem [resolvable:$true] %s511_s30 }
  0xb6   : > { %s17368_s5 = scalar_lea.vmem %s491_s15, 64  ;;  %p17376_p8 = scmp.lt.s32.totalorder %s491_s15, %s491_s15 }
  0xb7   : > { %p17369_p2 = scmp.ne.s32.totalorder %s491_s15, %s17368_s5  ;;  %p17377_p3 = scmp.lt.s32.totalorder %s17368_s5, %s17368_s5 }
  0xb9   : > { %p17371_p4 = pnand %p17369_p2, %p17735_p6  ;;  %p17378_p7 = por %p17377_p3, %p17376_p8 }
  0xbb   : > { %p17372_p0 = pneg %p17371_p4 }
  0xbd   : > { %p17379_p9 = pnand %p17378_p7, %p17372_p0 }
  0xbf   : > { %17382 = shalt.err (!%p17379_p9)
}
  0xc0   : > { %15878 = dma.hbm_to_vmem [thread:$0]  (!%p18576_p5), %s18525_s8, 64, %s491_s15, [#allocation15]  }
  0xc1   : > { %s17394_s26 = scalar_lea.vmem %s512_s30, 12288  ;;  %p17402_p10 = scmp.lt.s32.totalorder %s512_s30, %s512_s30 }
  0xc2   : > { %p17395_p11 = scmp.ne.s32.totalorder %s512_s30, %s17394_s26  ;;  %p17403_p13 = scmp.lt.s32.totalorder %s17394_s26, %s17394_s26 }
  0xc4   : > { %p17397_p12 = pnand %p17395_p11, %p17735_p6  ;;  %p17404_p2 = por %p17403_p13, %p17402_p10 }
  0xc6   : > { %p17398_p1 = pneg %p17397_p12 }
  0xc8   : > { %p17405_p4 = pnand %p17404_p2, %p17398_p1 }
  0xca   : > { %17408 = shalt.err (!%p17405_p4)
}
  0xcb   : > { %s17603_s14 = smov 192   ;;  %s17604_s1 = smov 12  }
  0xcc   : > { %15884 = dma.hbm_to_vmem [thread:$0]  (!%p18576_p5), %s18527_s10, 12288, %s512_s30, [#allocation18], %s17603_s14, %s17603_s14, %s17604_s1  }
  0xcd   : > { %s17605_s15 = smov [#allocation22]  }
  0xce   : > { %s535_s3 = sshll.u32 %s17605_s15, 4  ;;  %s536_s3 = int_to_ptr.vmem [resolvable:$true] %s535_s3 }
  0xcf   : > { %s17420_s5 = scalar_lea.vmem %s536_s3, 24576  ;;  %p17428_p7 = scmp.lt.s32.totalorder %s536_s3, %s536_s3 }
  0xd0   : > { %p17421_p0 = scmp.ne.s32.totalorder %s536_s3, %s17420_s5  ;;  %p17429_p9 = scmp.lt.s32.totalorder %s17420_s5, %s17420_s5 }
  0xd2   : > { %p17423_p8 = pnand %p17421_p0, %p17735_p6  ;;  %p17430_p11 = por %p17429_p9, %p17428_p7 }
  0xd4   : > { %p17424_p3 = pneg %p17423_p8 }
  0xd6   : > { %p17431_p12 = pnand %p17430_p11, %p17424_p3 }
  0xd8   : > { %17434 = shalt.err (!%p17431_p12)
}
  0xd9   : > { %s17606_s11 = smov 512   ;;  %s17607_s9 = smov 32  }
  0xda   : > { %15890 = dma.hbm_to_vmem [thread:$0]  (!%p18576_p5), %s18529_s12, 24576, %s536_s3, [#allocation21], %s17606_s11, %s17606_s11, %s17607_s9  }
  0xdb   : > { %s18578_s14 = sand.u32 1, %s17581_s20   ;;  %s17608_s7 = smov [#allocation23]  }
  0xdc   : > { %s14026_s1 = sshll.u32 %s18578_s14, 3  ;;  %s549_s27 = sshll.u32 %s17608_s7, 4  ;;  %s550_s27 = int_to_ptr.vmem [resolvable:$true] %s549_s27 }
  0xdd   : > { %s15747_s15 = sshll.u32 %s17585_s21, 7  ;;  %s17446_s5 = scalar_lea.vmem %s550_s27, 128 }
  0xde   : > { %p17447_p1 = scmp.ne.s32.totalorder %s550_s27, %s17446_s5  ;;  %p17454_p2 = scmp.lt.s32.totalorder %s550_s27, %s550_s27 }
  0xdf   : > { %p17455_p4 = scmp.lt.s32.totalorder %s17446_s5, %s17446_s5 }
  0xe0   : > { %p17449_p10 = pnand %p17447_p1, %p17735_p6 }
  0xe1   : > { %p17456_p0 = por %p17455_p4, %p17454_p2 }
  0xe2   : > { %p17450_p13 = pneg %p17449_p10 }
  0xe4   : > { %p17457_p8 = pnand %p17456_p0, %p17450_p13 }
  0xe6   : > { %17460 = shalt.err (!%p17457_p8)
}
  0xe7   : > { %15893 = dma.hbm_to_vmem [thread:$0]  (!%p18576_p5), %s18530_s13, 128, %s550_s27, [#allocation24]  }
  0xe8   : > { %s18579_s26 = sld [smem:[#allocation48_spill]]  ;;  %s583_s7 = scalar_lea.vmem [#allocation25], %s14026_s1 }
  0xe9   : > { %s591_s16 = sshll.u32 %s583_s7, 4  ;;  %p18580_p3 = scmp.ne.s32.totalorder %s18574_s23, 0  ;;  %s592_s16 = int_to_ptr.vmem [resolvable:$true] %s591_s16 }
  0xeb   : > { %p18581_p7 = pneg %p18580_p3 }
  0xee   : > { %s589_s14 = scalar_lea.hbm %s18579_s26, %s15747_s15  ;;  %s17466_s2 = scalar_lea.hbm %s18579_s26, 384 }
  0xef   : > { %s17461_s0 = scalar_lea.hbm %s589_s14, 128  ;;  %p17467_p5 = scmp.lt.s32.totalorder %s589_s14, %s18579_s26 }
  0xf0   : > { %p17462_p6 = scmp.ne.s32.totalorder %s589_s14, %s17461_s0  ;;  %p17468_p12 = scmp.lt.s32.totalorder %s17466_s2, %s17461_s0 }
  0xf2   : > { %p17464_p9 = pnand %p17462_p6, %p18581_p7  ;;  %p17469_p1 = por %p17468_p12, %p17467_p5 }
  0xf4   : > { %p17465_p11 = pneg %p17464_p9 }
  0xf6   : > { %p17470_p10 = pnand %p17469_p1, %p17465_p11 }
  0xf8   : > { %17473 = shalt.err (!%p17470_p10)
}
  0xf9   : > { %s17474_s1 = scalar_lea.vmem %s592_s16, 128  ;;  %p18582_p2 = pmov %p18581_p7 }
  0xfa   : > { %p17475_p13 = scmp.ne.s32.totalorder %s592_s16, %s17474_s1  ;;  %s17609_s27 = smov [#allocation25]  }
  0xfb   : > { %s17479_s15 = sshll.u32 %s17609_s27, 4  ;;  %s17480_s15 = int_to_ptr.vmem [resolvable:$false] %s17479_s15 }
  0xfc   : > { %p17477_p4 = pnand %p17475_p13, %p18582_p2  ;;  %s17481_s11 = scalar_lea.vmem %s17480_s15, 256 }
  0xfd   : > { %p17482_p8 = scmp.lt.s32.totalorder %s592_s16, %s17480_s15  ;;  %p17483_p6 = scmp.lt.s32.totalorder %s17481_s11, %s17474_s1 }
  0xfe   : > { %p17478_p0 = pneg %p17477_p4 }
  0xff   : > { %p17484_p7 = por %p17483_p6, %p17482_p8 }
 0x101   : > { %p17485_p9 = pnand %p17484_p7, %p17478_p0 }
 0x103   : > { %17488 = shalt.err (!%p17485_p9)
}
 0x104   : > { %15900 = dma.hbm_to_vmem [thread:$0]  (!%p18580_p3), %s589_s14, 128, %s592_s16, %s17833_s25  }
 0x105   : > { %s18583_s0 = sld [smem:[#allocation37_spill]] }
 0x10b   : > { %p18584_p11 = scmp.ne.s32.totalorder %s18583_s0, 0 }
 0x10c   : > { %s602_s2 = sand.u32 (!%p18584_p11), 1, %s17714_s24   ;;  %s17940_s9 = sand.u32 (!%p18584_p11), 1, %s17577_s19  }
 0x10d   : > { %600 = sbr.rel (%p18584_p11) target bundleno = 2776 (0xad8), region = 80  ;;  %s603_s5 = scalar_lea.sflag (!%p18584_p11), [#allocation3], %s602_s2 }
 0x10e   : > { %s15795_s7 = smul.u32 (!%p18584_p11), 12, %s17940_s9  ;;  %p18585_p5 = scmp.ne.s32.totalorder (!%p18584_p11), %s18571_s22, 0 }
 0x110   : > { %s17943_s28 = scalar_lea.vmem (!%p18584_p11), [#allocation2], %s15795_s7 }
 0x112   : > { %17532 = dma.done.wait (%p18585_p5), %s603_s5, 192  }
 0x113   : > { %17534 = vsyncadd (%p18585_p5), %s603_s5, 4294967104  ;;  %p18586_p3 = scmp.eq.s32.totalorder %s17714_s24, 0 }
 0x115   : > { %17536 = dma.done.wait (%p18586_p3), [#allocation6], 163840   ;;  %p18587_p12 = pmov %p18586_p3 }
 0x116   : > { %p18588_p1 = pmov %p18586_p3 }
 0x117   : > { %17538 = vsyncadd (%p18587_p12), [#allocation6], 4294803456 }
 0x118   : > { %17540 = dma.done.wait (%p18588_p1), [#allocation9], 128   ;;  %p18589_p10 = pmov %p18588_p1 }
 0x119   : > { %p18590_p13 = pmov %p18588_p1 }
 0x11a   : > { %17542 = vsyncadd (%p18589_p10), [#allocation9], 4294967168 }
 0x11b   : > { %17544 = dma.done.wait (%p18590_p13), [#allocation12], 16448   ;;  %p18591_p2 = pmov %p18588_p1 }
 0x11c   : > { %p18592_p4 = pmov %p18588_p1 }
 0x11d   : > { %17546 = vsyncadd (%p18591_p2), [#allocation12], 4294950848 }
 0x11e   : > { %17548 = dma.done.wait (%p18592_p4), [#allocation15], 128   ;;  %p18593_p0 = pmov %p18588_p1 }
 0x120   : > { %17550 = vsyncadd (%p18593_p0), [#allocation15], 4294967168  ;;  %p18594_p8 = pmov %p18593_p0 }
 0x121   : > { %p18595_p6 = pmov %p18593_p0 }
 0x122   : > { %17552 = dma.done.wait (%p18594_p8), [#allocation18], 12352  }
 0x123   : > { %17554 = vsyncadd (%p18595_p6), [#allocation18], 4294954944  ;;  %p18596_p7 = pmov %p18593_p0 }
 0x124   : > { %p18597_p9 = pmov %p18593_p0 }
 0x125   : > { %17556 = dma.done.wait (%p18596_p7), [#allocation21], 24624  }
 0x126   : > { %17558 = vsyncadd (%p18597_p9), [#allocation21], 4294942672  ;;  %p18598_p11 = pmov %p18593_p0 }
 0x127   : > { %p18599_p3 = pmov %p18593_p0 }
 0x128   : > { %17560 = dma.done.wait (%p18598_p11), [#allocation24], 128  }
 0x129   : > { %17562 = vsyncadd (%p18599_p3), [#allocation24], 4294967168  ;;  %s14043_s25 = sshll.u32 %s17940_s9, 3 }
 0x12a   : > { %s17978_s23 = scalar_lea.vmem [#allocation25], %s14043_s25 }
 0x12b   : > { %17564 = dma.done.wait (%p18585_p5), %s603_s5, 128  }
 0x12c   : > { %17566 = vsyncadd (%p18585_p5), %s603_s5, 4294967168  ;;  %v873_v0 = vld [vmem:[#allocation5 + $0x380] sm:$0xff]  ;;  %v17610_v32 = vmov 1983009808   ;;  %v728_v34 = vlaneseq  ;;  %v720_v59 = vld [vmem:[%s17943_s28] sm:$0xff]  ;;  %vm10119_vm0 = vcmask 1041408  }
 0x12d   : > { %v881_v1 = vld [vmem:[#allocation5 + $0x3c0] sm:$0xff]  ;;  %v726_v33 = vunpack.c.l.s4 %v17610_v32  ;;  %s14044_s22 = sshll.u32 %s17940_s9, 4  ;;  %s15748_s16 = sshll.u32 %s17714_s24, 8 }
 0x12e   : > { %v1129_v2 = vld [vmem:[#allocation5 + $0xb80] sm:$0xff]  ;;  %v14159_v3 = vcombine.high %v873_v0, %v881_v1  ;;  %v14158_v5 = vcombine.low %v873_v0, %v881_v1  ;;  %v17984_v44 = vshrl.u32 %v728_v34, 7  ;;  %v724_v0 = vcombine.high %v720_v59, %v720_v59  ;;  %s18472_s14 = scalar_lea.vmem [#allocation26], %s14044_s22  ;;  %s18600_s27 = sld [smem:[#allocation49_spill]] }
 0x12f   : > { %v1137_v4 = vld [vmem:[#allocation5 + $0xbc0] sm:$0xff]  ;;  %v727_v43 = vunpack.c.0.s8 %v726_v33  ;;  %s13795_s30 = sshll.u32 %s18472_s14, 4  ;;  %s13781_s11 = scalar_lea.sflag [#allocation4], %s17940_s9  ;;  %s13796_s30 = int_to_ptr.vmem [resolvable:$true] %s13795_s30 }
 0x130   : > { %v857_v6 = vld [vmem:[#allocation5 + $0x300] sm:$0xff]  ;;  %v14415_v8 = vcombine.high %v1129_v2, %v1137_v4  ;;  %v14414_v9 = vcombine.low %v1129_v2, %v1137_v4  ;;  %5369 = vmatprep.subr.bf16.mxu0 %v14159_v3  ;;  %s17489_s0 = scalar_lea.vmem %s13796_s30, 256  ;;  %p18601_p12 = scmp.ne.s32.totalorder %s18572_s29, 0 }
 0x131   : > { %v865_v7 = vld [vmem:[#allocation5 + $0x340] sm:$0xff]  ;;  %5370 = vmatpush1.bf16.msra.mxu0 %v14158_v5  ;;  %v17987_v53 = vsub.s32 %v727_v43, %v17984_v44  ;;  %p17490_p5 = scmp.ne.s32.totalorder %s13796_s30, %s17489_s0  ;;  %s17612_s2 = smov [#allocation26]  }
 0x132   : > { %v14143_v10 = vcombine.high %v857_v6, %v865_v7  ;;  %v1113_v11 = vld [vmem:[#allocation5 + $0xb00] sm:$0xff]  ;;  %5410 = vmatprep.subr.bf16.mxu1 %v14415_v8  ;;  %v14142_v18 = vcombine.low %v857_v6, %v865_v7  ;;  %s17493_s24 = sshll.u32 %s17612_s2, 4  ;;  %s17494_s24 = int_to_ptr.vmem [resolvable:$false] %s17493_s24 }
 0x133   : > { %v1121_v12 = vld [vmem:[#allocation5 + $0xb40] sm:$0xff]  ;;  %5411 = vmatpush1.bf16.msra.mxu1 %v14414_v9  ;;  %v17991_v63 = vrot.slane %v720_v59, %v17987_v53  ;;  %v17996_v5 = vrot.slane %v724_v0, %v17987_v53  ;;  %p17491_p1 = pnand %p17490_p5, %p18601_p12  ;;  %s17495_s7 = scalar_lea.vmem %s17494_s24, 512 }
 0x134   : > { %v841_v13 = vld [vmem:[#allocation5 + $0x280] sm:$0xff]  ;;  %v14399_v14 = vcombine.high %v1113_v11, %v1121_v12  ;;  %5371 = vmatprep.subr.bf16.mxu0 %v14143_v10  ;;  %v14398_v19 = vcombine.low %v1113_v11, %v1121_v12  ;;  %s13793_s15 = scalar_lea.hbm %s18600_s27, %s15748_s16  ;;  %p17496_p13 = scmp.lt.s32.totalorder %s13796_s30, %s17494_s24 }
 0x135   : > { %v849_v15 = vld [vmem:[#allocation5 + $0x2c0] sm:$0xff]  ;;  %5372 = vmatpush1.bf16.msra.mxu0 %v14142_v18  ;;  %v739_v4 = vcombine.high %v17991_v63, %v17991_v63  ;;  %v740_v12 = vcombine.high %v17996_v5, %v17996_v5  ;;  %p17492_p10 = pneg %p17491_p1  ;;  %p17497_p2 = scmp.lt.s32.totalorder %s17495_s7, %s17489_s0 }
 0x136   : > { %v1097_v16 = vld [vmem:[#allocation5 + $0xa80] sm:$0xff]  ;;  %v14127_v20 = vcombine.high %v841_v13, %v849_v15  ;;  %5412 = vmatprep.subr.bf16.mxu1 %v14399_v14  ;;  %v14126_v26 = vcombine.low %v841_v13, %v849_v15 }
 0x137   : > { %v1105_v17 = vld [vmem:[#allocation5 + $0xac0] sm:$0xff]  ;;  %5413 = vmatpush1.bf16.msra.mxu1 %v14398_v19  ;;  %v17998_v11 = vpack.c.bf16 %v739_v4, %v739_v4  ;;  %p17498_p4 = por %p17497_p2, %p17496_p13 }
 0x138   : > { %v14383_v21 = vcombine.high %v1097_v16, %v1105_v17  ;;  %v825_v22 = vld [vmem:[#allocation5 + $0x200] sm:$0xff]  ;;  %5373 = vmatprep.subr.bf16.mxu0 %v14127_v20  ;;  %v14382_v27 = vcombine.low %v1097_v16, %v1105_v17  ;;  %v18003_v16 = vpack.c.bf16 %v740_v12, %v740_v12 }
 0x139   : > { %v833_v23 = vld [vmem:[#allocation5 + $0x240] sm:$0xff]  ;;  %5374 = vmatpush1.bf16.msra.mxu0 %v14126_v26  ;;  %5401 = vmatprep.mubr.bf16.mxu0 %v17998_v11  ;;  %p17499_p0 = pnand %p17498_p4, %p17492_p10 }
 0x13a   : > { %v1081_v24 = vld [vmem:[#allocation5 + $0xa00] sm:$0xff]  ;;  %v14111_v28 = vcombine.high %v825_v22, %v833_v23  ;;  %5414 = vmatprep.subr.bf16.mxu1 %v14383_v21  ;;  %v14110_v37 = vcombine.low %v825_v22, %v833_v23  ;;  %5442 = vmatprep.mubr.bf16.mxu1 %v18003_v16 }
 0x13b   : > { %v1089_v25 = vld [vmem:[#allocation5 + $0xa40] sm:$0xff]  ;;  %5415 = vmatpush1.bf16.msra.mxu1 %v14382_v27 }
 0x13c   : > { %v14367_v29 = vcombine.high %v1081_v24, %v1089_v25  ;;  %v809_v30 = vld [vmem:[#allocation5 + $0x180] sm:$0xff]  ;;  %5375 = vmatprep.subr.bf16.mxu0 %v14111_v28  ;;  %v14366_v38 = vcombine.low %v1081_v24, %v1089_v25 }
 0x13d   : > { %v817_v31 = vld [vmem:[#allocation5 + $0x1c0] sm:$0xff]  ;;  %5376 = vmatpush1.bf16.msra.mxu0 %v14110_v37 }
 0x13e   : > { %v1065_v35 = vld [vmem:[#allocation5 + $0x980] sm:$0xff]  ;;  %v14095_v39 = vcombine.high %v809_v30, %v817_v31  ;;  %5416 = vmatprep.subr.bf16.mxu1 %v14367_v29  ;;  %v14094_v47 = vcombine.low %v809_v30, %v817_v31 }
 0x13f   : > { %v1073_v36 = vld [vmem:[#allocation5 + $0x9c0] sm:$0xff]  ;;  %5417 = vmatpush1.bf16.msra.mxu1 %v14366_v38 }
 0x140   : > { %v14351_v40 = vcombine.high %v1065_v35, %v1073_v36  ;;  %v793_v41 = vld [vmem:[#allocation5 + $0x100] sm:$0xff]  ;;  %5377 = vmatprep.subr.bf16.mxu0 %v14095_v39  ;;  %v14350_v48 = vcombine.low %v1065_v35, %v1073_v36 }
 0x141   : > { %v801_v42 = vld [vmem:[#allocation5 + $0x140] sm:$0xff]  ;;  %5378 = vmatpush1.bf16.msra.mxu0 %v14094_v47 }
 0x142   : > { %v1049_v45 = vld [vmem:[#allocation5 + $0x900] sm:$0xff]  ;;  %v14079_v49 = vcombine.high %v793_v41, %v801_v42  ;;  %5418 = vmatprep.subr.bf16.mxu1 %v14351_v40  ;;  %v14078_v56 = vcombine.low %v793_v41, %v801_v42 }
 0x143   : > { %v1057_v46 = vld [vmem:[#allocation5 + $0x940] sm:$0xff]  ;;  %5419 = vmatpush1.bf16.msra.mxu1 %v14350_v48 }
 0x144   : > { %v14335_v50 = vcombine.high %v1049_v45, %v1057_v46  ;;  %v777_v51 = vld [vmem:[#allocation5 + $0x80] sm:$0xff]  ;;  %5379 = vmatprep.subr.bf16.mxu0 %v14079_v49  ;;  %v14334_v57 = vcombine.low %v1049_v45, %v1057_v46 }
 0x145   : > { %v785_v52 = vld [vmem:[#allocation5 + $0xc0] sm:$0xff]  ;;  %5380 = vmatpush1.bf16.msra.mxu0 %v14078_v56 }
 0x146   : > { %v1033_v54 = vld [vmem:[#allocation5 + $0x880] sm:$0xff]  ;;  %v14063_v58 = vcombine.high %v777_v51, %v785_v52  ;;  %5420 = vmatprep.subr.bf16.mxu1 %v14335_v50  ;;  %v14062_v3 = vcombine.low %v777_v51, %v785_v52 }
 0x147   : > { %v1041_v55 = vld [vmem:[#allocation5 + $0x8c0] sm:$0xff]  ;;  %5421 = vmatpush1.bf16.msra.mxu1 %v14334_v57 }
 0x148   : > { %v14319_v60 = vcombine.high %v1033_v54, %v1041_v55  ;;  %v761_v61 = vld [vmem:[#allocation5] sm:$0xff]  ;;  %5381 = vmatprep.subr.bf16.mxu0 %v14063_v58  ;;  %v14318_v6 = vcombine.low %v1033_v54, %v1041_v55 }
 0x149   : > { %v769_v62 = vld [vmem:[#allocation5 + $0x40] sm:$0xff]  ;;  %5382 = vmatpush1.bf16.msra.mxu0 %v14062_v3 }
 0x14a   : > { %v1017_v1 = vld [vmem:[#allocation5 + $0x800] sm:$0xff]  ;;  %v14047_v7 = vcombine.high %v761_v61, %v769_v62  ;;  %5422 = vmatprep.subr.bf16.mxu1 %v14319_v60  ;;  %v14046_v15 = vcombine.low %v761_v61, %v769_v62 }
 0x14b   : > { %v1025_v2 = vld [vmem:[#allocation5 + $0x840] sm:$0xff]  ;;  %5423 = vmatpush1.bf16.msra.mxu1 %v14318_v6 }
 0x14c   : > { %v14303_v8 = vcombine.high %v1017_v1, %v1025_v2  ;;  %v1001_v9 = vld [vmem:[#allocation5 + $0x780] sm:$0xff]  ;;  %5383 = vmatprep.subr.bf16.mxu0 %v14047_v7  ;;  %v14302_v17 = vcombine.low %v1017_v1, %v1025_v2 }
 0x14d   : > { %v1009_v10 = vld [vmem:[#allocation5 + $0x7c0] sm:$0xff]  ;;  %5384 = vmatpush1.bf16.msra.mxu0 %v14046_v15 }
 0x14e   : > { %v1257_v13 = vld [vmem:[#allocation5 + $0xf80] sm:$0xff]  ;;  %v14287_v18 = vcombine.high %v1001_v9, %v1009_v10  ;;  %5424 = vmatprep.subr.bf16.mxu1 %v14303_v8  ;;  %v14286_v24 = vcombine.low %v1001_v9, %v1009_v10 }
 0x14f   : > { %v1265_v14 = vld [vmem:[#allocation5 + $0xfc0] sm:$0xff]  ;;  %5425 = vmatpush1.bf16.msra.mxu1 %v14302_v17 }
 0x150   : > { %v14543_v19 = vcombine.high %v1257_v13, %v1265_v14  ;;  %v985_v20 = vld [vmem:[#allocation5 + $0x700] sm:$0xff]  ;;  %5385 = vmatprep.subr.bf16.mxu0 %v14287_v18  ;;  %v14542_v25 = vcombine.low %v1257_v13, %v1265_v14 }
 0x151   : > { %v993_v21 = vld [vmem:[#allocation5 + $0x740] sm:$0xff]  ;;  %5386 = vmatpush2.bf16.msra.mxu0 %v14286_v24 }
 0x152   : > { %v1241_v22 = vld [vmem:[#allocation5 + $0xf00] sm:$0xff]  ;;  %v14271_v26 = vcombine.high %v985_v20, %v993_v21  ;;  %5426 = vmatprep.subr.bf16.mxu1 %v14543_v19  ;;  %v14270_v32 = vcombine.low %v985_v20, %v993_v21  ;;  %v874_v20 = vld [vmem:[#allocation5 + $0x388] sm:$0xff] }
 0x153   : > { %v1249_v23 = vld [vmem:[#allocation5 + $0xf40] sm:$0xff]  ;;  %5427 = vmatpush2.bf16.msra.mxu1 %v14542_v25  ;;  %v882_v21 = vld [vmem:[#allocation5 + $0x3c8] sm:$0xff] }
 0x154   : > { %v14527_v27 = vcombine.high %v1241_v22, %v1249_v23  ;;  %v969_v28 = vld [vmem:[#allocation5 + $0x680] sm:$0xff]  ;;  %5387 = vmatprep.subr.bf16.mxu0 %v14271_v26  ;;  %v14526_v33 = vcombine.low %v1241_v22, %v1249_v23  ;;  %v18007_v22 = vld.sshfl [vmem:[%s17943_s28 + $0x8] sm:$0x33 pattern:$0x76325410]  ;;  %v14161_v26 = vcombine.high %v874_v20, %v882_v21 }
 0x155   : > { %v977_v29 = vld [vmem:[#allocation5 + $0x6c0] sm:$0xff]  ;;  %5388 = vmatpush2.bf16.msra.mxu0 %v14270_v32  ;;  %v866_v32 = vld [vmem:[#allocation5 + $0x348] sm:$0xff] }
 0x156   : > { %v1225_v30 = vld [vmem:[#allocation5 + $0xe80] sm:$0xff]  ;;  %v14255_v34 = vcombine.high %v969_v28, %v977_v29  ;;  %5428 = vmatprep.subr.bf16.mxu1 %v14527_v27  ;;  %v14254_v40 = vcombine.low %v969_v28, %v977_v29  ;;  %v748_v29 = vcombine.high %v18007_v22, %v18007_v22 }
 0x157   : > { %v1233_v31 = vld [vmem:[#allocation5 + $0xec0] sm:$0xff]  ;;  %5429 = vmatpush2.bf16.msra.mxu1 %v14526_v33  ;;  %v18017_v33 = vpack.c.bf16 %v17996_v5, %v17996_v5 }
 0x158   : > { %v14511_v35 = vcombine.high %v1225_v30, %v1233_v31  ;;  %v953_v36 = vld [vmem:[#allocation5 + $0x600] sm:$0xff]  ;;  %5389 = vmatprep.subr.bf16.mxu0 %v14255_v34  ;;  %v14510_v41 = vcombine.low %v1225_v30, %v1233_v31  ;;  %v18013_v30 = vpack.c.bf16 %v17991_v63, %v17991_v63  ;;  %v858_v31 = vld [vmem:[#allocation5 + $0x308] sm:$0xff]  ;;  %v18019_v63 = vpack.c.bf16 %v748_v29, %v748_v29 }
 0x159   : > { %v961_v37 = vld [vmem:[#allocation5 + $0x640] sm:$0xff]  ;;  %5390 = vmatpush2.bf16.msra.mxu0 %v14254_v40  ;;  %v14145_v40 = vcombine.high %v858_v31, %v866_v32  ;;  %v1002_v29 = vld [vmem:[#allocation5 + $0x788] sm:$0xff] }
 0x15a   : > { %v1209_v38 = vld [vmem:[#allocation5 + $0xe00] sm:$0xff]  ;;  %v14239_v42 = vcombine.high %v953_v36, %v961_v37  ;;  %5430 = vmatprep.subr.bf16.mxu1 %v14511_v35  ;;  %v14238_v49 = vcombine.low %v953_v36, %v961_v37  ;;  %v14160_v35 = vcombine.low %v874_v20, %v882_v21  ;;  %v762_v20 = vld [vmem:[#allocation5 + $0x8] sm:$0xff] }
 0x15b   : > { %v1217_v39 = vld [vmem:[#allocation5 + $0xe40] sm:$0xff]  ;;  %5431 = vmatpush2.bf16.msra.mxu1 %v14510_v41  ;;  %v850_v41 = vld [vmem:[#allocation5 + $0x2c8] sm:$0xff] }
 0x15c   : > { %v14495_v43 = vcombine.high %v1209_v38, %v1217_v39  ;;  %v937_v45 = vld [vmem:[#allocation5 + $0x580] sm:$0xff]  ;;  %5391 = vmatprep.subr.bf16.mxu0 %v14239_v42  ;;  %v14494_v50 = vcombine.low %v1209_v38, %v1217_v39  ;;  %v842_v39 = vld [vmem:[#allocation5 + $0x288] sm:$0xff]  ;;  %v14144_v42 = vcombine.low %v858_v31, %v866_v32 }
 0x15d   : > { %v945_v46 = vld [vmem:[#allocation5 + $0x5c0] sm:$0xff]  ;;  %5392 = vmatpush2.bf16.msra.mxu0 %v14238_v49  ;;  %v834_v49 = vld [vmem:[#allocation5 + $0x248] sm:$0xff] }
 0x15e   : > { %v1193_v47 = vld [vmem:[#allocation5 + $0xd80] sm:$0xff]  ;;  %v14223_v51 = vcombine.high %v937_v45, %v945_v46  ;;  %5432 = vmatprep.subr.bf16.mxu1 %v14495_v43  ;;  %v14222_v58 = vcombine.low %v937_v45, %v945_v46  ;;  %v1010_v32 = vld [vmem:[#allocation5 + $0x7c8] sm:$0xff] }
 0x15f   : > { %v1201_v48 = vld [vmem:[#allocation5 + $0xdc0] sm:$0xff]  ;;  %5433 = vmatpush2.bf16.msra.mxu1 %v14494_v50 }
 0x160   : > { %v14479_v52 = vcombine.high %v1193_v47, %v1201_v48  ;;  %v921_v54 = vld [vmem:[#allocation5 + $0x500] sm:$0xff]  ;;  %5393 = vmatprep.subr.bf16.mxu0 %v14223_v51  ;;  %v14478_v59 = vcombine.low %v1193_v47, %v1201_v48  ;;  %v826_v47 = vld [vmem:[#allocation5 + $0x208] sm:$0xff]  ;;  %v14129_v48 = vcombine.high %v842_v39, %v850_v41  ;;  %v14128_v51 = vcombine.low %v842_v39, %v850_v41 }
 0x161   : > { %v929_v55 = vld [vmem:[#allocation5 + $0x540] sm:$0xff]  ;;  %5394 = vmatpush2.bf16.msra.mxu0 %v14222_v58  ;;  %v818_v58 = vld [vmem:[#allocation5 + $0x1c8] sm:$0xff] }
 0x162   : > { %v1177_v56 = vld [vmem:[#allocation5 + $0xd00] sm:$0xff]  ;;  %v14207_v60 = vcombine.high %v921_v54, %v929_v55  ;;  %5434 = vmatprep.subr.bf16.mxu1 %v14479_v52  ;;  %v14206_v3 = vcombine.low %v921_v54, %v929_v55  ;;  %v986_v39 = vld [vmem:[#allocation5 + $0x708] sm:$0xff] }
 0x163   : > { %v1185_v57 = vld [vmem:[#allocation5 + $0xd40] sm:$0xff]  ;;  %5435 = vmatpush2.bf16.msra.mxu1 %v14478_v59  ;;  %v994_v41 = vld [vmem:[#allocation5 + $0x748] sm:$0xff] }
 0x164   : > { %v14463_v61 = vcombine.high %v1177_v56, %v1185_v57  ;;  %v905_v62 = vld [vmem:[#allocation5 + $0x480] sm:$0xff]  ;;  %5395 = vmatprep.subr.bf16.mxu0 %v14207_v60  ;;  %v14462_v4 = vcombine.low %v1177_v56, %v1185_v57  ;;  %v810_v56 = vld [vmem:[#allocation5 + $0x188] sm:$0xff]  ;;  %v14113_v57 = vcombine.high %v826_v47, %v834_v49  ;;  %v14112_v60 = vcombine.low %v826_v47, %v834_v49 }
 0x165   : > { %v913_v0 = vld [vmem:[#allocation5 + $0x4c0] sm:$0xff]  ;;  %5396 = vmatpush2.bf16.msra.mxu0 %v14206_v3  ;;  %v802_v3 = vld [vmem:[#allocation5 + $0x148] sm:$0xff] }
 0x166   : > { %v1161_v1 = vld [vmem:[#allocation5 + $0xc80] sm:$0xff]  ;;  %v14191_v6 = vcombine.high %v905_v62, %v913_v0  ;;  %5436 = vmatprep.subr.bf16.mxu1 %v14463_v61  ;;  %v14190_v13 = vcombine.low %v905_v62, %v913_v0  ;;  %v970_v47 = vld [vmem:[#allocation5 + $0x688] sm:$0xff] }
 0x167   : > { %v1169_v2 = vld [vmem:[#allocation5 + $0xcc0] sm:$0xff]  ;;  %5437 = vmatpush2.bf16.msra.mxu1 %v14462_v4  ;;  %v978_v49 = vld [vmem:[#allocation5 + $0x6c8] sm:$0xff] }
 0x168   : > { %v14447_v7 = vcombine.high %v1161_v1, %v1169_v2  ;;  %v889_v8 = vld [vmem:[#allocation5 + $0x400] sm:$0xff]  ;;  %5397 = vmatprep.subr.bf16.mxu0 %v14191_v6  ;;  %v14446_v14 = vcombine.low %v1161_v1, %v1169_v2  ;;  %v794_v1 = vld [vmem:[#allocation5 + $0x108] sm:$0xff]  ;;  %v14097_v2 = vcombine.high %v810_v56, %v818_v58  ;;  %v14096_v6 = vcombine.low %v810_v56, %v818_v58 }
 0x169   : > { %v897_v9 = vld [vmem:[#allocation5 + $0x440] sm:$0xff]  ;;  %5398 = vmatpush2.bf16.msra.mxu0 %v14190_v13  ;;  %v786_v13 = vld [vmem:[#allocation5 + $0xc8] sm:$0xff] }
 0x16a   : > { %v1145_v10 = vld [vmem:[#allocation5 + $0xc00] sm:$0xff]  ;;  %v14175_v15 = vcombine.high %v889_v8, %v897_v9  ;;  %5438 = vmatprep.subr.bf16.mxu1 %v14447_v7  ;;  %v14174_v23 = vcombine.low %v889_v8, %v897_v9  ;;  %v954_v56 = vld [vmem:[#allocation5 + $0x608] sm:$0xff] }
 0x16b   : > { %v1153_v12 = vld [vmem:[#allocation5 + $0xc40] sm:$0xff]  ;;  %5439 = vmatpush2.bf16.msra.mxu1 %v14446_v14  ;;  %v962_v58 = vld [vmem:[#allocation5 + $0x648] sm:$0xff] }
 0x16c   : > { %v14431_v17 = vcombine.high %v1145_v10, %v1153_v12  ;;  %v1385_v18 = vld [vmem:[#allocation5 + $0x1380] sm:$0xff]  ;;  %5399 = vmatprep.subr.bf16.mxu0 %v14175_v15  ;;  %v14430_v24 = vcombine.low %v1145_v10, %v1153_v12  ;;  %v778_v10 = vld [vmem:[#allocation5 + $0x88] sm:$0xff]  ;;  %v14081_v12 = vcombine.high %v794_v1, %v802_v3  ;;  %v14080_v15 = vcombine.low %v794_v1, %v802_v3 }
 0x16d   : > { %v1393_v19 = vld [vmem:[#allocation5 + $0x13c0] sm:$0xff]  ;;  %5400 = vmatpush2.bf16.msra.mxu0 %v14174_v23  ;;  %v14065_v21 = vcombine.high %v778_v10, %v786_v13  ;;  %v770_v23 = vld [vmem:[#allocation5 + $0x48] sm:$0xff] }
 0x16e   : > { %v14671_v25 = vcombine.high %v1385_v18, %v1393_v19  ;;  %5440 = vmatprep.subr.bf16.mxu1 %v14431_v17  ;;  %v1369_v27 = vld [vmem:[#allocation5 + $0x1300] sm:$0xff]  ;;  %v14670_v34 = vcombine.low %v1385_v18, %v1393_v19  ;;  %v14049_v31 = vcombine.high %v762_v20, %v770_v23  ;;  %v938_v1 = vld [vmem:[#allocation5 + $0x588] sm:$0xff] }
 0x16f   : > { %v1377_v28 = vld [vmem:[#allocation5 + $0x1340] sm:$0xff]  ;;  %5441 = vmatpush2.bf16.msra.mxu1 %v14430_v24  ;;  %v946_v3 = vld [vmem:[#allocation5 + $0x5c8] sm:$0xff] }
 0x170   : > { %5451 = vmatprep.subr.bf16.mxu0 %v14671_v25  ;;  %v14655_v36 = vcombine.high %v1369_v27, %v1377_v28  ;;  %v1353_v37 = vld [vmem:[#allocation5 + $0x1280] sm:$0xff]  ;;  %5492 = vmatprep.subr.bf16.mxu1 %v14161_v26  ;;  %v14654_v5 = vcombine.low %v1369_v27, %v1377_v28  ;;  %v14064_v25 = vcombine.low %v778_v10, %v786_v13  ;;  %v922_v10 = vld [vmem:[#allocation5 + $0x508] sm:$0xff] }
 0x171   : > { %v1361_v38 = vld [vmem:[#allocation5 + $0x12c0] sm:$0xff]  ;;  %5402 = vmatmul.mubr.bf16.vlgmr.msra.gmra.mxu0 %v18013_v30  ;;  %v930_v13 = vld [vmem:[#allocation5 + $0x548] sm:$0xff] }
 0x172   : > { %5443 = vmatmul.mubr.bf16.vlgmr.msra.gmra.mxu1 %v18017_v33  ;;  %5452 = vmatpush1.bf16.msra.mxu0 %v14670_v34  ;;  %v14639_v43 = vcombine.high %v1353_v37, %v1361_v38  ;;  %v1337_v45 = vld [vmem:[#allocation5 + $0x1200] sm:$0xff]  ;;  %v14638_v50 = vcombine.low %v1353_v37, %v1361_v38 }
 0x173   : > { %5493 = vmatpush1.bf16.msra.mxu1 %v14160_v35  ;;  %5453 = vmatprep.subr.bf16.mxu0 %v14655_v36  ;;  %v1345_v46 = vld [vmem:[#allocation5 + $0x1240] sm:$0xff]  ;;  %v14048_v35 = vcombine.low %v762_v20, %v770_v23  ;;  %v906_v20 = vld [vmem:[#allocation5 + $0x488] sm:$0xff] }
 0x174   : > { %5494 = vmatprep.subr.bf16.mxu1 %v14145_v40  ;;  %5483 = vmatprep.mubr.bf16.mxu0 %v18019_v63  ;;  %v14623_v52 = vcombine.high %v1337_v45, %v1345_v46  ;;  %v1321_v54 = vld [vmem:[#allocation5 + $0x1180] sm:$0xff]  ;;  %v14622_v59 = vcombine.low %v1337_v45, %v1345_v46  ;;  %v14289_v40 = vcombine.high %v1002_v29, %v1010_v32  ;;  %v914_v23 = vld [vmem:[#allocation5 + $0x4c8] sm:$0xff] }
 0x175   : > { %5524 = vmatprep.mubr.bf16.mxu1 %v17998_v11  ;;  %v1329_v55 = vld [vmem:[#allocation5 + $0x11c0] sm:$0xff] }
 0x176   : > { %5454 = vmatpush1.bf16.msra.mxu0 %v14654_v5  ;;  %v14607_v61 = vcombine.high %v1321_v54, %v1329_v55  ;;  %v1305_v62 = vld [vmem:[#allocation5 + $0x1100] sm:$0xff]  ;;  %v14606_v4 = vcombine.low %v1321_v54, %v1329_v55 }
 0x177   : > { %5495 = vmatpush1.bf16.msra.mxu1 %v14144_v42  ;;  %5455 = vmatprep.subr.bf16.mxu0 %v14639_v43  ;;  %v1313_v0 = vld [vmem:[#allocation5 + $0x1140] sm:$0xff]  ;;  %v14288_v42 = vcombine.low %v1002_v29, %v1010_v32  ;;  %v890_v29 = vld [vmem:[#allocation5 + $0x408] sm:$0xff] }
 0x178   : > { %5496 = vmatprep.subr.bf16.mxu1 %v14129_v48  ;;  %v14591_v7 = vcombine.high %v1305_v62, %v1313_v0  ;;  %v1289_v8 = vld [vmem:[#allocation5 + $0x1080] sm:$0xff]  ;;  %v14590_v14 = vcombine.low %v1305_v62, %v1313_v0  ;;  %v14273_v48 = vcombine.high %v986_v39, %v994_v41  ;;  %v898_v32 = vld [vmem:[#allocation5 + $0x448] sm:$0xff] }
 0x179   : > { %v1297_v9 = vld [vmem:[#allocation5 + $0x10c0] sm:$0xff] }
 0x17a   : > { %5456 = vmatpush1.bf16.msra.mxu0 %v14638_v50  ;;  %v14575_v17 = vcombine.high %v1289_v8, %v1297_v9  ;;  %v1273_v18 = vld [vmem:[#allocation5 + $0x1000] sm:$0xff]  ;;  %v14574_v24 = vcombine.low %v1289_v8, %v1297_v9 }
 0x17b   : > { %5497 = vmatpush1.bf16.msra.mxu1 %v14128_v51  ;;  %5457 = vmatprep.subr.bf16.mxu0 %v14623_v52  ;;  %v1281_v19 = vld [vmem:[#allocation5 + $0x1040] sm:$0xff]  ;;  %v14272_v51 = vcombine.low %v986_v39, %v994_v41  ;;  %v1386_v39 = vld [vmem:[#allocation5 + $0x1388] sm:$0xff] }
 0x17c   : > { %5498 = vmatprep.subr.bf16.mxu1 %v14113_v57  ;;  %v14559_v26 = vcombine.high %v1273_v18, %v1281_v19  ;;  %v1513_v27 = vld [vmem:[#allocation5 + $0x1780] sm:$0xff]  ;;  %v14558_v34 = vcombine.low %v1273_v18, %v1281_v19  ;;  %v14257_v57 = vcombine.high %v970_v47, %v978_v49  ;;  %v1394_v41 = vld [vmem:[#allocation5 + $0x13c8] sm:$0xff] }
 0x17d   : > { %v1521_v28 = vld [vmem:[#allocation5 + $0x17c0] sm:$0xff] }
 0x17e   : > { %5458 = vmatpush1.bf16.msra.mxu0 %v14622_v59  ;;  %v14799_v36 = vcombine.high %v1513_v27, %v1521_v28  ;;  %v1497_v37 = vld [vmem:[#allocation5 + $0x1700] sm:$0xff]  ;;  %v14798_v5 = vcombine.low %v1513_v27, %v1521_v28 }
 0x17f   : > { %5499 = vmatpush1.bf16.msra.mxu1 %v14112_v60  ;;  %5459 = vmatprep.subr.bf16.mxu0 %v14607_v61  ;;  %v1505_v38 = vld [vmem:[#allocation5 + $0x1740] sm:$0xff]  ;;  %v14256_v60 = vcombine.low %v970_v47, %v978_v49  ;;  %v1370_v47 = vld [vmem:[#allocation5 + $0x1308] sm:$0xff] }
 0x180   : > { %5500 = vmatprep.subr.bf16.mxu1 %v14097_v2  ;;  %v14783_v43 = vcombine.high %v1497_v37, %v1505_v38  ;;  %v1481_v45 = vld [vmem:[#allocation5 + $0x1680] sm:$0xff]  ;;  %v14782_v50 = vcombine.low %v1497_v37, %v1505_v38  ;;  %v14241_v2 = vcombine.high %v954_v56, %v962_v58  ;;  %v1130_v37 = vld [vmem:[#allocation5 + $0xb88] sm:$0xff] }
 0x181   : > { %v1489_v46 = vld [vmem:[#allocation5 + $0x16c0] sm:$0xff]  ;;  %v1138_v38 = vld [vmem:[#allocation5 + $0xbc8] sm:$0xff] }
 0x182   : > { %5460 = vmatpush1.bf16.msra.mxu0 %v14606_v4  ;;  %v14767_v52 = vcombine.high %v1481_v45, %v1489_v46  ;;  %v1465_v54 = vld [vmem:[#allocation5 + $0x1600] sm:$0xff]  ;;  %v14766_v59 = vcombine.low %v1481_v45, %v1489_v46  ;;  %v1114_v45 = vld [vmem:[#allocation5 + $0xb08] sm:$0xff] }
 0x183   : > { %5501 = vmatpush1.bf16.msra.mxu1 %v14096_v6  ;;  %5461 = vmatprep.subr.bf16.mxu0 %v14591_v7  ;;  %v1473_v55 = vld [vmem:[#allocation5 + $0x1640] sm:$0xff]  ;;  %v14240_v6 = vcombine.low %v954_v56, %v962_v58  ;;  %v1122_v46 = vld [vmem:[#allocation5 + $0xb48] sm:$0xff] }
 0x184   : > { %5502 = vmatprep.subr.bf16.mxu1 %v14081_v12  ;;  %v14751_v61 = vcombine.high %v1465_v54, %v1473_v55  ;;  %v1449_v62 = vld [vmem:[#allocation5 + $0x1580] sm:$0xff]  ;;  %v14750_v4 = vcombine.low %v1465_v54, %v1473_v55  ;;  %v14225_v12 = vcombine.high %v938_v1, %v946_v3  ;;  %v1378_v49 = vld [vmem:[#allocation5 + $0x1348] sm:$0xff]  ;;  %v14401_v54 = vcombine.high %v1114_v45, %v1122_v46 }
 0x185   : > { %v1457_v0 = vld [vmem:[#allocation5 + $0x15c0] sm:$0xff]  ;;  %v1098_v55 = vld [vmem:[#allocation5 + $0xa88] sm:$0xff]  ;;  %v14657_v58 = vcombine.high %v1370_v47, %v1378_v49 }
 0x186   : > { %5462 = vmatpush1.bf16.msra.mxu0 %v14590_v14  ;;  %v14735_v7 = vcombine.high %v1449_v62, %v1457_v0  ;;  %v1433_v8 = vld [vmem:[#allocation5 + $0x1500] sm:$0xff]  ;;  %v14734_v14 = vcombine.low %v1449_v62, %v1457_v0  ;;  %v1106_v56 = vld [vmem:[#allocation5 + $0xac8] sm:$0xff] }
 0x187   : > { %5503 = vmatpush1.bf16.msra.mxu1 %v14080_v15  ;;  %5463 = vmatprep.subr.bf16.mxu0 %v14575_v17  ;;  %v1441_v9 = vld [vmem:[#allocation5 + $0x1540] sm:$0xff]  ;;  %v14224_v15 = vcombine.low %v938_v1, %v946_v3  ;;  %v1082_v62 = vld [vmem:[#allocation5 + $0xa08] sm:$0xff] }
 0x188   : > { %5504 = vmatprep.subr.bf16.mxu1 %v14065_v21  ;;  %v14719_v17 = vcombine.high %v1433_v8, %v1441_v9  ;;  %v1417_v18 = vld [vmem:[#allocation5 + $0x1480] sm:$0xff]  ;;  %v14209_v21 = vcombine.high %v922_v10, %v930_v13  ;;  %v1090_v0 = vld [vmem:[#allocation5 + $0xa48] sm:$0xff] }
 0x189   : > { %v1425_v19 = vld [vmem:[#allocation5 + $0x14c0] sm:$0xff]  ;;  %v1338_v1 = vld [vmem:[#allocation5 + $0x1208] sm:$0xff] }
 0x18a   : > { %5464 = vmatpush1.bf16.msra.mxu0 %v14574_v24  ;;  %v14718_v24 = vcombine.low %v1433_v8, %v1441_v9  ;;  %v1401_v27 = vld [vmem:[#allocation5 + $0x1400] sm:$0xff]  ;;  %v1346_v3 = vld [vmem:[#allocation5 + $0x1248] sm:$0xff] }
 0x18b   : > { %5505 = vmatpush1.bf16.msra.mxu1 %v14064_v25  ;;  %5465 = vmatprep.subr.bf16.mxu0 %v14559_v26  ;;  %v14208_v25 = vcombine.low %v922_v10, %v930_v13  ;;  %v14703_v26 = vcombine.high %v1417_v18, %v1425_v19  ;;  %v1409_v28 = vld [vmem:[#allocation5 + $0x1440] sm:$0xff]  ;;  %v1066_v8 = vld [vmem:[#allocation5 + $0x988] sm:$0xff] }
 0x18c   : > { %5506 = vmatprep.subr.bf16.mxu1 %v14049_v31  ;;  %v14193_v31 = vcombine.high %v906_v20, %v914_v23  ;;  %v1074_v9 = vld [vmem:[#allocation5 + $0x9c8] sm:$0xff] }
 0x18d   : > { %v1322_v10 = vld [vmem:[#allocation5 + $0x1188] sm:$0xff] }
 0x18e   : > { %5466 = vmatpush1.bf16.msra.mxu0 %v14558_v34  ;;  %v14702_v34 = vcombine.low %v1417_v18, %v1425_v19  ;;  %v1330_v13 = vld [vmem:[#allocation5 + $0x11c8] sm:$0xff] }
 0x18f   : > { %5507 = vmatpush1.bf16.msra.mxu1 %v14048_v35  ;;  %5467 = vmatprep.subr.bf16.mxu0 %v14799_v36  ;;  %v14192_v35 = vcombine.low %v906_v20, %v914_v23  ;;  %v14687_v36 = vcombine.high %v1401_v27, %v1409_v28  ;;  %v1050_v18 = vld [vmem:[#allocation5 + $0x908] sm:$0xff] }
 0x190   : > { %5508 = vmatprep.subr.bf16.mxu1 %v14289_v40  ;;  %v14177_v40 = vcombine.high %v890_v29, %v898_v32  ;;  %v1058_v19 = vld [vmem:[#allocation5 + $0x948] sm:$0xff] }
 0x191   : > { %v1306_v20 = vld [vmem:[#allocation5 + $0x1108] sm:$0xff] }
 0x192   : > { %5468 = vmatpush2.bf16.msra.mxu0 %v14798_v5  ;;  %v14686_v5 = vcombine.low %v1401_v27, %v1409_v28  ;;  %v1314_v23 = vld [vmem:[#allocation5 + $0x1148] sm:$0xff] }
 0x193   : > { %5509 = vmatpush2.bf16.msra.mxu1 %v14288_v42  ;;  %5469 = vmatprep.subr.bf16.mxu0 %v14783_v43  ;;  %v14176_v42 = vcombine.low %v890_v29, %v898_v32  ;;  %v14417_v43 = vcombine.high %v1130_v37, %v1138_v38  ;;  %v1034_v27 = vld [vmem:[#allocation5 + $0x888] sm:$0xff] }
 0x194   : > { %5510 = vmatprep.subr.bf16.mxu1 %v14273_v48  ;;  %v14673_v48 = vcombine.high %v1386_v39, %v1394_v41  ;;  %v1042_v28 = vld [vmem:[#allocation5 + $0x8c8] sm:$0xff] }
 0x195   : > { %v1290_v29 = vld [vmem:[#allocation5 + $0x1088] sm:$0xff] }
 0x196   : > { %5470 = vmatpush2.bf16.msra.mxu0 %v14782_v50  ;;  %v18027_v50 = vpack.c.bf16 %v18007_v22, %v18007_v22  ;;  %v14656_v22 = vcombine.low %v1370_v47, %v1378_v49  ;;  %v1298_v32 = vld [vmem:[#allocation5 + $0x10c8] sm:$0xff] }
 0x197   : > { %5511 = vmatpush2.bf16.msra.mxu1 %v14272_v51  ;;  %5471 = vmatprep.subr.bf16.mxu0 %v14767_v52  ;;  %v14416_v51 = vcombine.low %v1130_v37, %v1138_v38  ;;  %v14672_v52 = vcombine.low %v1386_v39, %v1394_v41  ;;  %v1018_v37 = vld [vmem:[#allocation5 + $0x808] sm:$0xff] }
 0x198   : > { %5512 = vmatprep.subr.bf16.mxu1 %v14257_v57  ;;  %v1354_v57 = vld [vmem:[#allocation5 + $0x1288] sm:$0xff] }
 0x199   : > { %v1026_v38 = vld [vmem:[#allocation5 + $0x848] sm:$0xff] }
 0x19a   : > { %5472 = vmatpush2.bf16.msra.mxu0 %v14766_v59  ;;  %v1362_v59 = vld [vmem:[#allocation5 + $0x12c8] sm:$0xff] }
 0x19b   : > { %5513 = vmatpush2.bf16.msra.mxu1 %v14256_v60  ;;  %5473 = vmatprep.subr.bf16.mxu0 %v14751_v61  ;;  %v14400_v60 = vcombine.low %v1114_v45, %v1122_v46  ;;  %v14385_v61 = vcombine.high %v1098_v55, %v1106_v56  ;;  %v1274_v39 = vld [vmem:[#allocation5 + $0x1008] sm:$0xff] }
 0x19c   : > { %5514 = vmatprep.subr.bf16.mxu1 %v14241_v2  ;;  %v14641_v2 = vcombine.high %v1354_v57, %v1362_v59  ;;  %v1282_v41 = vld [vmem:[#allocation5 + $0x1048] sm:$0xff] }
 0x19d   : > { %v1258_v45 = vld [vmem:[#allocation5 + $0xf88] sm:$0xff] }
 0x19e   : > { %5474 = vmatpush2.bf16.msra.mxu0 %v14750_v4  ;;  %v14384_v4 = vcombine.low %v1098_v55, %v1106_v56  ;;  %v1266_v46 = vld [vmem:[#allocation5 + $0xfc8] sm:$0xff] }
 0x19f   : > { %5515 = vmatpush2.bf16.msra.mxu1 %v14240_v6  ;;  %5475 = vmatprep.subr.bf16.mxu0 %v14735_v7  ;;  %v14640_v6 = vcombine.low %v1354_v57, %v1362_v59  ;;  %v14369_v7 = vcombine.high %v1082_v62, %v1090_v0  ;;  %v1514_v47 = vld [vmem:[#allocation5 + $0x1788] sm:$0xff] }
 0x1a0   : > { %5516 = vmatprep.subr.bf16.mxu1 %v14225_v12  ;;  %v14625_v12 = vcombine.high %v1338_v1, %v1346_v3  ;;  %v1522_v49 = vld [vmem:[#allocation5 + $0x17c8] sm:$0xff] }
 0x1a1   : > { %v1242_v55 = vld [vmem:[#allocation5 + $0xf08] sm:$0xff] }
 0x1a2   : > { %5476 = vmatpush2.bf16.msra.mxu0 %v14734_v14  ;;  %v14368_v14 = vcombine.low %v1082_v62, %v1090_v0  ;;  %v1250_v56 = vld [vmem:[#allocation5 + $0xf48] sm:$0xff] }
 0x1a3   : > { %5517 = vmatpush2.bf16.msra.mxu1 %v14224_v15  ;;  %5477 = vmatprep.subr.bf16.mxu0 %v14719_v17  ;;  %v14624_v15 = vcombine.low %v1338_v1, %v1346_v3  ;;  %v14353_v17 = vcombine.high %v1066_v8, %v1074_v9  ;;  %v1498_v57 = vld [vmem:[#allocation5 + $0x1708] sm:$0xff] }
 0x1a4   : > { %5518 = vmatprep.subr.bf16.mxu1 %v14209_v21  ;;  %v14609_v21 = vcombine.high %v1322_v10, %v1330_v13  ;;  %v1506_v59 = vld [vmem:[#allocation5 + $0x1748] sm:$0xff] }
 0x1a5   : > { %v1226_v62 = vld [vmem:[#allocation5 + $0xe88] sm:$0xff] }
 0x1a6   : > { %5478 = vmatpush2.bf16.msra.mxu0 %v14718_v24  ;;  %v14352_v24 = vcombine.low %v1066_v8, %v1074_v9  ;;  %v1234_v0 = vld [vmem:[#allocation5 + $0xec8] sm:$0xff] }
 0x1a7   : > { %5519 = vmatpush2.bf16.msra.mxu1 %v14208_v25  ;;  %5479 = vmatprep.subr.bf16.mxu0 %v14703_v26  ;;  %v14608_v25 = vcombine.low %v1322_v10, %v1330_v13  ;;  %v14337_v26 = vcombine.high %v1050_v18, %v1058_v19  ;;  %v1482_v1 = vld [vmem:[#allocation5 + $0x1688] sm:$0xff] }
 0x1a8   : > { %5520 = vmatprep.subr.bf16.mxu1 %v14193_v31  ;;  %v14593_v31 = vcombine.high %v1306_v20, %v1314_v23  ;;  %v1490_v3 = vld [vmem:[#allocation5 + $0x16c8] sm:$0xff] }
 0x1a9   : > { %v1210_v8 = vld [vmem:[#allocation5 + $0xe08] sm:$0xff] }
 0x1aa   : > { %5480 = vmatpush2.bf16.msra.mxu0 %v14702_v34  ;;  %v14336_v34 = vcombine.low %v1050_v18, %v1058_v19  ;;  %v1218_v9 = vld [vmem:[#allocation5 + $0xe48] sm:$0xff] }
 0x1ab   : > { %5521 = vmatpush2.bf16.msra.mxu1 %v14192_v35  ;;  %5481 = vmatprep.subr.bf16.mxu0 %v14687_v36  ;;  %v14592_v35 = vcombine.low %v1306_v20, %v1314_v23  ;;  %v14321_v36 = vcombine.high %v1034_v27, %v1042_v28  ;;  %v1466_v10 = vld [vmem:[#allocation5 + $0x1608] sm:$0xff] }
 0x1ac   : > { %5522 = vmatprep.subr.bf16.mxu1 %v14177_v40  ;;  %v14577_v40 = vcombine.high %v1290_v29, %v1298_v32  ;;  %v1474_v13 = vld [vmem:[#allocation5 + $0x1648] sm:$0xff] }
 0x1ad   : > { %v1194_v18 = vld [vmem:[#allocation5 + $0xd88] sm:$0xff] }
 0x1ae   : > { %5482 = vmatpush2.bf16.msra.mxu0 %v14686_v5  ;;  %v14320_v5 = vcombine.low %v1034_v27, %v1042_v28  ;;  %v1202_v19 = vld [vmem:[#allocation5 + $0xdc8] sm:$0xff] }
 0x1af   : > { %5523 = vmatpush2.bf16.msra.mxu1 %v14176_v42  ;;  %5533 = vmatprep.subr.bf16.mxu0 %v14417_v43  ;;  %v14576_v42 = vcombine.low %v1290_v29, %v1298_v32  ;;  %v14305_v43 = vcombine.high %v1018_v37, %v1026_v38  ;;  %v1450_v20 = vld [vmem:[#allocation5 + $0x1588] sm:$0xff] }
 0x1b0   : > { %5574 = vmatprep.subr.bf16.mxu1 %v14673_v48  ;;  %v14561_v48 = vcombine.high %v1274_v39, %v1282_v41  ;;  %v1458_v23 = vld [vmem:[#allocation5 + $0x15c8] sm:$0xff] }
 0x1b1   : > { %5484 = vmatmul.mubr.bf16.vlgmr.msra.gmra.mxu0 %v18027_v50  ;;  %v1178_v27 = vld [vmem:[#allocation5 + $0xd08] sm:$0xff] }
 0x1b2   : > { %5525 = vmatmul.mubr.bf16.vlgmr.msra.gmra.mxu1 %v18013_v30  ;;  %5534 = vmatpush1.bf16.msra.mxu0 %v14416_v51  ;;  %v14304_v51 = vcombine.low %v1018_v37, %v1026_v38  ;;  %v1186_v28 = vld [vmem:[#allocation5 + $0xd48] sm:$0xff] }
 0x1b3   : > { %5575 = vmatpush1.bf16.msra.mxu1 %v14672_v52  ;;  %5535 = vmatprep.subr.bf16.mxu0 %v14401_v54  ;;  %v14560_v52 = vcombine.low %v1274_v39, %v1282_v41  ;;  %v14545_v54 = vcombine.high %v1258_v45, %v1266_v46  ;;  %v1434_v29 = vld [vmem:[#allocation5 + $0x1508] sm:$0xff] }
 0x1b4   : > { %5576 = vmatprep.subr.bf16.mxu1 %v14657_v58  ;;  %5565 = vmatprep.mubr.bf16.mxu0 %v18003_v16  ;;  %v14801_v58 = vcombine.high %v1514_v47, %v1522_v49  ;;  %v1442_v32 = vld [vmem:[#allocation5 + $0x1548] sm:$0xff] }
 0x1b5   : > { %5606 = vmatprep.mubr.bf16.mxu1 %v18019_v63  ;;  %v1162_v37 = vld [vmem:[#allocation5 + $0xc88] sm:$0xff] }
 0x1b6   : > { %5536 = vmatpush1.bf16.msra.mxu0 %v14400_v60  ;;  %v14544_v60 = vcombine.low %v1258_v45, %v1266_v46  ;;  %v1170_v38 = vld [vmem:[#allocation5 + $0xcc8] sm:$0xff] }
 0x1b7   : > { %5577 = vmatpush1.bf16.msra.mxu1 %v14656_v22  ;;  %5537 = vmatprep.subr.bf16.mxu0 %v14385_v61  ;;  %v14800_v22 = vcombine.low %v1514_v47, %v1522_v49  ;;  %v14529_v61 = vcombine.high %v1242_v55, %v1250_v56  ;;  %v1418_v39 = vld [vmem:[#allocation5 + $0x1488] sm:$0xff] }
 0x1b8   : > { %5578 = vmatprep.subr.bf16.mxu1 %v14641_v2  ;;  %v14785_v2 = vcombine.high %v1498_v57, %v1506_v59  ;;  %v1426_v41 = vld [vmem:[#allocation5 + $0x14c8] sm:$0xff] }
 0x1b9   : > { %v1146_v45 = vld [vmem:[#allocation5 + $0xc08] sm:$0xff] }
 0x1ba   : > { %5538 = vmatpush1.bf16.msra.mxu0 %v14384_v4  ;;  %v14528_v4 = vcombine.low %v1242_v55, %v1250_v56  ;;  %v1154_v46 = vld [vmem:[#allocation5 + $0xc48] sm:$0xff]  ;;  %v875_v55 = vld [vmem:[#allocation5 + $0x390] sm:$0xff] }
 0x1bb   : > { %5579 = vmatpush1.bf16.msra.mxu1 %v14640_v6  ;;  %5539 = vmatprep.subr.bf16.mxu0 %v14369_v7  ;;  %v14784_v6 = vcombine.low %v1498_v57, %v1506_v59  ;;  %v14513_v7 = vcombine.high %v1226_v62, %v1234_v0  ;;  %v1402_v47 = vld [vmem:[#allocation5 + $0x1408] sm:$0xff]  ;;  %v883_v56 = vld [vmem:[#allocation5 + $0x3d0] sm:$0xff] }
 0x1bc   : > { %5580 = vmatprep.subr.bf16.mxu1 %v14625_v12  ;;  %v14769_v12 = vcombine.high %v1482_v1, %v1490_v3  ;;  %v1410_v49 = vld [vmem:[#allocation5 + $0x1448] sm:$0xff]  ;;  %v1131_v57 = vld [vmem:[#allocation5 + $0xb90] sm:$0xff] }
 0x1bd   : > { %v1139_v59 = vld [vmem:[#allocation5 + $0xbd0] sm:$0xff] }
 0x1be   : > { %5540 = vmatpush1.bf16.msra.mxu0 %v14368_v14  ;;  %v14512_v14 = vcombine.low %v1226_v62, %v1234_v0  ;;  %v859_v62 = vld [vmem:[#allocation5 + $0x310] sm:$0xff] }
 0x1bf   : > { %5581 = vmatpush1.bf16.msra.mxu1 %v14624_v15  ;;  %5541 = vmatprep.subr.bf16.mxu0 %v14353_v17  ;;  %v14768_v15 = vcombine.low %v1482_v1, %v1490_v3  ;;  %v14497_v17 = vcombine.high %v1210_v8, %v1218_v9  ;;  %v867_v0 = vld [vmem:[#allocation5 + $0x350] sm:$0xff] }
 0x1c0   : > { %5582 = vmatprep.subr.bf16.mxu1 %v14609_v21  ;;  %v14753_v21 = vcombine.high %v1466_v10, %v1474_v13  ;;  %v1115_v1 = vld [vmem:[#allocation5 + $0xb10] sm:$0xff] }
 0x1c1   : > { %v1123_v3 = vld [vmem:[#allocation5 + $0xb50] sm:$0xff] }
 0x1c2   : > { %5542 = vmatpush1.bf16.msra.mxu0 %v14352_v24  ;;  %v14496_v24 = vcombine.low %v1210_v8, %v1218_v9  ;;  %v843_v8 = vld [vmem:[#allocation5 + $0x290] sm:$0xff] }
 0x1c3   : > { %5583 = vmatpush1.bf16.msra.mxu1 %v14608_v25  ;;  %5543 = vmatprep.subr.bf16.mxu0 %v14337_v26  ;;  %v14752_v25 = vcombine.low %v1466_v10, %v1474_v13  ;;  %v14481_v26 = vcombine.high %v1194_v18, %v1202_v19  ;;  %v851_v9 = vld [vmem:[#allocation5 + $0x2d0] sm:$0xff] }
 0x1c4   : > { %5584 = vmatprep.subr.bf16.mxu1 %v14593_v31  ;;  %v14737_v31 = vcombine.high %v1450_v20, %v1458_v23  ;;  %v1099_v10 = vld [vmem:[#allocation5 + $0xa90] sm:$0xff] }
 0x1c5   : > { %v1107_v13 = vld [vmem:[#allocation5 + $0xad0] sm:$0xff] }
 0x1c6   : > { %5544 = vmatpush1.bf16.msra.mxu0 %v14336_v34  ;;  %v14480_v34 = vcombine.low %v1194_v18, %v1202_v19  ;;  %v827_v18 = vld [vmem:[#allocation5 + $0x210] sm:$0xff] }
 0x1c7   : > { %5585 = vmatpush1.bf16.msra.mxu1 %v14592_v35  ;;  %5545 = vmatprep.subr.bf16.mxu0 %v14321_v36  ;;  %v14736_v35 = vcombine.low %v1450_v20, %v1458_v23  ;;  %v14465_v36 = vcombine.high %v1178_v27, %v1186_v28  ;;  %v835_v19 = vld [vmem:[#allocation5 + $0x250] sm:$0xff] }
 0x1c8   : > { %5586 = vmatprep.subr.bf16.mxu1 %v14577_v40  ;;  %v14721_v40 = vcombine.high %v1434_v29, %v1442_v32  ;;  %v1083_v20 = vld [vmem:[#allocation5 + $0xa10] sm:$0xff] }
 0x1c9   : > { %v1091_v23 = vld [vmem:[#allocation5 + $0xa50] sm:$0xff] }
 0x1ca   : > { %5546 = vmatpush1.bf16.msra.mxu0 %v14320_v5  ;;  %v14464_v5 = vcombine.low %v1178_v27, %v1186_v28  ;;  %v811_v27 = vld [vmem:[#allocation5 + $0x190] sm:$0xff] }
 0x1cb   : > { %5587 = vmatpush1.bf16.msra.mxu1 %v14576_v42  ;;  %5547 = vmatprep.subr.bf16.mxu0 %v14305_v43  ;;  %v14720_v42 = vcombine.low %v1434_v29, %v1442_v32  ;;  %v14449_v43 = vcombine.high %v1162_v37, %v1170_v38  ;;  %v819_v28 = vld [vmem:[#allocation5 + $0x1d0] sm:$0xff] }
 0x1cc   : > { %5588 = vmatprep.subr.bf16.mxu1 %v14561_v48  ;;  %v14705_v48 = vcombine.high %v1418_v39, %v1426_v41  ;;  %v1067_v29 = vld [vmem:[#allocation5 + $0x990] sm:$0xff] }
 0x1cd   : > { %v1075_v32 = vld [vmem:[#allocation5 + $0x9d0] sm:$0xff] }
 0x1ce   : > { %5548 = vmatpush1.bf16.msra.mxu0 %v14304_v51  ;;  %v14448_v51 = vcombine.low %v1162_v37, %v1170_v38  ;;  %v795_v37 = vld [vmem:[#allocation5 + $0x110] sm:$0xff] }
 0x1cf   : > { %5589 = vmatpush1.bf16.msra.mxu1 %v14560_v52  ;;  %5549 = vmatprep.subr.bf16.mxu0 %v14545_v54  ;;  %v14704_v52 = vcombine.low %v1418_v39, %v1426_v41  ;;  %v14433_v54 = vcombine.high %v1146_v45, %v1154_v46  ;;  %v803_v38 = vld [vmem:[#allocation5 + $0x150] sm:$0xff] }
 0x1d0   : > { %5590 = vmatprep.subr.bf16.mxu1 %v14801_v58  ;;  %v14689_v58 = vcombine.high %v1402_v47, %v1410_v49  ;;  %v1051_v39 = vld [vmem:[#allocation5 + $0x910] sm:$0xff] }
 0x1d1   : > { %v1059_v41 = vld [vmem:[#allocation5 + $0x950] sm:$0xff] }
 0x1d2   : > { %5550 = vmatpush2.bf16.msra.mxu0 %v14544_v60  ;;  %v14432_v60 = vcombine.low %v1146_v45, %v1154_v46  ;;  %v779_v45 = vld [vmem:[#allocation5 + $0x90] sm:$0xff] }
 0x1d3   : > { %5591 = vmatpush2.bf16.msra.mxu1 %v14800_v22  ;;  %5551 = vmatprep.subr.bf16.mxu0 %v14529_v61  ;;  %v14688_v22 = vcombine.low %v1402_v47, %v1410_v49  ;;  %v14163_v61 = vcombine.high %v875_v55, %v883_v56  ;;  %v787_v46 = vld [vmem:[#allocation5 + $0xd0] sm:$0xff] }
 0x1d4   : > { %5592 = vmatprep.subr.bf16.mxu1 %v14785_v2  ;;  %v14419_v2 = vcombine.high %v1131_v57, %v1139_v59  ;;  %v1035_v47 = vld [vmem:[#allocation5 + $0x890] sm:$0xff] }
 0x1d5   : > { %v1043_v49 = vld [vmem:[#allocation5 + $0x8d0] sm:$0xff] }
 0x1d6   : > { %5552 = vmatpush2.bf16.msra.mxu0 %v14528_v4  ;;  %v14162_v4 = vcombine.low %v875_v55, %v883_v56  ;;  %v763_v55 = vld [vmem:[#allocation5 + $0x10] sm:$0xff] }
 0x1d7   : > { %5593 = vmatpush2.bf16.msra.mxu1 %v14784_v6  ;;  %5553 = vmatprep.subr.bf16.mxu0 %v14513_v7  ;;  %v14418_v6 = vcombine.low %v1131_v57, %v1139_v59  ;;  %v14147_v7 = vcombine.high %v859_v62, %v867_v0  ;;  %v771_v56 = vld [vmem:[#allocation5 + $0x50] sm:$0xff] }
 0x1d8   : > { %5594 = vmatprep.subr.bf16.mxu1 %v14769_v12  ;;  %v14403_v12 = vcombine.high %v1115_v1, %v1123_v3  ;;  %v1019_v57 = vld [vmem:[#allocation5 + $0x810] sm:$0xff] }
 0x1d9   : > { %v1027_v59 = vld [vmem:[#allocation5 + $0x850] sm:$0xff] }
 0x1da   : > { %5554 = vmatpush2.bf16.msra.mxu0 %v14512_v14  ;;  %v14146_v14 = vcombine.low %v859_v62, %v867_v0  ;;  %v1003_v62 = vld [vmem:[#allocation5 + $0x790] sm:$0xff] }
 0x1db   : > { %5595 = vmatpush2.bf16.msra.mxu1 %v14768_v15  ;;  %5555 = vmatprep.subr.bf16.mxu0 %v14497_v17  ;;  %v14402_v15 = vcombine.low %v1115_v1, %v1123_v3  ;;  %v14131_v17 = vcombine.high %v843_v8, %v851_v9  ;;  %v1011_v0 = vld [vmem:[#allocation5 + $0x7d0] sm:$0xff] }
 0x1dc   : > { %5596 = vmatprep.subr.bf16.mxu1 %v14753_v21  ;;  %v14387_v21 = vcombine.high %v1099_v10, %v1107_v13  ;;  %v1259_v1 = vld [vmem:[#allocation5 + $0xf90] sm:$0xff] }
 0x1dd   : > { %v1267_v3 = vld [vmem:[#allocation5 + $0xfd0] sm:$0xff] }
 0x1de   : > { %5556 = vmatpush2.bf16.msra.mxu0 %v14496_v24  ;;  %v14130_v24 = vcombine.low %v843_v8, %v851_v9  ;;  %v987_v8 = vld [vmem:[#allocation5 + $0x710] sm:$0xff] }
 0x1df   : > { %5597 = vmatpush2.bf16.msra.mxu1 %v14752_v25  ;;  %5557 = vmatprep.subr.bf16.mxu0 %v14481_v26  ;;  %v14386_v25 = vcombine.low %v1099_v10, %v1107_v13  ;;  %v14115_v26 = vcombine.high %v827_v18, %v835_v19  ;;  %v995_v9 = vld [vmem:[#allocation5 + $0x750] sm:$0xff] }
 0x1e0   : > { %5598 = vmatprep.subr.bf16.mxu1 %v14737_v31  ;;  %v14371_v31 = vcombine.high %v1083_v20, %v1091_v23  ;;  %v1243_v10 = vld [vmem:[#allocation5 + $0xf10] sm:$0xff] }
 0x1e1   : > { %v1251_v13 = vld [vmem:[#allocation5 + $0xf50] sm:$0xff] }
 0x1e2   : > { %5558 = vmatpush2.bf16.msra.mxu0 %v14480_v34  ;;  %v14114_v34 = vcombine.low %v827_v18, %v835_v19  ;;  %v971_v18 = vld [vmem:[#allocation5 + $0x690] sm:$0xff] }
 0x1e3   : > { %5599 = vmatpush2.bf16.msra.mxu1 %v14736_v35  ;;  %5559 = vmatprep.subr.bf16.mxu0 %v14465_v36  ;;  %v14370_v35 = vcombine.low %v1083_v20, %v1091_v23  ;;  %v14099_v36 = vcombine.high %v811_v27, %v819_v28  ;;  %v979_v19 = vld [vmem:[#allocation5 + $0x6d0] sm:$0xff] }
 0x1e4   : > { %5600 = vmatprep.subr.bf16.mxu1 %v14721_v40  ;;  %v14355_v40 = vcombine.high %v1067_v29, %v1075_v32  ;;  %v1227_v20 = vld [vmem:[#allocation5 + $0xe90] sm:$0xff] }
 0x1e5   : > { %v1235_v23 = vld [vmem:[#allocation5 + $0xed0] sm:$0xff] }
 0x1e6   : > { %5560 = vmatpush2.bf16.msra.mxu0 %v14464_v5  ;;  %v14098_v5 = vcombine.low %v811_v27, %v819_v28  ;;  %v955_v27 = vld [vmem:[#allocation5 + $0x610] sm:$0xff] }
 0x1e7   : > { %5601 = vmatpush2.bf16.msra.mxu1 %v14720_v42  ;;  %5561 = vmatprep.subr.bf16.mxu0 %v14449_v43  ;;  %v14354_v42 = vcombine.low %v1067_v29, %v1075_v32  ;;  %v14083_v43 = vcombine.high %v795_v37, %v803_v38  ;;  %v963_v28 = vld [vmem:[#allocation5 + $0x650] sm:$0xff] }
 0x1e8   : > { %5602 = vmatprep.subr.bf16.mxu1 %v14705_v48  ;;  %v14339_v48 = vcombine.high %v1051_v39, %v1059_v41  ;;  %v1211_v29 = vld [vmem:[#allocation5 + $0xe10] sm:$0xff] }
 0x1e9   : > { %v1219_v32 = vld [vmem:[#allocation5 + $0xe50] sm:$0xff] }
 0x1ea   : > { %5562 = vmatpush2.bf16.msra.mxu0 %v14448_v51  ;;  %v14082_v51 = vcombine.low %v795_v37, %v803_v38  ;;  %v939_v37 = vld [vmem:[#allocation5 + $0x590] sm:$0xff] }
 0x1eb   : > { %5603 = vmatpush2.bf16.msra.mxu1 %v14704_v52  ;;  %5563 = vmatprep.subr.bf16.mxu0 %v14433_v54  ;;  %v14338_v52 = vcombine.low %v1051_v39, %v1059_v41  ;;  %v14067_v54 = vcombine.high %v779_v45, %v787_v46  ;;  %v947_v38 = vld [vmem:[#allocation5 + $0x5d0] sm:$0xff] }
 0x1ec   : > { %5604 = vmatprep.subr.bf16.mxu1 %v14689_v58  ;;  %v14323_v58 = vcombine.high %v1035_v47, %v1043_v49  ;;  %v1195_v39 = vld [vmem:[#allocation5 + $0xd90] sm:$0xff] }
 0x1ed   : > { %v1203_v41 = vld [vmem:[#allocation5 + $0xdd0] sm:$0xff] }
 0x1ee   : > { %5564 = vmatpush2.bf16.msra.mxu0 %v14432_v60  ;;  %v14066_v60 = vcombine.low %v779_v45, %v787_v46  ;;  %v923_v45 = vld [vmem:[#allocation5 + $0x510] sm:$0xff] }
 0x1ef   : > { %5605 = vmatpush2.bf16.msra.mxu1 %v14688_v22  ;;  %5615 = vmatprep.subr.bf16.mxu0 %v14163_v61  ;;  %v14322_v22 = vcombine.low %v1035_v47, %v1043_v49  ;;  %v14051_v61 = vcombine.high %v763_v55, %v771_v56  ;;  %v931_v46 = vld [vmem:[#allocation5 + $0x550] sm:$0xff] }
 0x1f0   : > { %5656 = vmatprep.subr.bf16.mxu1 %v14419_v2  ;;  %v14307_v2 = vcombine.high %v1019_v57, %v1027_v59  ;;  %v1179_v47 = vld [vmem:[#allocation5 + $0xd10] sm:$0xff] }
 0x1f1   : > { %5566 = vmatmul.mubr.bf16.vlgmr.msra.gmra.mxu0 %v18017_v33  ;;  %v1187_v49 = vld [vmem:[#allocation5 + $0xd50] sm:$0xff] }
 0x1f2   : > { %5607 = vmatmul.mubr.bf16.vlgmr.msra.gmra.mxu1 %v18027_v50  ;;  %5616 = vmatpush1.bf16.msra.mxu0 %v14162_v4  ;;  %v14050_v4 = vcombine.low %v763_v55, %v771_v56  ;;  %v907_v55 = vld [vmem:[#allocation5 + $0x490] sm:$0xff] }
 0x1f3   : > { %5657 = vmatpush1.bf16.msra.mxu1 %v14418_v6  ;;  %5617 = vmatprep.subr.bf16.mxu0 %v14147_v7  ;;  %v14306_v6 = vcombine.low %v1019_v57, %v1027_v59  ;;  %v14291_v7 = vcombine.high %v1003_v62, %v1011_v0  ;;  %v915_v56 = vld [vmem:[#allocation5 + $0x4d0] sm:$0xff] }
 0x1f4   : > { %5658 = vmatprep.subr.bf16.mxu1 %v14403_v12  ;;  %5647 = vmatprep.mubr.bf16.mxu0 %v17998_v11  ;;  %v14547_v12 = vcombine.high %v1259_v1, %v1267_v3  ;;  %v1163_v57 = vld [vmem:[#allocation5 + $0xc90] sm:$0xff] }
 0x1f5   : > { %5688 = vmatprep.mubr.bf16.mxu1 %v18003_v16  ;;  %v1171_v59 = vld [vmem:[#allocation5 + $0xcd0] sm:$0xff] }
 0x1f6   : > { %5618 = vmatpush1.bf16.msra.mxu0 %v14146_v14  ;;  %v14290_v14 = vcombine.low %v1003_v62, %v1011_v0  ;;  %v891_v62 = vld [vmem:[#allocation5 + $0x410] sm:$0xff] }
 0x1f7   : > { %5659 = vmatpush1.bf16.msra.mxu1 %v14402_v15  ;;  %5619 = vmatprep.subr.bf16.mxu0 %v14131_v17  ;;  %v14546_v15 = vcombine.low %v1259_v1, %v1267_v3  ;;  %v14275_v17 = vcombine.high %v987_v8, %v995_v9  ;;  %v899_v0 = vld [vmem:[#allocation5 + $0x450] sm:$0xff] }
 0x1f8   : > { %5660 = vmatprep.subr.bf16.mxu1 %v14387_v21  ;;  %v14531_v21 = vcombine.high %v1243_v10, %v1251_v13  ;;  %v1147_v1 = vld [vmem:[#allocation5 + $0xc10] sm:$0xff] }
 0x1f9   : > { %v1155_v3 = vld [vmem:[#allocation5 + $0xc50] sm:$0xff] }
 0x1fa   : > { %5620 = vmatpush1.bf16.msra.mxu0 %v14130_v24  ;;  %v14274_v24 = vcombine.low %v987_v8, %v995_v9  ;;  %v1387_v8 = vld [vmem:[#allocation5 + $0x1390] sm:$0xff] }
 0x1fb   : > { %5661 = vmatpush1.bf16.msra.mxu1 %v14386_v25  ;;  %5621 = vmatprep.subr.bf16.mxu0 %v14115_v26  ;;  %v14530_v25 = vcombine.low %v1243_v10, %v1251_v13  ;;  %v14259_v26 = vcombine.high %v971_v18, %v979_v19  ;;  %v1395_v9 = vld [vmem:[#allocation5 + $0x13d0] sm:$0xff]  ;;  %v876_v10 = vld [vmem:[#allocation5 + $0x398] sm:$0xff] }
 0x1fc   : > { %5662 = vmatprep.subr.bf16.mxu1 %v14371_v31  ;;  %v14515_v31 = vcombine.high %v1227_v20, %v1235_v23  ;;  %v884_v13 = vld [vmem:[#allocation5 + $0x3d8] sm:$0xff] }
 0x1fe   : > { %5622 = vmatpush1.bf16.msra.mxu0 %v14114_v34  ;;  %v14258_v34 = vcombine.low %v971_v18, %v979_v19  ;;  %v1371_v18 = vld [vmem:[#allocation5 + $0x1310] sm:$0xff] }
 0x1ff   : > { %5663 = vmatpush1.bf16.msra.mxu1 %v14370_v35  ;;  %5623 = vmatprep.subr.bf16.mxu0 %v14099_v36  ;;  %v14514_v35 = vcombine.low %v1227_v20, %v1235_v23  ;;  %v14243_v36 = vcombine.high %v955_v27, %v963_v28  ;;  %v1379_v19 = vld [vmem:[#allocation5 + $0x1350] sm:$0xff]  ;;  %v860_v20 = vld [vmem:[#allocation5 + $0x318] sm:$0xff] }
 0x200   : > { %5664 = vmatprep.subr.bf16.mxu1 %v14355_v40  ;;  %v14499_v40 = vcombine.high %v1211_v29, %v1219_v32  ;;  %v868_v23 = vld [vmem:[#allocation5 + $0x358] sm:$0xff] }
 0x202   : > { %5624 = vmatpush1.bf16.msra.mxu0 %v14098_v5  ;;  %v14242_v5 = vcombine.low %v955_v27, %v963_v28  ;;  %v1355_v27 = vld [vmem:[#allocation5 + $0x1290] sm:$0xff] }
 0x203   : > { %5665 = vmatpush1.bf16.msra.mxu1 %v14354_v42  ;;  %5625 = vmatprep.subr.bf16.mxu0 %v14083_v43  ;;  %v14498_v42 = vcombine.low %v1211_v29, %v1219_v32  ;;  %v14227_v43 = vcombine.high %v939_v37, %v947_v38  ;;  %v1363_v28 = vld [vmem:[#allocation5 + $0x12d0] sm:$0xff]  ;;  %v844_v29 = vld [vmem:[#allocation5 + $0x298] sm:$0xff] }
 0x204   : > { %5666 = vmatprep.subr.bf16.mxu1 %v14339_v48  ;;  %v14483_v48 = vcombine.high %v1195_v39, %v1203_v41  ;;  %v852_v32 = vld [vmem:[#allocation5 + $0x2d8] sm:$0xff] }
 0x206   : > { %5626 = vmatpush1.bf16.msra.mxu0 %v14082_v51  ;;  %v14226_v51 = vcombine.low %v939_v37, %v947_v38 }
 0x207   : > { %5667 = vmatpush1.bf16.msra.mxu1 %v14338_v52  ;;  %5627 = vmatprep.subr.bf16.mxu0 %v14067_v54  ;;  %v14482_v52 = vcombine.low %v1195_v39, %v1203_v41  ;;  %v14211_v54 = vcombine.high %v923_v45, %v931_v46  ;;  %v14148_v39 = vcombine.low %v860_v20, %v868_v23  ;;  %v1339_v41 = vld [vmem:[#allocation5 + $0x1210] sm:$0xff] }
 0x208   : > { %5668 = vmatprep.subr.bf16.mxu1 %v14323_v58  ;;  %v14467_v58 = vcombine.high %v1179_v47, %v1187_v49 }
 0x20a   : > { %5628 = vmatpush1.bf16.msra.mxu0 %v14066_v60  ;;  %v14210_v60 = vcombine.low %v923_v45, %v931_v46  ;;  %v14133_v45 = vcombine.high %v844_v29, %v852_v32  ;;  %v836_v46 = vld [vmem:[#allocation5 + $0x258] sm:$0xff] }
 0x20b   : > { %5669 = vmatpush1.bf16.msra.mxu1 %v14322_v22  ;;  %5629 = vmatprep.subr.bf16.mxu0 %v14051_v61  ;;  %v14466_v22 = vcombine.low %v1179_v47, %v1187_v49  ;;  %v14195_v61 = vcombine.high %v907_v55, %v915_v56 }
 0x20c   : > { %5670 = vmatprep.subr.bf16.mxu1 %v14307_v2  ;;  %v14451_v2 = vcombine.high %v1163_v57, %v1171_v59 }
 0x20e   : > { %5630 = vmatpush1.bf16.msra.mxu0 %v14050_v4  ;;  %v14194_v4 = vcombine.low %v907_v55, %v915_v56  ;;  %v1323_v56 = vld [vmem:[#allocation5 + $0x1190] sm:$0xff] }
 0x20f   : > { %5671 = vmatpush1.bf16.msra.mxu1 %v14306_v6  ;;  %5631 = vmatprep.subr.bf16.mxu0 %v14291_v7  ;;  %v14450_v6 = vcombine.low %v1163_v57, %v1171_v59  ;;  %v14179_v7 = vcombine.high %v891_v62, %v899_v0  ;;  %v1331_v57 = vld [vmem:[#allocation5 + $0x11d0] sm:$0xff] }
 0x210   : > { %5672 = vmatprep.subr.bf16.mxu1 %v14547_v12  ;;  %v14435_v12 = vcombine.high %v1147_v1, %v1155_v3 }
 0x212   : > { %5632 = vmatpush2.bf16.msra.mxu0 %v14290_v14  ;;  %v14178_v14 = vcombine.low %v891_v62, %v899_v0  ;;  %v14611_v0 = vcombine.high %v1323_v56, %v1331_v57 }
 0x213   : > { %5673 = vmatpush2.bf16.msra.mxu1 %v14546_v15  ;;  %5633 = vmatprep.subr.bf16.mxu0 %v14275_v17  ;;  %v14434_v15 = vcombine.low %v1147_v1, %v1155_v3  ;;  %v14675_v17 = vcombine.high %v1387_v8, %v1395_v9  ;;  %v1307_v1 = vld [vmem:[#allocation5 + $0x1110] sm:$0xff]  ;;  %v796_v3 = vld [vmem:[#allocation5 + $0x118] sm:$0xff] }
 0x214   : > { %5674 = vmatprep.subr.bf16.mxu1 %v14531_v21  ;;  %v14165_v21 = vcombine.high %v876_v10, %v884_v13 }
 0x216   : > { %5634 = vmatpush2.bf16.msra.mxu0 %v14274_v24  ;;  %v14674_v24 = vcombine.low %v1387_v8, %v1395_v9 }
 0x217   : > { %5675 = vmatpush2.bf16.msra.mxu1 %v14530_v25  ;;  %5635 = vmatprep.subr.bf16.mxu0 %v14259_v26  ;;  %v14164_v25 = vcombine.low %v876_v10, %v884_v13  ;;  %v14659_v26 = vcombine.high %v1371_v18, %v1379_v19  ;;  %v1291_v10 = vld [vmem:[#allocation5 + $0x1090] sm:$0xff]  ;;  %v780_v13 = vld [vmem:[#allocation5 + $0x98] sm:$0xff] }
 0x218   : > { %5676 = vmatprep.subr.bf16.mxu1 %v14515_v31  ;;  %v14149_v31 = vcombine.high %v860_v20, %v868_v23  ;;  %v1275_v20 = vld [vmem:[#allocation5 + $0x1010] sm:$0xff]  ;;  %v764_v23 = vld [vmem:[#allocation5 + $0x18] sm:$0xff] }
 0x21a   : > { %5636 = vmatpush2.bf16.msra.mxu0 %v14258_v34 }
 0x21b   : > { %5677 = vmatpush2.bf16.msra.mxu1 %v14514_v35  ;;  %5637 = vmatprep.subr.bf16.mxu0 %v14243_v36  ;;  %v14658_v36 = vcombine.low %v1371_v18, %v1379_v19 }
 0x21c   : > { %5678 = vmatprep.subr.bf16.mxu1 %v14499_v40  ;;  %v14643_v40 = vcombine.high %v1355_v27, %v1363_v28 }
 0x21e   : > { %5638 = vmatpush2.bf16.msra.mxu0 %v14242_v5  ;;  %v1347_v5 = vld [vmem:[#allocation5 + $0x1250] sm:$0xff] }
 0x21f   : > { %5679 = vmatpush2.bf16.msra.mxu1 %v14498_v42  ;;  %5639 = vmatprep.subr.bf16.mxu0 %v14227_v43  ;;  %v828_v42 = vld [vmem:[#allocation5 + $0x218] sm:$0xff]  ;;  %v14627_v55 = vcombine.high %v1339_v41, %v1347_v5 }
 0x220   : > { %5680 = vmatprep.subr.bf16.mxu1 %v14483_v48  ;;  %v14116_v62 = vcombine.low %v828_v42, %v836_v46 }
 0x222   : > { %5640 = vmatpush2.bf16.msra.mxu0 %v14226_v51  ;;  %v14642_v51 = vcombine.low %v1355_v27, %v1363_v28 }
 0x223   : > { %5681 = vmatpush2.bf16.msra.mxu1 %v14482_v52  ;;  %5641 = vmatprep.subr.bf16.mxu0 %v14211_v54  ;;  %v14132_v54 = vcombine.low %v844_v29, %v852_v32  ;;  %v1515_v29 = vld [vmem:[#allocation5 + $0x1790] sm:$0xff]  ;;  %v1004_v32 = vld [vmem:[#allocation5 + $0x798] sm:$0xff] }
 0x224   : > { %5682 = vmatprep.subr.bf16.mxu1 %v14467_v58  ;;  %v812_v58 = vld [vmem:[#allocation5 + $0x198] sm:$0xff] }
 0x226   : > { %5642 = vmatpush2.bf16.msra.mxu0 %v14210_v60  ;;  %v14117_v60 = vcombine.high %v828_v42, %v836_v46 }
 0x227   : > { %5683 = vmatpush2.bf16.msra.mxu1 %v14466_v22  ;;  %5643 = vmatprep.subr.bf16.mxu0 %v14195_v61  ;;  %v820_v22 = vld [vmem:[#allocation5 + $0x1d8] sm:$0xff]  ;;  %v14626_v61 = vcombine.low %v1339_v41, %v1347_v5  ;;  %v1507_v41 = vld [vmem:[#allocation5 + $0x1750] sm:$0xff] }
 0x228   : > { %5684 = vmatprep.subr.bf16.mxu1 %v14451_v2  ;;  %v1315_v2 = vld [vmem:[#allocation5 + $0x1150] sm:$0xff]  ;;  %v14100_v8 = vcombine.low %v812_v58, %v820_v22  ;;  %v988_v5 = vld [vmem:[#allocation5 + $0x718] sm:$0xff] }
 0x229   : > { %v14595_v9 = vcombine.high %v1307_v1, %v1315_v2 }
 0x22a   : > { %5644 = vmatpush2.bf16.msra.mxu0 %v14194_v4  ;;  %v14101_v4 = vcombine.high %v812_v58, %v820_v22  ;;  %v956_v22 = vld [vmem:[#allocation5 + $0x618] sm:$0xff] }
 0x22b   : > { %5685 = vmatpush2.bf16.msra.mxu1 %v14450_v6  ;;  %5645 = vmatprep.subr.bf16.mxu0 %v14179_v7  ;;  %v804_v6 = vld [vmem:[#allocation5 + $0x158] sm:$0xff]  ;;  %v14610_v7 = vcombine.low %v1323_v56, %v1331_v57 }
 0x22c   : > { %5686 = vmatprep.subr.bf16.mxu1 %v14435_v12  ;;  %v1299_v12 = vld [vmem:[#allocation5 + $0x10d0] sm:$0xff]  ;;  %v14084_v18 = vcombine.low %v796_v3, %v804_v6 }
 0x22d   : > { %v14579_v19 = vcombine.high %v1291_v10, %v1299_v12 }
 0x22e   : > { %5646 = vmatpush2.bf16.msra.mxu0 %v14178_v14  ;;  %v14085_v14 = vcombine.high %v796_v3, %v804_v6  ;;  %v1451_v3 = vld [vmem:[#allocation5 + $0x1590] sm:$0xff]  ;;  %v940_v6 = vld [vmem:[#allocation5 + $0x598] sm:$0xff] }
 0x22f   : > { %5687 = vmatpush2.bf16.msra.mxu1 %v14434_v15  ;;  %5697 = vmatprep.subr.bf16.mxu0 %v14675_v17  ;;  %v788_v15 = vld [vmem:[#allocation5 + $0xd8] sm:$0xff]  ;;  %v14594_v17 = vcombine.low %v1307_v1, %v1315_v2 }
 0x230   : > { %5738 = vmatprep.subr.bf16.mxu1 %v14165_v21  ;;  %v1283_v21 = vld [vmem:[#allocation5 + $0x1050] sm:$0xff]  ;;  %v14068_v27 = vcombine.low %v780_v13, %v788_v15 }
 0x231   : > { %v5403_v34 = vpop.f32.mrf.mxu0  ;;  %5648 = vmatmul.mubr.bf16.vlgmr.msra.gmra.mxu0 %v18013_v30  ;;  %v14563_v28 = vcombine.high %v1275_v20, %v1283_v21 }
 0x232   : > { %v5444_v35 = vpop.f32.mrf.mxu1  ;;  %5689 = vmatmul.mubr.bf16.vlgmr.msra.gmra.mxu1 %v18017_v33  ;;  %5698 = vmatpush1.bf16.msra.mxu0 %v14674_v24  ;;  %v14069_v24 = vcombine.high %v780_v13, %v788_v15  ;;  %v1435_v13 = vld [vmem:[#allocation5 + $0x1510] sm:$0xff]  ;;  %v924_v15 = vld [vmem:[#allocation5 + $0x518] sm:$0xff] }
 0x233   : > { %v18039_v37 = vadd.f32 %v5444_v35, %v5403_v34  ;;  %5739 = vmatpush1.bf16.msra.mxu1 %v14164_v25  ;;  %v5405_v38 = vpop.f32.mrf.mxu0  ;;  %5699 = vmatprep.subr.bf16.mxu0 %v14659_v26  ;;  %v772_v25 = vld [vmem:[#allocation5 + $0x58] sm:$0xff]  ;;  %v14578_v26 = vcombine.low %v1291_v10, %v1299_v12 }
 0x234   : > { %v5446_v43 = vpop.f32.mrf.mxu1  ;;  %5740 = vmatprep.subr.bf16.mxu1 %v14149_v31  ;;  %5729 = vmatprep.mubr.bf16.mxu0 %v18019_v63  ;;  %v1523_v31 = vld [vmem:[#allocation5 + $0x17d0] sm:$0xff]  ;;  %v14053_v34 = vcombine.high %v764_v23, %v772_v25  ;;  %v1012_v35 = vld [vmem:[#allocation5 + $0x7d8] sm:$0xff] }
 0x235   : > { %v18042_v47 = vadd.f32 %v5446_v43, %v5405_v38  ;;  %v5407_v48 = vpop.f32.mrf.mxu0  ;;  %5770 = vmatprep.mubr.bf16.mxu1 %v17998_v11  ;;  %v14052_v38 = vcombine.low %v764_v23, %v772_v25  ;;  %v14293_v42 = vcombine.high %v1004_v32, %v1012_v35  ;;  %v996_v43 = vld [vmem:[#allocation5 + $0x758] sm:$0xff]  ;;  %v14292_v46 = vcombine.low %v1004_v32, %v1012_v35  ;;  %v1419_v23 = vld [vmem:[#allocation5 + $0x1490] sm:$0xff] }
 0x236   : > { %v5448_v49 = vpop.f32.mrf.mxu1  ;;  %5700 = vmatpush1.bf16.msra.mxu0 %v14658_v36  ;;  %v14562_v36 = vcombine.low %v1275_v20, %v1283_v21  ;;  %v14276_v57 = vcombine.low %v988_v5, %v996_v43  ;;  %v908_v25 = vld [vmem:[#allocation5 + $0x498] sm:$0xff]  ;;  %v1403_v32 = vld [vmem:[#allocation5 + $0x1410] sm:$0xff] }
 0x237   : > { %5741 = vmatpush1.bf16.msra.mxu1 %v14148_v39  ;;  %v5408_v52 = vpop.f32.mrf.mxu0  ;;  %5701 = vmatprep.subr.bf16.mxu0 %v14643_v40  ;;  %v14803_v39 = vcombine.high %v1515_v29, %v1523_v31  ;;  %v1499_v40 = vld [vmem:[#allocation5 + $0x1710] sm:$0xff]  ;;  %v892_v35 = vld [vmem:[#allocation5 + $0x418] sm:$0xff] }
 0x238   : > { %v5449_v59 = vpop.f32.mrf.mxu1  ;;  %5742 = vmatprep.subr.bf16.mxu1 %v14133_v45  ;;  %v14802_v45 = vcombine.low %v1515_v29, %v1523_v31  ;;  %v14787_v48 = vcombine.high %v1499_v40, %v1507_v41  ;;  %v1483_v49 = vld [vmem:[#allocation5 + $0x1690] sm:$0xff]  ;;  %v972_v52 = vld [vmem:[#allocation5 + $0x698] sm:$0xff]  ;;  %v14786_v56 = vcombine.low %v1499_v40, %v1507_v41 }
 0x239   : > { %v1467_v59 = vld [vmem:[#allocation5 + $0x1610] sm:$0xff] }
 0x23a   : > { %5702 = vmatpush1.bf16.msra.mxu0 %v14642_v51  ;;  %v1491_v51 = vld [vmem:[#allocation5 + $0x16d0] sm:$0xff] }
 0x23b   : > { %5743 = vmatpush1.bf16.msra.mxu1 %v14132_v54  ;;  %5703 = vmatprep.subr.bf16.mxu0 %v14627_v55  ;;  %v14277_v54 = vcombine.high %v988_v5, %v996_v43  ;;  %v980_v55 = vld [vmem:[#allocation5 + $0x6d8] sm:$0xff]  ;;  %v14771_v58 = vcombine.high %v1483_v49, %v1491_v51 }
 0x23c   : > { %5744 = vmatprep.subr.bf16.mxu1 %v14117_v60  ;;  %v1475_v60 = vld [vmem:[#allocation5 + $0x1650] sm:$0xff]  ;;  %v14260_v1 = vcombine.low %v972_v52, %v980_v55  ;;  %v1132_v5 = vld [vmem:[#allocation5 + $0xb98] sm:$0xff] }
 0x23d   : > { %v14755_v2 = vcombine.high %v1467_v59, %v1475_v60  ;;  %v1388_v43 = vld [vmem:[#allocation5 + $0x1398] sm:$0xff] }
 0x23e   : > { %5704 = vmatpush1.bf16.msra.mxu0 %v14626_v61  ;;  %v14261_v61 = vcombine.high %v972_v52, %v980_v55  ;;  %v1116_v52 = vld [vmem:[#allocation5 + $0xb18] sm:$0xff] }
 0x23f   : > { %5745 = vmatpush1.bf16.msra.mxu1 %v14116_v62  ;;  %5705 = vmatprep.subr.bf16.mxu0 %v14611_v0  ;;  %v964_v62 = vld [vmem:[#allocation5 + $0x658] sm:$0xff]  ;;  %v14770_v0 = vcombine.low %v1483_v49, %v1491_v51 }
 0x240   : > { %5746 = vmatprep.subr.bf16.mxu1 %v14101_v4  ;;  %v1459_v4 = vld [vmem:[#allocation5 + $0x15d0] sm:$0xff]  ;;  %v14244_v10 = vcombine.low %v956_v22, %v964_v62  ;;  %v1372_v55 = vld [vmem:[#allocation5 + $0x1318] sm:$0xff] }
 0x241   : > { %v14739_v12 = vcombine.high %v1451_v3, %v1459_v4 }
 0x242   : > { %5706 = vmatpush1.bf16.msra.mxu0 %v14610_v7  ;;  %v14245_v7 = vcombine.high %v956_v22, %v964_v62  ;;  %v1100_v22 = vld [vmem:[#allocation5 + $0xa98] sm:$0xff] }
 0x243   : > { %5747 = vmatpush1.bf16.msra.mxu1 %v14100_v8  ;;  %5707 = vmatprep.subr.bf16.mxu0 %v14595_v9  ;;  %v948_v8 = vld [vmem:[#allocation5 + $0x5d8] sm:$0xff]  ;;  %v14754_v9 = vcombine.low %v1467_v59, %v1475_v60 }
 0x244   : > { %5748 = vmatprep.subr.bf16.mxu1 %v14085_v14  ;;  %v1443_v14 = vld [vmem:[#allocation5 + $0x1550] sm:$0xff]  ;;  %v14228_v20 = vcombine.low %v940_v6, %v948_v8  ;;  %v1356_v62 = vld [vmem:[#allocation5 + $0x1298] sm:$0xff] }
 0x245   : > { %v14723_v21 = vcombine.high %v1435_v13, %v1443_v14 }
 0x246   : > { %5708 = vmatpush1.bf16.msra.mxu0 %v14594_v17  ;;  %v14229_v17 = vcombine.high %v940_v6, %v948_v8 }
 0x247   : > { %5749 = vmatpush1.bf16.msra.mxu1 %v14084_v18  ;;  %5709 = vmatprep.subr.bf16.mxu0 %v14579_v19  ;;  %v932_v18 = vld [vmem:[#allocation5 + $0x558] sm:$0xff]  ;;  %v14738_v19 = vcombine.low %v1451_v3, %v1459_v4 }
 0x248   : > { %5750 = vmatprep.subr.bf16.mxu1 %v14069_v24  ;;  %v1427_v24 = vld [vmem:[#allocation5 + $0x14d0] sm:$0xff]  ;;  %v14212_v29 = vcombine.low %v924_v15, %v932_v18 }
 0x249   : > { %v14707_v31 = vcombine.high %v1419_v23, %v1427_v24 }
 0x24a   : > { %5710 = vmatpush1.bf16.msra.mxu0 %v14578_v26  ;;  %v14213_v26 = vcombine.high %v924_v15, %v932_v18 }
 0x24b   : > { %5751 = vmatpush1.bf16.msra.mxu1 %v14068_v27  ;;  %5711 = vmatprep.subr.bf16.mxu0 %v14563_v28  ;;  %v916_v27 = vld [vmem:[#allocation5 + $0x4d8] sm:$0xff]  ;;  %v14722_v28 = vcombine.low %v1435_v13, %v1443_v14 }
 0x24c   : > { %5752 = vmatprep.subr.bf16.mxu1 %v14053_v34  ;;  %v1411_v34 = vld [vmem:[#allocation5 + $0x1450] sm:$0xff]  ;;  %v14196_v40 = vcombine.low %v908_v25, %v916_v27  ;;  %v1340_v13 = vld [vmem:[#allocation5 + $0x1218] sm:$0xff] }
 0x24d   : > { %v14691_v41 = vcombine.high %v1403_v32, %v1411_v34 }
 0x24e   : > { %5712 = vmatpush1.bf16.msra.mxu0 %v14562_v36  ;;  %v14197_v36 = vcombine.high %v908_v25, %v916_v27  ;;  %v1076_v25 = vld [vmem:[#allocation5 + $0x9d8] sm:$0xff] }
 0x24f   : > { %5753 = vmatpush1.bf16.msra.mxu1 %v14052_v38  ;;  %5713 = vmatprep.subr.bf16.mxu0 %v14803_v39  ;;  %v900_v38 = vld [vmem:[#allocation5 + $0x458] sm:$0xff]  ;;  %v14706_v39 = vcombine.low %v1419_v23, %v1427_v24 }
 0x250   : > { %5754 = vmatprep.subr.bf16.mxu1 %v14293_v42  ;;  %v1140_v42 = vld [vmem:[#allocation5 + $0xbd8] sm:$0xff]  ;;  %v14180_v49 = vcombine.low %v892_v35, %v900_v38 }
 0x251   : > { %v14421_v51 = vcombine.high %v1132_v5, %v1140_v42 }
 0x252   : > { %5714 = vmatpush2.bf16.msra.mxu0 %v14802_v45  ;;  %v14181_v45 = vcombine.high %v892_v35, %v900_v38  ;;  %v1052_v35 = vld [vmem:[#allocation5 + $0x918] sm:$0xff] }
 0x253   : > { %5755 = vmatpush2.bf16.msra.mxu1 %v14292_v46  ;;  %5715 = vmatprep.subr.bf16.mxu0 %v14787_v48  ;;  %v1396_v46 = vld [vmem:[#allocation5 + $0x13d8] sm:$0xff]  ;;  %v14690_v48 = vcombine.low %v1403_v32, %v1411_v34 }
 0x254   : > { %5756 = vmatprep.subr.bf16.mxu1 %v14277_v54  ;;  %v1124_v54 = vld [vmem:[#allocation5 + $0xb58] sm:$0xff]  ;;  %v14676_v59 = vcombine.low %v1388_v43, %v1396_v46 }
 0x255   : > { %v14405_v60 = vcombine.high %v1116_v52, %v1124_v54  ;;  %v14404_v6 = vcombine.low %v1116_v52, %v1124_v54  ;;  %v1308_v38 = vld [vmem:[#allocation5 + $0x1118] sm:$0xff] }
 0x256   : > { %5716 = vmatpush2.bf16.msra.mxu0 %v14786_v56  ;;  %v14677_v56 = vcombine.high %v1388_v43, %v1396_v46  ;;  %v1036_v43 = vld [vmem:[#allocation5 + $0x898] sm:$0xff] }
 0x257   : > { %5757 = vmatpush2.bf16.msra.mxu1 %v14276_v57  ;;  %5717 = vmatprep.subr.bf16.mxu0 %v14771_v58  ;;  %v1380_v57 = vld [vmem:[#allocation5 + $0x1358] sm:$0xff]  ;;  %v14420_v58 = vcombine.low %v1132_v5, %v1140_v42 }
 0x258   : > { %5758 = vmatprep.subr.bf16.mxu1 %v14261_v61  ;;  %v1108_v61 = vld [vmem:[#allocation5 + $0xad8] sm:$0xff]  ;;  %v14660_v8 = vcombine.low %v1372_v55, %v1380_v57 }
 0x259   : > { %v1292_v46 = vld [vmem:[#allocation5 + $0x1098] sm:$0xff] }
 0x25a   : > { %5718 = vmatpush2.bf16.msra.mxu0 %v14770_v0  ;;  %v14661_v0 = vcombine.high %v1372_v55, %v1380_v57  ;;  %v1020_v55 = vld [vmem:[#allocation5 + $0x818] sm:$0xff] }
 0x25b   : > { %5759 = vmatpush2.bf16.msra.mxu1 %v14260_v1  ;;  %5719 = vmatprep.subr.bf16.mxu0 %v14755_v2  ;;  %v1364_v1 = vld [vmem:[#allocation5 + $0x12d8] sm:$0xff] }
 0x25c   : > { %5760 = vmatprep.subr.bf16.mxu1 %v14245_v7  ;;  %v14644_v23 = vcombine.low %v1356_v62, %v1364_v1  ;;  %v1276_v57 = vld [vmem:[#allocation5 + $0x1018] sm:$0xff] }
 0x25e   : > { %5720 = vmatpush2.bf16.msra.mxu0 %v14754_v9  ;;  %v14389_v9 = vcombine.high %v1100_v22, %v1108_v61 }
 0x25f   : > { %5761 = vmatpush2.bf16.msra.mxu1 %v14244_v10  ;;  %5721 = vmatprep.subr.bf16.mxu0 %v14739_v12  ;;  %v1084_v10 = vld [vmem:[#allocation5 + $0xa18] sm:$0xff] }
 0x260   : > { %5762 = vmatprep.subr.bf16.mxu1 %v14229_v17  ;;  %v1092_v12 = vld [vmem:[#allocation5 + $0xa58] sm:$0xff] }
 0x261   : > { %v1348_v17 = vld [vmem:[#allocation5 + $0x1258] sm:$0xff]  ;;  %v14373_v24 = vcombine.high %v1084_v10, %v1092_v12 }
 0x262   : > { %5722 = vmatpush2.bf16.msra.mxu0 %v14738_v19  ;;  %v14628_v32 = vcombine.low %v1340_v13, %v1348_v17 }
 0x263   : > { %5763 = vmatpush2.bf16.msra.mxu1 %v14228_v20  ;;  %5723 = vmatprep.subr.bf16.mxu0 %v14723_v21  ;;  %v14388_v20 = vcombine.low %v1100_v22, %v1108_v61 }
 0x264   : > { %5764 = vmatprep.subr.bf16.mxu1 %v14213_v26  ;;  %v1324_v26 = vld [vmem:[#allocation5 + $0x1198] sm:$0xff] }
 0x266   : > { %5724 = vmatpush2.bf16.msra.mxu0 %v14722_v28  ;;  %v14629_v28 = vcombine.high %v1340_v13, %v1348_v17  ;;  %v1500_v13 = vld [vmem:[#allocation5 + $0x1718] sm:$0xff] }
 0x267   : > { %5765 = vmatpush2.bf16.msra.mxu1 %v14212_v29  ;;  %5725 = vmatprep.subr.bf16.mxu0 %v14707_v31  ;;  %v1332_v29 = vld [vmem:[#allocation5 + $0x11d8] sm:$0xff]  ;;  %v14372_v31 = vcombine.low %v1084_v10, %v1092_v12 }
 0x268   : > { %5766 = vmatprep.subr.bf16.mxu1 %v14197_v36  ;;  %v1060_v36 = vld [vmem:[#allocation5 + $0x958] sm:$0xff]  ;;  %v14612_v5 = vcombine.low %v1324_v26, %v1332_v29 }
 0x269   : > { %v14341_v42 = vcombine.high %v1052_v35, %v1060_v36  ;;  %v1244_v10 = vld [vmem:[#allocation5 + $0xf18] sm:$0xff] }
 0x26a   : > { %5726 = vmatpush2.bf16.msra.mxu0 %v14706_v39  ;;  %v14613_v39 = vcombine.high %v1324_v26, %v1332_v29  ;;  %v1252_v12 = vld [vmem:[#allocation5 + $0xf58] sm:$0xff] }
 0x26b   : > { %5767 = vmatpush2.bf16.msra.mxu1 %v14196_v40  ;;  %5727 = vmatprep.subr.bf16.mxu0 %v14691_v41  ;;  %v1316_v40 = vld [vmem:[#allocation5 + $0x1158] sm:$0xff]  ;;  %v14532_v26 = vcombine.low %v1244_v10, %v1252_v12 }
 0x26c   : > { %5768 = vmatprep.subr.bf16.mxu1 %v14181_v45  ;;  %v1044_v45 = vld [vmem:[#allocation5 + $0x8d8] sm:$0xff]  ;;  %v14596_v52 = vcombine.low %v1308_v38, %v1316_v40 }
 0x26d   : > { %v14325_v54 = vcombine.high %v1036_v43, %v1044_v45  ;;  %v1508_v17 = vld [vmem:[#allocation5 + $0x1758] sm:$0xff] }
 0x26e   : > { %5728 = vmatpush2.bf16.msra.mxu0 %v14690_v48  ;;  %v14597_v48 = vcombine.high %v1308_v38, %v1316_v40  ;;  %v1212_v29 = vld [vmem:[#allocation5 + $0xe18] sm:$0xff] }
 0x26f   : > { %5769 = vmatpush2.bf16.msra.mxu1 %v14180_v49  ;;  %5779 = vmatprep.subr.bf16.mxu0 %v14421_v51  ;;  %v1300_v49 = vld [vmem:[#allocation5 + $0x10d8] sm:$0xff]  ;;  %v14340_v51 = vcombine.low %v1052_v35, %v1060_v36 }
 0x270   : > { %5820 = vmatprep.subr.bf16.mxu1 %v14677_v56  ;;  %v1028_v56 = vld [vmem:[#allocation5 + $0x858] sm:$0xff]  ;;  %v14580_v22 = vcombine.low %v1292_v46, %v1300_v49 }
 0x271   : > { %v5485_v2 = vpop.f32.mrf.mxu0  ;;  %5730 = vmatmul.mubr.bf16.vlgmr.msra.gmra.mxu0 %v18027_v50  ;;  %v14309_v61 = vcombine.high %v1020_v55, %v1028_v56  ;;  %v1476_v35 = vld [vmem:[#allocation5 + $0x1658] sm:$0xff] }
 0x272   : > { %v18047_v3 = vadd.f32 %v5485_v2, %v18039_v37  ;;  %v18049_v4 = vpop.f32.mrf.mxu1  ;;  %5771 = vmatmul.mubr.bf16.vlgmr.msra.gmra.mxu1 %v18013_v30  ;;  %5780 = vmatpush1.bf16.msra.mxu0 %v14420_v58  ;;  %v14645_v37 = vcombine.high %v1356_v62, %v1364_v1  ;;  %v14581_v58 = vcombine.high %v1292_v46, %v1300_v49  ;;  %v1260_v62 = vld [vmem:[#allocation5 + $0xf98] sm:$0xff] }
 0x273   : > { %5821 = vmatpush1.bf16.msra.mxu1 %v14676_v59  ;;  %v5487_v7 = vpop.f32.mrf.mxu0  ;;  %5781 = vmatprep.subr.bf16.mxu0 %v14405_v60  ;;  %v1284_v59 = vld [vmem:[#allocation5 + $0x1058] sm:$0xff]  ;;  %v14324_v60 = vcombine.low %v1036_v43, %v1044_v45 }
 0x274   : > { %v18053_v14 = vadd.f32 %v5487_v7, %v18042_v47  ;;  %v18055_v15 = vpop.f32.mrf.mxu1  ;;  %5822 = vmatprep.subr.bf16.mxu1 %v14661_v0  ;;  %5811 = vmatprep.mubr.bf16.mxu0 %v18003_v16  ;;  %v1068_v47 = vld [vmem:[#allocation5 + $0x998] sm:$0xff]  ;;  %v14565_v2 = vcombine.high %v1276_v57, %v1284_v59  ;;  %v14308_v7 = vcombine.low %v1020_v55, %v1028_v56 }
 0x275   : > { %v5489_v18 = vpop.f32.mrf.mxu0  ;;  %5852 = vmatprep.mubr.bf16.mxu1 %v18019_v63  ;;  %v14357_v34 = vcombine.high %v1068_v47, %v1076_v25  ;;  %v14356_v41 = vcombine.low %v1068_v47, %v1076_v25  ;;  %v1268_v0 = vld [vmem:[#allocation5 + $0xfd8] sm:$0xff]  ;;  %v14789_v47 = vcombine.high %v1500_v13, %v1508_v17 }
 0x276   : > { %v5530_v19 = vpop.f32.mrf.mxu1  ;;  %5782 = vmatpush1.bf16.msra.mxu0 %v14404_v6  ;;  %v1516_v1 = vld [vmem:[#allocation5 + $0x1798] sm:$0xff]  ;;  %v14548_v18 = vcombine.low %v1260_v62, %v1268_v0 }
 0x277   : > { %5823 = vmatpush1.bf16.msra.mxu1 %v14660_v8  ;;  %v5490_v21 = vpop.f32.mrf.mxu0  ;;  %5783 = vmatprep.subr.bf16.mxu0 %v14389_v9  ;;  %v1524_v6 = vld [vmem:[#allocation5 + $0x17d8] sm:$0xff]  ;;  %v14564_v8 = vcombine.low %v1276_v57, %v1284_v59  ;;  %v14549_v9 = vcombine.high %v1260_v62, %v1268_v0 }
 0x278   : > { %v5531_v27 = vpop.f32.mrf.mxu1  ;;  %5824 = vmatprep.subr.bf16.mxu1 %v14645_v37  ;;  %v14805_v37 = vcombine.high %v1516_v1, %v1524_v6  ;;  %v14804_v19 = vcombine.low %v1516_v1, %v1524_v6  ;;  %v1228_v21 = vld [vmem:[#allocation5 + $0xe98] sm:$0xff] }
 0x279   : > { %v1492_v25 = vld [vmem:[#allocation5 + $0x16d8] sm:$0xff]  ;;  %v14788_v27 = vcombine.low %v1500_v13, %v1508_v17  ;;  %v877_v17 = vld [vmem:[#allocation5 + $0x3a0] sm:$0xff] }
 0x27a   : > { %5784 = vmatpush1.bf16.msra.mxu0 %v14388_v20  ;;  %v14533_v20 = vcombine.high %v1244_v10, %v1252_v12  ;;  %v1196_v40 = vld [vmem:[#allocation5 + $0xd98] sm:$0xff] }
 0x27b   : > { %5825 = vmatpush1.bf16.msra.mxu1 %v14644_v23  ;;  %5785 = vmatprep.subr.bf16.mxu0 %v14373_v24  ;;  %v1236_v23 = vld [vmem:[#allocation5 + $0xed8] sm:$0xff] }
 0x27c   : > { %5826 = vmatprep.subr.bf16.mxu1 %v14629_v28  ;;  %v1484_v24 = vld [vmem:[#allocation5 + $0x1698] sm:$0xff]  ;;  %v14517_v28 = vcombine.high %v1228_v21, %v1236_v23  ;;  %v14516_v36 = vcombine.low %v1228_v21, %v1236_v23  ;;  %v1141_v21 = vld [vmem:[#allocation5 + $0xbe0] sm:$0xff] }
 0x27d   : > { %v14772_v38 = vcombine.low %v1484_v24, %v1492_v25  ;;  %v1460_v43 = vld [vmem:[#allocation5 + $0x15d8] sm:$0xff] }
 0x27e   : > { %5786 = vmatpush1.bf16.msra.mxu0 %v14372_v31  ;;  %v1220_v31 = vld [vmem:[#allocation5 + $0xe58] sm:$0xff] }
 0x27f   : > { %5827 = vmatpush1.bf16.msra.mxu1 %v14628_v32  ;;  %5787 = vmatprep.subr.bf16.mxu0 %v14357_v34  ;;  %v1468_v32 = vld [vmem:[#allocation5 + $0x1618] sm:$0xff]  ;;  %v14773_v34 = vcombine.high %v1484_v24, %v1492_v25  ;;  %v14500_v45 = vcombine.low %v1212_v29, %v1220_v31  ;;  %v861_v25 = vld [vmem:[#allocation5 + $0x320] sm:$0xff] }
 0x280   : > { %5828 = vmatprep.subr.bf16.mxu1 %v14613_v39  ;;  %v14501_v39 = vcombine.high %v1212_v29, %v1220_v31  ;;  %v14756_v46 = vcombine.low %v1468_v32, %v1476_v35  ;;  %v1180_v49 = vld [vmem:[#allocation5 + $0xd18] sm:$0xff]  ;;  %v1125_v29 = vld [vmem:[#allocation5 + $0xb60] sm:$0xff] }
 0x281   : > { %v1444_v55 = vld [vmem:[#allocation5 + $0x1558] sm:$0xff] }
 0x282   : > { %5788 = vmatpush1.bf16.msra.mxu0 %v14356_v41  ;;  %v1204_v41 = vld [vmem:[#allocation5 + $0xdd8] sm:$0xff] }
 0x283   : > { %5829 = vmatpush1.bf16.msra.mxu1 %v14612_v5  ;;  %5789 = vmatprep.subr.bf16.mxu0 %v14341_v42  ;;  %v1452_v5 = vld [vmem:[#allocation5 + $0x1598] sm:$0xff]  ;;  %v14757_v42 = vcombine.high %v1468_v32, %v1476_v35  ;;  %v14484_v56 = vcombine.low %v1196_v40, %v1204_v41  ;;  %v845_v35 = vld [vmem:[#allocation5 + $0x2a0] sm:$0xff] }
 0x284   : > { %5830 = vmatprep.subr.bf16.mxu1 %v14597_v48  ;;  %v14485_v48 = vcombine.high %v1196_v40, %v1204_v41  ;;  %v14740_v57 = vcombine.low %v1452_v5, %v1460_v43  ;;  %v1164_v59 = vld [vmem:[#allocation5 + $0xc98] sm:$0xff]  ;;  %v1109_v40 = vld [vmem:[#allocation5 + $0xae0] sm:$0xff] }
 0x285   : > { %v1428_v62 = vld [vmem:[#allocation5 + $0x14d8] sm:$0xff] }
 0x286   : > { %5790 = vmatpush1.bf16.msra.mxu0 %v14340_v51  ;;  %v1188_v51 = vld [vmem:[#allocation5 + $0xd58] sm:$0xff] }
 0x287   : > { %5831 = vmatpush1.bf16.msra.mxu1 %v14596_v52  ;;  %5791 = vmatprep.subr.bf16.mxu0 %v14325_v54  ;;  %v1436_v52 = vld [vmem:[#allocation5 + $0x1518] sm:$0xff]  ;;  %v14741_v54 = vcombine.high %v1452_v5, %v1460_v43  ;;  %v14468_v0 = vcombine.low %v1180_v49, %v1188_v51 }
 0x288   : > { %5832 = vmatprep.subr.bf16.mxu1 %v14581_v58  ;;  %v14469_v58 = vcombine.high %v1180_v49, %v1188_v51  ;;  %v14724_v1 = vcombine.low %v1436_v52, %v1444_v55  ;;  %v1148_v6 = vld [vmem:[#allocation5 + $0xc18] sm:$0xff]  ;;  %v829_v49 = vld [vmem:[#allocation5 + $0x220] sm:$0xff] }
 0x289   : > { %v1412_v10 = vld [vmem:[#allocation5 + $0x1458] sm:$0xff]  ;;  %v837_v51 = vld [vmem:[#allocation5 + $0x260] sm:$0xff] }
 0x28a   : > { %5792 = vmatpush1.bf16.msra.mxu0 %v14324_v60  ;;  %v1172_v60 = vld [vmem:[#allocation5 + $0xcd8] sm:$0xff] }
 0x28b   : > { %5833 = vmatpush1.bf16.msra.mxu1 %v14580_v22  ;;  %5793 = vmatprep.subr.bf16.mxu0 %v14309_v61  ;;  %v1420_v22 = vld [vmem:[#allocation5 + $0x1498] sm:$0xff]  ;;  %v14725_v61 = vcombine.high %v1436_v52, %v1444_v55  ;;  %v14452_v12 = vcombine.low %v1164_v59, %v1172_v60  ;;  %v1085_v52 = vld [vmem:[#allocation5 + $0xa20] sm:$0xff] }
 0x28c   : > { %5834 = vmatprep.subr.bf16.mxu1 %v14565_v2  ;;  %v14453_v2 = vcombine.high %v1164_v59, %v1172_v60  ;;  %v14708_v13 = vcombine.low %v1420_v22, %v1428_v62 }
 0x28e   : > { %5794 = vmatpush1.bf16.msra.mxu0 %v14308_v7  ;;  %v1156_v7 = vld [vmem:[#allocation5 + $0xc58] sm:$0xff] }
 0x28f   : > { %5835 = vmatpush1.bf16.msra.mxu1 %v14564_v8  ;;  %5795 = vmatprep.subr.bf16.mxu0 %v14549_v9  ;;  %v1404_v8 = vld [vmem:[#allocation5 + $0x1418] sm:$0xff]  ;;  %v14709_v9 = vcombine.high %v1420_v22, %v1428_v62  ;;  %v14436_v23 = vcombine.low %v1148_v6, %v1156_v7 }
 0x290   : > { %5836 = vmatprep.subr.bf16.mxu1 %v14805_v37  ;;  %v14437_v37 = vcombine.high %v1148_v6, %v1156_v7  ;;  %v14692_v24 = vcombine.low %v1404_v8, %v1412_v10 }
 0x292   : > { %5796 = vmatpush2.bf16.msra.mxu0 %v14548_v18  ;;  %v885_v18 = vld [vmem:[#allocation5 + $0x3e0] sm:$0xff] }
 0x293   : > { %5837 = vmatpush2.bf16.msra.mxu1 %v14804_v19  ;;  %5797 = vmatprep.subr.bf16.mxu0 %v14533_v20  ;;  %v1133_v19 = vld [vmem:[#allocation5 + $0xba0] sm:$0xff]  ;;  %v14693_v20 = vcombine.high %v1404_v8, %v1412_v10  ;;  %v14166_v31 = vcombine.low %v877_v17, %v885_v18 }
 0x294   : > { %5838 = vmatprep.subr.bf16.mxu1 %v14789_v47  ;;  %v14167_v47 = vcombine.high %v877_v17, %v885_v18  ;;  %v14422_v32 = vcombine.low %v1133_v19, %v1141_v21  ;;  %v1077_v8 = vld [vmem:[#allocation5 + $0x9e0] sm:$0xff] }
 0x295   : > { %v1053_v17 = vld [vmem:[#allocation5 + $0x920] sm:$0xff] }
 0x296   : > { %5798 = vmatpush2.bf16.msra.mxu0 %v14532_v26  ;;  %v869_v26 = vld [vmem:[#allocation5 + $0x360] sm:$0xff] }
 0x297   : > { %5839 = vmatpush2.bf16.msra.mxu1 %v14788_v27  ;;  %5799 = vmatprep.subr.bf16.mxu0 %v14517_v28  ;;  %v1117_v27 = vld [vmem:[#allocation5 + $0xb20] sm:$0xff]  ;;  %v14423_v28 = vcombine.high %v1133_v19, %v1141_v21  ;;  %v14150_v43 = vcombine.low %v861_v25, %v869_v26 }
 0x298   : > { %5840 = vmatprep.subr.bf16.mxu1 %v14773_v34  ;;  %v14151_v34 = vcombine.high %v861_v25, %v869_v26  ;;  %v1061_v19 = vld [vmem:[#allocation5 + $0x960] sm:$0xff] }
 0x299   : > { %v1037_v25 = vld [vmem:[#allocation5 + $0x8a0] sm:$0xff]  ;;  %v14343_v26 = vcombine.high %v1053_v17, %v1061_v19 }
 0x29a   : > { %5800 = vmatpush2.bf16.msra.mxu0 %v14516_v36  ;;  %v853_v36 = vld [vmem:[#allocation5 + $0x2e0] sm:$0xff] }
 0x29b   : > { %5841 = vmatpush2.bf16.msra.mxu1 %v14772_v38  ;;  %5801 = vmatprep.subr.bf16.mxu0 %v14501_v39  ;;  %v1101_v38 = vld [vmem:[#allocation5 + $0xaa0] sm:$0xff]  ;;  %v14407_v39 = vcombine.high %v1117_v27, %v1125_v29  ;;  %v14134_v22 = vcombine.low %v845_v35, %v853_v36 }
 0x29c   : > { %5842 = vmatprep.subr.bf16.mxu1 %v14757_v42  ;;  %v14390_v62 = vcombine.low %v1101_v38, %v1109_v40 }
 0x29e   : > { %5802 = vmatpush2.bf16.msra.mxu0 %v14500_v45 }
 0x29f   : > { %5843 = vmatpush2.bf16.msra.mxu1 %v14756_v46  ;;  %5803 = vmatprep.subr.bf16.mxu0 %v14485_v48  ;;  %v14406_v46 = vcombine.low %v1117_v27, %v1125_v29  ;;  %v14135_v48 = vcombine.high %v845_v35, %v853_v36  ;;  %v1045_v27 = vld [vmem:[#allocation5 + $0x8e0] sm:$0xff]  ;;  %v14342_v29 = vcombine.low %v1053_v17, %v1061_v19 }
 0x2a0   : > { %5844 = vmatprep.subr.bf16.mxu1 %v14741_v54  ;;  %v1021_v35 = vld [vmem:[#allocation5 + $0x820] sm:$0xff]  ;;  %v14327_v36 = vcombine.high %v1037_v25, %v1045_v27 }
 0x2a1   : > { %v941_v19 = vld [vmem:[#allocation5 + $0x5a0] sm:$0xff] }
 0x2a2   : > { %5804 = vmatpush2.bf16.msra.mxu0 %v14484_v56 }
 0x2a3   : > { %5845 = vmatpush2.bf16.msra.mxu1 %v14740_v57  ;;  %5805 = vmatprep.subr.bf16.mxu0 %v14469_v58  ;;  %v1093_v57 = vld [vmem:[#allocation5 + $0xa60] sm:$0xff] }
 0x2a4   : > { %5846 = vmatprep.subr.bf16.mxu1 %v14725_v61  ;;  %v14375_v7 = vcombine.high %v1085_v52, %v1093_v57  ;;  %v14374_v10 = vcombine.low %v1085_v52, %v1093_v57  ;;  %v989_v52 = vld [vmem:[#allocation5 + $0x720] sm:$0xff] }
 0x2a5   : > { %v1253_v57 = vld [vmem:[#allocation5 + $0xf60] sm:$0xff] }
 0x2a6   : > { %5806 = vmatpush2.bf16.msra.mxu0 %v14468_v0  ;;  %v14119_v0 = vcombine.high %v829_v49, %v837_v51 }
 0x2a7   : > { %5847 = vmatpush2.bf16.msra.mxu1 %v14724_v1  ;;  %5807 = vmatprep.subr.bf16.mxu0 %v14453_v2  ;;  %v821_v1 = vld [vmem:[#allocation5 + $0x1e0] sm:$0xff] }
 0x2a8   : > { %5848 = vmatprep.subr.bf16.mxu1 %v14709_v9  ;;  %v1069_v2 = vld [vmem:[#allocation5 + $0x9a0] sm:$0xff]  ;;  %v14118_v9 = vcombine.low %v829_v49, %v837_v51 }
 0x2a9   : > { %v14359_v18 = vcombine.high %v1069_v2, %v1077_v8  ;;  %v14358_v21 = vcombine.low %v1069_v2, %v1077_v8  ;;  %v957_v8 = vld [vmem:[#allocation5 + $0x620] sm:$0xff] }
 0x2aa   : > { %5808 = vmatpush2.bf16.msra.mxu0 %v14452_v12 }
 0x2ab   : > { %5849 = vmatpush2.bf16.msra.mxu1 %v14708_v13  ;;  %5809 = vmatprep.subr.bf16.mxu0 %v14437_v37  ;;  %v797_v13 = vld [vmem:[#allocation5 + $0x120] sm:$0xff] }
 0x2ac   : > { %5850 = vmatprep.subr.bf16.mxu1 %v14693_v20  ;;  %v805_v37 = vld [vmem:[#allocation5 + $0x160] sm:$0xff] }
 0x2ae   : > { %5810 = vmatpush2.bf16.msra.mxu0 %v14436_v23  ;;  %v14087_v23 = vcombine.high %v797_v13, %v805_v37 }
 0x2af   : > { %5851 = vmatpush2.bf16.msra.mxu1 %v14692_v24  ;;  %5861 = vmatprep.subr.bf16.mxu0 %v14167_v47  ;;  %v781_v24 = vld [vmem:[#allocation5 + $0xa0] sm:$0xff] }
 0x2b0   : > { %5902 = vmatprep.subr.bf16.mxu1 %v14423_v28  ;;  %v789_v47 = vld [vmem:[#allocation5 + $0xe0] sm:$0xff]  ;;  %v14086_v28 = vcombine.low %v797_v13, %v805_v37 }
 0x2b1   : > { %v5567_v41 = vpop.f32.mrf.mxu0  ;;  %5812 = vmatmul.mubr.bf16.vlgmr.msra.gmra.mxu0 %v18017_v33  ;;  %v1221_v13 = vld [vmem:[#allocation5 + $0xe60] sm:$0xff] }
 0x2b2   : > { %v5568_v5 = vadd.f32 %v5567_v41, %v18049_v4  ;;  %v5608_v42 = vpop.f32.mrf.mxu1  ;;  %5853 = vmatmul.mubr.bf16.vlgmr.msra.gmra.mxu1 %v18027_v50  ;;  %5862 = vmatpush1.bf16.msra.mxu0 %v14166_v31  ;;  %v14391_v4 = vcombine.high %v1101_v38, %v1109_v40  ;;  %v14071_v31 = vcombine.high %v781_v24, %v789_v47  ;;  %v1029_v38 = vld [vmem:[#allocation5 + $0x860] sm:$0xff] }
 0x2b3   : > { %5903 = vmatpush1.bf16.msra.mxu1 %v14422_v32  ;;  %v5569_v45 = vpop.f32.mrf.mxu0  ;;  %5863 = vmatprep.subr.bf16.mxu0 %v14151_v34  ;;  %v765_v32 = vld [vmem:[#allocation5 + $0x20] sm:$0xff]  ;;  %v14326_v40 = vcombine.low %v1037_v25, %v1045_v27  ;;  %v14310_v49 = vcombine.low %v1021_v35, %v1029_v38 }
 0x2b4   : > { %v18062_v54 = vadd.f32 %v5608_v42, %v5568_v5  ;;  %v5570_v55 = vadd.f32 %v5569_v45, %v18055_v15  ;;  %v5610_v56 = vpop.f32.mrf.mxu1  ;;  %5904 = vmatprep.subr.bf16.mxu1 %v14407_v39  ;;  %5893 = vmatprep.mubr.bf16.mxu0 %v17998_v11  ;;  %v813_v15 = vld [vmem:[#allocation5 + $0x1a0] sm:$0xff]  ;;  %v14070_v39 = vcombine.low %v781_v24, %v789_v47 }
 0x2b5   : > { %v5571_v58 = vpop.f32.mrf.mxu0  ;;  %5934 = vmatprep.mubr.bf16.mxu1 %v18003_v16  ;;  %v14103_v12 = vcombine.high %v813_v15, %v821_v1  ;;  %v14102_v20 = vcombine.low %v813_v15, %v821_v1  ;;  %v773_v34 = vld [vmem:[#allocation5 + $0x60] sm:$0xff]  ;;  %v14311_v45 = vcombine.high %v1021_v35, %v1029_v38 }
 0x2b6   : > { %v18067_v59 = vadd.f32 %v5610_v56, %v5570_v55  ;;  %v5612_v60 = vpop.f32.mrf.mxu1  ;;  %5864 = vmatpush1.bf16.msra.mxu0 %v14150_v43  ;;  %v14055_v41 = vcombine.high %v765_v32, %v773_v34  ;;  %v1005_v5 = vld [vmem:[#allocation5 + $0x7a0] sm:$0xff] }
 0x2b7   : > { %5905 = vmatpush1.bf16.msra.mxu1 %v14406_v46  ;;  %v5572_v61 = vpop.f32.mrf.mxu0  ;;  %5865 = vmatprep.subr.bf16.mxu0 %v14135_v48  ;;  %v1013_v42 = vld [vmem:[#allocation5 + $0x7e0] sm:$0xff]  ;;  %v14054_v48 = vcombine.low %v765_v32, %v773_v34 }
 0x2b8   : > { %v5613_v6 = vpop.f32.mrf.mxu1  ;;  %5906 = vmatprep.subr.bf16.mxu1 %v14391_v4  ;;  %v1261_v43 = vld [vmem:[#allocation5 + $0xfa0] sm:$0xff]  ;;  %v14295_v51 = vcombine.high %v1005_v5, %v1013_v42  ;;  %v14294_v58 = vcombine.low %v1005_v5, %v1013_v42 }
 0x2b9   : > { %v1269_v46 = vld [vmem:[#allocation5 + $0xfe0] sm:$0xff] }
 0x2ba   : > { %5866 = vmatpush1.bf16.msra.mxu0 %v14134_v22  ;;  %v997_v55 = vld [vmem:[#allocation5 + $0x760] sm:$0xff]  ;;  %v14551_v4 = vcombine.high %v1261_v43, %v1269_v46  ;;  %v14550_v60 = vcombine.low %v1261_v43, %v1269_v46 }
 0x2bb   : > { %5907 = vmatpush1.bf16.msra.mxu1 %v14390_v62  ;;  %5867 = vmatprep.subr.bf16.mxu0 %v14119_v0  ;;  %v1245_v56 = vld [vmem:[#allocation5 + $0xf20] sm:$0xff]  ;;  %v14279_v22 = vcombine.high %v989_v52, %v997_v55  ;;  %v14278_v2 = vcombine.low %v989_v52, %v997_v55 }
 0x2bc   : > { %5908 = vmatprep.subr.bf16.mxu1 %v14375_v7  ;;  %v973_v61 = vld [vmem:[#allocation5 + $0x6a0] sm:$0xff]  ;;  %v14535_v15 = vcombine.high %v1245_v56, %v1253_v57  ;;  %v14534_v6 = vcombine.low %v1245_v56, %v1253_v57 }
 0x2bd   : > { %v981_v62 = vld [vmem:[#allocation5 + $0x6e0] sm:$0xff] }
 0x2be   : > { %5868 = vmatpush1.bf16.msra.mxu0 %v14118_v9  ;;  %v1229_v0 = vld [vmem:[#allocation5 + $0xea0] sm:$0xff]  ;;  %v14263_v7 = vcombine.high %v973_v61, %v981_v62  ;;  %v14262_v37 = vcombine.low %v973_v61, %v981_v62  ;;  %v886_v61 = vld [vmem:[#allocation5 + $0x3e8] sm:$0xff] }
 0x2bf   : > { %5909 = vmatpush1.bf16.msra.mxu1 %v14374_v10  ;;  %5869 = vmatprep.subr.bf16.mxu0 %v14103_v12  ;;  %v1237_v1 = vld [vmem:[#allocation5 + $0xee0] sm:$0xff] }
 0x2c0   : > { %5910 = vmatprep.subr.bf16.mxu1 %v14359_v18  ;;  %v965_v9 = vld [vmem:[#allocation5 + $0x660] sm:$0xff]  ;;  %v14519_v12 = vcombine.high %v1229_v0, %v1237_v1  ;;  %v14518_v17 = vcombine.low %v1229_v0, %v1237_v1 }
 0x2c1   : > { %v1213_v10 = vld [vmem:[#allocation5 + $0xe20] sm:$0xff]  ;;  %v14247_v18 = vcombine.high %v957_v8, %v965_v9  ;;  %v14246_v47 = vcombine.low %v957_v8, %v965_v9  ;;  %v870_v8 = vld [vmem:[#allocation5 + $0x368] sm:$0xff] }
 0x2c2   : > { %5870 = vmatpush1.bf16.msra.mxu0 %v14102_v20  ;;  %v949_v20 = vld [vmem:[#allocation5 + $0x5e0] sm:$0xff]  ;;  %v14502_v25 = vcombine.low %v1213_v10, %v1221_v13 }
 0x2c3   : > { %5911 = vmatpush1.bf16.msra.mxu1 %v14358_v21  ;;  %5871 = vmatprep.subr.bf16.mxu0 %v14087_v23  ;;  %v1197_v21 = vld [vmem:[#allocation5 + $0xda0] sm:$0xff]  ;;  %v14503_v23 = vcombine.high %v1213_v10, %v1221_v13  ;;  %v14230_v34 = vcombine.low %v941_v19, %v949_v20 }
 0x2c4   : > { %5912 = vmatprep.subr.bf16.mxu1 %v14343_v26  ;;  %v1205_v24 = vld [vmem:[#allocation5 + $0xde0] sm:$0xff]  ;;  %v14231_v26 = vcombine.high %v941_v19, %v949_v20  ;;  %v846_v19 = vld [vmem:[#allocation5 + $0x2a8] sm:$0xff] }
 0x2c5   : > { %v925_v27 = vld [vmem:[#allocation5 + $0x520] sm:$0xff]  ;;  %v14486_v35 = vcombine.low %v1197_v21, %v1205_v24  ;;  %v854_v20 = vld [vmem:[#allocation5 + $0x2e8] sm:$0xff] }
 0x2c6   : > { %5872 = vmatpush1.bf16.msra.mxu0 %v14086_v28  ;;  %v933_v28 = vld [vmem:[#allocation5 + $0x560] sm:$0xff] }
 0x2c7   : > { %5913 = vmatpush1.bf16.msra.mxu1 %v14342_v29  ;;  %5873 = vmatprep.subr.bf16.mxu0 %v14071_v31  ;;  %v1181_v29 = vld [vmem:[#allocation5 + $0xd20] sm:$0xff]  ;;  %v14487_v31 = vcombine.high %v1197_v21, %v1205_v24  ;;  %v14214_v42 = vcombine.low %v925_v27, %v933_v28 }
 0x2c8   : > { %5914 = vmatprep.subr.bf16.mxu1 %v14327_v36  ;;  %v1189_v32 = vld [vmem:[#allocation5 + $0xd60] sm:$0xff]  ;;  %v14215_v36 = vcombine.high %v925_v27, %v933_v28  ;;  %v14137_v28 = vcombine.high %v846_v19, %v854_v20 }
 0x2c9   : > { %v909_v38 = vld [vmem:[#allocation5 + $0x4a0] sm:$0xff]  ;;  %v14470_v43 = vcombine.low %v1181_v29, %v1189_v32 }
 0x2ca   : > { %5874 = vmatpush1.bf16.msra.mxu0 %v14070_v39  ;;  %v917_v39 = vld [vmem:[#allocation5 + $0x4e0] sm:$0xff] }
 0x2cb   : > { %5915 = vmatpush1.bf16.msra.mxu1 %v14326_v40  ;;  %5875 = vmatprep.subr.bf16.mxu0 %v14055_v41  ;;  %v1165_v40 = vld [vmem:[#allocation5 + $0xca0] sm:$0xff]  ;;  %v14471_v41 = vcombine.high %v1181_v29, %v1189_v32  ;;  %v14198_v55 = vcombine.low %v909_v38, %v917_v39 }
 0x2cc   : > { %5916 = vmatprep.subr.bf16.mxu1 %v14311_v45  ;;  %v1173_v5 = vld [vmem:[#allocation5 + $0xce0] sm:$0xff]  ;;  %v14199_v45 = vcombine.high %v909_v38, %v917_v39 }
 0x2cd   : > { %v893_v46 = vld [vmem:[#allocation5 + $0x420] sm:$0xff]  ;;  %v14454_v56 = vcombine.low %v1165_v40, %v1173_v5 }
 0x2ce   : > { %5876 = vmatpush1.bf16.msra.mxu0 %v14054_v48  ;;  %v901_v48 = vld [vmem:[#allocation5 + $0x460] sm:$0xff] }
 0x2cf   : > { %5917 = vmatpush1.bf16.msra.mxu1 %v14310_v49  ;;  %5877 = vmatprep.subr.bf16.mxu0 %v14295_v51  ;;  %v1149_v49 = vld [vmem:[#allocation5 + $0xc20] sm:$0xff]  ;;  %v14455_v51 = vcombine.high %v1165_v40, %v1173_v5  ;;  %v14182_v62 = vcombine.low %v893_v46, %v901_v48 }
 0x2d0   : > { %5918 = vmatprep.subr.bf16.mxu1 %v14551_v4  ;;  %v1157_v52 = vld [vmem:[#allocation5 + $0xc60] sm:$0xff]  ;;  %v14183_v4 = vcombine.high %v893_v46, %v901_v48  ;;  %v814_v48 = vld [vmem:[#allocation5 + $0x1a8] sm:$0xff] }
 0x2d1   : > { %v1389_v57 = vld [vmem:[#allocation5 + $0x13a0] sm:$0xff]  ;;  %v14438_v0 = vcombine.low %v1149_v49, %v1157_v52 }
 0x2d2   : > { %5878 = vmatpush2.bf16.msra.mxu0 %v14294_v58  ;;  %v1397_v58 = vld [vmem:[#allocation5 + $0x13e0] sm:$0xff] }
 0x2d3   : > { %5919 = vmatpush2.bf16.msra.mxu1 %v14550_v60  ;;  %5879 = vmatprep.subr.bf16.mxu0 %v14279_v22  ;;  %v878_v60 = vld [vmem:[#allocation5 + $0x3a8] sm:$0xff]  ;;  %v14439_v22 = vcombine.high %v1149_v49, %v1157_v52  ;;  %v1373_v1 = vld [vmem:[#allocation5 + $0x1320] sm:$0xff]  ;;  %v14678_v9 = vcombine.low %v1389_v57, %v1397_v58 }
 0x2d4   : > { %5920 = vmatprep.subr.bf16.mxu1 %v14535_v15  ;;  %v14679_v15 = vcombine.high %v1389_v57, %v1397_v58  ;;  %v14168_v10 = vcombine.low %v878_v60, %v886_v61  ;;  %v1341_v29 = vld [vmem:[#allocation5 + $0x1220] sm:$0xff]  ;;  %v822_v49 = vld [vmem:[#allocation5 + $0x1e8] sm:$0xff] }
 0x2d5   : > { %v1333_v46 = vld [vmem:[#allocation5 + $0x11e0] sm:$0xff]  ;;  %v798_v58 = vld [vmem:[#allocation5 + $0x128] sm:$0xff] }
 0x2d6   : > { %5880 = vmatpush2.bf16.msra.mxu0 %v14278_v2  ;;  %v1381_v2 = vld [vmem:[#allocation5 + $0x1360] sm:$0xff] }
 0x2d7   : > { %5921 = vmatpush2.bf16.msra.mxu1 %v14534_v6  ;;  %5881 = vmatprep.subr.bf16.mxu0 %v14263_v7  ;;  %v862_v6 = vld [vmem:[#allocation5 + $0x328] sm:$0xff]  ;;  %v14169_v7 = vcombine.high %v878_v60, %v886_v61  ;;  %v1317_v57 = vld [vmem:[#allocation5 + $0x1160] sm:$0xff]  ;;  %v14104_v61 = vcombine.low %v814_v48, %v822_v49 }
 0x2d8   : > { %5922 = vmatprep.subr.bf16.mxu1 %v14519_v12  ;;  %v14663_v12 = vcombine.high %v1373_v1, %v1381_v2  ;;  %v14153_v13 = vcombine.high %v862_v6, %v870_v8  ;;  %v806_v60 = vld [vmem:[#allocation5 + $0x168] sm:$0xff] }
 0x2da   : > { %5882 = vmatpush2.bf16.msra.mxu0 %v14262_v37  ;;  %v1357_v37 = vld [vmem:[#allocation5 + $0x12a0] sm:$0xff] }
 0x2db   : > { %5923 = vmatpush2.bf16.msra.mxu1 %v14518_v17  ;;  %5883 = vmatprep.subr.bf16.mxu0 %v14247_v18  ;;  %v1365_v17 = vld [vmem:[#allocation5 + $0x12e0] sm:$0xff] }
 0x2dc   : > { %5924 = vmatprep.subr.bf16.mxu1 %v14503_v23  ;;  %v14662_v23 = vcombine.low %v1373_v1, %v1381_v2  ;;  %v14646_v39 = vcombine.low %v1357_v37, %v1365_v17  ;;  %v1301_v1 = vld [vmem:[#allocation5 + $0x10e0] sm:$0xff]  ;;  %v782_v2 = vld [vmem:[#allocation5 + $0xa8] sm:$0xff] }
 0x2de   : > { %5884 = vmatpush2.bf16.msra.mxu0 %v14246_v47 }
 0x2df   : > { %5925 = vmatpush2.bf16.msra.mxu1 %v14502_v25  ;;  %5885 = vmatprep.subr.bf16.mxu0 %v14231_v26  ;;  %v14152_v25 = vcombine.low %v862_v6, %v870_v8  ;;  %v14647_v26 = vcombine.high %v1357_v37, %v1365_v17  ;;  %v790_v6 = vld [vmem:[#allocation5 + $0xe8] sm:$0xff]  ;;  %v14088_v8 = vcombine.low %v798_v58, %v806_v60 }
 0x2e0   : > { %5926 = vmatprep.subr.bf16.mxu1 %v14487_v31  ;;  %v1349_v31 = vld [vmem:[#allocation5 + $0x1260] sm:$0xff]  ;;  %v766_v37 = vld [vmem:[#allocation5 + $0x28] sm:$0xff] }
 0x2e1   : > { %v14631_v5 = vcombine.high %v1341_v29, %v1349_v31  ;;  %v774_v17 = vld [vmem:[#allocation5 + $0x68] sm:$0xff] }
 0x2e2   : > { %5886 = vmatpush2.bf16.msra.mxu0 %v14230_v34 }
 0x2e3   : > { %5927 = vmatpush2.bf16.msra.mxu1 %v14486_v35  ;;  %5887 = vmatprep.subr.bf16.mxu0 %v14215_v36  ;;  %v830_v35 = vld [vmem:[#allocation5 + $0x228] sm:$0xff] }
 0x2e4   : > { %5928 = vmatprep.subr.bf16.mxu1 %v14471_v41  ;;  %v838_v36 = vld [vmem:[#allocation5 + $0x268] sm:$0xff]  ;;  %v14136_v41 = vcombine.low %v846_v19, %v854_v20  ;;  %v14072_v19 = vcombine.low %v782_v2, %v790_v6 }
 0x2e5   : > { %v14120_v52 = vcombine.low %v830_v35, %v838_v36 }
 0x2e6   : > { %5888 = vmatpush2.bf16.msra.mxu0 %v14214_v42 }
 0x2e7   : > { %5929 = vmatpush2.bf16.msra.mxu1 %v14470_v43  ;;  %5889 = vmatprep.subr.bf16.mxu0 %v14199_v45  ;;  %v14121_v43 = vcombine.high %v830_v35, %v838_v36  ;;  %v1325_v45 = vld [vmem:[#allocation5 + $0x11a0] sm:$0xff]  ;;  %v990_v36 = vld [vmem:[#allocation5 + $0x728] sm:$0xff] }
 0x2e8   : > { %5930 = vmatprep.subr.bf16.mxu1 %v14455_v51  ;;  %v14630_v51 = vcombine.low %v1341_v29, %v1349_v31  ;;  %v1509_v35 = vld [vmem:[#allocation5 + $0x1760] sm:$0xff] }
 0x2ea   : > { %5890 = vmatpush2.bf16.msra.mxu0 %v14198_v55  ;;  %v14615_v55 = vcombine.high %v1325_v45, %v1333_v46 }
 0x2eb   : > { %5931 = vmatpush2.bf16.msra.mxu1 %v14454_v56  ;;  %5891 = vmatprep.subr.bf16.mxu0 %v14183_v4  ;;  %v14105_v56 = vcombine.high %v814_v48, %v822_v49  ;;  %v1309_v4 = vld [vmem:[#allocation5 + $0x1120] sm:$0xff] }
 0x2ec   : > { %5932 = vmatprep.subr.bf16.mxu1 %v14439_v22  ;;  %v14614_v22 = vcombine.low %v1325_v45, %v1333_v46  ;;  %v974_v45 = vld [vmem:[#allocation5 + $0x6a8] sm:$0xff] }
 0x2ed   : > { %v982_v46 = vld [vmem:[#allocation5 + $0x6e8] sm:$0xff] }
 0x2ee   : > { %5892 = vmatpush2.bf16.msra.mxu0 %v14182_v62  ;;  %v14599_v62 = vcombine.high %v1309_v4, %v1317_v57 }
 0x2ef   : > { %5933 = vmatpush2.bf16.msra.mxu1 %v14438_v0  ;;  %5943 = vmatprep.subr.bf16.mxu0 %v14679_v15  ;;  %v14089_v0 = vcombine.high %v798_v58, %v806_v60  ;;  %v1293_v15 = vld [vmem:[#allocation5 + $0x10a0] sm:$0xff]  ;;  %v14264_v60 = vcombine.low %v974_v45, %v982_v46 }
 0x2f0   : > { %5984 = vmatprep.subr.bf16.mxu1 %v14169_v7  ;;  %v14598_v7 = vcombine.low %v1309_v4, %v1317_v57  ;;  %v958_v4 = vld [vmem:[#allocation5 + $0x628] sm:$0xff] }
 0x2f1   : > { %v5649_v18 = vpop.f32.mrf.mxu0  ;;  %5894 = vmatmul.mubr.bf16.vlgmr.msra.gmra.mxu0 %v18013_v30  ;;  %v966_v57 = vld [vmem:[#allocation5 + $0x668] sm:$0xff] }
 0x2f2   : > { %v5690_v21 = vpop.f32.mrf.mxu1  ;;  %5935 = vmatmul.mubr.bf16.vlgmr.msra.gmra.mxu1 %v18017_v33  ;;  %5944 = vmatpush1.bf16.msra.mxu0 %v14678_v9  ;;  %v14583_v9 = vcombine.high %v1293_v15, %v1301_v1 }
 0x2f3   : > { %v18071_v24 = vadd.f32 %v5690_v21, %v5649_v18  ;;  %5985 = vmatpush1.bf16.msra.mxu1 %v14168_v10  ;;  %v5651_v47 = vpop.f32.mrf.mxu0  ;;  %5945 = vmatprep.subr.bf16.mxu0 %v14663_v12  ;;  %v14073_v10 = vcombine.high %v782_v2, %v790_v6  ;;  %v1277_v12 = vld [vmem:[#allocation5 + $0x1020] sm:$0xff]  ;;  %v14582_v18 = vcombine.low %v1293_v15, %v1301_v1  ;;  %v942_v15 = vld [vmem:[#allocation5 + $0x5a8] sm:$0xff] }
 0x2f4   : > { %v5692_v27 = vpop.f32.mrf.mxu1  ;;  %5986 = vmatprep.subr.bf16.mxu1 %v14153_v13  ;;  %5975 = vmatprep.mubr.bf16.mxu0 %v18019_v63  ;;  %v1285_v13 = vld [vmem:[#allocation5 + $0x1060] sm:$0xff]  ;;  %v14057_v21 = vcombine.high %v766_v37, %v774_v17  ;;  %v950_v1 = vld [vmem:[#allocation5 + $0x5e8] sm:$0xff]  ;;  %v14248_v6 = vcombine.low %v958_v4, %v966_v57 }
 0x2f5   : > { %v18074_v32 = vadd.f32 %v5692_v27, %v5651_v47  ;;  %v5653_v34 = vpop.f32.mrf.mxu0  ;;  %6016 = vmatprep.mubr.bf16.mxu1 %v17998_v11  ;;  %v14567_v20 = vcombine.high %v1277_v12, %v1285_v13  ;;  %v1525_v47 = vld [vmem:[#allocation5 + $0x17e0] sm:$0xff]  ;;  %v14566_v27 = vcombine.low %v1277_v12, %v1285_v13  ;;  %v926_v12 = vld [vmem:[#allocation5 + $0x528] sm:$0xff] }
 0x2f6   : > { %v5694_v38 = vpop.f32.mrf.mxu1  ;;  %5946 = vmatpush1.bf16.msra.mxu0 %v14662_v23  ;;  %v1517_v23 = vld [vmem:[#allocation5 + $0x17a0] sm:$0xff]  ;;  %v934_v13 = vld [vmem:[#allocation5 + $0x568] sm:$0xff] }
 0x2f7   : > { %5987 = vmatpush1.bf16.msra.mxu1 %v14152_v25  ;;  %v5654_v40 = vpop.f32.mrf.mxu0  ;;  %5947 = vmatprep.subr.bf16.mxu0 %v14647_v26  ;;  %v1006_v25 = vld [vmem:[#allocation5 + $0x7a8] sm:$0xff]  ;;  %v14807_v29 = vcombine.high %v1517_v23, %v1525_v47  ;;  %v1501_v34 = vld [vmem:[#allocation5 + $0x1720] sm:$0xff] }
 0x2f8   : > { %v5695_v42 = vpop.f32.mrf.mxu1  ;;  %5988 = vmatprep.subr.bf16.mxu1 %v14137_v28  ;;  %v1014_v26 = vld [vmem:[#allocation5 + $0x7e8] sm:$0xff]  ;;  %v14056_v28 = vcombine.low %v766_v37, %v774_v17  ;;  %v14790_v48 = vcombine.low %v1501_v34, %v1509_v35  ;;  %v14232_v17 = vcombine.low %v942_v15, %v950_v1 }
 0x2f9   : > { %v14297_v31 = vcombine.high %v1006_v25, %v1014_v26  ;;  %v998_v38 = vld [vmem:[#allocation5 + $0x768] sm:$0xff]  ;;  %v14296_v40 = vcombine.low %v1006_v25, %v1014_v26  ;;  %v1485_v42 = vld [vmem:[#allocation5 + $0x16a0] sm:$0xff]  ;;  %v14216_v26 = vcombine.low %v926_v12, %v934_v13 }
 0x2fa   : > { %5948 = vmatpush1.bf16.msra.mxu0 %v14646_v39  ;;  %v14806_v39 = vcombine.low %v1517_v23, %v1525_v47  ;;  %v14280_v49 = vcombine.low %v990_v36, %v998_v38  ;;  %v910_v23 = vld [vmem:[#allocation5 + $0x4a8] sm:$0xff] }
 0x2fb   : > { %5989 = vmatpush1.bf16.msra.mxu1 %v14136_v41  ;;  %5949 = vmatprep.subr.bf16.mxu0 %v14631_v5  ;;  %v14791_v41 = vcombine.high %v1501_v34, %v1509_v35  ;;  %v14281_v5 = vcombine.high %v990_v36, %v998_v38  ;;  %v918_v47 = vld [vmem:[#allocation5 + $0x4e8] sm:$0xff] }
 0x2fc   : > { %5990 = vmatprep.subr.bf16.mxu1 %v14121_v43  ;;  %v1493_v43 = vld [vmem:[#allocation5 + $0x16e0] sm:$0xff]  ;;  %v894_v34 = vld [vmem:[#allocation5 + $0x428] sm:$0xff]  ;;  %v14200_v38 = vcombine.low %v910_v23, %v918_v47 }
 0x2fd   : > { %v14774_v58 = vcombine.low %v1485_v42, %v1493_v43  ;;  %v902_v35 = vld [vmem:[#allocation5 + $0x468] sm:$0xff] }
 0x2fe   : > { %5950 = vmatpush1.bf16.msra.mxu0 %v14630_v51  ;;  %v14775_v51 = vcombine.high %v1485_v42, %v1493_v43  ;;  %v1390_v42 = vld [vmem:[#allocation5 + $0x13a8] sm:$0xff] }
 0x2ff   : > { %5991 = vmatpush1.bf16.msra.mxu1 %v14120_v52  ;;  %5951 = vmatprep.subr.bf16.mxu0 %v14615_v55  ;;  %v14265_v52 = vcombine.high %v974_v45, %v982_v46  ;;  %v1469_v55 = vld [vmem:[#allocation5 + $0x1620] sm:$0xff]  ;;  %v1398_v43 = vld [vmem:[#allocation5 + $0x13e8] sm:$0xff]  ;;  %v14184_v46 = vcombine.low %v894_v34, %v902_v35 }
 0x300   : > { %5992 = vmatprep.subr.bf16.mxu1 %v14105_v56  ;;  %v1477_v56 = vld [vmem:[#allocation5 + $0x1660] sm:$0xff] }
 0x301   : > { %v14758_v2 = vcombine.low %v1469_v55, %v1477_v56 }
 0x302   : > { %5952 = vmatpush1.bf16.msra.mxu0 %v14614_v22  ;;  %v14759_v22 = vcombine.high %v1469_v55, %v1477_v56  ;;  %v1374_v55 = vld [vmem:[#allocation5 + $0x1328] sm:$0xff] }
 0x303   : > { %5993 = vmatpush1.bf16.msra.mxu1 %v14104_v61  ;;  %5953 = vmatprep.subr.bf16.mxu0 %v14599_v62  ;;  %v14249_v61 = vcombine.high %v958_v4, %v966_v57  ;;  %v1453_v62 = vld [vmem:[#allocation5 + $0x15a0] sm:$0xff]  ;;  %v1382_v56 = vld [vmem:[#allocation5 + $0x1368] sm:$0xff]  ;;  %v14680_v57 = vcombine.low %v1390_v42, %v1398_v43 }
 0x304   : > { %5994 = vmatprep.subr.bf16.mxu1 %v14089_v0  ;;  %v1461_v0 = vld [vmem:[#allocation5 + $0x15e0] sm:$0xff] }
 0x305   : > { %v14742_v37 = vcombine.low %v1453_v62, %v1461_v0 }
 0x306   : > { %5954 = vmatpush1.bf16.msra.mxu0 %v14598_v7  ;;  %v14743_v7 = vcombine.high %v1453_v62, %v1461_v0  ;;  %v1358_v0 = vld [vmem:[#allocation5 + $0x12a8] sm:$0xff] }
 0x307   : > { %5995 = vmatpush1.bf16.msra.mxu1 %v14088_v8  ;;  %5955 = vmatprep.subr.bf16.mxu0 %v14583_v9  ;;  %v14233_v8 = vcombine.high %v942_v15, %v950_v1  ;;  %v1437_v9 = vld [vmem:[#allocation5 + $0x1520] sm:$0xff]  ;;  %v1366_v15 = vld [vmem:[#allocation5 + $0x12e8] sm:$0xff] }
 0x308   : > { %5996 = vmatprep.subr.bf16.mxu1 %v14073_v10  ;;  %v1445_v10 = vld [vmem:[#allocation5 + $0x1560] sm:$0xff] }
 0x309   : > { %v14726_v25 = vcombine.low %v1437_v9, %v1445_v10 }
 0x30a   : > { %5956 = vmatpush1.bf16.msra.mxu0 %v14582_v18  ;;  %v14727_v18 = vcombine.high %v1437_v9, %v1445_v10 }
 0x30b   : > { %5997 = vmatpush1.bf16.msra.mxu1 %v14072_v19  ;;  %5957 = vmatprep.subr.bf16.mxu0 %v14567_v20  ;;  %v14217_v19 = vcombine.high %v926_v12, %v934_v13  ;;  %v1421_v20 = vld [vmem:[#allocation5 + $0x14a0] sm:$0xff]  ;;  %v14649_v13 = vcombine.high %v1358_v0, %v1366_v15 }
 0x30c   : > { %5998 = vmatprep.subr.bf16.mxu1 %v14057_v21  ;;  %v1429_v21 = vld [vmem:[#allocation5 + $0x14e0] sm:$0xff] }
 0x30d   : > { %v14710_v36 = vcombine.low %v1421_v20, %v1429_v21 }
 0x30e   : > { %5958 = vmatpush1.bf16.msra.mxu0 %v14566_v27  ;;  %v14711_v27 = vcombine.high %v1421_v20, %v1429_v21 }
 0x30f   : > { %5999 = vmatpush1.bf16.msra.mxu1 %v14056_v28  ;;  %5959 = vmatprep.subr.bf16.mxu0 %v14807_v29  ;;  %v14201_v28 = vcombine.high %v910_v23, %v918_v47  ;;  %v1405_v29 = vld [vmem:[#allocation5 + $0x1420] sm:$0xff] }
 0x310   : > { %6000 = vmatprep.subr.bf16.mxu1 %v14297_v31  ;;  %v1413_v31 = vld [vmem:[#allocation5 + $0x1460] sm:$0xff] }
 0x311   : > { %v14694_v45 = vcombine.low %v1405_v29, %v1413_v31 }
 0x312   : > { %5960 = vmatpush2.bf16.msra.mxu0 %v14806_v39  ;;  %v14695_v39 = vcombine.high %v1405_v29, %v1413_v31  ;;  %v1326_v29 = vld [vmem:[#allocation5 + $0x11a8] sm:$0xff] }
 0x313   : > { %6001 = vmatpush2.bf16.msra.mxu1 %v14296_v40  ;;  %5961 = vmatprep.subr.bf16.mxu0 %v14791_v41  ;;  %v14185_v40 = vcombine.high %v894_v34, %v902_v35  ;;  %v1134_v41 = vld [vmem:[#allocation5 + $0xba8] sm:$0xff] }
 0x314   : > { %6002 = vmatprep.subr.bf16.mxu1 %v14281_v5  ;;  %v1142_v5 = vld [vmem:[#allocation5 + $0xbe8] sm:$0xff] }
 0x315   : > { %v14424_v4 = vcombine.low %v1134_v41, %v1142_v5  ;;  %v1334_v31 = vld [vmem:[#allocation5 + $0x11e8] sm:$0xff] }
 0x316   : > { %5962 = vmatpush2.bf16.msra.mxu0 %v14790_v48  ;;  %v14425_v48 = vcombine.high %v1134_v41, %v1142_v5  ;;  %v1310_v41 = vld [vmem:[#allocation5 + $0x1128] sm:$0xff] }
 0x317   : > { %6003 = vmatpush2.bf16.msra.mxu1 %v14280_v49  ;;  %5963 = vmatprep.subr.bf16.mxu0 %v14775_v51  ;;  %v14681_v49 = vcombine.high %v1390_v42, %v1398_v43  ;;  %v1118_v51 = vld [vmem:[#allocation5 + $0xb28] sm:$0xff]  ;;  %v14616_v43 = vcombine.low %v1326_v29, %v1334_v31 }
 0x318   : > { %6004 = vmatprep.subr.bf16.mxu1 %v14265_v52  ;;  %v1126_v52 = vld [vmem:[#allocation5 + $0xb68] sm:$0xff] }
 0x319   : > { %v1318_v5 = vld [vmem:[#allocation5 + $0x1168] sm:$0xff] }
 0x31a   : > { %5964 = vmatpush2.bf16.msra.mxu0 %v14774_v58  ;;  %v14409_v58 = vcombine.high %v1118_v51, %v1126_v52 }
 0x31b   : > { %6005 = vmatpush2.bf16.msra.mxu1 %v14264_v60  ;;  %5965 = vmatprep.subr.bf16.mxu0 %v14759_v22  ;;  %v14665_v60 = vcombine.high %v1374_v55, %v1382_v56  ;;  %v1102_v22 = vld [vmem:[#allocation5 + $0xaa8] sm:$0xff] }
 0x31c   : > { %6006 = vmatprep.subr.bf16.mxu1 %v14249_v61  ;;  %v1110_v61 = vld [vmem:[#allocation5 + $0xae8] sm:$0xff] }
 0x31d   : > { %v14393_v9 = vcombine.high %v1102_v22, %v1110_v61  ;;  %v14392_v21 = vcombine.low %v1102_v22, %v1110_v61  ;;  %v1278_v22 = vld [vmem:[#allocation5 + $0x1028] sm:$0xff] }
 0x31e   : > { %5966 = vmatpush2.bf16.msra.mxu0 %v14758_v2  ;;  %v1286_v61 = vld [vmem:[#allocation5 + $0x1068] sm:$0xff] }
 0x31f   : > { %6007 = vmatpush2.bf16.msra.mxu1 %v14248_v6  ;;  %5967 = vmatprep.subr.bf16.mxu0 %v14743_v7  ;;  %v14408_v6 = vcombine.low %v1118_v51, %v1126_v52  ;;  %v1294_v51 = vld [vmem:[#allocation5 + $0x10a8] sm:$0xff] }
 0x320   : > { %6008 = vmatprep.subr.bf16.mxu1 %v14233_v8  ;;  %v14664_v8 = vcombine.low %v1374_v55, %v1382_v56  ;;  %v1302_v52 = vld [vmem:[#allocation5 + $0x10e8] sm:$0xff]  ;;  %v14600_v56 = vcombine.low %v1310_v41, %v1318_v5 }
 0x322   : > { %5968 = vmatpush2.bf16.msra.mxu0 %v14742_v37  ;;  %v1094_v37 = vld [vmem:[#allocation5 + $0xa68] sm:$0xff] }
 0x323   : > { %6009 = vmatpush2.bf16.msra.mxu1 %v14232_v17  ;;  %5969 = vmatprep.subr.bf16.mxu0 %v14727_v18  ;;  %v1342_v18 = vld [vmem:[#allocation5 + $0x1228] sm:$0xff] }
 0x324   : > { %6010 = vmatprep.subr.bf16.mxu1 %v14217_v19  ;;  %v1350_v19 = vld [vmem:[#allocation5 + $0x1268] sm:$0xff] }
 0x325   : > { %v14632_v35 = vcombine.low %v1342_v18, %v1350_v19 }
 0x326   : > { %5970 = vmatpush2.bf16.msra.mxu0 %v14726_v25 }
 0x327   : > { %6011 = vmatpush2.bf16.msra.mxu1 %v14216_v26  ;;  %5971 = vmatprep.subr.bf16.mxu0 %v14711_v27  ;;  %v14633_v26 = vcombine.high %v1342_v18, %v1350_v19  ;;  %v1070_v27 = vld [vmem:[#allocation5 + $0x9a8] sm:$0xff] }
 0x328   : > { %6012 = vmatprep.subr.bf16.mxu1 %v14201_v28  ;;  %v1078_v28 = vld [vmem:[#allocation5 + $0x9e8] sm:$0xff] }
 0x329   : > { %v14360_v42 = vcombine.low %v1070_v27, %v1078_v28  ;;  %v1246_v19 = vld [vmem:[#allocation5 + $0xf28] sm:$0xff] }
 0x32a   : > { %5972 = vmatpush2.bf16.msra.mxu0 %v14710_v36  ;;  %v14361_v36 = vcombine.high %v1070_v27, %v1078_v28  ;;  %v1230_v27 = vld [vmem:[#allocation5 + $0xea8] sm:$0xff] }
 0x32b   : > { %6013 = vmatpush2.bf16.msra.mxu1 %v14200_v38  ;;  %5973 = vmatprep.subr.bf16.mxu0 %v14695_v39  ;;  %v14617_v38 = vcombine.high %v1326_v29, %v1334_v31  ;;  %v1054_v39 = vld [vmem:[#allocation5 + $0x928] sm:$0xff] }
 0x32c   : > { %6014 = vmatprep.subr.bf16.mxu1 %v14185_v40  ;;  %v1062_v40 = vld [vmem:[#allocation5 + $0x968] sm:$0xff] }
 0x32d   : > { %v14344_v55 = vcombine.low %v1054_v39, %v1062_v40  ;;  %v1238_v28 = vld [vmem:[#allocation5 + $0xee8] sm:$0xff] }
 0x32e   : > { %5974 = vmatpush2.bf16.msra.mxu0 %v14694_v45  ;;  %v14345_v45 = vcombine.high %v1054_v39, %v1062_v40  ;;  %v1486_v29 = vld [vmem:[#allocation5 + $0x16a8] sm:$0xff] }
 0x32f   : > { %6015 = vmatpush2.bf16.msra.mxu1 %v14184_v46  ;;  %6025 = vmatprep.subr.bf16.mxu0 %v14425_v48  ;;  %v14601_v46 = vcombine.high %v1310_v41, %v1318_v5  ;;  %v1038_v48 = vld [vmem:[#allocation5 + $0x8a8] sm:$0xff] }
 0x330   : > { %6066 = vmatprep.subr.bf16.mxu1 %v14681_v49  ;;  %v1046_v49 = vld [vmem:[#allocation5 + $0x8e8] sm:$0xff] }
 0x331   : > { %v5731_v62 = vpop.f32.mrf.mxu0  ;;  %5976 = vmatmul.mubr.bf16.vlgmr.msra.gmra.mxu0 %v18027_v50  ;;  %v1494_v31 = vld [vmem:[#allocation5 + $0x16e8] sm:$0xff] }
 0x332   : > { %v18079_v1 = vadd.f32 %v5731_v62, %v18071_v24  ;;  %v18081_v2 = vpop.f32.mrf.mxu1  ;;  %6017 = vmatmul.mubr.bf16.vlgmr.msra.gmra.mxu1 %v18013_v30  ;;  %6026 = vmatpush1.bf16.msra.mxu0 %v14424_v4  ;;  %v1086_v24 = vld [vmem:[#allocation5 + $0xa28] sm:$0xff]  ;;  %v14329_v4 = vcombine.high %v1038_v48, %v1046_v49  ;;  %v14328_v62 = vcombine.low %v1038_v48, %v1046_v49 }
 0x333   : > { %6067 = vmatpush1.bf16.msra.mxu1 %v14680_v57  ;;  %v5733_v7 = vpop.f32.mrf.mxu0  ;;  %6027 = vmatprep.subr.bf16.mxu0 %v14409_v58  ;;  %v14377_v47 = vcombine.high %v1086_v24, %v1094_v37  ;;  %v14376_v34 = vcombine.low %v1086_v24, %v1094_v37  ;;  %v14585_v57 = vcombine.high %v1294_v51, %v1302_v52  ;;  %v1022_v58 = vld [vmem:[#allocation5 + $0x828] sm:$0xff] }
 0x334   : > { %v18085_v10 = vadd.f32 %v5733_v7, %v18074_v32  ;;  %v18087_v12 = vpop.f32.mrf.mxu1  ;;  %6068 = vmatprep.subr.bf16.mxu1 %v14665_v60  ;;  %6057 = vmatprep.mubr.bf16.mxu0 %v18003_v16  ;;  %v14648_v32 = vcombine.low %v1358_v0, %v1366_v15  ;;  %v1030_v60 = vld [vmem:[#allocation5 + $0x868] sm:$0xff]  ;;  %v14584_v0 = vcombine.low %v1294_v51, %v1302_v52 }
 0x335   : > { %v5735_v17 = vpop.f32.mrf.mxu0  ;;  %6098 = vmatprep.mubr.bf16.mxu1 %v18019_v63  ;;  %v14313_v15 = vcombine.high %v1022_v58, %v1030_v60  ;;  %v1262_v7 = vld [vmem:[#allocation5 + $0xfa8] sm:$0xff]  ;;  %v14312_v24 = vcombine.low %v1022_v58, %v1030_v60  ;;  %v14568_v37 = vcombine.low %v1278_v22, %v1286_v61 }
 0x336   : > { %v5776_v20 = vpop.f32.mrf.mxu1  ;;  %6028 = vmatpush1.bf16.msra.mxu0 %v14408_v6  ;;  %v14569_v6 = vcombine.high %v1278_v22, %v1286_v61  ;;  %v1214_v39 = vld [vmem:[#allocation5 + $0xe28] sm:$0xff] }
 0x337   : > { %6069 = vmatpush1.bf16.msra.mxu1 %v14664_v8  ;;  %v5736_v23 = vpop.f32.mrf.mxu0  ;;  %6029 = vmatprep.subr.bf16.mxu0 %v14393_v9  ;;  %v1270_v8 = vld [vmem:[#allocation5 + $0xfe8] sm:$0xff] }
 0x338   : > { %v5777_v25 = vpop.f32.mrf.mxu1  ;;  %6070 = vmatprep.subr.bf16.mxu1 %v14649_v13  ;;  %v1518_v9 = vld [vmem:[#allocation5 + $0x17a8] sm:$0xff]  ;;  %v14553_v17 = vcombine.high %v1262_v7, %v1270_v8 }
 0x339   : > { %v1526_v13 = vld [vmem:[#allocation5 + $0x17e8] sm:$0xff] }
 0x33a   : > { %6030 = vmatpush1.bf16.msra.mxu0 %v14392_v21  ;;  %v14809_v18 = vcombine.high %v1518_v9, %v1526_v13  ;;  %v1254_v20 = vld [vmem:[#allocation5 + $0xf68] sm:$0xff] }
 0x33b   : > { %6071 = vmatpush1.bf16.msra.mxu1 %v14648_v32  ;;  %6031 = vmatprep.subr.bf16.mxu0 %v14377_v47  ;;  %v1502_v21 = vld [vmem:[#allocation5 + $0x1728] sm:$0xff]  ;;  %v14552_v32 = vcombine.low %v1262_v7, %v1270_v8  ;;  %v14808_v47 = vcombine.low %v1518_v9, %v1526_v13  ;;  %v14537_v25 = vcombine.high %v1246_v19, %v1254_v20 }
 0x33c   : > { %6072 = vmatprep.subr.bf16.mxu1 %v14633_v26  ;;  %v1510_v23 = vld [vmem:[#allocation5 + $0x1768] sm:$0xff] }
 0x33d   : > { %v14793_v26 = vcombine.high %v1502_v21, %v1510_v23  ;;  %v1222_v40 = vld [vmem:[#allocation5 + $0xe68] sm:$0xff] }
 0x33e   : > { %6032 = vmatpush1.bf16.msra.mxu0 %v14376_v34  ;;  %v14536_v34 = vcombine.low %v1246_v19, %v1254_v20  ;;  %v1470_v41 = vld [vmem:[#allocation5 + $0x1628] sm:$0xff] }
 0x33f   : > { %6073 = vmatpush1.bf16.msra.mxu1 %v14632_v35  ;;  %6033 = vmatprep.subr.bf16.mxu0 %v14361_v36  ;;  %v14792_v35 = vcombine.low %v1502_v21, %v1510_v23  ;;  %v14521_v36 = vcombine.high %v1230_v27, %v1238_v28  ;;  %v1478_v5 = vld [vmem:[#allocation5 + $0x1668] sm:$0xff] }
 0x340   : > { %6074 = vmatprep.subr.bf16.mxu1 %v14617_v38  ;;  %v14777_v38 = vcombine.high %v1486_v29, %v1494_v31  ;;  %v1198_v48 = vld [vmem:[#allocation5 + $0xda8] sm:$0xff] }
 0x341   : > { %v1206_v49 = vld [vmem:[#allocation5 + $0xde8] sm:$0xff] }
 0x342   : > { %6034 = vmatpush1.bf16.msra.mxu0 %v14360_v42  ;;  %v14520_v42 = vcombine.low %v1230_v27, %v1238_v28  ;;  %v1454_v51 = vld [vmem:[#allocation5 + $0x15a8] sm:$0xff]  ;;  %v879_v27 = vld [vmem:[#allocation5 + $0x3b0] sm:$0xff] }
 0x343   : > { %6075 = vmatpush1.bf16.msra.mxu1 %v14616_v43  ;;  %6035 = vmatprep.subr.bf16.mxu0 %v14345_v45  ;;  %v14776_v43 = vcombine.low %v1486_v29, %v1494_v31  ;;  %v14505_v45 = vcombine.high %v1214_v39, %v1222_v40  ;;  %v1462_v52 = vld [vmem:[#allocation5 + $0x15e8] sm:$0xff]  ;;  %v887_v28 = vld [vmem:[#allocation5 + $0x3f0] sm:$0xff] }
 0x344   : > { %6076 = vmatprep.subr.bf16.mxu1 %v14601_v46  ;;  %v14761_v46 = vcombine.high %v1470_v41, %v1478_v5  ;;  %v1182_v58 = vld [vmem:[#allocation5 + $0xd28] sm:$0xff]  ;;  %v1135_v29 = vld [vmem:[#allocation5 + $0xbb0] sm:$0xff] }
 0x345   : > { %v1190_v60 = vld [vmem:[#allocation5 + $0xd68] sm:$0xff]  ;;  %v1143_v31 = vld [vmem:[#allocation5 + $0xbf0] sm:$0xff] }
 0x346   : > { %6036 = vmatpush1.bf16.msra.mxu0 %v14344_v55  ;;  %v14504_v55 = vcombine.low %v1214_v39, %v1222_v40  ;;  %v1438_v22 = vld [vmem:[#allocation5 + $0x1528] sm:$0xff]  ;;  %v863_v39 = vld [vmem:[#allocation5 + $0x330] sm:$0xff] }
 0x347   : > { %6077 = vmatpush1.bf16.msra.mxu1 %v14600_v56  ;;  %6037 = vmatprep.subr.bf16.mxu0 %v14329_v4  ;;  %v14760_v56 = vcombine.low %v1470_v41, %v1478_v5  ;;  %v14489_v4 = vcombine.high %v1198_v48, %v1206_v49  ;;  %v1446_v61 = vld [vmem:[#allocation5 + $0x1568] sm:$0xff]  ;;  %v871_v40 = vld [vmem:[#allocation5 + $0x370] sm:$0xff] }
 0x348   : > { %6078 = vmatprep.subr.bf16.mxu1 %v14585_v57  ;;  %v14745_v57 = vcombine.high %v1454_v51, %v1462_v52  ;;  %v1166_v7 = vld [vmem:[#allocation5 + $0xca8] sm:$0xff]  ;;  %v1119_v41 = vld [vmem:[#allocation5 + $0xb30] sm:$0xff] }
 0x349   : > { %v1174_v8 = vld [vmem:[#allocation5 + $0xce8] sm:$0xff]  ;;  %v1127_v5 = vld [vmem:[#allocation5 + $0xb70] sm:$0xff] }
 0x34a   : > { %6038 = vmatpush1.bf16.msra.mxu0 %v14328_v62  ;;  %v14488_v62 = vcombine.low %v1198_v48, %v1206_v49  ;;  %v1422_v9 = vld [vmem:[#allocation5 + $0x14a8] sm:$0xff]  ;;  %v847_v48 = vld [vmem:[#allocation5 + $0x2b0] sm:$0xff] }
 0x34b   : > { %6079 = vmatpush1.bf16.msra.mxu1 %v14584_v0  ;;  %6039 = vmatprep.subr.bf16.mxu0 %v14313_v15  ;;  %v14744_v0 = vcombine.low %v1454_v51, %v1462_v52  ;;  %v14473_v15 = vcombine.high %v1182_v58, %v1190_v60  ;;  %v1430_v13 = vld [vmem:[#allocation5 + $0x14e8] sm:$0xff]  ;;  %v855_v49 = vld [vmem:[#allocation5 + $0x2f0] sm:$0xff] }
 0x34c   : > { %6080 = vmatprep.subr.bf16.mxu1 %v14569_v6  ;;  %v14729_v6 = vcombine.high %v1438_v22, %v1446_v61  ;;  %v1150_v19 = vld [vmem:[#allocation5 + $0xc28] sm:$0xff]  ;;  %v1103_v52 = vld [vmem:[#allocation5 + $0xab0] sm:$0xff] }
 0x34d   : > { %v1158_v20 = vld [vmem:[#allocation5 + $0xc68] sm:$0xff] }
 0x34e   : > { %6040 = vmatpush1.bf16.msra.mxu0 %v14312_v24  ;;  %v14472_v24 = vcombine.low %v1182_v58, %v1190_v60  ;;  %v1406_v21 = vld [vmem:[#allocation5 + $0x1428] sm:$0xff]  ;;  %v14410_v60 = vcombine.low %v1119_v41, %v1127_v5 }
 0x34f   : > { %6081 = vmatpush1.bf16.msra.mxu1 %v14568_v37  ;;  %6041 = vmatprep.subr.bf16.mxu0 %v14553_v17  ;;  %v14728_v37 = vcombine.low %v1438_v22, %v1446_v61  ;;  %v14457_v17 = vcombine.high %v1166_v7, %v1174_v8  ;;  %v1414_v23 = vld [vmem:[#allocation5 + $0x1468] sm:$0xff]  ;;  %v14139_v22 = vcombine.high %v847_v48, %v855_v49 }
 0x350   : > { %6082 = vmatprep.subr.bf16.mxu1 %v14809_v18  ;;  %v14713_v18 = vcombine.high %v1422_v9, %v1430_v13 }
 0x352   : > { %6042 = vmatpush2.bf16.msra.mxu0 %v14552_v32  ;;  %v14456_v32 = vcombine.low %v1166_v7, %v1174_v8  ;;  %v839_v7 = vld [vmem:[#allocation5 + $0x270] sm:$0xff] }
 0x353   : > { %6083 = vmatpush2.bf16.msra.mxu1 %v14808_v47  ;;  %6043 = vmatprep.subr.bf16.mxu0 %v14537_v25  ;;  %v14712_v47 = vcombine.low %v1422_v9, %v1430_v13  ;;  %v14441_v25 = vcombine.high %v1150_v19, %v1158_v20  ;;  %v1087_v8 = vld [vmem:[#allocation5 + $0xa30] sm:$0xff] }
 0x354   : > { %6084 = vmatprep.subr.bf16.mxu1 %v14793_v26  ;;  %v14697_v26 = vcombine.high %v1406_v21, %v1414_v23  ;;  %v1095_v9 = vld [vmem:[#allocation5 + $0xa70] sm:$0xff] }
 0x356   : > { %6044 = vmatpush2.bf16.msra.mxu0 %v14536_v34  ;;  %v14440_v34 = vcombine.low %v1150_v19, %v1158_v20  ;;  %v14379_v20 = vcombine.high %v1087_v8, %v1095_v9 }
 0x357   : > { %6085 = vmatpush2.bf16.msra.mxu1 %v14792_v35  ;;  %6045 = vmatprep.subr.bf16.mxu0 %v14521_v36  ;;  %v14696_v35 = vcombine.low %v1406_v21, %v1414_v23  ;;  %v14171_v36 = vcombine.high %v879_v27, %v887_v28  ;;  %v815_v21 = vld [vmem:[#allocation5 + $0x1b0] sm:$0xff] }
 0x358   : > { %6086 = vmatprep.subr.bf16.mxu1 %v14777_v38  ;;  %v14427_v38 = vcombine.high %v1135_v29, %v1143_v31  ;;  %v823_v23 = vld [vmem:[#allocation5 + $0x1f0] sm:$0xff] }
 0x35a   : > { %6046 = vmatpush2.bf16.msra.mxu0 %v14520_v42  ;;  %v14170_v42 = vcombine.low %v879_v27, %v887_v28  ;;  %v14107_v27 = vcombine.high %v815_v21, %v823_v23 }
 0x35b   : > { %6087 = vmatpush2.bf16.msra.mxu1 %v14776_v43  ;;  %6047 = vmatprep.subr.bf16.mxu0 %v14505_v45  ;;  %v14426_v43 = vcombine.low %v1135_v29, %v1143_v31  ;;  %v14155_v45 = vcombine.high %v863_v39, %v871_v40  ;;  %v799_v29 = vld [vmem:[#allocation5 + $0x130] sm:$0xff] }
 0x35c   : > { %6088 = vmatprep.subr.bf16.mxu1 %v14761_v46  ;;  %v14411_v46 = vcombine.high %v1119_v41, %v1127_v5  ;;  %v807_v31 = vld [vmem:[#allocation5 + $0x170] sm:$0xff] }
 0x35d   : > { %v783_v41 = vld [vmem:[#allocation5 + $0xb0] sm:$0xff] }
 0x35e   : > { %6048 = vmatpush2.bf16.msra.mxu0 %v14504_v55  ;;  %v1111_v55 = vld [vmem:[#allocation5 + $0xaf0] sm:$0xff] }
 0x35f   : > { %6089 = vmatpush2.bf16.msra.mxu1 %v14760_v56  ;;  %6049 = vmatprep.subr.bf16.mxu0 %v14489_v4  ;;  %v791_v5 = vld [vmem:[#allocation5 + $0xf0] sm:$0xff] }
 0x360   : > { %6090 = vmatprep.subr.bf16.mxu1 %v14745_v57  ;;  %v14154_v57 = vcombine.low %v863_v39, %v871_v40  ;;  %v14091_v39 = vcombine.high %v799_v29, %v807_v31 }
 0x362   : > { %6050 = vmatpush2.bf16.msra.mxu0 %v14488_v62 }
 0x363   : > { %6091 = vmatpush2.bf16.msra.mxu1 %v14744_v0  ;;  %6051 = vmatprep.subr.bf16.mxu0 %v14473_v15  ;;  %v14395_v15 = vcombine.high %v1103_v52, %v1111_v55 }
 0x364   : > { %6092 = vmatprep.subr.bf16.mxu1 %v14729_v6  ;;  %v831_v6 = vld [vmem:[#allocation5 + $0x230] sm:$0xff] }
 0x366   : > { %6052 = vmatpush2.bf16.msra.mxu0 %v14472_v24 }
 0x367   : > { %6093 = vmatpush2.bf16.msra.mxu1 %v14728_v37  ;;  %6053 = vmatprep.subr.bf16.mxu0 %v14457_v17  ;;  %v14138_v37 = vcombine.low %v847_v48, %v855_v49  ;;  %v14075_v48 = vcombine.high %v783_v41, %v791_v5 }
 0x368   : > { %6094 = vmatprep.subr.bf16.mxu1 %v14713_v18  ;;  %v14123_v18 = vcombine.high %v831_v6, %v839_v7 }
 0x36a   : > { %6054 = vmatpush2.bf16.msra.mxu0 %v14456_v32  ;;  %v1071_v32 = vld [vmem:[#allocation5 + $0x9b0] sm:$0xff] }
 0x36b   : > { %6095 = vmatpush2.bf16.msra.mxu1 %v14712_v47  ;;  %6055 = vmatprep.subr.bf16.mxu0 %v14441_v25  ;;  %v1079_v47 = vld [vmem:[#allocation5 + $0x9f0] sm:$0xff]  ;;  %v14122_v25 = vcombine.low %v831_v6, %v839_v7 }
 0x36c   : > { %6096 = vmatprep.subr.bf16.mxu1 %v14697_v26  ;;  %v14378_v26 = vcombine.low %v1087_v8, %v1095_v9  ;;  %v14363_v28 = vcombine.high %v1071_v32, %v1079_v47  ;;  %v991_v9 = vld [vmem:[#allocation5 + $0x730] sm:$0xff] }
 0x36e   : > { %6056 = vmatpush2.bf16.msra.mxu0 %v14440_v34  ;;  %v1055_v34 = vld [vmem:[#allocation5 + $0x930] sm:$0xff] }
 0x36f   : > { %6097 = vmatpush2.bf16.msra.mxu1 %v14696_v35  ;;  %6107 = vmatprep.subr.bf16.mxu0 %v14171_v36  ;;  %v1063_v35 = vld [vmem:[#allocation5 + $0x970] sm:$0xff]  ;;  %v14106_v36 = vcombine.low %v815_v21, %v823_v23 }
 0x370   : > { %6148 = vmatprep.subr.bf16.mxu1 %v14427_v38  ;;  %v14362_v38 = vcombine.low %v1071_v32, %v1079_v47  ;;  %v14347_v40 = vcombine.high %v1055_v34, %v1063_v35  ;;  %v975_v21 = vld [vmem:[#allocation5 + $0x6b0] sm:$0xff] }
 0x371   : > { %v5813_v51 = vpop.f32.mrf.mxu0  ;;  %6058 = vmatmul.mubr.bf16.vlgmr.msra.gmra.mxu0 %v18017_v33  ;;  %v983_v23 = vld [vmem:[#allocation5 + $0x6f0] sm:$0xff] }
 0x372   : > { %v5814_v56 = vadd.f32 %v5813_v51, %v18081_v2  ;;  %v5854_v4 = vpop.f32.mrf.mxu1  ;;  %6099 = vmatmul.mubr.bf16.vlgmr.msra.gmra.mxu1 %v18027_v50  ;;  %6108 = vmatpush1.bf16.msra.mxu0 %v14170_v42  ;;  %v1039_v42 = vld [vmem:[#allocation5 + $0x8b0] sm:$0xff] }
 0x373   : > { %6149 = vmatpush1.bf16.msra.mxu1 %v14426_v43  ;;  %v5815_v58 = vpop.f32.mrf.mxu0  ;;  %6109 = vmatprep.subr.bf16.mxu0 %v14155_v45  ;;  %v1047_v43 = vld [vmem:[#allocation5 + $0x8f0] sm:$0xff]  ;;  %v14090_v45 = vcombine.low %v799_v29, %v807_v31 }
 0x374   : > { %v18094_v61 = vadd.f32 %v5854_v4, %v5814_v56  ;;  %v5816_v62 = vadd.f32 %v5815_v58, %v18087_v12  ;;  %v5856_v0 = vpop.f32.mrf.mxu1  ;;  %6150 = vmatprep.subr.bf16.mxu1 %v14411_v46  ;;  %6139 = vmatprep.mubr.bf16.mxu0 %v17998_v11  ;;  %v14394_v12 = vcombine.low %v1103_v52, %v1111_v55  ;;  %v767_v51 = vld [vmem:[#allocation5 + $0x30] sm:$0xff] }
 0x375   : > { %v5817_v2 = vpop.f32.mrf.mxu0  ;;  %6180 = vmatprep.mubr.bf16.mxu1 %v18003_v16  ;;  %v14346_v46 = vcombine.low %v1055_v34, %v1063_v35  ;;  %v14331_v49 = vcombine.high %v1039_v42, %v1047_v43  ;;  %v775_v52 = vld [vmem:[#allocation5 + $0x70] sm:$0xff]  ;;  %v14074_v4 = vcombine.low %v783_v41, %v791_v5 }
 0x376   : > { %v18099_v13 = vadd.f32 %v5856_v0, %v5816_v62  ;;  %v5858_v24 = vpop.f32.mrf.mxu1  ;;  %6110 = vmatpush1.bf16.msra.mxu0 %v14154_v57  ;;  %v1023_v55 = vld [vmem:[#allocation5 + $0x830] sm:$0xff]  ;;  %v14330_v57 = vcombine.low %v1039_v42, %v1047_v43  ;;  %v14059_v58 = vcombine.high %v767_v51, %v775_v52  ;;  %v14058_v6 = vcombine.low %v767_v51, %v775_v52 }
 0x377   : > { %6151 = vmatpush1.bf16.msra.mxu1 %v14410_v60  ;;  %v5818_v17 = vpop.f32.mrf.mxu0  ;;  %6111 = vmatprep.subr.bf16.mxu0 %v14139_v22  ;;  %v1031_v56 = vld [vmem:[#allocation5 + $0x870] sm:$0xff] }
 0x378   : > { %v5859_v19 = vpop.f32.mrf.mxu1  ;;  %6152 = vmatprep.subr.bf16.mxu1 %v14395_v15  ;;  %v14315_v60 = vcombine.high %v1023_v55, %v1031_v56  ;;  %v1007_v22 = vld [vmem:[#allocation5 + $0x7b0] sm:$0xff]  ;;  %v14314_v7 = vcombine.low %v1023_v55, %v1031_v56 }
 0x379   : > { %v1015_v62 = vld [vmem:[#allocation5 + $0x7f0] sm:$0xff] }
 0x37a   : > { %6112 = vmatpush1.bf16.msra.mxu0 %v14138_v37  ;;  %v1263_v0 = vld [vmem:[#allocation5 + $0xfb0] sm:$0xff]  ;;  %v14299_v2 = vcombine.high %v1007_v22, %v1015_v62 }
 0x37b   : > { %6153 = vmatpush1.bf16.msra.mxu1 %v14394_v12  ;;  %6113 = vmatprep.subr.bf16.mxu0 %v14123_v18  ;;  %v1271_v15 = vld [vmem:[#allocation5 + $0xff0] sm:$0xff]  ;;  %v14298_v12 = vcombine.low %v1007_v22, %v1015_v62 }
 0x37c   : > { %6154 = vmatprep.subr.bf16.mxu1 %v14379_v20  ;;  %v14555_v8 = vcombine.high %v1263_v0, %v1271_v15  ;;  %v999_v24 = vld [vmem:[#allocation5 + $0x770] sm:$0xff]  ;;  %v14554_v18 = vcombine.low %v1263_v0, %v1271_v15 }
 0x37d   : > { %v1247_v37 = vld [vmem:[#allocation5 + $0xf30] sm:$0xff]  ;;  %v14283_v19 = vcombine.high %v991_v9, %v999_v24 }
 0x37e   : > { %6114 = vmatpush1.bf16.msra.mxu0 %v14122_v25  ;;  %v1255_v17 = vld [vmem:[#allocation5 + $0xf70] sm:$0xff]  ;;  %v14282_v25 = vcombine.low %v991_v9, %v999_v24 }
 0x37f   : > { %6155 = vmatpush1.bf16.msra.mxu1 %v14378_v26  ;;  %6115 = vmatprep.subr.bf16.mxu0 %v14107_v27  ;;  %v14539_v20 = vcombine.high %v1247_v37, %v1255_v17  ;;  %v1231_v32 = vld [vmem:[#allocation5 + $0xeb0] sm:$0xff]  ;;  %v14538_v26 = vcombine.low %v1247_v37, %v1255_v17  ;;  %v14267_v27 = vcombine.high %v975_v21, %v983_v23 }
 0x380   : > { %6156 = vmatprep.subr.bf16.mxu1 %v14363_v28  ;;  %v1239_v47 = vld [vmem:[#allocation5 + $0xef0] sm:$0xff] }
 0x381   : > { %v14523_v28 = vcombine.high %v1231_v32, %v1239_v47  ;;  %v959_v29 = vld [vmem:[#allocation5 + $0x630] sm:$0xff] }
 0x382   : > { %6116 = vmatpush1.bf16.msra.mxu0 %v14106_v36  ;;  %v967_v31 = vld [vmem:[#allocation5 + $0x670] sm:$0xff]  ;;  %v14266_v36 = vcombine.low %v975_v21, %v983_v23 }
 0x383   : > { %6157 = vmatpush1.bf16.msra.mxu1 %v14362_v38  ;;  %6117 = vmatprep.subr.bf16.mxu0 %v14091_v39  ;;  %v1215_v34 = vld [vmem:[#allocation5 + $0xe30] sm:$0xff]  ;;  %v14522_v38 = vcombine.low %v1231_v32, %v1239_v47  ;;  %v14251_v39 = vcombine.high %v959_v29, %v967_v31  ;;  %v880_v32 = vld [vmem:[#allocation5 + $0x3b8] sm:$0xff] }
 0x384   : > { %6158 = vmatprep.subr.bf16.mxu1 %v14347_v40  ;;  %v1223_v35 = vld [vmem:[#allocation5 + $0xe70] sm:$0xff]  ;;  %v888_v47 = vld [vmem:[#allocation5 + $0x3f8] sm:$0xff] }
 0x385   : > { %v14507_v40 = vcombine.high %v1215_v34, %v1223_v35  ;;  %v943_v41 = vld [vmem:[#allocation5 + $0x5b0] sm:$0xff] }
 0x386   : > { %6118 = vmatpush1.bf16.msra.mxu0 %v14090_v45  ;;  %v951_v5 = vld [vmem:[#allocation5 + $0x5f0] sm:$0xff]  ;;  %v14250_v45 = vcombine.low %v959_v29, %v967_v31 }
 0x387   : > { %6159 = vmatpush1.bf16.msra.mxu1 %v14346_v46  ;;  %6119 = vmatprep.subr.bf16.mxu0 %v14075_v48  ;;  %v1199_v42 = vld [vmem:[#allocation5 + $0xdb0] sm:$0xff]  ;;  %v14506_v46 = vcombine.low %v1215_v34, %v1223_v35  ;;  %v14235_v48 = vcombine.high %v943_v41, %v951_v5  ;;  %v864_v34 = vld [vmem:[#allocation5 + $0x338] sm:$0xff] }
 0x388   : > { %6160 = vmatprep.subr.bf16.mxu1 %v14331_v49  ;;  %v1207_v43 = vld [vmem:[#allocation5 + $0xdf0] sm:$0xff]  ;;  %v872_v35 = vld [vmem:[#allocation5 + $0x378] sm:$0xff] }
 0x389   : > { %v14491_v49 = vcombine.high %v1199_v42, %v1207_v43  ;;  %v927_v51 = vld [vmem:[#allocation5 + $0x530] sm:$0xff] }
 0x38a   : > { %6120 = vmatpush1.bf16.msra.mxu0 %v14074_v4  ;;  %v935_v52 = vld [vmem:[#allocation5 + $0x570] sm:$0xff]  ;;  %v14234_v4 = vcombine.low %v943_v41, %v951_v5 }
 0x38b   : > { %6161 = vmatpush1.bf16.msra.mxu1 %v14330_v57  ;;  %6121 = vmatprep.subr.bf16.mxu0 %v14059_v58  ;;  %v1183_v55 = vld [vmem:[#allocation5 + $0xd30] sm:$0xff]  ;;  %v14490_v57 = vcombine.low %v1199_v42, %v1207_v43  ;;  %v14219_v58 = vcombine.high %v927_v51, %v935_v52  ;;  %v848_v43 = vld [vmem:[#allocation5 + $0x2b8] sm:$0xff] }
 0x38c   : > { %6162 = vmatprep.subr.bf16.mxu1 %v14315_v60  ;;  %v1191_v56 = vld [vmem:[#allocation5 + $0xd70] sm:$0xff] }
 0x38d   : > { %v14475_v60 = vcombine.high %v1183_v55, %v1191_v56  ;;  %v911_v22 = vld [vmem:[#allocation5 + $0x4b0] sm:$0xff] }
 0x38e   : > { %6122 = vmatpush1.bf16.msra.mxu0 %v14058_v6  ;;  %v919_v62 = vld [vmem:[#allocation5 + $0x4f0] sm:$0xff]  ;;  %v14218_v6 = vcombine.low %v927_v51, %v935_v52  ;;  %v14156_v52 = vcombine.low %v864_v34, %v872_v35 }
 0x38f   : > { %6163 = vmatpush1.bf16.msra.mxu1 %v14314_v7  ;;  %6123 = vmatprep.subr.bf16.mxu0 %v14299_v2  ;;  %v1167_v0 = vld [vmem:[#allocation5 + $0xcb0] sm:$0xff]  ;;  %v14474_v7 = vcombine.low %v1183_v55, %v1191_v56  ;;  %v14203_v2 = vcombine.high %v911_v22, %v919_v62 }
 0x390   : > { %6164 = vmatprep.subr.bf16.mxu1 %v14555_v8  ;;  %v1175_v15 = vld [vmem:[#allocation5 + $0xcf0] sm:$0xff] }
 0x391   : > { %v14459_v8 = vcombine.high %v1167_v0, %v1175_v15  ;;  %v895_v9 = vld [vmem:[#allocation5 + $0x430] sm:$0xff] }
 0x392   : > { %6124 = vmatpush2.bf16.msra.mxu0 %v14298_v12  ;;  %v903_v24 = vld [vmem:[#allocation5 + $0x470] sm:$0xff]  ;;  %v14202_v12 = vcombine.low %v911_v22, %v919_v62  ;;  %v832_v62 = vld [vmem:[#allocation5 + $0x238] sm:$0xff] }
 0x393   : > { %6165 = vmatpush2.bf16.msra.mxu1 %v14554_v18  ;;  %6125 = vmatprep.subr.bf16.mxu0 %v14283_v19  ;;  %v1151_v37 = vld [vmem:[#allocation5 + $0xc30] sm:$0xff]  ;;  %v14458_v18 = vcombine.low %v1167_v0, %v1175_v15  ;;  %v14187_v19 = vcombine.high %v895_v9, %v903_v24  ;;  %v840_v0 = vld [vmem:[#allocation5 + $0x278] sm:$0xff] }
 0x394   : > { %6166 = vmatprep.subr.bf16.mxu1 %v14539_v20  ;;  %v1159_v17 = vld [vmem:[#allocation5 + $0xc70] sm:$0xff] }
 0x395   : > { %v14443_v20 = vcombine.high %v1151_v37, %v1159_v17  ;;  %v1391_v21 = vld [vmem:[#allocation5 + $0x13b0] sm:$0xff] }
 0x396   : > { %6126 = vmatpush2.bf16.msra.mxu0 %v14282_v25  ;;  %v1399_v23 = vld [vmem:[#allocation5 + $0x13f0] sm:$0xff]  ;;  %v14186_v25 = vcombine.low %v895_v9, %v903_v24  ;;  %v14125_v24 = vcombine.high %v832_v62, %v840_v0 }
 0x397   : > { %6167 = vmatpush2.bf16.msra.mxu1 %v14538_v26  ;;  %6127 = vmatprep.subr.bf16.mxu0 %v14267_v27  ;;  %v14442_v26 = vcombine.low %v1151_v37, %v1159_v17  ;;  %v14683_v27 = vcombine.high %v1391_v21, %v1399_v23  ;;  %v1375_v29 = vld [vmem:[#allocation5 + $0x1330] sm:$0xff] }
 0x398   : > { %6168 = vmatprep.subr.bf16.mxu1 %v14523_v28  ;;  %v14173_v28 = vcombine.high %v880_v32, %v888_v47  ;;  %v1383_v31 = vld [vmem:[#allocation5 + $0x1370] sm:$0xff] }
 0x399   : > { %v1359_v41 = vld [vmem:[#allocation5 + $0x12b0] sm:$0xff] }
 0x39a   : > { %6128 = vmatpush2.bf16.msra.mxu0 %v14266_v36  ;;  %v14682_v36 = vcombine.low %v1391_v21, %v1399_v23  ;;  %v1367_v5 = vld [vmem:[#allocation5 + $0x12f0] sm:$0xff] }
 0x39b   : > { %6169 = vmatpush2.bf16.msra.mxu1 %v14522_v38  ;;  %6129 = vmatprep.subr.bf16.mxu0 %v14251_v39  ;;  %v14172_v38 = vcombine.low %v880_v32, %v888_v47  ;;  %v14667_v39 = vcombine.high %v1375_v29, %v1383_v31  ;;  %v14651_v55 = vcombine.high %v1359_v41, %v1367_v5  ;;  %v1327_v37 = vld [vmem:[#allocation5 + $0x11b0] sm:$0xff]  ;;  %v800_v47 = vld [vmem:[#allocation5 + $0x138] sm:$0xff] }
 0x39c   : > { %6170 = vmatprep.subr.bf16.mxu1 %v14507_v40  ;;  %v14157_v40 = vcombine.high %v864_v34, %v872_v35  ;;  %v1335_v17 = vld [vmem:[#allocation5 + $0x11f0] sm:$0xff]  ;;  %v784_v35 = vld [vmem:[#allocation5 + $0xb8] sm:$0xff] }
 0x39d   : > { %v1311_v23 = vld [vmem:[#allocation5 + $0x1130] sm:$0xff] }
 0x39e   : > { %6130 = vmatpush2.bf16.msra.mxu0 %v14250_v45  ;;  %v856_v45 = vld [vmem:[#allocation5 + $0x2f8] sm:$0xff]  ;;  %v1319_v32 = vld [vmem:[#allocation5 + $0x1170] sm:$0xff] }
 0x39f   : > { %6171 = vmatpush2.bf16.msra.mxu1 %v14506_v46  ;;  %6131 = vmatprep.subr.bf16.mxu0 %v14235_v48  ;;  %v14666_v48 = vcombine.low %v1375_v29, %v1383_v31  ;;  %v1295_v31 = vld [vmem:[#allocation5 + $0x10b0] sm:$0xff] }
 0x3a0   : > { %6172 = vmatprep.subr.bf16.mxu1 %v14491_v49  ;;  %v1303_v34 = vld [vmem:[#allocation5 + $0x10f0] sm:$0xff] }
 0x3a2   : > { %6132 = vmatpush2.bf16.msra.mxu0 %v14234_v4  ;;  %v14141_v4 = vcombine.high %v848_v43, %v856_v45 }
 0x3a3   : > { %6173 = vmatpush2.bf16.msra.mxu1 %v14490_v57  ;;  %6133 = vmatprep.subr.bf16.mxu0 %v14219_v58  ;;  %v1343_v57 = vld [vmem:[#allocation5 + $0x1230] sm:$0xff] }
 0x3a4   : > { %6174 = vmatprep.subr.bf16.mxu1 %v14475_v60  ;;  %v1351_v58 = vld [vmem:[#allocation5 + $0x1270] sm:$0xff] }
 0x3a6   : > { %6134 = vmatpush2.bf16.msra.mxu0 %v14218_v6  ;;  %v14650_v6 = vcombine.low %v1359_v41, %v1367_v5  ;;  %v1279_v5 = vld [vmem:[#allocation5 + $0x1030] sm:$0xff] }
 0x3a7   : > { %6175 = vmatpush2.bf16.msra.mxu1 %v14474_v7  ;;  %6135 = vmatprep.subr.bf16.mxu0 %v14203_v2  ;;  %v14140_v2 = vcombine.low %v848_v43, %v856_v45  ;;  %v768_v43 = vld [vmem:[#allocation5 + $0x38] sm:$0xff] }
 0x3a8   : > { %6176 = vmatprep.subr.bf16.mxu1 %v14459_v8  ;;  %v14635_v8 = vcombine.high %v1343_v57, %v1351_v58  ;;  %v776_v45 = vld [vmem:[#allocation5 + $0x78] sm:$0xff] }
 0x3aa   : > { %6136 = vmatpush2.bf16.msra.mxu0 %v14202_v12  ;;  %v816_v12 = vld [vmem:[#allocation5 + $0x1b8] sm:$0xff] }
 0x3ab   : > { %6177 = vmatpush2.bf16.msra.mxu1 %v14458_v18  ;;  %6137 = vmatprep.subr.bf16.mxu0 %v14187_v19  ;;  %v824_v18 = vld [vmem:[#allocation5 + $0x1f8] sm:$0xff]  ;;  %v14634_v19 = vcombine.low %v1343_v57, %v1351_v58 }
 0x3ac   : > { %6178 = vmatprep.subr.bf16.mxu1 %v14443_v20  ;;  %v14619_v20 = vcombine.high %v1327_v37, %v1335_v17  ;;  %v14109_v21 = vcombine.high %v816_v12, %v824_v18  ;;  %v1016_v57 = vld [vmem:[#allocation5 + $0x7f8] sm:$0xff] }
 0x3ae   : > { %6138 = vmatpush2.bf16.msra.mxu0 %v14186_v25  ;;  %v808_v25 = vld [vmem:[#allocation5 + $0x178] sm:$0xff] }
 0x3af   : > { %6179 = vmatpush2.bf16.msra.mxu1 %v14442_v26  ;;  %6189 = vmatprep.subr.bf16.mxu0 %v14683_v27  ;;  %v14618_v26 = vcombine.low %v1327_v37, %v1335_v17  ;;  %v14108_v27 = vcombine.low %v816_v12, %v824_v18  ;;  %v14093_v29 = vcombine.high %v800_v47, %v808_v25  ;;  %v1487_v17 = vld [vmem:[#allocation5 + $0x16b0] sm:$0xff]  ;;  %v976_v18 = vld [vmem:[#allocation5 + $0x6b8] sm:$0xff] }
 0x3b0   : > { %6230 = vmatprep.subr.bf16.mxu1 %v14173_v28  ;;  %v14603_v28 = vcombine.high %v1311_v23, %v1319_v32  ;;  %v1495_v12 = vld [vmem:[#allocation5 + $0x16f0] sm:$0xff] }
 0x3b1   : > { %v5895_v42 = vpop.f32.mrf.mxu0  ;;  %6140 = vmatmul.mubr.bf16.vlgmr.msra.gmra.mxu0 %v18013_v30 }
 0x3b2   : > { %v5936_v46 = vpop.f32.mrf.mxu1  ;;  %6181 = vmatmul.mubr.bf16.vlgmr.msra.gmra.mxu1 %v18017_v33  ;;  %6190 = vmatpush1.bf16.msra.mxu0 %v14682_v36  ;;  %v792_v36 = vld [vmem:[#allocation5 + $0xf8] sm:$0xff] }
 0x3b3   : > { %v18103_v49 = vadd.f32 %v5936_v46, %v5895_v42  ;;  %6231 = vmatpush1.bf16.msra.mxu1 %v14172_v38  ;;  %v5897_v51 = vpop.f32.mrf.mxu0  ;;  %6191 = vmatprep.subr.bf16.mxu0 %v14667_v39  ;;  %v14602_v38 = vcombine.low %v1311_v23, %v1319_v32  ;;  %v14092_v39 = vcombine.low %v800_v47, %v808_v25  ;;  %v1287_v42 = vld [vmem:[#allocation5 + $0x1070] sm:$0xff]  ;;  %v960_v25 = vld [vmem:[#allocation5 + $0x638] sm:$0xff] }
 0x3b4   : > { %v5938_v56 = vpop.f32.mrf.mxu1  ;;  %6232 = vmatprep.subr.bf16.mxu1 %v14157_v40  ;;  %6221 = vmatprep.mubr.bf16.mxu0 %v18019_v63  ;;  %v14587_v40 = vcombine.high %v1295_v31, %v1303_v34  ;;  %v14077_v41 = vcombine.high %v784_v35, %v792_v36  ;;  %v14586_v46 = vcombine.low %v1295_v31, %v1303_v34  ;;  %v1471_v32 = vld [vmem:[#allocation5 + $0x1630] sm:$0xff] }
 0x3b5   : > { %v18106_v60 = vadd.f32 %v5938_v56, %v5897_v51  ;;  %v5899_v22 = vpop.f32.mrf.mxu0  ;;  %6262 = vmatprep.mubr.bf16.mxu1 %v17998_v11  ;;  %v14124_v11 = vcombine.low %v832_v62, %v840_v0  ;;  %v14571_v51 = vcombine.high %v1279_v5, %v1287_v42  ;;  %v1527_v56 = vld [vmem:[#allocation5 + $0x17f0] sm:$0xff]  ;;  %v14570_v58 = vcombine.low %v1279_v5, %v1287_v42 }
 0x3b6   : > { %v5940_v15 = vpop.f32.mrf.mxu1  ;;  %6192 = vmatpush1.bf16.msra.mxu0 %v14666_v48  ;;  %v14076_v48 = vcombine.low %v784_v35, %v792_v36  ;;  %v14060_v22 = vcombine.low %v768_v43, %v776_v45  ;;  %v1479_v47 = vld [vmem:[#allocation5 + $0x1670] sm:$0xff]  ;;  %v944_v36 = vld [vmem:[#allocation5 + $0x5b8] sm:$0xff] }
 0x3b7   : > { %6233 = vmatpush1.bf16.msra.mxu1 %v14156_v52  ;;  %v5900_v7 = vpop.f32.mrf.mxu0  ;;  %6193 = vmatprep.subr.bf16.mxu0 %v14651_v55  ;;  %v14061_v52 = vcombine.high %v768_v43, %v776_v45  ;;  %v1519_v55 = vld [vmem:[#allocation5 + $0x17b0] sm:$0xff]  ;;  %v928_v45 = vld [vmem:[#allocation5 + $0x538] sm:$0xff] }
 0x3b8   : > { %v5941_v9 = vpop.f32.mrf.mxu1  ;;  %6234 = vmatprep.subr.bf16.mxu1 %v14141_v4  ;;  %v1008_v4 = vld [vmem:[#allocation5 + $0x7b8] sm:$0xff]  ;;  %v14811_v62 = vcombine.high %v1519_v55, %v1527_v56  ;;  %v1503_v15 = vld [vmem:[#allocation5 + $0x1730] sm:$0xff] }
 0x3b9   : > { %v14301_v0 = vcombine.high %v1008_v4, %v1016_v57  ;;  %v992_v7 = vld [vmem:[#allocation5 + $0x738] sm:$0xff]  ;;  %v14300_v9 = vcombine.low %v1008_v4, %v1016_v57  ;;  %v1455_v34 = vld [vmem:[#allocation5 + $0x15b0] sm:$0xff] }
 0x3ba   : > { %6194 = vmatpush1.bf16.msra.mxu0 %v14650_v6  ;;  %v1511_v6 = vld [vmem:[#allocation5 + $0x1770] sm:$0xff]  ;;  %v912_v57 = vld [vmem:[#allocation5 + $0x4b8] sm:$0xff] }
 0x3bb   : > { %6235 = vmatpush1.bf16.msra.mxu1 %v14140_v2  ;;  %6195 = vmatprep.subr.bf16.mxu0 %v14635_v8  ;;  %v1000_v2 = vld [vmem:[#allocation5 + $0x778] sm:$0xff]  ;;  %v14810_v8 = vcombine.low %v1519_v55, %v1527_v56  ;;  %v1463_v35 = vld [vmem:[#allocation5 + $0x15f0] sm:$0xff] }
 0x3bc   : > { %6236 = vmatprep.subr.bf16.mxu1 %v14125_v24  ;;  %v14795_v24 = vcombine.high %v1503_v15, %v1511_v6  ;;  %v14285_v37 = vcombine.high %v992_v7, %v1000_v2  ;;  %v1439_v42 = vld [vmem:[#allocation5 + $0x1530] sm:$0xff] }
 0x3bd   : > { %v1447_v43 = vld [vmem:[#allocation5 + $0x1570] sm:$0xff] }
 0x3be   : > { %6196 = vmatpush1.bf16.msra.mxu0 %v14634_v19  ;;  %v984_v19 = vld [vmem:[#allocation5 + $0x6f8] sm:$0xff]  ;;  %v1423_v56 = vld [vmem:[#allocation5 + $0x14b0] sm:$0xff] }
 0x3bf   : > { %6237 = vmatpush1.bf16.msra.mxu1 %v14124_v11  ;;  %6197 = vmatprep.subr.bf16.mxu0 %v14619_v20  ;;  %v14794_v11 = vcombine.low %v1503_v15, %v1511_v6  ;;  %v14284_v20 = vcombine.low %v992_v7, %v1000_v2  ;;  %v14269_v23 = vcombine.high %v976_v18, %v984_v19  ;;  %v1431_v4 = vld [vmem:[#allocation5 + $0x14f0] sm:$0xff]  ;;  %v896_v2 = vld [vmem:[#allocation5 + $0x438] sm:$0xff] }
 0x3c0   : > { %6238 = vmatprep.subr.bf16.mxu1 %v14109_v21  ;;  %v14779_v21 = vcombine.high %v1487_v17, %v1495_v12  ;;  %v1407_v6 = vld [vmem:[#allocation5 + $0x1430] sm:$0xff] }
 0x3c1   : > { %v1415_v7 = vld [vmem:[#allocation5 + $0x1470] sm:$0xff] }
 0x3c2   : > { %6198 = vmatpush1.bf16.msra.mxu0 %v14618_v26  ;;  %v968_v26 = vld [vmem:[#allocation5 + $0x678] sm:$0xff] }
 0x3c3   : > { %6239 = vmatpush1.bf16.msra.mxu1 %v14108_v27  ;;  %6199 = vmatprep.subr.bf16.mxu0 %v14603_v28  ;;  %v14778_v27 = vcombine.low %v1487_v17, %v1495_v12  ;;  %v14268_v28 = vcombine.low %v976_v18, %v984_v19  ;;  %v14253_v31 = vcombine.high %v960_v25, %v968_v26  ;;  %v1136_v12 = vld [vmem:[#allocation5 + $0xbb8] sm:$0xff] }
 0x3c4   : > { %6240 = vmatprep.subr.bf16.mxu1 %v14093_v29  ;;  %v14763_v29 = vcombine.high %v1471_v32, %v1479_v47  ;;  %v1144_v18 = vld [vmem:[#allocation5 + $0xbf8] sm:$0xff] }
 0x3c5   : > { %v1392_v19 = vld [vmem:[#allocation5 + $0x13b8] sm:$0xff] }
 0x3c6   : > { %6200 = vmatpush1.bf16.msra.mxu0 %v14602_v38  ;;  %v952_v38 = vld [vmem:[#allocation5 + $0x5f8] sm:$0xff] }
 0x3c7   : > { %6241 = vmatpush1.bf16.msra.mxu1 %v14092_v39  ;;  %6201 = vmatprep.subr.bf16.mxu0 %v14587_v40  ;;  %v14762_v39 = vcombine.low %v1471_v32, %v1479_v47  ;;  %v14252_v40 = vcombine.low %v960_v25, %v968_v26  ;;  %v14237_v5 = vcombine.high %v944_v36, %v952_v38  ;;  %v1120_v47 = vld [vmem:[#allocation5 + $0xb38] sm:$0xff] }
 0x3c8   : > { %6242 = vmatprep.subr.bf16.mxu1 %v14077_v41  ;;  %v14747_v41 = vcombine.high %v1455_v34, %v1463_v35  ;;  %v1128_v25 = vld [vmem:[#allocation5 + $0xb78] sm:$0xff] }
 0x3c9   : > { %v1376_v26 = vld [vmem:[#allocation5 + $0x1338] sm:$0xff] }
 0x3ca   : > { %6202 = vmatpush1.bf16.msra.mxu0 %v14586_v46  ;;  %v936_v46 = vld [vmem:[#allocation5 + $0x578] sm:$0xff] }
 0x3cb   : > { %6243 = vmatpush1.bf16.msra.mxu1 %v14076_v48  ;;  %6203 = vmatprep.subr.bf16.mxu0 %v14571_v51  ;;  %v14746_v48 = vcombine.low %v1455_v34, %v1463_v35  ;;  %v14236_v51 = vcombine.low %v944_v36, %v952_v38  ;;  %v14221_v55 = vcombine.high %v928_v45, %v936_v46  ;;  %v1104_v35 = vld [vmem:[#allocation5 + $0xab8] sm:$0xff] }
 0x3cc   : > { %6244 = vmatprep.subr.bf16.mxu1 %v14061_v52  ;;  %v14731_v52 = vcombine.high %v1439_v42, %v1447_v43  ;;  %v1112_v36 = vld [vmem:[#allocation5 + $0xaf8] sm:$0xff] }
 0x3ce   : > { %6204 = vmatpush1.bf16.msra.mxu0 %v14570_v58  ;;  %v920_v58 = vld [vmem:[#allocation5 + $0x4f8] sm:$0xff] }
 0x3cf   : > { %6245 = vmatpush1.bf16.msra.mxu1 %v14060_v22  ;;  %6205 = vmatprep.subr.bf16.mxu0 %v14811_v62  ;;  %v14730_v22 = vcombine.low %v1439_v42, %v1447_v43  ;;  %v14220_v62 = vcombine.low %v928_v45, %v936_v46  ;;  %v14205_v15 = vcombine.high %v912_v57, %v920_v58 }
 0x3d0   : > { %6246 = vmatprep.subr.bf16.mxu1 %v14301_v0  ;;  %v14715_v0 = vcombine.high %v1423_v56, %v1431_v4  ;;  %v14412_v42 = vcombine.low %v1120_v47, %v1128_v25  ;;  %v14397_v46 = vcombine.high %v1104_v35, %v1112_v36 }
 0x3d2   : > { %6206 = vmatpush2.bf16.msra.mxu0 %v14810_v8  ;;  %v904_v8 = vld [vmem:[#allocation5 + $0x478] sm:$0xff] }
 0x3d3   : > { %6247 = vmatpush2.bf16.msra.mxu1 %v14300_v9  ;;  %6207 = vmatprep.subr.bf16.mxu0 %v14795_v24  ;;  %v14714_v9 = vcombine.low %v1423_v56, %v1431_v4  ;;  %v14204_v24 = vcombine.low %v912_v57, %v920_v58  ;;  %v14189_v17 = vcombine.high %v896_v2, %v904_v8  ;;  %v1352_v4 = vld [vmem:[#allocation5 + $0x1278] sm:$0xff] }
 0x3d4   : > { %6248 = vmatprep.subr.bf16.mxu1 %v14285_v37  ;;  %v14699_v37 = vcombine.high %v1407_v6, %v1415_v7  ;;  %v14396_v58 = vcombine.low %v1104_v35, %v1112_v36  ;;  %v1280_v35 = vld [vmem:[#allocation5 + $0x1038] sm:$0xff] }
 0x3d5   : > { %v1288_v36 = vld [vmem:[#allocation5 + $0x1078] sm:$0xff] }
 0x3d6   : > { %6208 = vmatpush2.bf16.msra.mxu0 %v14794_v11  ;;  %v1400_v11 = vld [vmem:[#allocation5 + $0x13f8] sm:$0xff] }
 0x3d7   : > { %6249 = vmatpush2.bf16.msra.mxu1 %v14284_v20  ;;  %6209 = vmatprep.subr.bf16.mxu0 %v14779_v21  ;;  %v14698_v20 = vcombine.low %v1407_v6, %v1415_v7  ;;  %v14188_v21 = vcombine.low %v896_v2, %v904_v8  ;;  %v14685_v32 = vcombine.high %v1392_v19, %v1400_v11  ;;  %v1072_v6 = vld [vmem:[#allocation5 + $0x9b8] sm:$0xff] }
 0x3d8   : > { %6250 = vmatprep.subr.bf16.mxu1 %v14269_v23  ;;  %v14429_v23 = vcombine.high %v1136_v12, %v1144_v18  ;;  %v1080_v7 = vld [vmem:[#allocation5 + $0x9f8] sm:$0xff] }
 0x3d9   : > { %v1328_v2 = vld [vmem:[#allocation5 + $0x11b8] sm:$0xff] }
 0x3da   : > { %6210 = vmatpush2.bf16.msra.mxu0 %v14778_v27  ;;  %v1384_v27 = vld [vmem:[#allocation5 + $0x1378] sm:$0xff] }
 0x3db   : > { %6251 = vmatpush2.bf16.msra.mxu1 %v14268_v28  ;;  %6211 = vmatprep.subr.bf16.mxu0 %v14763_v29  ;;  %v14428_v28 = vcombine.low %v1136_v12, %v1144_v18  ;;  %v14684_v29 = vcombine.low %v1392_v19, %v1400_v11  ;;  %v14669_v34 = vcombine.high %v1376_v26, %v1384_v27  ;;  %v1312_v12 = vld [vmem:[#allocation5 + $0x1138] sm:$0xff] }
 0x3dc   : > { %6252 = vmatprep.subr.bf16.mxu1 %v14253_v31  ;;  %v14413_v31 = vcombine.high %v1120_v47, %v1128_v25  ;;  %v14668_v45 = vcombine.low %v1376_v26, %v1384_v27  ;;  %v1320_v18 = vld [vmem:[#allocation5 + $0x1178] sm:$0xff]  ;;  %v14364_v19 = vcombine.low %v1072_v6, %v1080_v7 }
 0x3dd   : > { %v1296_v47 = vld [vmem:[#allocation5 + $0x10b8] sm:$0xff]  ;;  %v14604_v27 = vcombine.low %v1312_v12, %v1320_v18 }
 0x3de   : > { %6212 = vmatpush2.bf16.msra.mxu0 %v14762_v39  ;;  %v1360_v39 = vld [vmem:[#allocation5 + $0x12b8] sm:$0xff] }
 0x3df   : > { %6253 = vmatpush2.bf16.msra.mxu1 %v14252_v40  ;;  %6213 = vmatprep.subr.bf16.mxu0 %v14747_v41  ;;  %v1368_v40 = vld [vmem:[#allocation5 + $0x12f8] sm:$0xff] }
 0x3e0   : > { %6254 = vmatprep.subr.bf16.mxu1 %v14237_v5  ;;  %v1304_v25 = vld [vmem:[#allocation5 + $0x10f8] sm:$0xff] }
 0x3e2   : > { %6214 = vmatpush2.bf16.msra.mxu0 %v14746_v48 }
 0x3e3   : > { %6255 = vmatpush2.bf16.msra.mxu1 %v14236_v51  ;;  %6215 = vmatprep.subr.bf16.mxu0 %v14731_v52  ;;  %v14653_v52 = vcombine.high %v1360_v39, %v1368_v40 }
 0x3e4   : > { %6256 = vmatprep.subr.bf16.mxu1 %v14221_v55  ;;  %v1096_v55 = vld [vmem:[#allocation5 + $0xa78] sm:$0xff] }
 0x3e6   : > { %6216 = vmatpush2.bf16.msra.mxu0 %v14730_v22 }
 0x3e7   : > { %6257 = vmatpush2.bf16.msra.mxu1 %v14220_v62  ;;  %6217 = vmatprep.subr.bf16.mxu0 %v14715_v0 }
 0x3e8   : > { %6258 = vmatprep.subr.bf16.mxu1 %v14205_v15 }
 0x3ea   : > { %6218 = vmatpush2.bf16.msra.mxu0 %v14714_v9  ;;  %v14365_v9 = vcombine.high %v1072_v6, %v1080_v7  ;;  %v1232_v6 = vld [vmem:[#allocation5 + $0xeb8] sm:$0xff] }
 0x3eb   : > { %6259 = vmatpush2.bf16.msra.mxu1 %v14204_v24  ;;  %6219 = vmatprep.subr.bf16.mxu0 %v14699_v37  ;;  %v1056_v37 = vld [vmem:[#allocation5 + $0x938] sm:$0xff] }
 0x3ec   : > { %6260 = vmatprep.subr.bf16.mxu1 %v14189_v17  ;;  %v1064_v17 = vld [vmem:[#allocation5 + $0x978] sm:$0xff] }
 0x3ed   : > { %v14348_v26 = vcombine.low %v1056_v37, %v1064_v17  ;;  %v1240_v7 = vld [vmem:[#allocation5 + $0xef8] sm:$0xff] }
 0x3ee   : > { %6220 = vmatpush2.bf16.msra.mxu0 %v14698_v20  ;;  %v14349_v20 = vcombine.high %v1056_v37, %v1064_v17  ;;  %v1216_v37 = vld [vmem:[#allocation5 + $0xe38] sm:$0xff] }
 0x3ef   : > { %6261 = vmatpush2.bf16.msra.mxu1 %v14188_v21  ;;  %6271 = vmatprep.subr.bf16.mxu0 %v14429_v23  ;;  %v14605_v21 = vcombine.high %v1312_v12, %v1320_v18  ;;  %v1040_v23 = vld [vmem:[#allocation5 + $0x8b8] sm:$0xff] }
 0x3f0   : > { %6312 = vmatprep.subr.bf16.mxu1 %v14685_v32  ;;  %v1048_v32 = vld [vmem:[#allocation5 + $0x8f8] sm:$0xff] }
 0x3f1   : > { %v5977_v38 = vpop.f32.mrf.mxu0  ;;  %6222 = vmatmul.mubr.bf16.vlgmr.msra.gmra.mxu0 %v18027_v50  ;;  %v1224_v17 = vld [vmem:[#allocation5 + $0xe78] sm:$0xff] }
 0x3f2   : > { %v18111_v41 = vadd.f32 %v5977_v38, %v18103_v49  ;;  %v18113_v5 = vpop.f32.mrf.mxu1  ;;  %6263 = vmatmul.mubr.bf16.vlgmr.msra.gmra.mxu1 %v18013_v30  ;;  %6272 = vmatpush1.bf16.msra.mxu0 %v14428_v28  ;;  %v1088_v49 = vld [vmem:[#allocation5 + $0xa38] sm:$0xff]  ;;  %v14333_v28 = vcombine.high %v1040_v23, %v1048_v32  ;;  %v14332_v38 = vcombine.low %v1040_v23, %v1048_v32 }
 0x3f3   : > { %6313 = vmatpush1.bf16.msra.mxu1 %v14684_v29  ;;  %v5979_v43 = vpop.f32.mrf.mxu0  ;;  %6273 = vmatprep.subr.bf16.mxu0 %v14413_v31  ;;  %v1344_v30 = vld [vmem:[#allocation5 + $0x1238] sm:$0xff]  ;;  %v14381_v62 = vcombine.high %v1088_v49, %v1096_v55  ;;  %v14380_v8 = vcombine.low %v1088_v49, %v1096_v55  ;;  %v14589_v29 = vcombine.high %v1296_v47, %v1304_v25 }
 0x3f4   : > { %v18117_v48 = vadd.f32 %v5979_v43, %v18106_v60  ;;  %v18119_v51 = vpop.f32.mrf.mxu1  ;;  %6314 = vmatprep.subr.bf16.mxu1 %v14669_v34  ;;  %6303 = vmatprep.mubr.bf16.mxu0 %v18003_v16  ;;  %v14652_v60 = vcombine.low %v1360_v39, %v1368_v40  ;;  %v14637_v15 = vcombine.high %v1344_v30, %v1352_v4  ;;  %v1336_v16 = vld [vmem:[#allocation5 + $0x11f8] sm:$0xff] }
 0x3f5   : > { %v5981_v56 = vpop.f32.mrf.mxu0  ;;  %6344 = vmatprep.mubr.bf16.mxu1 %v18019_v63  ;;  %v14636_v63 = vcombine.low %v1344_v30, %v1352_v4  ;;  %v14621_v24 = vcombine.high %v1328_v2, %v1336_v16  ;;  %v14620_v11 = vcombine.low %v1328_v2, %v1336_v16  ;;  %v1024_v31 = vld [vmem:[#allocation5 + $0x838] sm:$0xff]  ;;  %v14588_v39 = vcombine.low %v1296_v47, %v1304_v25 }
 0x3f6   : > { %v6022_v57 = vpop.f32.mrf.mxu1  ;;  %6274 = vmatpush1.bf16.msra.mxu0 %v14412_v42  ;;  %v1032_v34 = vld [vmem:[#allocation5 + $0x878] sm:$0xff]  ;;  %v14573_v42 = vcombine.high %v1280_v35, %v1288_v36  ;;  %v14572_v55 = vcombine.low %v1280_v35, %v1288_v36 }
 0x3f7   : > { %6315 = vmatpush1.bf16.msra.mxu1 %v14668_v45  ;;  %v5982_v22 = vpop.f32.mrf.mxu0  ;;  %6275 = vmatprep.subr.bf16.mxu0 %v14397_v46  ;;  %v14317_v40 = vcombine.high %v1024_v31, %v1032_v34  ;;  %v1264_v43 = vld [vmem:[#allocation5 + $0xfb8] sm:$0xff]  ;;  %v14316_v49 = vcombine.low %v1024_v31, %v1032_v34 }
 0x3f8   : > { %v6023_v0 = vpop.f32.mrf.mxu1  ;;  %6316 = vmatprep.subr.bf16.mxu1 %v14653_v52  ;;  %v1272_v45 = vld [vmem:[#allocation5 + $0xff8] sm:$0xff] }
 0x3f9   : > { %v1520_v46 = vld [vmem:[#allocation5 + $0x17b8] sm:$0xff]  ;;  %v14557_v56 = vcombine.high %v1264_v43, %v1272_v45 }
 0x3fa   : > { %6276 = vmatpush1.bf16.msra.mxu0 %v14396_v58  ;;  %v1528_v52 = vld [vmem:[#allocation5 + $0x17f8] sm:$0xff] }
 0x3fb   : > { %6317 = vmatpush1.bf16.msra.mxu1 %v14652_v60  ;;  %6277 = vmatprep.subr.bf16.mxu0 %v14381_v62  ;;  %v14813_v30 = vcombine.high %v1520_v46, %v1528_v52  ;;  %v1248_v4 = vld [vmem:[#allocation5 + $0xf38] sm:$0xff]  ;;  %v14556_v60 = vcombine.low %v1264_v43, %v1272_v45  ;;  %v14812_v62 = vcombine.low %v1520_v46, %v1528_v52 }
 0x3fc   : > { %6318 = vmatprep.subr.bf16.mxu1 %v14637_v15  ;;  %v1256_v57 = vld [vmem:[#allocation5 + $0xf78] sm:$0xff] }
 0x3fd   : > { %v1504_v58 = vld [vmem:[#allocation5 + $0x1738] sm:$0xff]  ;;  %v14541_v0 = vcombine.high %v1248_v4, %v1256_v57 }
 0x3fe   : > { %6278 = vmatpush1.bf16.msra.mxu0 %v14380_v8  ;;  %v1512_v22 = vld [vmem:[#allocation5 + $0x1778] sm:$0xff]  ;;  %v14540_v8 = vcombine.low %v1248_v4, %v1256_v57 }
 0x3ff   : > { %6319 = vmatpush1.bf16.msra.mxu1 %v14636_v63  ;;  %6279 = vmatprep.subr.bf16.mxu0 %v14365_v9  ;;  %v14797_v15 = vcombine.high %v1504_v58, %v1512_v22  ;;  %v1488_v2 = vld [vmem:[#allocation5 + $0x16b8] sm:$0xff]  ;;  %v14796_v63 = vcombine.low %v1504_v58, %v1512_v22  ;;  %v14525_v9 = vcombine.high %v1232_v6, %v1240_v7 }
 0x400   : > { %6320 = vmatprep.subr.bf16.mxu1 %v14621_v24  ;;  %v1496_v16 = vld [vmem:[#allocation5 + $0x16f8] sm:$0xff] }
 0x401   : > { %v14781_v24 = vcombine.high %v1488_v2, %v1496_v16  ;;  %v1472_v12 = vld [vmem:[#allocation5 + $0x1638] sm:$0xff] }
 0x402   : > { %6280 = vmatpush1.bf16.msra.mxu0 %v14364_v19  ;;  %v1480_v18 = vld [vmem:[#allocation5 + $0x1678] sm:$0xff]  ;;  %v14524_v19 = vcombine.low %v1232_v6, %v1240_v7 }
 0x403   : > { %6321 = vmatpush1.bf16.msra.mxu1 %v14620_v11  ;;  %6281 = vmatprep.subr.bf16.mxu0 %v14349_v20  ;;  %v14780_v11 = vcombine.low %v1488_v2, %v1496_v16  ;;  %v14509_v20 = vcombine.high %v1216_v37, %v1224_v17  ;;  %v1200_v23 = vld [vmem:[#allocation5 + $0xdb8] sm:$0xff]  ;;  %v15991_v2 = vld [vmem:[#allocation7 + $0xe4] ss:$16 sps:$4 sm:$0xff]  }
 0x404   : > { %6322 = vmatprep.subr.bf16.mxu1 %v14605_v21  ;;  %v14765_v21 = vcombine.high %v1472_v12, %v1480_v18  ;;  %v1208_v32 = vld [vmem:[#allocation5 + $0xdf8] sm:$0xff]  ;;  %v15994_v16 = vld [vmem:[#allocation7 + $0x2e4] ss:$16 sps:$4 sm:$0xff]  }
 0x405   : > { %v1456_v47 = vld [vmem:[#allocation5 + $0x15b8] sm:$0xff] }
 0x406   : > { %6282 = vmatpush1.bf16.msra.mxu0 %v14348_v26  ;;  %v1464_v25 = vld [vmem:[#allocation5 + $0x15f8] sm:$0xff]  ;;  %v14508_v26 = vcombine.low %v1216_v37, %v1224_v17  ;;  %v16000_v17 = vld [vmem:[#allocation7 + $0x2c4] ss:$16 sps:$4 sm:$0xff]  }
 0x407   : > { %6323 = vmatpush1.bf16.msra.mxu1 %v14604_v27  ;;  %6283 = vmatprep.subr.bf16.mxu0 %v14333_v28  ;;  %v14764_v27 = vcombine.low %v1472_v12, %v1480_v18  ;;  %v14493_v28 = vcombine.high %v1200_v23, %v1208_v32  ;;  %v1184_v31 = vld [vmem:[#allocation5 + $0xd38] sm:$0xff]  ;;  %v18130_v12 = vpack.c.bf16 %v18067_v59, %v18067_v59 }
 0x408   : > { %6324 = vmatprep.subr.bf16.mxu1 %v14589_v29  ;;  %v14749_v29 = vcombine.high %v1456_v47, %v1464_v25  ;;  %v1192_v34 = vld [vmem:[#allocation5 + $0xd78] sm:$0xff] }
 0x409   : > { %v1440_v35 = vld [vmem:[#allocation5 + $0x1538] sm:$0xff] }
 0x40a   : > { %6284 = vmatpush1.bf16.msra.mxu0 %v14332_v38  ;;  %v1448_v36 = vld [vmem:[#allocation5 + $0x1578] sm:$0xff]  ;;  %v14492_v38 = vcombine.low %v1200_v23, %v1208_v32 }
 0x40b   : > { %6325 = vmatpush1.bf16.msra.mxu1 %v14588_v39  ;;  %6285 = vmatprep.subr.bf16.mxu0 %v14317_v40  ;;  %v14748_v39 = vcombine.low %v1456_v47, %v1464_v25  ;;  %v14477_v40 = vcombine.high %v1184_v31, %v1192_v34  ;;  %v1168_v43 = vld [vmem:[#allocation5 + $0xcb8] sm:$0xff]  ;;  %v16001_v25 = vld [vmem:[#allocation7 + $0xa0] ss:$16 sps:$4 sm:$0xff]  }
 0x40c   : > { %6326 = vmatprep.subr.bf16.mxu1 %v14573_v42  ;;  %v14733_v42 = vcombine.high %v1440_v35, %v1448_v36  ;;  %v1176_v45 = vld [vmem:[#allocation5 + $0xcf8] sm:$0xff] }
 0x40d   : > { %v1424_v46 = vld [vmem:[#allocation5 + $0x14b8] sm:$0xff] }
 0x40e   : > { %6286 = vmatpush1.bf16.msra.mxu0 %v14316_v49  ;;  %v1432_v52 = vld [vmem:[#allocation5 + $0x14f8] sm:$0xff]  ;;  %v14476_v49 = vcombine.low %v1184_v31, %v1192_v34  ;;  %v16012_v31 = vld [vmem:[#allocation7 + $0x284] ss:$16 sps:$4 sm:$0xff]   ;;  %v16010_v34 = vld [vmem:[#allocation7 + $0x280] ss:$16 sps:$4 sm:$0xff]  }
 0x40f   : > { %6327 = vmatpush1.bf16.msra.mxu1 %v14572_v55  ;;  %6287 = vmatprep.subr.bf16.mxu0 %v14557_v56  ;;  %v14732_v55 = vcombine.low %v1440_v35, %v1448_v36  ;;  %v14461_v56 = vcombine.high %v1168_v43, %v1176_v45  ;;  %v1152_v4 = vld [vmem:[#allocation5 + $0xc38] sm:$0xff]  ;;  %v16015_v35 = vld [vmem:[#allocation7 + $0x64] ss:$16 sps:$4 sm:$0xff]  }
 0x410   : > { %6328 = vmatprep.subr.bf16.mxu1 %v14813_v30  ;;  %v14717_v30 = vcombine.high %v1424_v46, %v1432_v52  ;;  %v1160_v57 = vld [vmem:[#allocation5 + $0xc78] sm:$0xff]  ;;  %v16018_v36 = vld [vmem:[#allocation7 + $0x264] ss:$16 sps:$4 sm:$0xff]  }
 0x411   : > { %v1408_v58 = vld [vmem:[#allocation5 + $0x1438] sm:$0xff]  ;;  %v14444_v6 = vcombine.low %v1152_v4, %v1160_v57 }
 0x412   : > { %6288 = vmatpush2.bf16.msra.mxu0 %v14556_v60  ;;  %v1416_v22 = vld [vmem:[#allocation5 + $0x1478] sm:$0xff]  ;;  %v14460_v60 = vcombine.low %v1168_v43, %v1176_v45  ;;  %v16019_v43 = vld [vmem:[#allocation7 + $0x40] ss:$16 sps:$4 sm:$0xff]  }
 0x413   : > { %6329 = vmatpush2.bf16.msra.mxu1 %v14812_v62  ;;  %6289 = vmatprep.subr.bf16.mxu0 %v14541_v0  ;;  %v14716_v62 = vcombine.low %v1424_v46, %v1432_v52  ;;  %v14445_v0 = vcombine.high %v1152_v4, %v1160_v57  ;;  %v14700_v7 = vcombine.low %v1408_v58, %v1416_v22  ;;  %v16022_v45 = vld [vmem:[#allocation7 + $0x240] ss:$16 sps:$4 sm:$0xff]   ;;  %v16027_v46 = vld [vmem:[#allocation7 + $0x24] ss:$16 sps:$4 sm:$0xff]  }
 0x414   : > { %6330 = vmatprep.subr.bf16.mxu1 %v14797_v15  ;;  %v14701_v15 = vcombine.high %v1408_v58, %v1416_v22  ;;  %v16030_v52 = vld [vmem:[#allocation7 + $0x224] ss:$16 sps:$4 sm:$0xff]   ;;  %v16031_v4 = vld [vmem:[#allocation7] ss:$16 sps:$4 sm:$0xff]  }
 0x415   : > { %v16034_v57 = vld [vmem:[#allocation7 + $0x200] ss:$16 sps:$4 sm:$0xff]   ;;  %v16039_v58 = vld [vmem:[#allocation7 + $0x1e4] ss:$16 sps:$4 sm:$0xff]  }
 0x416   : > { %6290 = vmatpush2.bf16.msra.mxu0 %v14540_v8  ;;  %v15989_v8 = vld [vmem:[#allocation7 + $0xe0] ss:$16 sps:$4 sm:$0xff]   ;;  %v16042_v22 = vld [vmem:[#allocation7 + $0x3e4] ss:$16 sps:$4 sm:$0xff]  }
 0x417   : > { %6331 = vmatpush2.bf16.msra.mxu1 %v14796_v63  ;;  %6291 = vmatprep.subr.bf16.mxu0 %v14525_v9  ;;  %v15992_v63 = vld [vmem:[#allocation7 + $0x2e0] ss:$16 sps:$4 sm:$0xff]   ;;  %v15997_v9 = vld [vmem:[#allocation7 + $0xc4] ss:$16 sps:$4 sm:$0xff]  }
 0x418   : > { %6332 = vmatprep.subr.bf16.mxu1 %v14781_v24  ;;  %v18125_v24 = vpack.c.bf16 %v18053_v14, %v18053_v14 }
 0x41a   : > { %6292 = vmatpush2.bf16.msra.mxu0 %v14524_v19 }
 0x41b   : > { %6333 = vmatpush2.bf16.msra.mxu1 %v14780_v11  ;;  %6293 = vmatprep.subr.bf16.mxu0 %v14509_v20  ;;  %v15995_v11 = vld [vmem:[#allocation7 + $0xc0] ss:$16 sps:$4 sm:$0xff]  }
 0x41c   : > { %6334 = vmatprep.subr.bf16.mxu1 %v14765_v21  ;;  %v15998_v20 = vld [vmem:[#allocation7 + $0x2c0] ss:$16 sps:$4 sm:$0xff]   ;;  %v16003_v21 = vld [vmem:[#allocation7 + $0xa4] ss:$16 sps:$4 sm:$0xff]  }
 0x41e   : > { %6294 = vmatpush2.bf16.msra.mxu0 %v14508_v26 }
 0x41f   : > { %6335 = vmatpush2.bf16.msra.mxu1 %v14764_v27  ;;  %6295 = vmatprep.subr.bf16.mxu0 %v14493_v28  ;;  %v16004_v27 = vld [vmem:[#allocation7 + $0x2a0] ss:$16 sps:$4 sm:$0xff]   ;;  %v16009_v28 = vld [vmem:[#allocation7 + $0x84] ss:$16 sps:$4 sm:$0xff]  }
 0x420   : > { %6336 = vmatprep.subr.bf16.mxu1 %v14749_v29 }
 0x422   : > { %6296 = vmatpush2.bf16.msra.mxu0 %v14492_v38  ;;  %v16013_v38 = vld [vmem:[#allocation7 + $0x60] ss:$16 sps:$4 sm:$0xff]  }
 0x423   : > { %6337 = vmatpush2.bf16.msra.mxu1 %v14748_v39  ;;  %6297 = vmatprep.subr.bf16.mxu0 %v14477_v40  ;;  %v16016_v39 = vld [vmem:[#allocation7 + $0x260] ss:$16 sps:$4 sm:$0xff]   ;;  %v16021_v40 = vld [vmem:[#allocation7 + $0x44] ss:$16 sps:$4 sm:$0xff]  }
 0x424   : > { %6338 = vmatprep.subr.bf16.mxu1 %v14733_v42  ;;  %v16024_v42 = vld [vmem:[#allocation7 + $0x244] ss:$16 sps:$4 sm:$0xff]  }
 0x426   : > { %6298 = vmatpush2.bf16.msra.mxu0 %v14476_v49  ;;  %v16025_v49 = vld [vmem:[#allocation7 + $0x20] ss:$16 sps:$4 sm:$0xff]  }
 0x427   : > { %6339 = vmatpush2.bf16.msra.mxu1 %v14732_v55  ;;  %6299 = vmatprep.subr.bf16.mxu0 %v14461_v56  ;;  %v16028_v55 = vld [vmem:[#allocation7 + $0x220] ss:$16 sps:$4 sm:$0xff]   ;;  %v16033_v56 = vld [vmem:[#allocation7 + $0x4] ss:$16 sps:$4 sm:$0xff]  }
 0x428   : > { %6340 = vmatprep.subr.bf16.mxu1 %v14717_v30  ;;  %v16036_v30 = vld [vmem:[#allocation7 + $0x204] ss:$16 sps:$4 sm:$0xff]  }
 0x42a   : > { %6300 = vmatpush2.bf16.msra.mxu0 %v14460_v60  ;;  %v16037_v60 = vld [vmem:[#allocation7 + $0x1e0] ss:$16 sps:$4 sm:$0xff]  }
 0x42b   : > { %6341 = vmatpush2.bf16.msra.mxu1 %v14716_v62  ;;  %6301 = vmatprep.subr.bf16.mxu0 %v14445_v0  ;;  %v16040_v62 = vld [vmem:[#allocation7 + $0x3e0] ss:$16 sps:$4 sm:$0xff]   ;;  %v16045_v0 = vld [vmem:[#allocation7 + $0x1c4] ss:$16 sps:$4 sm:$0xff]  }
 0x42c   : > { %6342 = vmatprep.subr.bf16.mxu1 %v14701_v15  ;;  %v16048_v15 = vld [vmem:[#allocation7 + $0x3c4] ss:$16 sps:$4 sm:$0xff]  }
 0x42e   : > { %6302 = vmatpush2.bf16.msra.mxu0 %v14444_v6  ;;  %v16043_v6 = vld [vmem:[#allocation7 + $0x1c0] ss:$16 sps:$4 sm:$0xff]  }
 0x42f   : > { %6343 = vmatpush2.bf16.msra.mxu1 %v14700_v7  ;;  %9463 = vmatprep.subr.bf16.mxu0 %v15991_v2  ;;  %v16046_v7 = vld [vmem:[#allocation7 + $0x3c0] ss:$16 sps:$4 sm:$0xff]   ;;  %v16051_v2 = vld [vmem:[#allocation7 + $0x1a4] ss:$16 sps:$4 sm:$0xff]  }
 0x430   : > { %9504 = vmatprep.subr.bf16.mxu1 %v15994_v16  ;;  %v16054_v16 = vld [vmem:[#allocation7 + $0x3a4] ss:$16 sps:$4 sm:$0xff]  }
 0x431   : > { %v6059_v37 = vpop.f32.mrf.mxu0  ;;  %6304 = vmatmul.mubr.bf16.vlgmr.msra.gmra.mxu0 %v18017_v33 }
 0x432   : > { %v6060_v18 = vadd.f32 %v6059_v37, %v18113_v5  ;;  %v6100_v19 = vpop.f32.mrf.mxu1  ;;  %6345 = vmatmul.mubr.bf16.vlgmr.msra.gmra.mxu1 %v18027_v50  ;;  %9464 = vmatpush1.bf16.msra.mxu0 %v15989_v8  ;;  %v16006_v5 = vld [vmem:[#allocation7 + $0x2a4] ss:$16 sps:$4 sm:$0xff]   ;;  %v16049_v8 = vld [vmem:[#allocation7 + $0x1a0] ss:$16 sps:$4 sm:$0xff]  }
 0x433   : > { %9495 = vmatprep.mubr.bf16.mxu0 %v18125_v24  ;;  %9505 = vmatpush1.bf16.msra.mxu1 %v15992_v63  ;;  %v6061_v14 = vpop.f32.mrf.mxu0  ;;  %v16052_v63 = vld [vmem:[#allocation7 + $0x3a0] ss:$16 sps:$4 sm:$0xff]   ;;  %v16060_v37 = vld [vmem:[#allocation7 + $0x384] ss:$16 sps:$4 sm:$0xff]  }
 0x434   : > { %v18135_v23 = vadd.f32 %v6100_v19, %v6060_v18  ;;  %9536 = vmatprep.mubr.bf16.mxu1 %v18130_v12  ;;  %v6062_v33 = vadd.f32 %v6061_v14, %v18119_v51  ;;  %v6102_v59 = vpop.f32.mrf.mxu1  ;;  %9465 = vmatprep.subr.bf16.mxu0 %v15997_v9  ;;  %v16007_v51 = vld [vmem:[#allocation7 + $0x80] ss:$16 sps:$4 sm:$0xff]   ;;  %v16057_v9 = vld [vmem:[#allocation7 + $0x184] ss:$16 sps:$4 sm:$0xff]  }
 0x435   : > { %v6063_v32 = vpop.f32.mrf.mxu0  ;;  %9506 = vmatprep.subr.bf16.mxu1 %v16000_v17  ;;  %v16055_v17 = vld [vmem:[#allocation7 + $0x180] ss:$16 sps:$4 sm:$0xff]   ;;  %v16063_v19 = vld [vmem:[#allocation7 + $0x164] ss:$16 sps:$4 sm:$0xff]  }
 0x436   : > { %v18139_v50 = vadd.f32 %v6102_v59, %v6062_v33  ;;  %v6104_v47 = vpop.f32.mrf.mxu1  ;;  %9466 = vmatpush1.bf16.msra.mxu0 %v15995_v11  ;;  %v16058_v18 = vld [vmem:[#allocation7 + $0x380] ss:$16 sps:$4 sm:$0xff]   ;;  %v16066_v11 = vld [vmem:[#allocation7 + $0x364] ss:$16 sps:$4 sm:$0xff]  }
 0x437   : > { %9507 = vmatpush1.bf16.msra.mxu1 %v15998_v20  ;;  %v6064_v26 = vpop.f32.mrf.mxu0  ;;  %9467 = vmatprep.subr.bf16.mxu0 %v16003_v21  ;;  %v16061_v14 = vld [vmem:[#allocation7 + $0x160] ss:$16 sps:$4 sm:$0xff]   ;;  %v16069_v21 = vld [vmem:[#allocation7 + $0x144] ss:$16 sps:$4 sm:$0xff]  }
 0x438   : > { %v6105_v29 = vpop.f32.mrf.mxu1  ;;  %9508 = vmatprep.subr.bf16.mxu1 %v16006_v5  ;;  %v16064_v20 = vld [vmem:[#allocation7 + $0x360] ss:$16 sps:$4 sm:$0xff]   ;;  %v16072_v33 = vld [vmem:[#allocation7 + $0x344] ss:$16 sps:$4 sm:$0xff]  }
 0x439   : > { %v16067_v59 = vld [vmem:[#allocation7 + $0x140] ss:$16 sps:$4 sm:$0xff]   ;;  %v16075_v32 = vld [vmem:[#allocation7 + $0x124] ss:$16 sps:$4 sm:$0xff]  }
 0x43a   : > { %9468 = vmatpush1.bf16.msra.mxu0 %v16001_v25  ;;  %v16070_v5 = vld [vmem:[#allocation7 + $0x340] ss:$16 sps:$4 sm:$0xff]   ;;  %v16078_v47 = vld [vmem:[#allocation7 + $0x324] ss:$16 sps:$4 sm:$0xff]  }
 0x43b   : > { %9509 = vmatpush1.bf16.msra.mxu1 %v16004_v27  ;;  %9469 = vmatprep.subr.bf16.mxu0 %v16009_v28  ;;  %v16073_v25 = vld [vmem:[#allocation7 + $0x120] ss:$16 sps:$4 sm:$0xff]   ;;  %v16081_v27 = vld [vmem:[#allocation7 + $0x104] ss:$16 sps:$4 sm:$0xff]  }
 0x43c   : > { %9510 = vmatprep.subr.bf16.mxu1 %v16012_v31  ;;  %v16076_v26 = vld [vmem:[#allocation7 + $0x320] ss:$16 sps:$4 sm:$0xff]   ;;  %v16084_v28 = vld [vmem:[#allocation7 + $0x304] ss:$16 sps:$4 sm:$0xff]  }
 0x43d   : > { %v16079_v29 = vld [vmem:[#allocation7 + $0x100] ss:$16 sps:$4 sm:$0xff]  }
 0x43e   : > { %9470 = vmatpush1.bf16.msra.mxu0 %v16007_v51  ;;  %v16082_v31 = vld [vmem:[#allocation7 + $0x300] ss:$16 sps:$4 sm:$0xff]   ;;  %v16087_v51 = vld [vmem:[#allocation7 + $0x4e4] ss:$16 sps:$4 sm:$0xff]  }
 0x43f   : > { %9511 = vmatpush1.bf16.msra.mxu1 %v16010_v34  ;;  %9471 = vmatprep.subr.bf16.mxu0 %v16015_v35  ;;  %v16090_v34 = vld [vmem:[#allocation7 + $0x6e4] ss:$16 sps:$4 sm:$0xff]   ;;  %v16085_v35 = vld [vmem:[#allocation7 + $0x4e0] ss:$16 sps:$4 sm:$0xff]  }
 0x440   : > { %9512 = vmatprep.subr.bf16.mxu1 %v16018_v36  ;;  %v18143_v36 = vpack.c.bf16 %v18047_v3, %v18047_v3  ;;  %v18156_v3 = vpack.c.bf16 %v18099_v13, %v18099_v13 }
 0x442   : > { %9472 = vmatpush1.bf16.msra.mxu0 %v16013_v38  ;;  %v16088_v38 = vld [vmem:[#allocation7 + $0x6e0] ss:$16 sps:$4 sm:$0xff]  }
 0x443   : > { %9513 = vmatpush1.bf16.msra.mxu1 %v16016_v39  ;;  %9473 = vmatprep.subr.bf16.mxu0 %v16021_v40  ;;  %v18147_v39 = vpack.c.bf16 %v18062_v54, %v18062_v54  ;;  %v16093_v40 = vld [vmem:[#allocation7 + $0x4c4] ss:$16 sps:$4 sm:$0xff]   ;;  %v16091_v54 = vld [vmem:[#allocation7 + $0x4c0] ss:$16 sps:$4 sm:$0xff]  }
 0x444   : > { %9514 = vmatprep.subr.bf16.mxu1 %v16024_v42  ;;  %v18151_v42 = vpack.c.bf16 %v18085_v10, %v18085_v10 }
 0x446   : > { %9474 = vmatpush1.bf16.msra.mxu0 %v16019_v43 }
 0x447   : > { %9515 = vmatpush1.bf16.msra.mxu1 %v16022_v45  ;;  %9475 = vmatprep.subr.bf16.mxu0 %v16027_v46  ;;  %v16096_v45 = vld [vmem:[#allocation7 + $0x6c4] ss:$16 sps:$4 sm:$0xff]  }
 0x448   : > { %9516 = vmatprep.subr.bf16.mxu1 %v16030_v52 }
 0x44a   : > { %9476 = vmatpush1.bf16.msra.mxu0 %v16025_v49  ;;  %v16094_v49 = vld [vmem:[#allocation7 + $0x6c0] ss:$16 sps:$4 sm:$0xff]  }
 0x44b   : > { %9517 = vmatpush1.bf16.msra.mxu1 %v16028_v55  ;;  %9477 = vmatprep.subr.bf16.mxu0 %v16033_v56  ;;  %v16099_v55 = vld [vmem:[#allocation7 + $0x4a4] ss:$16 sps:$4 sm:$0xff]  }
 0x44c   : > { %9518 = vmatprep.subr.bf16.mxu1 %v16036_v30  ;;  %v16102_v30 = vld [vmem:[#allocation7 + $0x6a4] ss:$16 sps:$4 sm:$0xff]  }
 0x44e   : > { %9478 = vmatpush1.bf16.msra.mxu0 %v16031_v4 }
 0x44f   : > { %9519 = vmatpush1.bf16.msra.mxu1 %v16034_v57  ;;  %9479 = vmatprep.subr.bf16.mxu0 %v16039_v58  ;;  %v16097_v58 = vld [vmem:[#allocation7 + $0x4a0] ss:$16 sps:$4 sm:$0xff]  }
 0x450   : > { %9520 = vmatprep.subr.bf16.mxu1 %v16042_v22 }
 0x452   : > { %9480 = vmatpush2.bf16.msra.mxu0 %v16037_v60  ;;  %v16100_v60 = vld [vmem:[#allocation7 + $0x6a0] ss:$16 sps:$4 sm:$0xff]  }
 0x453   : > { %9521 = vmatpush2.bf16.msra.mxu1 %v16040_v62  ;;  %9481 = vmatprep.subr.bf16.mxu0 %v16045_v0  ;;  %v16105_v62 = vld [vmem:[#allocation7 + $0x484] ss:$16 sps:$4 sm:$0xff]  }
 0x454   : > { %9522 = vmatprep.subr.bf16.mxu1 %v16048_v15  ;;  %v16108_v15 = vld [vmem:[#allocation7 + $0x684] ss:$16 sps:$4 sm:$0xff]  }
 0x456   : > { %9482 = vmatpush2.bf16.msra.mxu0 %v16043_v6  ;;  %v16103_v6 = vld [vmem:[#allocation7 + $0x480] ss:$16 sps:$4 sm:$0xff]  }
 0x457   : > { %9523 = vmatpush2.bf16.msra.mxu1 %v16046_v7  ;;  %9483 = vmatprep.subr.bf16.mxu0 %v16051_v2  ;;  %v16106_v7 = vld [vmem:[#allocation7 + $0x680] ss:$16 sps:$4 sm:$0xff]   ;;  %v16111_v2 = vld [vmem:[#allocation7 + $0x464] ss:$16 sps:$4 sm:$0xff]  }
 0x458   : > { %9524 = vmatprep.subr.bf16.mxu1 %v16054_v16  ;;  %v16114_v16 = vld [vmem:[#allocation7 + $0x664] ss:$16 sps:$4 sm:$0xff]  }
 0x45a   : > { %9484 = vmatpush2.bf16.msra.mxu0 %v16049_v8  ;;  %v16109_v8 = vld [vmem:[#allocation7 + $0x460] ss:$16 sps:$4 sm:$0xff]  }
 0x45b   : > { %9525 = vmatpush2.bf16.msra.mxu1 %v16052_v63  ;;  %9485 = vmatprep.subr.bf16.mxu0 %v16057_v9  ;;  %v16112_v63 = vld [vmem:[#allocation7 + $0x660] ss:$16 sps:$4 sm:$0xff]   ;;  %v16117_v9 = vld [vmem:[#allocation7 + $0x444] ss:$16 sps:$4 sm:$0xff]  }
 0x45c   : > { %9526 = vmatprep.subr.bf16.mxu1 %v16060_v37  ;;  %v16120_v37 = vld [vmem:[#allocation7 + $0x644] ss:$16 sps:$4 sm:$0xff]  }
 0x45e   : > { %9486 = vmatpush2.bf16.msra.mxu0 %v16055_v17  ;;  %v16115_v17 = vld [vmem:[#allocation7 + $0x440] ss:$16 sps:$4 sm:$0xff]  }
 0x45f   : > { %9527 = vmatpush2.bf16.msra.mxu1 %v16058_v18  ;;  %9487 = vmatprep.subr.bf16.mxu0 %v16063_v19  ;;  %v16118_v18 = vld [vmem:[#allocation7 + $0x640] ss:$16 sps:$4 sm:$0xff]   ;;  %v16123_v19 = vld [vmem:[#allocation7 + $0x424] ss:$16 sps:$4 sm:$0xff]  }
 0x460   : > { %9528 = vmatprep.subr.bf16.mxu1 %v16066_v11  ;;  %v16126_v11 = vld [vmem:[#allocation7 + $0x624] ss:$16 sps:$4 sm:$0xff]  }
 0x462   : > { %9488 = vmatpush2.bf16.msra.mxu0 %v16061_v14  ;;  %v16121_v14 = vld [vmem:[#allocation7 + $0x420] ss:$16 sps:$4 sm:$0xff]  }
 0x463   : > { %9529 = vmatpush2.bf16.msra.mxu1 %v16064_v20  ;;  %9489 = vmatprep.subr.bf16.mxu0 %v16069_v21  ;;  %v16124_v20 = vld [vmem:[#allocation7 + $0x620] ss:$16 sps:$4 sm:$0xff]   ;;  %v16129_v21 = vld [vmem:[#allocation7 + $0x404] ss:$16 sps:$4 sm:$0xff]  }
 0x464   : > { %9530 = vmatprep.subr.bf16.mxu1 %v16072_v33  ;;  %v16132_v33 = vld [vmem:[#allocation7 + $0x604] ss:$16 sps:$4 sm:$0xff]  }
 0x466   : > { %9490 = vmatpush2.bf16.msra.mxu0 %v16067_v59  ;;  %v16127_v59 = vld [vmem:[#allocation7 + $0x400] ss:$16 sps:$4 sm:$0xff]  }
 0x467   : > { %9531 = vmatpush2.bf16.msra.mxu1 %v16070_v5  ;;  %9491 = vmatprep.subr.bf16.mxu0 %v16075_v32  ;;  %v16130_v5 = vld [vmem:[#allocation7 + $0x600] ss:$16 sps:$4 sm:$0xff]   ;;  %v16135_v32 = vld [vmem:[#allocation7 + $0x5e4] ss:$16 sps:$4 sm:$0xff]  }
 0x468   : > { %9532 = vmatprep.subr.bf16.mxu1 %v16078_v47  ;;  %v16138_v47 = vld [vmem:[#allocation7 + $0x7e4] ss:$16 sps:$4 sm:$0xff]  }
 0x46a   : > { %9492 = vmatpush2.bf16.msra.mxu0 %v16073_v25  ;;  %v16133_v25 = vld [vmem:[#allocation7 + $0x5e0] ss:$16 sps:$4 sm:$0xff]  }
 0x46b   : > { %9533 = vmatpush2.bf16.msra.mxu1 %v16076_v26  ;;  %9493 = vmatprep.subr.bf16.mxu0 %v16081_v27  ;;  %v16136_v26 = vld [vmem:[#allocation7 + $0x7e0] ss:$16 sps:$4 sm:$0xff]   ;;  %v16141_v27 = vld [vmem:[#allocation7 + $0x5c4] ss:$16 sps:$4 sm:$0xff]  }
 0x46c   : > { %9534 = vmatprep.subr.bf16.mxu1 %v16084_v28  ;;  %v16144_v28 = vld [vmem:[#allocation7 + $0x7c4] ss:$16 sps:$4 sm:$0xff]  }
 0x46e   : > { %9494 = vmatpush2.bf16.msra.mxu0 %v16079_v29  ;;  %v16139_v29 = vld [vmem:[#allocation7 + $0x5c0] ss:$16 sps:$4 sm:$0xff]  }
 0x46f   : > { %9535 = vmatpush2.bf16.msra.mxu1 %v16082_v31  ;;  %9545 = vmatprep.subr.bf16.mxu0 %v16087_v51  ;;  %v16142_v31 = vld [vmem:[#allocation7 + $0x7c0] ss:$16 sps:$4 sm:$0xff]   ;;  %v16147_v51 = vld [vmem:[#allocation7 + $0x5a4] ss:$16 sps:$4 sm:$0xff]  }
 0x470   : > { %9586 = vmatprep.subr.bf16.mxu1 %v16090_v34  ;;  %v16150_v34 = vld [vmem:[#allocation7 + $0x7a4] ss:$16 sps:$4 sm:$0xff]  }
 0x471   : > { %v6141_v43 = vpop.f32.mrf.mxu0  ;;  %9496 = vmatmul.mubr.bf16.vlgmr.msra.gmra.mxu0 %v18143_v36 }
 0x472   : > { %v6182_v46 = vpop.f32.mrf.mxu1  ;;  %9537 = vmatmul.mubr.bf16.vlgmr.msra.gmra.mxu1 %v18147_v39  ;;  %9546 = vmatpush1.bf16.msra.mxu0 %v16085_v35  ;;  %v16145_v35 = vld [vmem:[#allocation7 + $0x5a0] ss:$16 sps:$4 sm:$0xff]  }
 0x473   : > { %v18159_v52 = vadd.f32 %v6182_v46, %v6141_v43  ;;  %9577 = vmatprep.mubr.bf16.mxu0 %v18151_v42  ;;  %9587 = vmatpush1.bf16.msra.mxu1 %v16088_v38  ;;  %v6143_v10 = vpop.f32.mrf.mxu0  ;;  %v16148_v38 = vld [vmem:[#allocation7 + $0x7a0] ss:$16 sps:$4 sm:$0xff]   ;;  %v16156_v43 = vld [vmem:[#allocation7 + $0x784] ss:$16 sps:$4 sm:$0xff]  }
 0x474   : > { %9618 = vmatprep.mubr.bf16.mxu1 %v18156_v3  ;;  %v6184_v56 = vpop.f32.mrf.mxu1  ;;  %9547 = vmatprep.subr.bf16.mxu0 %v16093_v40  ;;  %v16153_v40 = vld [vmem:[#allocation7 + $0x584] ss:$16 sps:$4 sm:$0xff]   ;;  %v16154_v46 = vld [vmem:[#allocation7 + $0x780] ss:$16 sps:$4 sm:$0xff]  }
 0x475   : > { %v18163_v13 = vadd.f32 %v6184_v56, %v6143_v10  ;;  %v6145_v4 = vpop.f32.mrf.mxu0  ;;  %9588 = vmatprep.subr.bf16.mxu1 %v16096_v45  ;;  %v16151_v45 = vld [vmem:[#allocation7 + $0x580] ss:$16 sps:$4 sm:$0xff]   ;;  %v16162_v10 = vld [vmem:[#allocation7 + $0x764] ss:$16 sps:$4 sm:$0xff]  }
 0x476   : > { %v6186_v57 = vpop.f32.mrf.mxu1  ;;  %9548 = vmatpush1.bf16.msra.mxu0 %v16091_v54  ;;  %v16159_v54 = vld [vmem:[#allocation7 + $0x564] ss:$16 sps:$4 sm:$0xff]   ;;  %v16163_v4 = vld [vmem:[#allocation7 + $0x540] ss:$16 sps:$4 sm:$0xff]  }
 0x477   : > { %9589 = vmatpush1.bf16.msra.mxu1 %v16094_v49  ;;  %v6146_v22 = vpop.f32.mrf.mxu0  ;;  %9549 = vmatprep.subr.bf16.mxu0 %v16099_v55  ;;  %v16157_v49 = vld [vmem:[#allocation7 + $0x560] ss:$16 sps:$4 sm:$0xff]   ;;  %v16165_v56 = vld [vmem:[#allocation7 + $0x544] ss:$16 sps:$4 sm:$0xff]  }
 0x478   : > { %v6187_v0 = vpop.f32.mrf.mxu1  ;;  %9590 = vmatprep.subr.bf16.mxu1 %v16102_v30  ;;  %v16160_v55 = vld [vmem:[#allocation7 + $0x760] ss:$16 sps:$4 sm:$0xff]   ;;  %v16168_v30 = vld [vmem:[#allocation7 + $0x744] ss:$16 sps:$4 sm:$0xff]  }
 0x479   : > { %v16166_v57 = vld [vmem:[#allocation7 + $0x740] ss:$16 sps:$4 sm:$0xff]   ;;  %v16174_v22 = vld [vmem:[#allocation7 + $0x724] ss:$16 sps:$4 sm:$0xff]  }
 0x47a   : > { %9550 = vmatpush1.bf16.msra.mxu0 %v16097_v58  ;;  %v16171_v58 = vld [vmem:[#allocation7 + $0x524] ss:$16 sps:$4 sm:$0xff]  }
 0x47b   : > { %9591 = vmatpush1.bf16.msra.mxu1 %v16100_v60  ;;  %9551 = vmatprep.subr.bf16.mxu0 %v16105_v62  ;;  %v16169_v60 = vld [vmem:[#allocation7 + $0x520] ss:$16 sps:$4 sm:$0xff]   ;;  %v16177_v0 = vld [vmem:[#allocation7 + $0x504] ss:$16 sps:$4 sm:$0xff]  }
 0x47c   : > { %9592 = vmatprep.subr.bf16.mxu1 %v16108_v15  ;;  %v16172_v62 = vld [vmem:[#allocation7 + $0x720] ss:$16 sps:$4 sm:$0xff]   ;;  %v16180_v15 = vld [vmem:[#allocation7 + $0x704] ss:$16 sps:$4 sm:$0xff]  }
 0x47e   : > { %9552 = vmatpush1.bf16.msra.mxu0 %v16103_v6  ;;  %v16175_v6 = vld [vmem:[#allocation7 + $0x500] ss:$16 sps:$4 sm:$0xff]  }
 0x47f   : > { %9593 = vmatpush1.bf16.msra.mxu1 %v16106_v7  ;;  %9553 = vmatprep.subr.bf16.mxu0 %v16111_v2  ;;  %v16178_v7 = vld [vmem:[#allocation7 + $0x700] ss:$16 sps:$4 sm:$0xff]   ;;  %v16183_v2 = vld [vmem:[#allocation7 + $0x8e4] ss:$16 sps:$4 sm:$0xff]  }
 0x480   : > { %9594 = vmatprep.subr.bf16.mxu1 %v16114_v16  ;;  %v16186_v16 = vld [vmem:[#allocation7 + $0xae4] ss:$16 sps:$4 sm:$0xff]  }
 0x482   : > { %9554 = vmatpush1.bf16.msra.mxu0 %v16109_v8  ;;  %v16181_v8 = vld [vmem:[#allocation7 + $0x8e0] ss:$16 sps:$4 sm:$0xff]  }
 0x483   : > { %9595 = vmatpush1.bf16.msra.mxu1 %v16112_v63  ;;  %9555 = vmatprep.subr.bf16.mxu0 %v16117_v9  ;;  %v18167_v63 = vpack.c.bf16 %v18079_v1, %v18079_v1  ;;  %v16184_v9 = vld [vmem:[#allocation7 + $0xae0] ss:$16 sps:$4 sm:$0xff]   ;;  %v18180_v1 = vpack.c.bf16 %v18139_v50, %v18139_v50 }
 0x484   : > { %9596 = vmatprep.subr.bf16.mxu1 %v16120_v37  ;;  %v18171_v37 = vpack.c.bf16 %v18094_v61, %v18094_v61  ;;  %v16187_v61 = vld [vmem:[#allocation7 + $0x8c0] ss:$16 sps:$4 sm:$0xff]  }
 0x486   : > { %9556 = vmatpush1.bf16.msra.mxu0 %v16115_v17  ;;  %v16189_v17 = vld [vmem:[#allocation7 + $0x8c4] ss:$16 sps:$4 sm:$0xff]  }
 0x487   : > { %9597 = vmatpush1.bf16.msra.mxu1 %v16118_v18  ;;  %9557 = vmatprep.subr.bf16.mxu0 %v16123_v19  ;;  %v18175_v18 = vpack.c.bf16 %v18117_v48, %v18117_v48 }
 0x488   : > { %9598 = vmatprep.subr.bf16.mxu1 %v16126_v11  ;;  %v16192_v11 = vld [vmem:[#allocation7 + $0xac4] ss:$16 sps:$4 sm:$0xff]  }
 0x48a   : > { %9558 = vmatpush1.bf16.msra.mxu0 %v16121_v14 }
 0x48b   : > { %9599 = vmatpush1.bf16.msra.mxu1 %v16124_v20  ;;  %9559 = vmatprep.subr.bf16.mxu0 %v16129_v21  ;;  %v16190_v21 = vld [vmem:[#allocation7 + $0xac0] ss:$16 sps:$4 sm:$0xff]  }
 0x48c   : > { %9600 = vmatprep.subr.bf16.mxu1 %v16132_v33  ;;  %v16195_v33 = vld [vmem:[#allocation7 + $0x8a4] ss:$16 sps:$4 sm:$0xff]  }
 0x48e   : > { %9560 = vmatpush1.bf16.msra.mxu0 %v16127_v59 }
 0x48f   : > { %9601 = vmatpush1.bf16.msra.mxu1 %v16130_v5  ;;  %9561 = vmatprep.subr.bf16.mxu0 %v16135_v32  ;;  %v16193_v32 = vld [vmem:[#allocation7 + $0x8a0] ss:$16 sps:$4 sm:$0xff]  }
 0x490   : > { %9602 = vmatprep.subr.bf16.mxu1 %v16138_v47 }
 0x492   : > { %9562 = vmatpush2.bf16.msra.mxu0 %v16133_v25  ;;  %v16196_v25 = vld [vmem:[#allocation7 + $0xaa0] ss:$16 sps:$4 sm:$0xff]  }
 0x493   : > { %9603 = vmatpush2.bf16.msra.mxu1 %v16136_v26  ;;  %9563 = vmatprep.subr.bf16.mxu0 %v16141_v27  ;;  %v16201_v26 = vld [vmem:[#allocation7 + $0x884] ss:$16 sps:$4 sm:$0xff]  }
 0x494   : > { %9604 = vmatprep.subr.bf16.mxu1 %v16144_v28  ;;  %v16204_v28 = vld [vmem:[#allocation7 + $0xa84] ss:$16 sps:$4 sm:$0xff]  }
 0x496   : > { %9564 = vmatpush2.bf16.msra.mxu0 %v16139_v29  ;;  %v16199_v29 = vld [vmem:[#allocation7 + $0x880] ss:$16 sps:$4 sm:$0xff]  }
 0x497   : > { %9605 = vmatpush2.bf16.msra.mxu1 %v16142_v31  ;;  %9565 = vmatprep.subr.bf16.mxu0 %v16147_v51  ;;  %v16202_v31 = vld [vmem:[#allocation7 + $0xa80] ss:$16 sps:$4 sm:$0xff]   ;;  %v16207_v51 = vld [vmem:[#allocation7 + $0x864] ss:$16 sps:$4 sm:$0xff]  }
 0x498   : > { %9606 = vmatprep.subr.bf16.mxu1 %v16150_v34  ;;  %v16210_v34 = vld [vmem:[#allocation7 + $0xa64] ss:$16 sps:$4 sm:$0xff]  }
 0x49a   : > { %9566 = vmatpush2.bf16.msra.mxu0 %v16145_v35  ;;  %v16205_v35 = vld [vmem:[#allocation7 + $0x860] ss:$16 sps:$4 sm:$0xff]  }
 0x49b   : > { %9607 = vmatpush2.bf16.msra.mxu1 %v16148_v38  ;;  %9567 = vmatprep.subr.bf16.mxu0 %v16153_v40  ;;  %v16208_v38 = vld [vmem:[#allocation7 + $0xa60] ss:$16 sps:$4 sm:$0xff]   ;;  %v16213_v40 = vld [vmem:[#allocation7 + $0x844] ss:$16 sps:$4 sm:$0xff]  }
 0x49c   : > { %9608 = vmatprep.subr.bf16.mxu1 %v16156_v43  ;;  %v16216_v43 = vld [vmem:[#allocation7 + $0xa44] ss:$16 sps:$4 sm:$0xff]  }
 0x49e   : > { %9568 = vmatpush2.bf16.msra.mxu0 %v16151_v45  ;;  %v16211_v45 = vld [vmem:[#allocation7 + $0x840] ss:$16 sps:$4 sm:$0xff]  }
 0x49f   : > { %9609 = vmatpush2.bf16.msra.mxu1 %v16154_v46  ;;  %9569 = vmatprep.subr.bf16.mxu0 %v16159_v54  ;;  %v16214_v46 = vld [vmem:[#allocation7 + $0xa40] ss:$16 sps:$4 sm:$0xff]   ;;  %v16219_v54 = vld [vmem:[#allocation7 + $0x824] ss:$16 sps:$4 sm:$0xff]  }
 0x4a0   : > { %9610 = vmatprep.subr.bf16.mxu1 %v16162_v10  ;;  %v16222_v10 = vld [vmem:[#allocation7 + $0xa24] ss:$16 sps:$4 sm:$0xff]  }
 0x4a2   : > { %9570 = vmatpush2.bf16.msra.mxu0 %v16157_v49  ;;  %v16217_v49 = vld [vmem:[#allocation7 + $0x820] ss:$16 sps:$4 sm:$0xff]  }
 0x4a3   : > { %9611 = vmatpush2.bf16.msra.mxu1 %v16160_v55  ;;  %9571 = vmatprep.subr.bf16.mxu0 %v16165_v56  ;;  %v16220_v55 = vld [vmem:[#allocation7 + $0xa20] ss:$16 sps:$4 sm:$0xff]   ;;  %v16225_v56 = vld [vmem:[#allocation7 + $0x804] ss:$16 sps:$4 sm:$0xff]  }
 0x4a4   : > { %9612 = vmatprep.subr.bf16.mxu1 %v16168_v30  ;;  %v16228_v30 = vld [vmem:[#allocation7 + $0xa04] ss:$16 sps:$4 sm:$0xff]  }
 0x4a6   : > { %9572 = vmatpush2.bf16.msra.mxu0 %v16163_v4  ;;  %v16223_v4 = vld [vmem:[#allocation7 + $0x800] ss:$16 sps:$4 sm:$0xff]  }
 0x4a7   : > { %9613 = vmatpush2.bf16.msra.mxu1 %v16166_v57  ;;  %9573 = vmatprep.subr.bf16.mxu0 %v16171_v58  ;;  %v16226_v57 = vld [vmem:[#allocation7 + $0xa00] ss:$16 sps:$4 sm:$0xff]   ;;  %v16231_v58 = vld [vmem:[#allocation7 + $0x9e4] ss:$16 sps:$4 sm:$0xff]  }
 0x4a8   : > { %9614 = vmatprep.subr.bf16.mxu1 %v16174_v22  ;;  %v16234_v22 = vld [vmem:[#allocation7 + $0xbe4] ss:$16 sps:$4 sm:$0xff]  }
 0x4aa   : > { %9574 = vmatpush2.bf16.msra.mxu0 %v16169_v60  ;;  %v16229_v60 = vld [vmem:[#allocation7 + $0x9e0] ss:$16 sps:$4 sm:$0xff]  }
 0x4ab   : > { %9615 = vmatpush2.bf16.msra.mxu1 %v16172_v62  ;;  %9575 = vmatprep.subr.bf16.mxu0 %v16177_v0  ;;  %v16232_v62 = vld [vmem:[#allocation7 + $0xbe0] ss:$16 sps:$4 sm:$0xff]   ;;  %v16237_v0 = vld [vmem:[#allocation7 + $0x9c4] ss:$16 sps:$4 sm:$0xff]  }
 0x4ac   : > { %9616 = vmatprep.subr.bf16.mxu1 %v16180_v15  ;;  %v16240_v15 = vld [vmem:[#allocation7 + $0xbc4] ss:$16 sps:$4 sm:$0xff]  }
 0x4ae   : > { %9576 = vmatpush2.bf16.msra.mxu0 %v16175_v6  ;;  %v16235_v6 = vld [vmem:[#allocation7 + $0x9c0] ss:$16 sps:$4 sm:$0xff]  }
 0x4af   : > { %9617 = vmatpush2.bf16.msra.mxu1 %v16178_v7  ;;  %9627 = vmatprep.subr.bf16.mxu0 %v16183_v2  ;;  %v16238_v7 = vld [vmem:[#allocation7 + $0xbc0] ss:$16 sps:$4 sm:$0xff]   ;;  %v16243_v2 = vld [vmem:[#allocation7 + $0x9a4] ss:$16 sps:$4 sm:$0xff]  }
 0x4b0   : > { %9668 = vmatprep.subr.bf16.mxu1 %v16186_v16  ;;  %v16246_v16 = vld [vmem:[#allocation7 + $0xba4] ss:$16 sps:$4 sm:$0xff]  }
 0x4b1   : > { %v6223_v19 = vpop.f32.mrf.mxu0  ;;  %9578 = vmatmul.mubr.bf16.vlgmr.msra.gmra.mxu0 %v18167_v63 }
 0x4b2   : > { %v18183_v14 = vadd.f32 %v6223_v19, %v18159_v52  ;;  %v18185_v20 = vpop.f32.mrf.mxu1  ;;  %9619 = vmatmul.mubr.bf16.vlgmr.msra.gmra.mxu1 %v18171_v37  ;;  %9628 = vmatpush1.bf16.msra.mxu0 %v16181_v8  ;;  %v16198_v52 = vld [vmem:[#allocation7 + $0xaa4] ss:$16 sps:$4 sm:$0xff]   ;;  %v16241_v8 = vld [vmem:[#allocation7 + $0x9a0] ss:$16 sps:$4 sm:$0xff]  }
 0x4b3   : > { %9659 = vmatprep.mubr.bf16.mxu0 %v18175_v18  ;;  %9669 = vmatpush1.bf16.msra.mxu1 %v16184_v9  ;;  %v18189_v48 = vpop.f32.mrf.mxu0  ;;  %v16244_v9 = vld [vmem:[#allocation7 + $0xba0] ss:$16 sps:$4 sm:$0xff]   ;;  %v16252_v19 = vld [vmem:[#allocation7 + $0xb84] ss:$16 sps:$4 sm:$0xff]  }
 0x4b4   : > { %9700 = vmatprep.mubr.bf16.mxu1 %v18180_v1  ;;  %v18192_v50 = vpop.f32.mrf.mxu1  ;;  %9629 = vmatprep.subr.bf16.mxu0 %v16189_v17  ;;  %v16249_v17 = vld [vmem:[#allocation7 + $0x984] ss:$16 sps:$4 sm:$0xff]  }
 0x4b5   : > { %v6227_v59 = vpop.f32.mrf.mxu0  ;;  %9670 = vmatprep.subr.bf16.mxu1 %v16192_v11  ;;  %v16247_v11 = vld [vmem:[#allocation7 + $0x980] ss:$16 sps:$4 sm:$0xff]  }
 0x4b6   : > { %v6268_v5 = vpop.f32.mrf.mxu1  ;;  %9630 = vmatpush1.bf16.msra.mxu0 %v16187_v61  ;;  %v16250_v61 = vld [vmem:[#allocation7 + $0xb80] ss:$16 sps:$4 sm:$0xff]  }
 0x4b7   : > { %9671 = vmatpush1.bf16.msra.mxu1 %v16190_v21  ;;  %v6228_v47 = vpop.f32.mrf.mxu0  ;;  %9631 = vmatprep.subr.bf16.mxu0 %v16195_v33  ;;  %v16255_v21 = vld [vmem:[#allocation7 + $0x964] ss:$16 sps:$4 sm:$0xff]   ;;  %v16256_v59 = vld [vmem:[#allocation7 + $0xb60] ss:$16 sps:$4 sm:$0xff]  }
 0x4b8   : > { %v6269_v27 = vpop.f32.mrf.mxu1  ;;  %9672 = vmatprep.subr.bf16.mxu1 %v16198_v52  ;;  %v16258_v33 = vld [vmem:[#allocation7 + $0xb64] ss:$16 sps:$4 sm:$0xff]   ;;  %v16253_v52 = vld [vmem:[#allocation7 + $0x960] ss:$16 sps:$4 sm:$0xff]  }
 0x4b9   : > { %v16261_v5 = vld [vmem:[#allocation7 + $0x944] ss:$16 sps:$4 sm:$0xff]   ;;  %v16259_v47 = vld [vmem:[#allocation7 + $0x940] ss:$16 sps:$4 sm:$0xff]  }
 0x4ba   : > { %9632 = vmatpush1.bf16.msra.mxu0 %v16193_v32  ;;  %v16264_v32 = vld [vmem:[#allocation7 + $0xb44] ss:$16 sps:$4 sm:$0xff]  }
 0x4bb   : > { %9673 = vmatpush1.bf16.msra.mxu1 %v16196_v25  ;;  %9633 = vmatprep.subr.bf16.mxu0 %v16201_v26  ;;  %v16262_v25 = vld [vmem:[#allocation7 + $0xb40] ss:$16 sps:$4 sm:$0xff]   ;;  %v16267_v26 = vld [vmem:[#allocation7 + $0x924] ss:$16 sps:$4 sm:$0xff]  }
 0x4bc   : > { %9674 = vmatprep.subr.bf16.mxu1 %v16204_v28  ;;  %v16270_v27 = vld [vmem:[#allocation7 + $0xb24] ss:$16 sps:$4 sm:$0xff]   ;;  %v16265_v28 = vld [vmem:[#allocation7 + $0x920] ss:$16 sps:$4 sm:$0xff]  }
 0x4be   : > { %9634 = vmatpush1.bf16.msra.mxu0 %v16199_v29  ;;  %v16268_v29 = vld [vmem:[#allocation7 + $0xb20] ss:$16 sps:$4 sm:$0xff]  }
 0x4bf   : > { %9675 = vmatpush1.bf16.msra.mxu1 %v16202_v31  ;;  %9635 = vmatprep.subr.bf16.mxu0 %v16207_v51  ;;  %v16273_v31 = vld [vmem:[#allocation7 + $0x904] ss:$16 sps:$4 sm:$0xff]  }
 0x4c0   : > { %9676 = vmatprep.subr.bf16.mxu1 %v16210_v34  ;;  %v16276_v51 = vld [vmem:[#allocation7 + $0xb04] ss:$16 sps:$4 sm:$0xff]   ;;  %v16271_v34 = vld [vmem:[#allocation7 + $0x900] ss:$16 sps:$4 sm:$0xff]  }
 0x4c2   : > { %9636 = vmatpush1.bf16.msra.mxu0 %v16205_v35  ;;  %v16274_v35 = vld [vmem:[#allocation7 + $0xb00] ss:$16 sps:$4 sm:$0xff]  }
 0x4c3   : > { %9677 = vmatpush1.bf16.msra.mxu1 %v16208_v38  ;;  %9637 = vmatprep.subr.bf16.mxu0 %v16213_v40  ;;  %v16279_v38 = vld [vmem:[#allocation7 + $0xce4] ss:$16 sps:$4 sm:$0xff]  }
 0x4c4   : > { %9678 = vmatprep.subr.bf16.mxu1 %v16216_v43  ;;  %v16282_v40 = vld [vmem:[#allocation7 + $0xee4] ss:$16 sps:$4 sm:$0xff]   ;;  %v6226_v43 = vadd.f32 %v18189_v48, %v18163_v13  ;;  %v16286_v48 = vld [vmem:[#allocation7 + $0xec0] ss:$16 sps:$4 sm:$0xff]  }
 0x4c6   : > { %9638 = vmatpush1.bf16.msra.mxu0 %v16211_v45  ;;  %v16277_v45 = vld [vmem:[#allocation7 + $0xce0] ss:$16 sps:$4 sm:$0xff]  }
 0x4c7   : > { %9679 = vmatpush1.bf16.msra.mxu1 %v16214_v46  ;;  %9639 = vmatprep.subr.bf16.mxu0 %v16219_v54  ;;  %v18198_v46 = vpack.c.bf16 %v18111_v41, %v18111_v41  ;;  %v16280_v54 = vld [vmem:[#allocation7 + $0xee0] ss:$16 sps:$4 sm:$0xff]  }
 0x4c8   : > { %9680 = vmatprep.subr.bf16.mxu1 %v16222_v10  ;;  %v18202_v10 = vpack.c.bf16 %v18135_v23, %v18135_v23  ;;  %v16283_v41 = vld [vmem:[#allocation7 + $0xcc0] ss:$16 sps:$4 sm:$0xff]  }
 0x4ca   : > { %9640 = vmatpush1.bf16.msra.mxu0 %v16217_v49  ;;  %v16285_v49 = vld [vmem:[#allocation7 + $0xcc4] ss:$16 sps:$4 sm:$0xff]  }
 0x4cb   : > { %9681 = vmatpush1.bf16.msra.mxu1 %v16220_v55  ;;  %9641 = vmatprep.subr.bf16.mxu0 %v16225_v56  ;;  %v16288_v55 = vld [vmem:[#allocation7 + $0xec4] ss:$16 sps:$4 sm:$0xff]   ;;  %v18204_v56 = vpack.c.bf16 %v6226_v43, %v6226_v43 }
 0x4cc   : > { %9682 = vmatprep.subr.bf16.mxu1 %v16228_v30  ;;  %v16336_v43 = vld [vmem:[#allocation7 + $0xfc4] ss:$16 sps:$4 sm:$0xff]  }
 0x4ce   : > { %9642 = vmatpush1.bf16.msra.mxu0 %v16223_v4  ;;  %v16291_v4 = vld [vmem:[#allocation7 + $0xca4] ss:$16 sps:$4 sm:$0xff]  }
 0x4cf   : > { %9683 = vmatpush1.bf16.msra.mxu1 %v16226_v57  ;;  %9643 = vmatprep.subr.bf16.mxu0 %v16231_v58 }
 0x4d0   : > { %9684 = vmatprep.subr.bf16.mxu1 %v16234_v22  ;;  %v16294_v22 = vld [vmem:[#allocation7 + $0xea4] ss:$16 sps:$4 sm:$0xff]  }
 0x4d2   : > { %9644 = vmatpush2.bf16.msra.mxu0 %v16229_v60 }
 0x4d3   : > { %9685 = vmatpush2.bf16.msra.mxu1 %v16232_v62  ;;  %9645 = vmatprep.subr.bf16.mxu0 %v16237_v0 }
 0x4d4   : > { %9686 = vmatprep.subr.bf16.mxu1 %v16240_v15  ;;  %v16289_v15 = vld [vmem:[#allocation7 + $0xca0] ss:$16 sps:$4 sm:$0xff]  }
 0x4d6   : > { %9646 = vmatpush2.bf16.msra.mxu0 %v16235_v6 }
 0x4d7   : > { %9687 = vmatpush2.bf16.msra.mxu1 %v16238_v7  ;;  %9647 = vmatprep.subr.bf16.mxu0 %v16243_v2  ;;  %v16292_v7 = vld [vmem:[#allocation7 + $0xea0] ss:$16 sps:$4 sm:$0xff]   ;;  %v16297_v2 = vld [vmem:[#allocation7 + $0xc84] ss:$16 sps:$4 sm:$0xff]  }
 0x4d8   : > { %9688 = vmatprep.subr.bf16.mxu1 %v16246_v16 }
 0x4da   : > { %9648 = vmatpush2.bf16.msra.mxu0 %v16241_v8 }
 0x4db   : > { %9689 = vmatpush2.bf16.msra.mxu1 %v16244_v9  ;;  %9649 = vmatprep.subr.bf16.mxu0 %v16249_v17  ;;  %v16300_v9 = vld [vmem:[#allocation7 + $0xe84] ss:$16 sps:$4 sm:$0xff]   ;;  %v16298_v17 = vld [vmem:[#allocation7 + $0xe80] ss:$16 sps:$4 sm:$0xff]  }
 0x4dc   : > { %9690 = vmatprep.subr.bf16.mxu1 %v16252_v19  ;;  %v16303_v19 = vld [vmem:[#allocation7 + $0xc64] ss:$16 sps:$4 sm:$0xff]  }
 0x4de   : > { %9650 = vmatpush2.bf16.msra.mxu0 %v16247_v11  ;;  %v16306_v11 = vld [vmem:[#allocation7 + $0xe64] ss:$16 sps:$4 sm:$0xff]  }
 0x4df   : > { %9691 = vmatpush2.bf16.msra.mxu1 %v16250_v61  ;;  %9651 = vmatprep.subr.bf16.mxu0 %v16255_v21  ;;  %v16301_v61 = vld [vmem:[#allocation7 + $0xc60] ss:$16 sps:$4 sm:$0xff]  }
 0x4e0   : > { %9692 = vmatprep.subr.bf16.mxu1 %v16258_v33  ;;  %v16304_v21 = vld [vmem:[#allocation7 + $0xe60] ss:$16 sps:$4 sm:$0xff]   ;;  %v16309_v33 = vld [vmem:[#allocation7 + $0xc44] ss:$16 sps:$4 sm:$0xff]  }
 0x4e2   : > { %9652 = vmatpush2.bf16.msra.mxu0 %v16253_v52  ;;  %v16312_v52 = vld [vmem:[#allocation7 + $0xe44] ss:$16 sps:$4 sm:$0xff]  }
 0x4e3   : > { %9693 = vmatpush2.bf16.msra.mxu1 %v16256_v59  ;;  %9653 = vmatprep.subr.bf16.mxu0 %v16261_v5  ;;  %v16307_v59 = vld [vmem:[#allocation7 + $0xc40] ss:$16 sps:$4 sm:$0xff]  }
 0x4e4   : > { %9694 = vmatprep.subr.bf16.mxu1 %v16264_v32  ;;  %v16310_v5 = vld [vmem:[#allocation7 + $0xe40] ss:$16 sps:$4 sm:$0xff]   ;;  %v16315_v32 = vld [vmem:[#allocation7 + $0xc24] ss:$16 sps:$4 sm:$0xff]  }
 0x4e6   : > { %9654 = vmatpush2.bf16.msra.mxu0 %v16259_v47  ;;  %v16318_v47 = vld [vmem:[#allocation7 + $0xe24] ss:$16 sps:$4 sm:$0xff]  }
 0x4e7   : > { %9695 = vmatpush2.bf16.msra.mxu1 %v16262_v25  ;;  %9655 = vmatprep.subr.bf16.mxu0 %v16267_v26  ;;  %v16313_v25 = vld [vmem:[#allocation7 + $0xc20] ss:$16 sps:$4 sm:$0xff]  }
 0x4e8   : > { %9696 = vmatprep.subr.bf16.mxu1 %v16270_v27  ;;  %v16316_v26 = vld [vmem:[#allocation7 + $0xe20] ss:$16 sps:$4 sm:$0xff]   ;;  %v16321_v27 = vld [vmem:[#allocation7 + $0xc04] ss:$16 sps:$4 sm:$0xff]  }
 0x4ea   : > { %9656 = vmatpush2.bf16.msra.mxu0 %v16265_v28  ;;  %v16324_v28 = vld [vmem:[#allocation7 + $0xe04] ss:$16 sps:$4 sm:$0xff]  }
 0x4eb   : > { %9697 = vmatpush2.bf16.msra.mxu1 %v16268_v29  ;;  %9657 = vmatprep.subr.bf16.mxu0 %v16273_v31  ;;  %v16319_v29 = vld [vmem:[#allocation7 + $0xc00] ss:$16 sps:$4 sm:$0xff]  }
 0x4ec   : > { %9698 = vmatprep.subr.bf16.mxu1 %v16276_v51  ;;  %v16322_v31 = vld [vmem:[#allocation7 + $0xe00] ss:$16 sps:$4 sm:$0xff]   ;;  %v16327_v51 = vld [vmem:[#allocation7 + $0xde4] ss:$16 sps:$4 sm:$0xff]  }
 0x4ee   : > { %9658 = vmatpush2.bf16.msra.mxu0 %v16271_v34  ;;  %v16330_v34 = vld [vmem:[#allocation7 + $0xfe4] ss:$16 sps:$4 sm:$0xff]  }
 0x4ef   : > { %9699 = vmatpush2.bf16.msra.mxu1 %v16274_v35  ;;  %9709 = vmatprep.subr.bf16.mxu0 %v16279_v38  ;;  %v16325_v35 = vld [vmem:[#allocation7 + $0xde0] ss:$16 sps:$4 sm:$0xff]  }
 0x4f0   : > { %9750 = vmatprep.subr.bf16.mxu1 %v16282_v40  ;;  %v16328_v38 = vld [vmem:[#allocation7 + $0xfe0] ss:$16 sps:$4 sm:$0xff]   ;;  %v16333_v40 = vld [vmem:[#allocation7 + $0xdc4] ss:$16 sps:$4 sm:$0xff]  }
 0x4f1   : > { %v18206_v30 = vpop.f32.mrf.mxu0  ;;  %9660 = vmatmul.mubr.bf16.vlgmr.msra.gmra.mxu0 %v18198_v46 }
 0x4f2   : > { %v18209_v13 = vpop.f32.mrf.mxu1  ;;  %9701 = vmatmul.mubr.bf16.vlgmr.msra.gmra.mxu1 %v18202_v10  ;;  %9710 = vmatpush1.bf16.msra.mxu0 %v16277_v45  ;;  %v16331_v45 = vld [vmem:[#allocation7 + $0xdc0] ss:$16 sps:$4 sm:$0xff]  }
 0x4f3   : > { %9741 = vmatprep.mubr.bf16.mxu0 %v18204_v56  ;;  %9751 = vmatpush1.bf16.msra.mxu1 %v16280_v54  ;;  %v6307_v23 = vpop.f32.mrf.mxu0  ;;  %v16334_v54 = vld [vmem:[#allocation7 + $0xfc0] ss:$16 sps:$4 sm:$0xff]  }
 0x4f4   : > { %v6308_v57 = vadd.f32 %v6307_v23, %v18192_v50  ;;  %v6348_v58 = vpop.f32.mrf.mxu1  ;;  %9711 = vmatprep.subr.bf16.mxu0 %v16285_v49  ;;  %9752 = vmatprep.subr.bf16.mxu1 %v16288_v55  ;;  %v16295_v50 = vld [vmem:[#allocation7 + $0xc80] ss:$16 sps:$4 sm:$0xff]   ;;  %v16339_v49 = vld [vmem:[#allocation7 + $0xda4] ss:$16 sps:$4 sm:$0xff]  }
 0x4f5   : > { %v6309_v60 = vpop.f32.mrf.mxu0  ;;  %v16342_v55 = vld [vmem:[#allocation7 + $0xfa4] ss:$16 sps:$4 sm:$0xff]   ;;  %v16340_v23 = vld [vmem:[#allocation7 + $0xfa0] ss:$16 sps:$4 sm:$0xff]  }
 0x4f6   : > { %v6349_v62 = vadd.f32 %v6348_v58, %v6308_v57  ;;  %v6350_v0 = vpop.f32.mrf.mxu1  ;;  %9712 = vmatpush1.bf16.msra.mxu0 %v16283_v41  ;;  %v16337_v41 = vld [vmem:[#allocation7 + $0xda0] ss:$16 sps:$4 sm:$0xff]   ;;  %v16354_v60 = vld [vmem:[#allocation7 + $0xf64] ss:$16 sps:$4 sm:$0xff]  }
 0x4f7   : > { %9753 = vmatpush1.bf16.msra.mxu1 %v16286_v48  ;;  %v6310_v6 = vpop.f32.mrf.mxu0  ;;  %9713 = vmatprep.subr.bf16.mxu0 %v16291_v4  ;;  %v16345_v48 = vld [vmem:[#allocation7 + $0xd84] ss:$16 sps:$4 sm:$0xff]   ;;  %v16343_v57 = vld [vmem:[#allocation7 + $0xd80] ss:$16 sps:$4 sm:$0xff]  }
 0x4f8   : > { %v18214_v16 = vpack.c.bf16 %v6349_v62, %v6349_v62  ;;  %v6351_v8 = vpop.f32.mrf.mxu1  ;;  %9754 = vmatprep.subr.bf16.mxu1 %v16294_v22  ;;  %v16348_v4 = vld [vmem:[#allocation7 + $0xf84] ss:$16 sps:$4 sm:$0xff]   ;;  %v16346_v58 = vld [vmem:[#allocation7 + $0xf80] ss:$16 sps:$4 sm:$0xff]  }
 0x4f9   : > { %v16351_v22 = vld [vmem:[#allocation7 + $0xd64] ss:$16 sps:$4 sm:$0xff]   ;;  %v16349_v62 = vld [vmem:[#allocation7 + $0xd60] ss:$16 sps:$4 sm:$0xff]  }
 0x4fa   : > { %9714 = vmatpush1.bf16.msra.mxu0 %v16289_v15  ;;  %9782 = vmatprep.mubr.bf16.mxu1 %v18214_v16  ;;  %v16352_v0 = vld [vmem:[#allocation7 + $0xf60] ss:$16 sps:$4 sm:$0xff]   ;;  %v16357_v15 = vld [vmem:[#allocation7 + $0xd44] ss:$16 sps:$4 sm:$0xff]  }
 0x4fb   : > { %9755 = vmatpush1.bf16.msra.mxu1 %v16292_v7  ;;  %9715 = vmatprep.subr.bf16.mxu0 %v16297_v2  ;;  %v16360_v6 = vld [vmem:[#allocation7 + $0xf44] ss:$16 sps:$4 sm:$0xff]   ;;  %v16355_v7 = vld [vmem:[#allocation7 + $0xd40] ss:$16 sps:$4 sm:$0xff]  }
 0x4fc   : > { %9756 = vmatprep.subr.bf16.mxu1 %v16300_v9  ;;  %v16358_v2 = vld [vmem:[#allocation7 + $0xf40] ss:$16 sps:$4 sm:$0xff]   ;;  %v16363_v8 = vld [vmem:[#allocation7 + $0xd24] ss:$16 sps:$4 sm:$0xff]  }
 0x4fd   : > { %v16366_v9 = vld [vmem:[#allocation7 + $0xf24] ss:$16 sps:$4 sm:$0xff]  }
 0x4fe   : > { %9716 = vmatpush1.bf16.msra.mxu0 %v16295_v50  ;;  %v16361_v50 = vld [vmem:[#allocation7 + $0xd20] ss:$16 sps:$4 sm:$0xff]  }
 0x4ff   : > { %9757 = vmatpush1.bf16.msra.mxu1 %v16298_v17  ;;  %9717 = vmatprep.subr.bf16.mxu0 %v16303_v19  ;;  %v16364_v17 = vld [vmem:[#allocation7 + $0xf20] ss:$16 sps:$4 sm:$0xff]   ;;  %v16369_v19 = vld [vmem:[#allocation7 + $0xd04] ss:$16 sps:$4 sm:$0xff]  }
 0x500   : > { %9758 = vmatprep.subr.bf16.mxu1 %v16306_v11  ;;  %v6306_v11 = vadd.f32 %v18206_v30, %v18185_v20  ;;  %v16373_v30 = vld [vmem:[#allocation7 + $0xe8] ss:$16 sps:$4 sm:$0xff]  }
 0x502   : > { %9718 = vmatpush1.bf16.msra.mxu0 %v16301_v61  ;;  %v16372_v61 = vld [vmem:[#allocation7 + $0xf04] ss:$16 sps:$4 sm:$0xff]  }
 0x503   : > { %9759 = vmatpush1.bf16.msra.mxu1 %v16304_v21  ;;  %9719 = vmatprep.subr.bf16.mxu0 %v16309_v33  ;;  %v16367_v21 = vld [vmem:[#allocation7 + $0xd00] ss:$16 sps:$4 sm:$0xff]   ;;  %v18220_v33 = vsub.s32 0, %v17984_v44 }
 0x504   : > { %9760 = vmatprep.subr.bf16.mxu1 %v16312_v52  ;;  %v16370_v52 = vld [vmem:[#allocation7 + $0xf00] ss:$16 sps:$4 sm:$0xff]  }
 0x506   : > { %9720 = vmatpush1.bf16.msra.mxu0 %v16307_v59  ;;  %v6881_v59 = vld [vmem:[#allocation8] sm:$0xf] }
 0x507   : > { %9761 = vmatpush1.bf16.msra.mxu1 %v16310_v5  ;;  %9721 = vmatprep.subr.bf16.mxu0 %v16315_v32  ;;  %v16375_v5 = vld [vmem:[#allocation7 + $0xec] ss:$16 sps:$4 sm:$0xff]   ;;  %v6347_v32 = vadd.f32 %v18209_v13, %v6306_v11  ;;  %v6886_v20 = vrot.slane %v6881_v59, %v18220_v33  ;;  %v16409_v11 = vld [vmem:[#allocation7 + $0x28] ss:$16 sps:$4 sm:$0xff]  }
 0x508   : > { %9762 = vmatprep.subr.bf16.mxu1 %v16318_v47  ;;  %v16378_v47 = vld [vmem:[#allocation7 + $0x2ec] ss:$16 sps:$4 sm:$0xff]  }
 0x50a   : > { %9722 = vmatpush1.bf16.msra.mxu0 %v16313_v25  ;;  %v18224_v25 = vsub.s32 1, %v17984_v44 }
 0x50b   : > { %9763 = vmatpush1.bf16.msra.mxu1 %v16316_v26  ;;  %9723 = vmatprep.subr.bf16.mxu0 %v16321_v27  ;;  %v18229_v26 = vpack.c.bf16 %v18183_v14, %v18183_v14  ;;  %v16376_v27 = vld [vmem:[#allocation7 + $0x2e8] ss:$16 sps:$4 sm:$0xff]  }
 0x50c   : > { %9764 = vmatprep.subr.bf16.mxu1 %v16324_v28  ;;  %v18231_v28 = vpack.c.bf16 %v6347_v32, %v6347_v32  ;;  %v6890_v13 = vrot.slane %v6881_v59, %v18224_v25  ;;  %v16379_v14 = vld [vmem:[#allocation7 + $0xc8] ss:$16 sps:$4 sm:$0xff]   ;;  %v16423_v32 = vld [vmem:[#allocation7 + $0x1ec] ss:$16 sps:$4 sm:$0xff]  }
 0x50d   : > { %v16415_v59 = vld [vmem:[#allocation7 + $0x8] ss:$16 sps:$4 sm:$0xff]  }
 0x50e   : > { %9724 = vmatpush1.bf16.msra.mxu0 %v16319_v29  ;;  %v16381_v29 = vld [vmem:[#allocation7 + $0xcc] ss:$16 sps:$4 sm:$0xff]  }
 0x50f   : > { %9765 = vmatpush1.bf16.msra.mxu1 %v16322_v31  ;;  %9725 = vmatprep.subr.bf16.mxu0 %v16327_v51  ;;  %v16384_v51 = vld [vmem:[#allocation7 + $0x2cc] ss:$16 sps:$4 sm:$0xff]  }
 0x510   : > { %9766 = vmatprep.subr.bf16.mxu1 %v16330_v34 }
 0x512   : > { %9726 = vmatpush2.bf16.msra.mxu0 %v16325_v35 }
 0x513   : > { %9767 = vmatpush2.bf16.msra.mxu1 %v16328_v38  ;;  %9727 = vmatprep.subr.bf16.mxu0 %v16333_v40  ;;  %v16382_v40 = vld [vmem:[#allocation7 + $0x2c8] ss:$16 sps:$4 sm:$0xff]  }
 0x514   : > { %9768 = vmatprep.subr.bf16.mxu1 %v16336_v43  ;;  %v16387_v43 = vld [vmem:[#allocation7 + $0xac] ss:$16 sps:$4 sm:$0xff]  }
 0x516   : > { %9728 = vmatpush2.bf16.msra.mxu0 %v16331_v45 }
 0x517   : > { %9769 = vmatpush2.bf16.msra.mxu1 %v16334_v54  ;;  %9729 = vmatprep.subr.bf16.mxu0 %v16339_v49 }
 0x518   : > { %9770 = vmatprep.subr.bf16.mxu1 %v16342_v55  ;;  %v16390_v55 = vld [vmem:[#allocation7 + $0x2ac] ss:$16 sps:$4 sm:$0xff]  }
 0x51a   : > { %9730 = vmatpush2.bf16.msra.mxu0 %v16337_v41 }
 0x51b   : > { %9771 = vmatpush2.bf16.msra.mxu1 %v16340_v23  ;;  %9731 = vmatprep.subr.bf16.mxu0 %v16345_v48 }
 0x51c   : > { %9772 = vmatprep.subr.bf16.mxu1 %v16348_v4  ;;  %v16385_v4 = vld [vmem:[#allocation7 + $0xa8] ss:$16 sps:$4 sm:$0xff]  }
 0x51e   : > { %9732 = vmatpush2.bf16.msra.mxu0 %v16343_v57  ;;  %v16388_v57 = vld [vmem:[#allocation7 + $0x2a8] ss:$16 sps:$4 sm:$0xff]  }
 0x51f   : > { %9773 = vmatpush2.bf16.msra.mxu1 %v16346_v58  ;;  %9733 = vmatprep.subr.bf16.mxu0 %v16351_v22  ;;  %v16393_v58 = vld [vmem:[#allocation7 + $0x8c] ss:$16 sps:$4 sm:$0xff]  }
 0x520   : > { %9774 = vmatprep.subr.bf16.mxu1 %v16354_v60  ;;  %v16396_v60 = vld [vmem:[#allocation7 + $0x28c] ss:$16 sps:$4 sm:$0xff]  }
 0x522   : > { %9734 = vmatpush2.bf16.msra.mxu0 %v16349_v62  ;;  %v16394_v62 = vld [vmem:[#allocation7 + $0x288] ss:$16 sps:$4 sm:$0xff]  }
 0x523   : > { %9775 = vmatpush2.bf16.msra.mxu1 %v16352_v0  ;;  %9735 = vmatprep.subr.bf16.mxu0 %v16357_v15  ;;  %v16399_v0 = vld [vmem:[#allocation7 + $0x6c] ss:$16 sps:$4 sm:$0xff]  }
 0x524   : > { %9776 = vmatprep.subr.bf16.mxu1 %v16360_v6  ;;  %v16402_v15 = vld [vmem:[#allocation7 + $0x26c] ss:$16 sps:$4 sm:$0xff]   ;;  %v16397_v6 = vld [vmem:[#allocation7 + $0x68] ss:$16 sps:$4 sm:$0xff]  }
 0x526   : > { %9736 = vmatpush2.bf16.msra.mxu0 %v16355_v7  ;;  %v16400_v7 = vld [vmem:[#allocation7 + $0x268] ss:$16 sps:$4 sm:$0xff]  }
 0x527   : > { %9777 = vmatpush2.bf16.msra.mxu1 %v16358_v2  ;;  %9737 = vmatprep.subr.bf16.mxu0 %v16363_v8  ;;  %v16405_v2 = vld [vmem:[#allocation7 + $0x4c] ss:$16 sps:$4 sm:$0xff]  }
 0x528   : > { %9778 = vmatprep.subr.bf16.mxu1 %v16366_v9  ;;  %v16408_v8 = vld [vmem:[#allocation7 + $0x24c] ss:$16 sps:$4 sm:$0xff]   ;;  %v16403_v9 = vld [vmem:[#allocation7 + $0x48] ss:$16 sps:$4 sm:$0xff]  }
 0x52a   : > { %9738 = vmatpush2.bf16.msra.mxu0 %v16361_v50  ;;  %v16406_v50 = vld [vmem:[#allocation7 + $0x248] ss:$16 sps:$4 sm:$0xff]  }
 0x52b   : > { %9779 = vmatpush2.bf16.msra.mxu1 %v16364_v17  ;;  %9739 = vmatprep.subr.bf16.mxu0 %v16369_v19  ;;  %v16411_v17 = vld [vmem:[#allocation7 + $0x2c] ss:$16 sps:$4 sm:$0xff]  }
 0x52c   : > { %9780 = vmatprep.subr.bf16.mxu1 %v16372_v61  ;;  %v16414_v19 = vld [vmem:[#allocation7 + $0x22c] ss:$16 sps:$4 sm:$0xff]   ;;  %v16412_v61 = vld [vmem:[#allocation7 + $0x228] ss:$16 sps:$4 sm:$0xff]  }
 0x52e   : > { %9740 = vmatpush2.bf16.msra.mxu0 %v16367_v21  ;;  %v16417_v21 = vld [vmem:[#allocation7 + $0xc] ss:$16 sps:$4 sm:$0xff]  }
 0x52f   : > { %9781 = vmatpush2.bf16.msra.mxu1 %v16370_v52  ;;  %9791 = vmatprep.subr.bf16.mxu0 %v16375_v5  ;;  %v16420_v52 = vld [vmem:[#allocation7 + $0x20c] ss:$16 sps:$4 sm:$0xff]   ;;  %v16418_v5 = vld [vmem:[#allocation7 + $0x208] ss:$16 sps:$4 sm:$0xff]  }
 0x530   : > { %9832 = vmatprep.subr.bf16.mxu1 %v16378_v47  ;;  %v16426_v47 = vld [vmem:[#allocation7 + $0x3ec] ss:$16 sps:$4 sm:$0xff]  }
 0x531   : > { %v9497_v31 = vpop.f32.mrf.mxu0  ;;  %9742 = vmatmul.mubr.bf16.vlgmr.msra.gmra.mxu0 %v18229_v26 }
 0x532   : > { %v9498_v34 = vadd.f32 %v9497_v31, %v6886_v20  ;;  %v9538_v35 = vpop.f32.mrf.mxu1  ;;  %9783 = vmatmul.mubr.bf16.vlgmr.msra.gmra.mxu1 %v18231_v28  ;;  %9792 = vmatpush1.bf16.msra.mxu0 %v16373_v30  ;;  %v16421_v20 = vld [vmem:[#allocation7 + $0x1e8] ss:$16 sps:$4 sm:$0xff]  }
 0x533   : > { %9823 = vmatprep.mubr.bf16.mxu0 %v18125_v24  ;;  %9833 = vmatpush1.bf16.msra.mxu1 %v16376_v27  ;;  %v9499_v38 = vpop.f32.mrf.mxu0  ;;  %v16424_v30 = vld [vmem:[#allocation7 + $0x3e8] ss:$16 sps:$4 sm:$0xff]   ;;  %v16429_v27 = vld [vmem:[#allocation7 + $0x1cc] ss:$16 sps:$4 sm:$0xff]  }
 0x534   : > { %v18237_v45 = vadd.f32 %v9538_v35, %v9498_v34  ;;  %9864 = vmatprep.mubr.bf16.mxu1 %v18130_v12  ;;  %v9500_v54 = vadd.f32 %v9499_v38, %v6890_v13  ;;  %v9540_v49 = vpop.f32.mrf.mxu1  ;;  %9793 = vmatprep.subr.bf16.mxu0 %v16381_v29  ;;  %v16391_v12 = vld [vmem:[#allocation7 + $0x88] ss:$16 sps:$4 sm:$0xff]   ;;  %v16432_v13 = vld [vmem:[#allocation7 + $0x3cc] ss:$16 sps:$4 sm:$0xff]  }
 0x535   : > { %v9501_v41 = vpop.f32.mrf.mxu0  ;;  %9834 = vmatprep.subr.bf16.mxu1 %v16384_v51  ;;  %v16427_v29 = vld [vmem:[#allocation7 + $0x1c8] ss:$16 sps:$4 sm:$0xff]   ;;  %v16435_v51 = vld [vmem:[#allocation7 + $0x1ac] ss:$16 sps:$4 sm:$0xff]  }
 0x536   : > { %v18240_v23 = vadd.f32 %v9540_v49, %v9500_v54  ;;  %v9542_v48 = vpop.f32.mrf.mxu1  ;;  %9794 = vmatpush1.bf16.msra.mxu0 %v16379_v14  ;;  %v16430_v31 = vld [vmem:[#allocation7 + $0x3c8] ss:$16 sps:$4 sm:$0xff]   ;;  %v16438_v34 = vld [vmem:[#allocation7 + $0x3ac] ss:$16 sps:$4 sm:$0xff]  }
 0x537   : > { %9835 = vmatpush1.bf16.msra.mxu1 %v16382_v40  ;;  %v9502_v24 = vpop.f32.mrf.mxu0  ;;  %9795 = vmatprep.subr.bf16.mxu0 %v16387_v43  ;;  %v16433_v35 = vld [vmem:[#allocation7 + $0x1a8] ss:$16 sps:$4 sm:$0xff]   ;;  %v16441_v38 = vld [vmem:[#allocation7 + $0x18c] ss:$16 sps:$4 sm:$0xff]  }
 0x538   : > { %v9543_v22 = vpop.f32.mrf.mxu1  ;;  %9836 = vmatprep.subr.bf16.mxu1 %v16390_v55  ;;  %v16436_v14 = vld [vmem:[#allocation7 + $0x3a8] ss:$16 sps:$4 sm:$0xff]   ;;  %v16444_v40 = vld [vmem:[#allocation7 + $0x38c] ss:$16 sps:$4 sm:$0xff]  }
 0x539   : > { %v16439_v43 = vld [vmem:[#allocation7 + $0x188] ss:$16 sps:$4 sm:$0xff]   ;;  %v16447_v49 = vld [vmem:[#allocation7 + $0x16c] ss:$16 sps:$4 sm:$0xff]  }
 0x53a   : > { %9796 = vmatpush1.bf16.msra.mxu0 %v16385_v4  ;;  %v16442_v54 = vld [vmem:[#allocation7 + $0x388] ss:$16 sps:$4 sm:$0xff]   ;;  %v16450_v55 = vld [vmem:[#allocation7 + $0x36c] ss:$16 sps:$4 sm:$0xff]  }
 0x53b   : > { %9837 = vmatpush1.bf16.msra.mxu1 %v16388_v57  ;;  %9797 = vmatprep.subr.bf16.mxu0 %v16393_v58  ;;  %v16445_v41 = vld [vmem:[#allocation7 + $0x168] ss:$16 sps:$4 sm:$0xff]   ;;  %v16453_v4 = vld [vmem:[#allocation7 + $0x14c] ss:$16 sps:$4 sm:$0xff]  }
 0x53c   : > { %9838 = vmatprep.subr.bf16.mxu1 %v16396_v60  ;;  %v16448_v48 = vld [vmem:[#allocation7 + $0x368] ss:$16 sps:$4 sm:$0xff]   ;;  %v16456_v24 = vld [vmem:[#allocation7 + $0x34c] ss:$16 sps:$4 sm:$0xff]  }
 0x53d   : > { %v16451_v57 = vld [vmem:[#allocation7 + $0x148] ss:$16 sps:$4 sm:$0xff]   ;;  %v16459_v22 = vld [vmem:[#allocation7 + $0x12c] ss:$16 sps:$4 sm:$0xff]  }
 0x53e   : > { %9798 = vmatpush1.bf16.msra.mxu0 %v16391_v12  ;;  %v16454_v58 = vld [vmem:[#allocation7 + $0x348] ss:$16 sps:$4 sm:$0xff]   ;;  %v16462_v60 = vld [vmem:[#allocation7 + $0x32c] ss:$16 sps:$4 sm:$0xff]  }
 0x53f   : > { %9839 = vmatpush1.bf16.msra.mxu1 %v16394_v62  ;;  %9799 = vmatprep.subr.bf16.mxu0 %v16399_v0  ;;  %v16457_v12 = vld [vmem:[#allocation7 + $0x128] ss:$16 sps:$4 sm:$0xff]   ;;  %v16465_v0 = vld [vmem:[#allocation7 + $0x10c] ss:$16 sps:$4 sm:$0xff]  }
 0x540   : > { %9840 = vmatprep.subr.bf16.mxu1 %v16402_v15  ;;  %v16460_v62 = vld [vmem:[#allocation7 + $0x328] ss:$16 sps:$4 sm:$0xff]   ;;  %v16468_v15 = vld [vmem:[#allocation7 + $0x30c] ss:$16 sps:$4 sm:$0xff]  }
 0x542   : > { %9800 = vmatpush1.bf16.msra.mxu0 %v16397_v6  ;;  %v16463_v6 = vld [vmem:[#allocation7 + $0x108] ss:$16 sps:$4 sm:$0xff]  }
 0x543   : > { %9841 = vmatpush1.bf16.msra.mxu1 %v16400_v7  ;;  %9801 = vmatprep.subr.bf16.mxu0 %v16405_v2  ;;  %v16466_v7 = vld [vmem:[#allocation7 + $0x308] ss:$16 sps:$4 sm:$0xff]   ;;  %v16471_v2 = vld [vmem:[#allocation7 + $0x4ec] ss:$16 sps:$4 sm:$0xff]  }
 0x544   : > { %9842 = vmatprep.subr.bf16.mxu1 %v16408_v8  ;;  %v16474_v8 = vld [vmem:[#allocation7 + $0x6ec] ss:$16 sps:$4 sm:$0xff]  }
 0x546   : > { %9802 = vmatpush1.bf16.msra.mxu0 %v16403_v9  ;;  %v16469_v9 = vld [vmem:[#allocation7 + $0x4e8] ss:$16 sps:$4 sm:$0xff]  }
 0x547   : > { %9843 = vmatpush1.bf16.msra.mxu1 %v16406_v50  ;;  %9803 = vmatprep.subr.bf16.mxu0 %v16411_v17  ;;  %v16472_v50 = vld [vmem:[#allocation7 + $0x6e8] ss:$16 sps:$4 sm:$0xff]   ;;  %v16477_v17 = vld [vmem:[#allocation7 + $0x4cc] ss:$16 sps:$4 sm:$0xff]  }
 0x548   : > { %9844 = vmatprep.subr.bf16.mxu1 %v16414_v19 }
 0x54a   : > { %9804 = vmatpush1.bf16.msra.mxu0 %v16409_v11  ;;  %v16480_v11 = vld [vmem:[#allocation7 + $0x6cc] ss:$16 sps:$4 sm:$0xff]  }
 0x54b   : > { %9845 = vmatpush1.bf16.msra.mxu1 %v16412_v61  ;;  %9805 = vmatprep.subr.bf16.mxu0 %v16417_v21 }
 0x54c   : > { %9846 = vmatprep.subr.bf16.mxu1 %v16420_v52  ;;  %v16475_v52 = vld [vmem:[#allocation7 + $0x4c8] ss:$16 sps:$4 sm:$0xff]  }
 0x54e   : > { %9806 = vmatpush1.bf16.msra.mxu0 %v16415_v59 }
 0x54f   : > { %9847 = vmatpush1.bf16.msra.mxu1 %v16418_v5  ;;  %9807 = vmatprep.subr.bf16.mxu0 %v16423_v32  ;;  %v16478_v5 = vld [vmem:[#allocation7 + $0x6c8] ss:$16 sps:$4 sm:$0xff]   ;;  %v16483_v32 = vld [vmem:[#allocation7 + $0x4ac] ss:$16 sps:$4 sm:$0xff]  }
 0x550   : > { %9848 = vmatprep.subr.bf16.mxu1 %v16426_v47 }
 0x552   : > { %9808 = vmatpush2.bf16.msra.mxu0 %v16421_v20 }
 0x553   : > { %9849 = vmatpush2.bf16.msra.mxu1 %v16424_v30  ;;  %9809 = vmatprep.subr.bf16.mxu0 %v16429_v27 }
 0x554   : > { %9850 = vmatprep.subr.bf16.mxu1 %v16432_v13 }
 0x556   : > { %9810 = vmatpush2.bf16.msra.mxu0 %v16427_v29  ;;  %v16484_v29 = vld [vmem:[#allocation7 + $0x6a8] ss:$16 sps:$4 sm:$0xff]  }
 0x557   : > { %9851 = vmatpush2.bf16.msra.mxu1 %v16430_v31  ;;  %9811 = vmatprep.subr.bf16.mxu0 %v16435_v51  ;;  %v16489_v31 = vld [vmem:[#allocation7 + $0x48c] ss:$16 sps:$4 sm:$0xff]  }
 0x558   : > { %9852 = vmatprep.subr.bf16.mxu1 %v16438_v34  ;;  %v16490_v34 = vld [vmem:[#allocation7 + $0x688] ss:$16 sps:$4 sm:$0xff]  }
 0x55a   : > { %9812 = vmatpush2.bf16.msra.mxu0 %v16433_v35  ;;  %v16495_v35 = vld [vmem:[#allocation7 + $0x46c] ss:$16 sps:$4 sm:$0xff]  }
 0x55b   : > { %9853 = vmatpush2.bf16.msra.mxu1 %v16436_v14  ;;  %9813 = vmatprep.subr.bf16.mxu0 %v16441_v38  ;;  %v16498_v14 = vld [vmem:[#allocation7 + $0x66c] ss:$16 sps:$4 sm:$0xff]   ;;  %v16493_v38 = vld [vmem:[#allocation7 + $0x468] ss:$16 sps:$4 sm:$0xff]  }
 0x55c   : > { %9854 = vmatprep.subr.bf16.mxu1 %v16444_v40  ;;  %v16496_v40 = vld [vmem:[#allocation7 + $0x668] ss:$16 sps:$4 sm:$0xff]  }
 0x55e   : > { %9814 = vmatpush2.bf16.msra.mxu0 %v16439_v43  ;;  %v16501_v43 = vld [vmem:[#allocation7 + $0x44c] ss:$16 sps:$4 sm:$0xff]  }
 0x55f   : > { %9855 = vmatpush2.bf16.msra.mxu1 %v16442_v54  ;;  %9815 = vmatprep.subr.bf16.mxu0 %v16447_v49  ;;  %v16504_v54 = vld [vmem:[#allocation7 + $0x64c] ss:$16 sps:$4 sm:$0xff]   ;;  %v16499_v49 = vld [vmem:[#allocation7 + $0x448] ss:$16 sps:$4 sm:$0xff]  }
 0x560   : > { %9856 = vmatprep.subr.bf16.mxu1 %v16450_v55  ;;  %v16502_v55 = vld [vmem:[#allocation7 + $0x648] ss:$16 sps:$4 sm:$0xff]  }
 0x562   : > { %9816 = vmatpush2.bf16.msra.mxu0 %v16445_v41  ;;  %v16507_v41 = vld [vmem:[#allocation7 + $0x42c] ss:$16 sps:$4 sm:$0xff]  }
 0x563   : > { %9857 = vmatpush2.bf16.msra.mxu1 %v16448_v48  ;;  %9817 = vmatprep.subr.bf16.mxu0 %v16453_v4  ;;  %v16510_v48 = vld [vmem:[#allocation7 + $0x62c] ss:$16 sps:$4 sm:$0xff]   ;;  %v16505_v4 = vld [vmem:[#allocation7 + $0x428] ss:$16 sps:$4 sm:$0xff]  }
 0x564   : > { %9858 = vmatprep.subr.bf16.mxu1 %v16456_v24  ;;  %v16508_v24 = vld [vmem:[#allocation7 + $0x628] ss:$16 sps:$4 sm:$0xff]  }
 0x566   : > { %9818 = vmatpush2.bf16.msra.mxu0 %v16451_v57  ;;  %v16513_v57 = vld [vmem:[#allocation7 + $0x40c] ss:$16 sps:$4 sm:$0xff]  }
 0x567   : > { %9859 = vmatpush2.bf16.msra.mxu1 %v16454_v58  ;;  %9819 = vmatprep.subr.bf16.mxu0 %v16459_v22  ;;  %v16516_v58 = vld [vmem:[#allocation7 + $0x60c] ss:$16 sps:$4 sm:$0xff]   ;;  %v16511_v22 = vld [vmem:[#allocation7 + $0x408] ss:$16 sps:$4 sm:$0xff]  }
 0x568   : > { %9860 = vmatprep.subr.bf16.mxu1 %v16462_v60  ;;  %v16514_v60 = vld [vmem:[#allocation7 + $0x608] ss:$16 sps:$4 sm:$0xff]  }
 0x56a   : > { %9820 = vmatpush2.bf16.msra.mxu0 %v16457_v12  ;;  %v16519_v12 = vld [vmem:[#allocation7 + $0x5ec] ss:$16 sps:$4 sm:$0xff]  }
 0x56b   : > { %9861 = vmatpush2.bf16.msra.mxu1 %v16460_v62  ;;  %9821 = vmatprep.subr.bf16.mxu0 %v16465_v0  ;;  %v16522_v62 = vld [vmem:[#allocation7 + $0x7ec] ss:$16 sps:$4 sm:$0xff]   ;;  %v16517_v0 = vld [vmem:[#allocation7 + $0x5e8] ss:$16 sps:$4 sm:$0xff]  }
 0x56c   : > { %9862 = vmatprep.subr.bf16.mxu1 %v16468_v15  ;;  %v16520_v15 = vld [vmem:[#allocation7 + $0x7e8] ss:$16 sps:$4 sm:$0xff]  }
 0x56e   : > { %9822 = vmatpush2.bf16.msra.mxu0 %v16463_v6  ;;  %v16525_v6 = vld [vmem:[#allocation7 + $0x5cc] ss:$16 sps:$4 sm:$0xff]  }
 0x56f   : > { %9863 = vmatpush2.bf16.msra.mxu1 %v16466_v7  ;;  %9873 = vmatprep.subr.bf16.mxu0 %v16471_v2  ;;  %v16528_v7 = vld [vmem:[#allocation7 + $0x7cc] ss:$16 sps:$4 sm:$0xff]   ;;  %v16523_v2 = vld [vmem:[#allocation7 + $0x5c8] ss:$16 sps:$4 sm:$0xff]  }
 0x570   : > { %9914 = vmatprep.subr.bf16.mxu1 %v16474_v8  ;;  %v16526_v8 = vld [vmem:[#allocation7 + $0x7c8] ss:$16 sps:$4 sm:$0xff]  }
 0x571   : > { %v9579_v19 = vpop.f32.mrf.mxu0  ;;  %9824 = vmatmul.mubr.bf16.vlgmr.msra.gmra.mxu0 %v18143_v36 }
 0x572   : > { %v9580_v61 = vadd.f32 %v9579_v19, %v18237_v45  ;;  %v9620_v21 = vpop.f32.mrf.mxu1  ;;  %9865 = vmatmul.mubr.bf16.vlgmr.msra.gmra.mxu1 %v18147_v39  ;;  %9874 = vmatpush1.bf16.msra.mxu0 %v16469_v9  ;;  %v16486_v45 = vld [vmem:[#allocation7 + $0x6ac] ss:$16 sps:$4 sm:$0xff]   ;;  %v16532_v19 = vld [vmem:[#allocation7 + $0x7a8] ss:$16 sps:$4 sm:$0xff]  }
 0x573   : > { %9905 = vmatprep.mubr.bf16.mxu0 %v18151_v42  ;;  %9915 = vmatpush1.bf16.msra.mxu1 %v16472_v50  ;;  %v9581_v59 = vpop.f32.mrf.mxu0  ;;  %v16481_v42 = vld [vmem:[#allocation7 + $0x4a8] ss:$16 sps:$4 sm:$0xff]   ;;  %v16531_v9 = vld [vmem:[#allocation7 + $0x5ac] ss:$16 sps:$4 sm:$0xff]  }
 0x574   : > { %v18246_v47 = vadd.f32 %v9620_v21, %v9580_v61  ;;  %9946 = vmatprep.mubr.bf16.mxu1 %v18156_v3  ;;  %v9582_v36 = vadd.f32 %v9581_v59, %v18240_v23  ;;  %v9622_v20 = vpop.f32.mrf.mxu1  ;;  %9875 = vmatprep.subr.bf16.mxu0 %v16477_v17  ;;  %v16492_v3 = vld [vmem:[#allocation7 + $0x68c] ss:$16 sps:$4 sm:$0xff]   ;;  %v16487_v23 = vld [vmem:[#allocation7 + $0x488] ss:$16 sps:$4 sm:$0xff]  }
 0x575   : > { %v9583_v30 = vpop.f32.mrf.mxu0  ;;  %9916 = vmatprep.subr.bf16.mxu1 %v16480_v11  ;;  %v16534_v50 = vld [vmem:[#allocation7 + $0x7ac] ss:$16 sps:$4 sm:$0xff]   ;;  %v16529_v17 = vld [vmem:[#allocation7 + $0x5a8] ss:$16 sps:$4 sm:$0xff]  }
 0x576   : > { %v18250_v39 = vadd.f32 %v9622_v20, %v9582_v36  ;;  %v9624_v27 = vpop.f32.mrf.mxu1  ;;  %9876 = vmatpush1.bf16.msra.mxu0 %v16475_v52  ;;  %v16537_v11 = vld [vmem:[#allocation7 + $0x58c] ss:$16 sps:$4 sm:$0xff]   ;;  %v16535_v21 = vld [vmem:[#allocation7 + $0x588] ss:$16 sps:$4 sm:$0xff]  }
 0x577   : > { %9917 = vmatpush1.bf16.msra.mxu1 %v16478_v5  ;;  %v9584_v13 = vpop.f32.mrf.mxu0  ;;  %9877 = vmatprep.subr.bf16.mxu0 %v16483_v32  ;;  %v16540_v61 = vld [vmem:[#allocation7 + $0x78c] ss:$16 sps:$4 sm:$0xff]   ;;  %v16538_v52 = vld [vmem:[#allocation7 + $0x788] ss:$16 sps:$4 sm:$0xff]  }
 0x578   : > { %v9625_v51 = vpop.f32.mrf.mxu1  ;;  %9918 = vmatprep.subr.bf16.mxu1 %v16486_v45  ;;  %v16543_v59 = vld [vmem:[#allocation7 + $0x56c] ss:$16 sps:$4 sm:$0xff]   ;;  %v16541_v32 = vld [vmem:[#allocation7 + $0x568] ss:$16 sps:$4 sm:$0xff]  }
 0x579   : > { %v16546_v5 = vld [vmem:[#allocation7 + $0x76c] ss:$16 sps:$4 sm:$0xff]   ;;  %v16544_v36 = vld [vmem:[#allocation7 + $0x768] ss:$16 sps:$4 sm:$0xff]  }
 0x57a   : > { %9878 = vmatpush1.bf16.msra.mxu0 %v16481_v42  ;;  %v16549_v20 = vld [vmem:[#allocation7 + $0x54c] ss:$16 sps:$4 sm:$0xff]   ;;  %v16547_v30 = vld [vmem:[#allocation7 + $0x548] ss:$16 sps:$4 sm:$0xff]  }
 0x57b   : > { %9919 = vmatpush1.bf16.msra.mxu1 %v16484_v29  ;;  %9879 = vmatprep.subr.bf16.mxu0 %v16489_v31  ;;  %v16552_v45 = vld [vmem:[#allocation7 + $0x74c] ss:$16 sps:$4 sm:$0xff]   ;;  %v16550_v27 = vld [vmem:[#allocation7 + $0x748] ss:$16 sps:$4 sm:$0xff]  }
 0x57c   : > { %9920 = vmatprep.subr.bf16.mxu1 %v16492_v3  ;;  %v16555_v42 = vld [vmem:[#allocation7 + $0x52c] ss:$16 sps:$4 sm:$0xff]   ;;  %v16553_v29 = vld [vmem:[#allocation7 + $0x528] ss:$16 sps:$4 sm:$0xff]  }
 0x57d   : > { %v16558_v13 = vld [vmem:[#allocation7 + $0x72c] ss:$16 sps:$4 sm:$0xff]   ;;  %v16556_v31 = vld [vmem:[#allocation7 + $0x728] ss:$16 sps:$4 sm:$0xff]  }
 0x57e   : > { %9880 = vmatpush1.bf16.msra.mxu0 %v16487_v23  ;;  %v16561_v51 = vld [vmem:[#allocation7 + $0x50c] ss:$16 sps:$4 sm:$0xff]   ;;  %v16559_v23 = vld [vmem:[#allocation7 + $0x508] ss:$16 sps:$4 sm:$0xff]  }
 0x57f   : > { %9921 = vmatpush1.bf16.msra.mxu1 %v16490_v34  ;;  %9881 = vmatprep.subr.bf16.mxu0 %v16495_v35  ;;  %v16564_v3 = vld [vmem:[#allocation7 + $0x70c] ss:$16 sps:$4 sm:$0xff]   ;;  %v16562_v34 = vld [vmem:[#allocation7 + $0x708] ss:$16 sps:$4 sm:$0xff]  }
 0x580   : > { %9922 = vmatprep.subr.bf16.mxu1 %v16498_v14  ;;  %v16567_v35 = vld [vmem:[#allocation7 + $0x8ec] ss:$16 sps:$4 sm:$0xff]  }
 0x581   : > { %v16570_v14 = vld [vmem:[#allocation7 + $0xaec] ss:$16 sps:$4 sm:$0xff]  }
 0x582   : > { %9882 = vmatpush1.bf16.msra.mxu0 %v16493_v38  ;;  %v16565_v38 = vld [vmem:[#allocation7 + $0x8e8] ss:$16 sps:$4 sm:$0xff]  }
 0x583   : > { %9923 = vmatpush1.bf16.msra.mxu1 %v16496_v40  ;;  %9883 = vmatprep.subr.bf16.mxu0 %v16501_v43  ;;  %v16568_v40 = vld [vmem:[#allocation7 + $0xae8] ss:$16 sps:$4 sm:$0xff]   ;;  %v16573_v43 = vld [vmem:[#allocation7 + $0x8cc] ss:$16 sps:$4 sm:$0xff]  }
 0x584   : > { %9924 = vmatprep.subr.bf16.mxu1 %v16504_v54 }
 0x586   : > { %9884 = vmatpush1.bf16.msra.mxu0 %v16499_v49  ;;  %v16576_v49 = vld [vmem:[#allocation7 + $0xacc] ss:$16 sps:$4 sm:$0xff]  }
 0x587   : > { %9925 = vmatpush1.bf16.msra.mxu1 %v16502_v55  ;;  %9885 = vmatprep.subr.bf16.mxu0 %v16507_v41 }
 0x588   : > { %9926 = vmatprep.subr.bf16.mxu1 %v16510_v48  ;;  %v16571_v48 = vld [vmem:[#allocation7 + $0x8c8] ss:$16 sps:$4 sm:$0xff]  }
 0x58a   : > { %9886 = vmatpush1.bf16.msra.mxu0 %v16505_v4 }
 0x58b   : > { %9927 = vmatpush1.bf16.msra.mxu1 %v16508_v24  ;;  %9887 = vmatprep.subr.bf16.mxu0 %v16513_v57  ;;  %v16574_v24 = vld [vmem:[#allocation7 + $0xac8] ss:$16 sps:$4 sm:$0xff]   ;;  %v16579_v57 = vld [vmem:[#allocation7 + $0x8ac] ss:$16 sps:$4 sm:$0xff]  }
 0x58c   : > { %9928 = vmatprep.subr.bf16.mxu1 %v16516_v58 }
 0x58e   : > { %9888 = vmatpush1.bf16.msra.mxu0 %v16511_v22 }
 0x58f   : > { %9929 = vmatpush1.bf16.msra.mxu1 %v16514_v60  ;;  %9889 = vmatprep.subr.bf16.mxu0 %v16519_v12  ;;  %v16577_v60 = vld [vmem:[#allocation7 + $0x8a8] ss:$16 sps:$4 sm:$0xff]  }
 0x590   : > { %9930 = vmatprep.subr.bf16.mxu1 %v16522_v62  ;;  %v16580_v12 = vld [vmem:[#allocation7 + $0xaa8] ss:$16 sps:$4 sm:$0xff]   ;;  %v16585_v62 = vld [vmem:[#allocation7 + $0x88c] ss:$16 sps:$4 sm:$0xff]  }
 0x592   : > { %9890 = vmatpush2.bf16.msra.mxu0 %v16517_v0 }
 0x593   : > { %9931 = vmatpush2.bf16.msra.mxu1 %v16520_v15  ;;  %9891 = vmatprep.subr.bf16.mxu0 %v16525_v6  ;;  %v16588_v15 = vld [vmem:[#allocation7 + $0xa8c] ss:$16 sps:$4 sm:$0xff]   ;;  %v16583_v6 = vld [vmem:[#allocation7 + $0x888] ss:$16 sps:$4 sm:$0xff]  }
 0x594   : > { %9932 = vmatprep.subr.bf16.mxu1 %v16528_v7  ;;  %v16591_v7 = vld [vmem:[#allocation7 + $0x86c] ss:$16 sps:$4 sm:$0xff]  }
 0x596   : > { %9892 = vmatpush2.bf16.msra.mxu0 %v16523_v2  ;;  %v16594_v2 = vld [vmem:[#allocation7 + $0xa6c] ss:$16 sps:$4 sm:$0xff]  }
 0x597   : > { %9933 = vmatpush2.bf16.msra.mxu1 %v16526_v8  ;;  %9893 = vmatprep.subr.bf16.mxu0 %v16531_v9  ;;  %v16589_v8 = vld [vmem:[#allocation7 + $0x868] ss:$16 sps:$4 sm:$0xff]  }
 0x598   : > { %9934 = vmatprep.subr.bf16.mxu1 %v16534_v50  ;;  %v16592_v9 = vld [vmem:[#allocation7 + $0xa68] ss:$16 sps:$4 sm:$0xff]   ;;  %v16597_v50 = vld [vmem:[#allocation7 + $0x84c] ss:$16 sps:$4 sm:$0xff]  }
 0x59a   : > { %9894 = vmatpush2.bf16.msra.mxu0 %v16529_v17  ;;  %v16600_v17 = vld [vmem:[#allocation7 + $0xa4c] ss:$16 sps:$4 sm:$0xff]  }
 0x59b   : > { %9935 = vmatpush2.bf16.msra.mxu1 %v16532_v19  ;;  %9895 = vmatprep.subr.bf16.mxu0 %v16537_v11  ;;  %v16595_v19 = vld [vmem:[#allocation7 + $0x848] ss:$16 sps:$4 sm:$0xff]  }
 0x59c   : > { %9936 = vmatprep.subr.bf16.mxu1 %v16540_v61  ;;  %v16598_v11 = vld [vmem:[#allocation7 + $0xa48] ss:$16 sps:$4 sm:$0xff]   ;;  %v16603_v61 = vld [vmem:[#allocation7 + $0x82c] ss:$16 sps:$4 sm:$0xff]  }
 0x59e   : > { %9896 = vmatpush2.bf16.msra.mxu0 %v16535_v21  ;;  %v16606_v21 = vld [vmem:[#allocation7 + $0xa2c] ss:$16 sps:$4 sm:$0xff]  }
 0x59f   : > { %9937 = vmatpush2.bf16.msra.mxu1 %v16538_v52  ;;  %9897 = vmatprep.subr.bf16.mxu0 %v16543_v59  ;;  %v16601_v52 = vld [vmem:[#allocation7 + $0x828] ss:$16 sps:$4 sm:$0xff]  }
 0x5a0   : > { %9938 = vmatprep.subr.bf16.mxu1 %v16546_v5  ;;  %v16604_v59 = vld [vmem:[#allocation7 + $0xa28] ss:$16 sps:$4 sm:$0xff]   ;;  %v16609_v5 = vld [vmem:[#allocation7 + $0x80c] ss:$16 sps:$4 sm:$0xff]  }
 0x5a2   : > { %9898 = vmatpush2.bf16.msra.mxu0 %v16541_v32  ;;  %v16612_v32 = vld [vmem:[#allocation7 + $0xa0c] ss:$16 sps:$4 sm:$0xff]  }
 0x5a3   : > { %9939 = vmatpush2.bf16.msra.mxu1 %v16544_v36  ;;  %9899 = vmatprep.subr.bf16.mxu0 %v16549_v20  ;;  %v16607_v36 = vld [vmem:[#allocation7 + $0x808] ss:$16 sps:$4 sm:$0xff]  }
 0x5a4   : > { %9940 = vmatprep.subr.bf16.mxu1 %v16552_v45  ;;  %v16610_v20 = vld [vmem:[#allocation7 + $0xa08] ss:$16 sps:$4 sm:$0xff]   ;;  %v16615_v45 = vld [vmem:[#allocation7 + $0x9ec] ss:$16 sps:$4 sm:$0xff]  }
 0x5a6   : > { %9900 = vmatpush2.bf16.msra.mxu0 %v16547_v30  ;;  %v16618_v30 = vld [vmem:[#allocation7 + $0xbec] ss:$16 sps:$4 sm:$0xff]  }
 0x5a7   : > { %9941 = vmatpush2.bf16.msra.mxu1 %v16550_v27  ;;  %9901 = vmatprep.subr.bf16.mxu0 %v16555_v42  ;;  %v16613_v27 = vld [vmem:[#allocation7 + $0x9e8] ss:$16 sps:$4 sm:$0xff]  }
 0x5a8   : > { %9942 = vmatprep.subr.bf16.mxu1 %v16558_v13  ;;  %v16616_v42 = vld [vmem:[#allocation7 + $0xbe8] ss:$16 sps:$4 sm:$0xff]   ;;  %v16621_v13 = vld [vmem:[#allocation7 + $0x9cc] ss:$16 sps:$4 sm:$0xff]  }
 0x5aa   : > { %9902 = vmatpush2.bf16.msra.mxu0 %v16553_v29  ;;  %v16624_v29 = vld [vmem:[#allocation7 + $0xbcc] ss:$16 sps:$4 sm:$0xff]  }
 0x5ab   : > { %9943 = vmatpush2.bf16.msra.mxu1 %v16556_v31  ;;  %9903 = vmatprep.subr.bf16.mxu0 %v16561_v51  ;;  %v16619_v31 = vld [vmem:[#allocation7 + $0x9c8] ss:$16 sps:$4 sm:$0xff]  }
 0x5ac   : > { %9944 = vmatprep.subr.bf16.mxu1 %v16564_v3  ;;  %v16622_v51 = vld [vmem:[#allocation7 + $0xbc8] ss:$16 sps:$4 sm:$0xff]   ;;  %v16627_v3 = vld [vmem:[#allocation7 + $0x9ac] ss:$16 sps:$4 sm:$0xff]  }
 0x5ae   : > { %9904 = vmatpush2.bf16.msra.mxu0 %v16559_v23  ;;  %v16630_v23 = vld [vmem:[#allocation7 + $0xbac] ss:$16 sps:$4 sm:$0xff]  }
 0x5af   : > { %9945 = vmatpush2.bf16.msra.mxu1 %v16562_v34  ;;  %9955 = vmatprep.subr.bf16.mxu0 %v16567_v35  ;;  %v16625_v34 = vld [vmem:[#allocation7 + $0x9a8] ss:$16 sps:$4 sm:$0xff]  }
 0x5b0   : > { %9996 = vmatprep.subr.bf16.mxu1 %v16570_v14  ;;  %v16628_v35 = vld [vmem:[#allocation7 + $0xba8] ss:$16 sps:$4 sm:$0xff]   ;;  %v16633_v14 = vld [vmem:[#allocation7 + $0x98c] ss:$16 sps:$4 sm:$0xff]  }
 0x5b1   : > { %v9661_v54 = vpop.f32.mrf.mxu0  ;;  %9906 = vmatmul.mubr.bf16.vlgmr.msra.gmra.mxu0 %v18167_v63 }
 0x5b2   : > { %v9662_v55 = vadd.f32 %v9661_v54, %v18246_v47  ;;  %v9702_v41 = vpop.f32.mrf.mxu1  ;;  %9947 = vmatmul.mubr.bf16.vlgmr.msra.gmra.mxu1 %v18171_v37  ;;  %9956 = vmatpush1.bf16.msra.mxu0 %v16565_v38  ;;  %v16582_v47 = vld [vmem:[#allocation7 + $0xaac] ss:$16 sps:$4 sm:$0xff]  }
 0x5b3   : > { %9987 = vmatprep.mubr.bf16.mxu0 %v18175_v18  ;;  %9997 = vmatpush1.bf16.msra.mxu1 %v16568_v40  ;;  %v18256_v4 = vpop.f32.mrf.mxu0  ;;  %v16636_v38 = vld [vmem:[#allocation7 + $0xb8c] ss:$16 sps:$4 sm:$0xff]   ;;  %v16631_v40 = vld [vmem:[#allocation7 + $0x988] ss:$16 sps:$4 sm:$0xff]  }
 0x5b4   : > { %v18258_v58 = vadd.f32 %v9702_v41, %v9662_v55  ;;  %10028 = vmatprep.mubr.bf16.mxu1 %v18180_v1  ;;  %v18261_v63 = vpop.f32.mrf.mxu1  ;;  %9957 = vmatprep.subr.bf16.mxu0 %v16573_v43  ;;  %v16586_v1 = vld [vmem:[#allocation7 + $0xa88] ss:$16 sps:$4 sm:$0xff]   ;;  %v16639_v54 = vld [vmem:[#allocation7 + $0x96c] ss:$16 sps:$4 sm:$0xff]  }
 0x5b5   : > { %v9665_v22 = vpop.f32.mrf.mxu0  ;;  %9998 = vmatprep.subr.bf16.mxu1 %v16576_v49  ;;  %v16634_v43 = vld [vmem:[#allocation7 + $0xb88] ss:$16 sps:$4 sm:$0xff]   ;;  %v16642_v49 = vld [vmem:[#allocation7 + $0xb6c] ss:$16 sps:$4 sm:$0xff]  }
 0x5b6   : > { %v9706_v37 = vpop.f32.mrf.mxu1  ;;  %9958 = vmatpush1.bf16.msra.mxu0 %v16571_v48  ;;  %v16637_v55 = vld [vmem:[#allocation7 + $0x968] ss:$16 sps:$4 sm:$0xff]   ;;  %v16645_v48 = vld [vmem:[#allocation7 + $0x94c] ss:$16 sps:$4 sm:$0xff]  }
 0x5b7   : > { %9999 = vmatpush1.bf16.msra.mxu1 %v16574_v24  ;;  %v9666_v18 = vpop.f32.mrf.mxu0  ;;  %9959 = vmatprep.subr.bf16.mxu0 %v16579_v57  ;;  %v16640_v41 = vld [vmem:[#allocation7 + $0xb68] ss:$16 sps:$4 sm:$0xff]   ;;  %v16648_v24 = vld [vmem:[#allocation7 + $0xb4c] ss:$16 sps:$4 sm:$0xff]  }
 0x5b8   : > { %v9707_v0 = vpop.f32.mrf.mxu1  ;;  %10000 = vmatprep.subr.bf16.mxu1 %v16582_v47  ;;  %v16643_v57 = vld [vmem:[#allocation7 + $0x948] ss:$16 sps:$4 sm:$0xff]   ;;  %v16651_v22 = vld [vmem:[#allocation7 + $0x92c] ss:$16 sps:$4 sm:$0xff]  }
 0x5b9   : > { %v16646_v47 = vld [vmem:[#allocation7 + $0xb48] ss:$16 sps:$4 sm:$0xff]   ;;  %v16654_v37 = vld [vmem:[#allocation7 + $0xb2c] ss:$16 sps:$4 sm:$0xff]  }
 0x5ba   : > { %9960 = vmatpush1.bf16.msra.mxu0 %v16577_v60  ;;  %v16649_v60 = vld [vmem:[#allocation7 + $0x928] ss:$16 sps:$4 sm:$0xff]  }
 0x5bb   : > { %10001 = vmatpush1.bf16.msra.mxu1 %v16580_v12  ;;  %9961 = vmatprep.subr.bf16.mxu0 %v16585_v62  ;;  %v16652_v18 = vld [vmem:[#allocation7 + $0xb28] ss:$16 sps:$4 sm:$0xff]   ;;  %v16657_v12 = vld [vmem:[#allocation7 + $0x90c] ss:$16 sps:$4 sm:$0xff]  }
 0x5bc   : > { %10002 = vmatprep.subr.bf16.mxu1 %v16588_v15  ;;  %v16660_v62 = vld [vmem:[#allocation7 + $0xb0c] ss:$16 sps:$4 sm:$0xff]   ;;  %v16655_v0 = vld [vmem:[#allocation7 + $0x908] ss:$16 sps:$4 sm:$0xff]  }
 0x5bd   : > { %v16658_v15 = vld [vmem:[#allocation7 + $0xb08] ss:$16 sps:$4 sm:$0xff]  }
 0x5be   : > { %9962 = vmatpush1.bf16.msra.mxu0 %v16583_v6  ;;  %v16663_v6 = vld [vmem:[#allocation7 + $0xcec] ss:$16 sps:$4 sm:$0xff]  }
 0x5bf   : > { %10003 = vmatpush1.bf16.msra.mxu1 %v16586_v1  ;;  %9963 = vmatprep.subr.bf16.mxu0 %v16591_v7  ;;  %v16666_v1 = vld [vmem:[#allocation7 + $0xeec] ss:$16 sps:$4 sm:$0xff]   ;;  %v9664_v7 = vadd.f32 %v18256_v4, %v18250_v39  ;;  %v16667_v39 = vld [vmem:[#allocation7 + $0xcc8] ss:$16 sps:$4 sm:$0xff]  }
 0x5c0   : > { %10004 = vmatprep.subr.bf16.mxu1 %v16594_v2  ;;  %v16661_v2 = vld [vmem:[#allocation7 + $0xce8] ss:$16 sps:$4 sm:$0xff]  }
 0x5c2   : > { %9964 = vmatpush1.bf16.msra.mxu0 %v16589_v8  ;;  %v16664_v8 = vld [vmem:[#allocation7 + $0xee8] ss:$16 sps:$4 sm:$0xff]  }
 0x5c3   : > { %10005 = vmatpush1.bf16.msra.mxu1 %v16592_v9  ;;  %9965 = vmatprep.subr.bf16.mxu0 %v16597_v50  ;;  %v16669_v9 = vld [vmem:[#allocation7 + $0xccc] ss:$16 sps:$4 sm:$0xff]  }
 0x5c4   : > { %10006 = vmatprep.subr.bf16.mxu1 %v16600_v17  ;;  %v16672_v17 = vld [vmem:[#allocation7 + $0xecc] ss:$16 sps:$4 sm:$0xff]  }
 0x5c6   : > { %9966 = vmatpush1.bf16.msra.mxu0 %v16595_v19  ;;  %v9705_v19 = vadd.f32 %v18261_v63, %v9664_v7  ;;  %v16678_v63 = vld [vmem:[#allocation7 + $0xeac] ss:$16 sps:$4 sm:$0xff]  }
 0x5c7   : > { %10007 = vmatpush1.bf16.msra.mxu1 %v16598_v11  ;;  %9967 = vmatprep.subr.bf16.mxu0 %v16603_v61 }
 0x5c8   : > { %10008 = vmatprep.subr.bf16.mxu1 %v16606_v21  ;;  %v16670_v21 = vld [vmem:[#allocation7 + $0xec8] ss:$16 sps:$4 sm:$0xff]  }
 0x5ca   : > { %9968 = vmatpush1.bf16.msra.mxu0 %v16601_v52  ;;  %v16675_v52 = vld [vmem:[#allocation7 + $0xcac] ss:$16 sps:$4 sm:$0xff]  }
 0x5cb   : > { %10009 = vmatpush1.bf16.msra.mxu1 %v16604_v59  ;;  %9969 = vmatprep.subr.bf16.mxu0 %v16609_v5 }
 0x5cc   : > { %10010 = vmatprep.subr.bf16.mxu1 %v16612_v32 }
 0x5ce   : > { %9970 = vmatpush1.bf16.msra.mxu0 %v16607_v36  ;;  %v16673_v36 = vld [vmem:[#allocation7 + $0xca8] ss:$16 sps:$4 sm:$0xff]  }
 0x5cf   : > { %10011 = vmatpush1.bf16.msra.mxu1 %v16610_v20  ;;  %9971 = vmatprep.subr.bf16.mxu0 %v16615_v45  ;;  %v16676_v20 = vld [vmem:[#allocation7 + $0xea8] ss:$16 sps:$4 sm:$0xff]   ;;  %v16681_v45 = vld [vmem:[#allocation7 + $0xc8c] ss:$16 sps:$4 sm:$0xff]  }
 0x5d0   : > { %10012 = vmatprep.subr.bf16.mxu1 %v16618_v30 }
 0x5d2   : > { %9972 = vmatpush2.bf16.msra.mxu0 %v16613_v27 }
 0x5d3   : > { %10013 = vmatpush2.bf16.msra.mxu1 %v16616_v42  ;;  %9973 = vmatprep.subr.bf16.mxu0 %v16621_v13  ;;  %v16679_v13 = vld [vmem:[#allocation7 + $0xc88] ss:$16 sps:$4 sm:$0xff]  }
 0x5d4   : > { %10014 = vmatprep.subr.bf16.mxu1 %v16624_v29 }
 0x5d6   : > { %9974 = vmatpush2.bf16.msra.mxu0 %v16619_v31  ;;  %v16682_v31 = vld [vmem:[#allocation7 + $0xe88] ss:$16 sps:$4 sm:$0xff]  }
 0x5d7   : > { %10015 = vmatpush2.bf16.msra.mxu1 %v16622_v51  ;;  %9975 = vmatprep.subr.bf16.mxu0 %v16627_v3  ;;  %v16687_v51 = vld [vmem:[#allocation7 + $0xc6c] ss:$16 sps:$4 sm:$0xff]  }
 0x5d8   : > { %10016 = vmatprep.subr.bf16.mxu1 %v16630_v23  ;;  %v16690_v3 = vld [vmem:[#allocation7 + $0xe6c] ss:$16 sps:$4 sm:$0xff]  }
 0x5da   : > { %9976 = vmatpush2.bf16.msra.mxu0 %v16625_v34  ;;  %v16685_v34 = vld [vmem:[#allocation7 + $0xc68] ss:$16 sps:$4 sm:$0xff]  }
 0x5db   : > { %10017 = vmatpush2.bf16.msra.mxu1 %v16628_v35  ;;  %9977 = vmatprep.subr.bf16.mxu0 %v16633_v14  ;;  %v16688_v14 = vld [vmem:[#allocation7 + $0xe68] ss:$16 sps:$4 sm:$0xff]  }
 0x5dc   : > { %10018 = vmatprep.subr.bf16.mxu1 %v16636_v38  ;;  %v16693_v38 = vld [vmem:[#allocation7 + $0xc4c] ss:$16 sps:$4 sm:$0xff]  }
 0x5de   : > { %9978 = vmatpush2.bf16.msra.mxu0 %v16631_v40  ;;  %v16696_v40 = vld [vmem:[#allocation7 + $0xe4c] ss:$16 sps:$4 sm:$0xff]  }
 0x5df   : > { %10019 = vmatpush2.bf16.msra.mxu1 %v16634_v43  ;;  %9979 = vmatprep.subr.bf16.mxu0 %v16639_v54  ;;  %v16691_v54 = vld [vmem:[#allocation7 + $0xc48] ss:$16 sps:$4 sm:$0xff]  }
 0x5e0   : > { %10020 = vmatprep.subr.bf16.mxu1 %v16642_v49 }
 0x5e2   : > { %9980 = vmatpush2.bf16.msra.mxu0 %v16637_v55  ;;  %v16694_v55 = vld [vmem:[#allocation7 + $0xe48] ss:$16 sps:$4 sm:$0xff]  }
 0x5e3   : > { %10021 = vmatpush2.bf16.msra.mxu1 %v16640_v41  ;;  %9981 = vmatprep.subr.bf16.mxu0 %v16645_v48  ;;  %v16699_v41 = vld [vmem:[#allocation7 + $0xc2c] ss:$16 sps:$4 sm:$0xff]  }
 0x5e4   : > { %10022 = vmatprep.subr.bf16.mxu1 %v16648_v24  ;;  %v16702_v48 = vld [vmem:[#allocation7 + $0xe2c] ss:$16 sps:$4 sm:$0xff]  }
 0x5e6   : > { %9982 = vmatpush2.bf16.msra.mxu0 %v16643_v57  ;;  %v16697_v57 = vld [vmem:[#allocation7 + $0xc28] ss:$16 sps:$4 sm:$0xff]  }
 0x5e7   : > { %10023 = vmatpush2.bf16.msra.mxu1 %v16646_v47  ;;  %9983 = vmatprep.subr.bf16.mxu0 %v16651_v22  ;;  %v16700_v22 = vld [vmem:[#allocation7 + $0xe28] ss:$16 sps:$4 sm:$0xff]  }
 0x5e8   : > { %10024 = vmatprep.subr.bf16.mxu1 %v16654_v37  ;;  %v16705_v37 = vld [vmem:[#allocation7 + $0xc0c] ss:$16 sps:$4 sm:$0xff]  }
 0x5ea   : > { %9984 = vmatpush2.bf16.msra.mxu0 %v16649_v60  ;;  %v16708_v60 = vld [vmem:[#allocation7 + $0xe0c] ss:$16 sps:$4 sm:$0xff]  }
 0x5eb   : > { %10025 = vmatpush2.bf16.msra.mxu1 %v16652_v18  ;;  %9985 = vmatprep.subr.bf16.mxu0 %v16657_v12 }
 0x5ec   : > { %10026 = vmatprep.subr.bf16.mxu1 %v16660_v62  ;;  %v16703_v62 = vld [vmem:[#allocation7 + $0xc08] ss:$16 sps:$4 sm:$0xff]  }
 0x5ee   : > { %9986 = vmatpush2.bf16.msra.mxu0 %v16655_v0 }
 0x5ef   : > { %10027 = vmatpush2.bf16.msra.mxu1 %v16658_v15  ;;  %10037 = vmatprep.subr.bf16.mxu0 %v16663_v6  ;;  %v16706_v15 = vld [vmem:[#allocation7 + $0xe08] ss:$16 sps:$4 sm:$0xff]   ;;  %v16711_v6 = vld [vmem:[#allocation7 + $0xdec] ss:$16 sps:$4 sm:$0xff]  }
 0x5f0   : > { %10078 = vmatprep.subr.bf16.mxu1 %v16666_v1 }
 0x5f1   : > { %v9743_v50 = vpop.f32.mrf.mxu0  ;;  %9988 = vmatmul.mubr.bf16.vlgmr.msra.gmra.mxu0 %v18198_v46 }
 0x5f2   : > { %v9744_v11 = vadd.f32 %v9743_v50, %v18258_v58  ;;  %v9784_v61 = vpop.f32.mrf.mxu1  ;;  %10029 = vmatmul.mubr.bf16.vlgmr.msra.gmra.mxu1 %v18202_v10  ;;  %10038 = vmatpush1.bf16.msra.mxu0 %v16661_v2  ;;  %v16714_v2 = vld [vmem:[#allocation7 + $0xfec] ss:$16 sps:$4 sm:$0xff]   ;;  %v16712_v50 = vld [vmem:[#allocation7 + $0xfe8] ss:$16 sps:$4 sm:$0xff]  }
 0x5f3   : > { %10069 = vmatprep.mubr.bf16.mxu0 %v18204_v56  ;;  %10079 = vmatpush1.bf16.msra.mxu1 %v16664_v8  ;;  %v9745_v4 = vpop.f32.mrf.mxu0 }
 0x5f4   : > { %v18270_v59 = vadd.f32 %v9784_v61, %v9744_v11  ;;  %10110 = vmatprep.mubr.bf16.mxu1 %v18214_v16  ;;  %v9746_v46 = vadd.f32 %v9745_v4, %v9705_v19  ;;  %v9786_v5 = vpop.f32.mrf.mxu1  ;;  %10039 = vmatprep.subr.bf16.mxu0 %v16669_v9  ;;  %v16684_v16 = vld [vmem:[#allocation7 + $0xe8c] ss:$16 sps:$4 sm:$0xff]   ;;  %v16709_v9 = vld [vmem:[#allocation7 + $0xde8] ss:$16 sps:$4 sm:$0xff]  }
 0x5f5   : > { %v9747_v58 = vpop.f32.mrf.mxu0  ;;  %10080 = vmatprep.subr.bf16.mxu1 %v16672_v17  ;;  %v16717_v17 = vld [vmem:[#allocation7 + $0xdcc] ss:$16 sps:$4 sm:$0xff]   ;;  %v16715_v4 = vld [vmem:[#allocation7 + $0xdc8] ss:$16 sps:$4 sm:$0xff]  }
 0x5f6   : > { %v9787_v32 = vadd.f32 %v9786_v5, %v9746_v46  ;;  %v9788_v10 = vpop.f32.mrf.mxu1  ;;  %10040 = vmatpush1.bf16.msra.mxu0 %v16667_v39  ;;  %v10120_v18 = vsel %vm10119_vm0, %v18270_v59, 0.0  ;;  %v16720_v61 = vld [vmem:[#allocation7 + $0xfcc] ss:$16 sps:$4 sm:$0xff]  }
 0x5f7   : > { %10081 = vmatpush1.bf16.msra.mxu1 %v16670_v21  ;;  %v9748_v56 = vpop.f32.mrf.mxu0  ;;  %10041 = vmatprep.subr.bf16.mxu0 %v16675_v52  ;;  %v10121_v1 = vrot.slane %v10120_v18, 4  ;;  %v16718_v21 = vld [vmem:[#allocation7 + $0xfc8] ss:$16 sps:$4 sm:$0xff]   ;;  %v16723_v52 = vld [vmem:[#allocation7 + $0xdac] ss:$16 sps:$4 sm:$0xff]  }
 0x5f8   : > { %v10127_v30 = vsel %vm10119_vm0, %v9787_v32, 0.0  ;;  %v9789_v27 = vpop.f32.mrf.mxu1  ;;  %10082 = vmatprep.subr.bf16.mxu1 %v16678_v63  ;;  %v16726_v63 = vld [vmem:[#allocation7 + $0xfac] ss:$16 sps:$4 sm:$0xff]   ;;  %v16724_v10 = vld [vmem:[#allocation7 + $0xfa8] ss:$16 sps:$4 sm:$0xff]  }
 0x5f9   : > { %v10128_v42 = vrot.slane %v10127_v30, 4  ;;  %v10122_v19 = vadd.f32 %v10121_v1, %v10120_v18  ;;  %v16727_v27 = vld [vmem:[#allocation7 + $0xd88] ss:$16 sps:$4 sm:$0xff]   ;;  %v18299_v1 = vsub.s32 3, %v17984_v44 }
 0x5fa   : > { %10042 = vmatpush1.bf16.msra.mxu0 %v16673_v36  ;;  %v16729_v36 = vld [vmem:[#allocation7 + $0xd8c] ss:$16 sps:$4 sm:$0xff]  }
 0x5fb   : > { %v10129_v29 = vadd.f32 %v10128_v42, %v10127_v30  ;;  %10083 = vmatpush1.bf16.msra.mxu1 %v16676_v20  ;;  %10043 = vmatprep.subr.bf16.mxu0 %v16681_v45  ;;  %v10123_v46 = vrot.slane %v10122_v19, 2  ;;  %v16732_v45 = vld [vmem:[#allocation7 + $0xf8c] ss:$16 sps:$4 sm:$0xff]  }
 0x5fc   : > { %10084 = vmatprep.subr.bf16.mxu1 %v16684_v16  ;;  %v16730_v16 = vld [vmem:[#allocation7 + $0xf88] ss:$16 sps:$4 sm:$0xff]   ;;  %v16735_v42 = vld [vmem:[#allocation7 + $0xd6c] ss:$16 sps:$4 sm:$0xff]  }
 0x5fd   : > { %v10130_v23 = vrot.slane %v10129_v29, 2  ;;  %v10124_v56 = vadd.f32 %v10123_v46, %v10122_v19 }
 0x5fe   : > { %10044 = vmatpush1.bf16.msra.mxu0 %v16679_v13 }
 0x5ff   : > { %v10131_v35 = vadd.f32 %v10130_v23, %v10129_v29  ;;  %10085 = vmatpush1.bf16.msra.mxu1 %v16682_v31  ;;  %10045 = vmatprep.subr.bf16.mxu0 %v16687_v51  ;;  %v10125_v13 = vrot.slane %v10124_v56, 1  ;;  %v16738_v29 = vld [vmem:[#allocation7 + $0xf6c] ss:$16 sps:$4 sm:$0xff]   ;;  %v16733_v31 = vld [vmem:[#allocation7 + $0xd68] ss:$16 sps:$4 sm:$0xff]  }
 0x600   : > { %10086 = vmatprep.subr.bf16.mxu1 %v16690_v3  ;;  %v16736_v51 = vld [vmem:[#allocation7 + $0xf68] ss:$16 sps:$4 sm:$0xff]   ;;  %v16741_v3 = vld [vmem:[#allocation7 + $0xd4c] ss:$16 sps:$4 sm:$0xff]  }
 0x601   : > { %v10132_v43 = vrot.slane %v10131_v35, 1  ;;  %v10126_v23 = vadd.f32 %v10125_v13, %v10124_v56  ;;  %v16763_v56 = vld [vmem:[#allocation13 + $0xa0] ss:$16 sps:$4 sm:$0xff]  }
 0x602   : > { %10046 = vmatpush1.bf16.msra.mxu0 %v16685_v34  ;;  %v16744_v34 = vld [vmem:[#allocation7 + $0xf4c] ss:$16 sps:$4 sm:$0xff]  }
 0x603   : > { %v10133_v49 = vadd.f32 %v10132_v43, %v10131_v35  ;;  %10087 = vmatpush1.bf16.msra.mxu1 %v16688_v14  ;;  %10047 = vmatprep.subr.bf16.mxu0 %v16693_v38  ;;  %v16739_v35 = vld [vmem:[#allocation7 + $0xd48] ss:$16 sps:$4 sm:$0xff]   ;;  %v18281_v14 = vld [vmem:[#allocation10] sm:$0xf]  ;;  %v10149_v43 = vmul.f32 0.5, %v10126_v23 }
 0x604   : > { %10088 = vmatprep.subr.bf16.mxu1 %v16696_v40  ;;  %v16742_v38 = vld [vmem:[#allocation7 + $0xf48] ss:$16 sps:$4 sm:$0xff]   ;;  %v16747_v40 = vld [vmem:[#allocation7 + $0xd2c] ss:$16 sps:$4 sm:$0xff]   ;;  %v16777_v23 = vld [vmem:[#allocation13 + $0x24] ss:$16 sps:$4 sm:$0xff]  }
 0x605   : > { %v10150_v24 = vmul.f32 0.5, %v10133_v49  ;;  %v16750_v49 = vld [vmem:[#allocation7 + $0xf2c] ss:$16 sps:$4 sm:$0xff]  }
 0x606   : > { %10048 = vmatpush1.bf16.msra.mxu0 %v16691_v54  ;;  %v10202_v54 = vrot.slane %v18281_v14, %v18224_v25  ;;  %v16769_v13 = vld [vmem:[#allocation13 + $0x60] ss:$16 sps:$4 sm:$0xff]  }
 0x607   : > { %v18274_v47 = vsub.f32 %v9787_v32, %v10150_v24  ;;  %10089 = vmatpush1.bf16.msra.mxu1 %v16694_v55  ;;  %10049 = vmatprep.subr.bf16.mxu0 %v16699_v41  ;;  %v16721_v32 = vld [vmem:[#allocation7 + $0xda8] ss:$16 sps:$4 sm:$0xff]  }
 0x608   : > { %10090 = vmatprep.subr.bf16.mxu1 %v16702_v48  ;;  %v16745_v55 = vld [vmem:[#allocation7 + $0xd28] ss:$16 sps:$4 sm:$0xff]   ;;  %v16753_v48 = vld [vmem:[#allocation7 + $0xd0c] ss:$16 sps:$4 sm:$0xff]  }
 0x609   : > { %v10158_v12 = vmul.f32 %v18274_v47, %v18274_v47  ;;  %v16748_v41 = vld [vmem:[#allocation7 + $0xf28] ss:$16 sps:$4 sm:$0xff]  }
 0x60a   : > { %10050 = vmatpush1.bf16.msra.mxu0 %v16697_v57  ;;  %v18285_v24 = vld [vmem:[#allocation11] sm:$0xf]  ;;  %v18288_v57 = vsub.f32 %v18270_v59, %v10149_v43 }
 0x60b   : > { %v10168_v0 = vsel %vm10119_vm0, %v10158_v12, 0.0  ;;  %10091 = vmatpush1.bf16.msra.mxu1 %v16700_v22  ;;  %10051 = vmatprep.subr.bf16.mxu0 %v16705_v37  ;;  %v10216_v22 = vmul.f32 %v10202_v54, %v18274_v47  ;;  %v16756_v37 = vld [vmem:[#allocation7 + $0xf0c] ss:$16 sps:$4 sm:$0xff]   ;;  %v16783_v54 = vld [vmem:[#allocation13 + $0x1e4] ss:$16 sps:$4 sm:$0xff]  }
 0x60c   : > { %v10169_v7 = vrot.slane %v10168_v0, 4  ;;  %10092 = vmatprep.subr.bf16.mxu1 %v16708_v60  ;;  %v10240_v60 = vrot.slane %v18285_v24, %v18224_v25  ;;  %v10157_v59 = vmul.f32 %v18288_v57, %v18288_v57 }
 0x60e   : > { %v10170_v8 = vadd.f32 %v10169_v7, %v10168_v0  ;;  %10052 = vmatpush1.bf16.msra.mxu0 %v16703_v62  ;;  %v16751_v62 = vld [vmem:[#allocation7 + $0xd08] ss:$16 sps:$4 sm:$0xff]   ;;  %v18294_v0 = vsub.s32 2, %v17984_v44  ;;  %v17094_v7 = vld [vmem:[#allocation8] sm:$0xf] }
 0x60f   : > { %10093 = vmatpush1.bf16.msra.mxu1 %v16706_v15  ;;  %10053 = vmatprep.subr.bf16.mxu0 %v16711_v6  ;;  %v16754_v15 = vld [vmem:[#allocation7 + $0xf08] ss:$16 sps:$4 sm:$0xff]   ;;  %v16759_v6 = vld [vmem:[#allocation13 + $0xe4] ss:$16 sps:$4 sm:$0xff]  }
 0x610   : > { %v10171_v11 = vrot.slane %v10170_v8, 2  ;;  %10094 = vmatprep.subr.bf16.mxu1 %v16714_v2  ;;  %v6894_v2 = vrot.slane %v17094_v7, %v18294_v0 }
 0x612   : > { %v10172_v39 = vadd.f32 %v10171_v11, %v10170_v8  ;;  %10054 = vmatpush2.bf16.msra.mxu0 %v16709_v9  ;;  %v16757_v8 = vld [vmem:[#allocation13 + $0xe0] ss:$16 sps:$4 sm:$0xff]   ;;  %v6898_v11 = vrot.slane %v17094_v7, %v18299_v1 }
 0x613   : > { %10095 = vmatpush2.bf16.msra.mxu1 %v16712_v50  ;;  %10055 = vmatprep.subr.bf16.mxu0 %v16717_v17  ;;  %v16762_v50 = vld [vmem:[#allocation13 + $0xc4] ss:$16 sps:$4 sm:$0xff]   ;;  %v10161_v17 = vsel %vm10119_vm0, %v10157_v59, 0.0  ;;  %v16796_v7 = vld [vmem:[#allocation13 + $0x140] ss:$16 sps:$4 sm:$0xff]  }
 0x614   : > { %v10173_v5 = vrot.slane %v10172_v39, 1  ;;  %10096 = vmatprep.subr.bf16.mxu1 %v16720_v61 }
 0x616   : > { %v10174_v58 = vadd.f32 %v10173_v5, %v10172_v39  ;;  %10056 = vmatpush2.bf16.msra.mxu0 %v16715_v4  ;;  %v16765_v5 = vld [vmem:[#allocation13 + $0xa4] ss:$16 sps:$4 sm:$0xff]  }
 0x617   : > { %10097 = vmatpush2.bf16.msra.mxu1 %v16718_v21  ;;  %10057 = vmatprep.subr.bf16.mxu0 %v16723_v52  ;;  %v16760_v21 = vld [vmem:[#allocation13 + $0xc0] ss:$16 sps:$4 sm:$0xff]   ;;  %v10162_v52 = vrot.slane %v10161_v17, 4 }
 0x618   : > { %v10190_v20 = vmul.f32 0.5, %v10174_v58  ;;  %10098 = vmatprep.subr.bf16.mxu1 %v16726_v63 }
 0x61a   : > { %v10220_v30 = vadd.f32 1e-05, %v10190_v20  ;;  %10058 = vmatpush2.bf16.msra.mxu0 %v16721_v32  ;;  %v10163_v20 = vadd.f32 %v10162_v52, %v10161_v17  ;;  %v16804_v17 = vld [vmem:[#allocation13 + $0x104] ss:$16 sps:$4 sm:$0xff]   ;;  %v16810_v52 = vld [vmem:[#allocation13 + $0xcc] ss:$16 sps:$4 sm:$0xff]  }
 0x61b   : > { %10099 = vmatpush2.bf16.msra.mxu1 %v16724_v10  ;;  %10059 = vmatprep.subr.bf16.mxu0 %v16729_v36 }
 0x61c   : > { %17078 = vrsqrt.f32 %v10220_v30  ;;  %10100 = vmatprep.subr.bf16.mxu1 %v16732_v45  ;;  %v16768_v45 = vld [vmem:[#allocation13 + $0x84] ss:$16 sps:$4 sm:$0xff]  }
 0x61e   : > { %10060 = vmatpush2.bf16.msra.mxu0 %v16727_v27  ;;  %v16766_v27 = vld [vmem:[#allocation13 + $0x80] ss:$16 sps:$4 sm:$0xff]  }
 0x61f   : > { %10101 = vmatpush2.bf16.msra.mxu1 %v16730_v16  ;;  %10061 = vmatprep.subr.bf16.mxu0 %v16735_v42  ;;  %v10164_v16 = vrot.slane %v10163_v20, 2  ;;  %v16771_v42 = vld [vmem:[#allocation13 + $0x64] ss:$16 sps:$4 sm:$0xff]  }
 0x620   : > { %10102 = vmatprep.subr.bf16.mxu1 %v16738_v29 }
 0x621   : > { %v10165_v29 = vadd.f32 %v10164_v16, %v10163_v20  ;;  %v16853_v20 = vld [vmem:[#allocation13 + $0x2e0] ss:$16 sps:$4 sm:$0xff]  }
 0x622   : > { %10062 = vmatpush2.bf16.msra.mxu0 %v16733_v31  ;;  %v16774_v31 = vld [vmem:[#allocation13 + $0x44] ss:$16 sps:$4 sm:$0xff]  }
 0x623   : > { %10103 = vmatpush2.bf16.msra.mxu1 %v16736_v51  ;;  %10063 = vmatprep.subr.bf16.mxu0 %v16741_v3  ;;  %v16772_v51 = vld [vmem:[#allocation13 + $0x40] ss:$16 sps:$4 sm:$0xff]   ;;  %v10166_v3 = vrot.slane %v10165_v29, 1 }
 0x624   : > { %10104 = vmatprep.subr.bf16.mxu1 %v16744_v34  ;;  %v16775_v34 = vld [vmem:[#allocation13 + $0x20] ss:$16 sps:$4 sm:$0xff]  }
 0x626   : > { %10064 = vmatpush2.bf16.msra.mxu0 %v16739_v35  ;;  %v10167_v35 = vadd.f32 %v10166_v3, %v10165_v29  ;;  %v16816_v29 = vld [vmem:[#allocation13 + $0x8c] ss:$16 sps:$4 sm:$0xff]   ;;  %v16814_v3 = vld [vmem:[#allocation13 + $0x88] ss:$16 sps:$4 sm:$0xff]  }
 0x627   : > { %10105 = vmatpush2.bf16.msra.mxu1 %v16742_v38  ;;  %10065 = vmatprep.subr.bf16.mxu0 %v16747_v40  ;;  %v16780_v38 = vld [vmem:[#allocation13 + $0x4] ss:$16 sps:$4 sm:$0xff]   ;;  %v16778_v40 = vld [vmem:[#allocation13] ss:$16 sps:$4 sm:$0xff]  }
 0x628   : > { %10106 = vmatprep.subr.bf16.mxu1 %v16750_v49  ;;  %v10189_v43 = vmul.f32 0.5, %v10167_v35  ;;  %v16781_v49 = vld [vmem:[#allocation13 + $0x1e0] ss:$16 sps:$4 sm:$0xff]   ;;  %v16817_v35 = vld [vmem:[#allocation13 + $0x68] ss:$16 sps:$4 sm:$0xff]  }
 0x629   : > { %v17079_v18 = vpop.eup %17078 }
 0x62a   : > { %v10228_v12 = vmul.f32 %v17079_v18, %v10216_v22  ;;  %10066 = vmatpush2.bf16.msra.mxu0 %v16745_v55  ;;  %v10219_v55 = vadd.f32 1e-05, %v10189_v43  ;;  %v16789_v22 = vld [vmem:[#allocation13 + $0x1a4] ss:$16 sps:$4 sm:$0xff]   ;;  %v16790_v18 = vld [vmem:[#allocation13 + $0x180] ss:$16 sps:$4 sm:$0xff]  }
 0x62b   : > { %10107 = vmatpush2.bf16.msra.mxu1 %v16748_v41  ;;  %10067 = vmatprep.subr.bf16.mxu0 %v16753_v48  ;;  %v16786_v41 = vld [vmem:[#allocation13 + $0x1c4] ss:$16 sps:$4 sm:$0xff]   ;;  %v16784_v48 = vld [vmem:[#allocation13 + $0x1c0] ss:$16 sps:$4 sm:$0xff]  }
 0x62c   : > { %10108 = vmatprep.subr.bf16.mxu1 %v16756_v37  ;;  %v10254_v47 = vadd.f32 %v10240_v60, %v10228_v12  ;;  %17080 = vrsqrt.f32 %v10219_v55  ;;  %v16787_v37 = vld [vmem:[#allocation13 + $0x1a0] ss:$16 sps:$4 sm:$0xff]   ;;  %v16792_v60 = vld [vmem:[#allocation13 + $0x184] ss:$16 sps:$4 sm:$0xff]   ;;  %v16825_v55 = vld [vmem:[#allocation13 + $0x2c] ss:$16 sps:$4 sm:$0xff]  }
 0x62d   : > { %v16795_v12 = vld [vmem:[#allocation13 + $0x164] ss:$16 sps:$4 sm:$0xff]   ;;  %v16862_v43 = vld [vmem:[#allocation13 + $0x280] ss:$16 sps:$4 sm:$0xff]  }
 0x62e   : > { %10068 = vmatpush2.bf16.msra.mxu0 %v16751_v62  ;;  %v10258_v9 = vmax.f32 %v10254_v47, 0.0  ;;  %v10198_v62 = vrot.slane %v18281_v14, %v18220_v33 }
 0x62f   : > { %10109 = vmatpush2.bf16.msra.mxu1 %v16754_v15  ;;  %11055 = vmatprep.subr.bf16.mxu0 %v16759_v6  ;;  %v16793_v15 = vld [vmem:[#allocation13 + $0x160] ss:$16 sps:$4 sm:$0xff]   ;;  %v16798_v6 = vld [vmem:[#allocation13 + $0x144] ss:$16 sps:$4 sm:$0xff]  }
 0x630   : > { %v18303_v19 = vpack.c.bf16 %v10258_v9, %v10258_v9  ;;  %v10215_v47 = vmul.f32 %v10198_v62, %v18288_v57  ;;  %v10236_v9 = vrot.slane %v18285_v24, %v18220_v33  ;;  %v16805_v57 = vld [vmem:[#allocation13 + $0xe8] ss:$16 sps:$4 sm:$0xff]   ;;  %v16831_v62 = vld [vmem:[#allocation13 + $0x1ec] ss:$16 sps:$4 sm:$0xff]  }
 0x631   : > { %v9825_v61 = vpop.f32.mrf.mxu0  ;;  %10070 = vmatmul.mubr.bf16.vlgmr.msra.gmra.mxu0 %v18229_v26 }
 0x632   : > { %v9826_v39 = vadd.f32 %v9825_v61, %v6894_v2  ;;  %v9866_v4 = vpop.f32.mrf.mxu1  ;;  %10111 = vmatmul.mubr.bf16.vlgmr.msra.gmra.mxu1 %v18231_v28  ;;  %11056 = vmatpush1.bf16.msra.mxu0 %v16757_v8  ;;  %v16801_v8 = vld [vmem:[#allocation13 + $0x124] ss:$16 sps:$4 sm:$0xff]   ;;  %v16802_v61 = vld [vmem:[#allocation13 + $0x100] ss:$16 sps:$4 sm:$0xff]  }
 0x633   : > { %11087 = vmatprep.mubr.bf16.mxu0 %v18303_v19  ;;  %v9827_v46 = vpop.f32.mrf.mxu0  ;;  %11057 = vmatprep.subr.bf16.mxu0 %v16762_v50  ;;  %v16799_v50 = vld [vmem:[#allocation13 + $0x120] ss:$16 sps:$4 sm:$0xff]  }
 0x634   : > { %v18309_v63 = vadd.f32 %v9866_v4, %v9826_v39  ;;  %v9828_v58 = vadd.f32 %v9827_v46, %v6898_v11  ;;  %v9868_v32 = vpop.f32.mrf.mxu1  ;;  %v16807_v4 = vld [vmem:[#allocation13 + $0xec] ss:$16 sps:$4 sm:$0xff]  }
 0x635   : > { %v9829_v10 = vpop.f32.mrf.mxu0 }
 0x636   : > { %v18311_v36 = vadd.f32 %v9868_v32, %v9828_v58  ;;  %v9870_v26 = vpop.f32.mrf.mxu1  ;;  %11058 = vmatpush1.bf16.msra.mxu0 %v16760_v21  ;;  %v16808_v32 = vld [vmem:[#allocation13 + $0xc8] ss:$16 sps:$4 sm:$0xff]   ;;  %v16855_v10 = vld [vmem:[#allocation13 + $0x2e4] ss:$16 sps:$4 sm:$0xff]  }
 0x637   : > { %v9830_v28 = vpop.f32.mrf.mxu0  ;;  %11059 = vmatprep.subr.bf16.mxu0 %v16765_v5  ;;  %11096 = vmatprep.subr.bf16.mxu1 %v16855_v10  ;;  %v16886_v10 = vld [vmem:[#allocation13 + $0x380] ss:$16 sps:$4 sm:$0xff]  }
 0x638   : > { %v9871_v30 = vpop.f32.mrf.mxu1  ;;  %11097 = vmatpush1.bf16.msra.mxu1 %v16853_v20  ;;  %v16849_v20 = vld [vmem:[#allocation13 + $0x12c] ss:$16 sps:$4 sm:$0xff]  }
 0x639   : > { %v17081_v59 = vpop.eup %17080 }
 0x63a   : > { %11060 = vmatpush1.bf16.msra.mxu0 %v16763_v56  ;;  %v10227_v2 = vmul.f32 %v17081_v59, %v10215_v47  ;;  %v16813_v56 = vld [vmem:[#allocation13 + $0xac] ss:$16 sps:$4 sm:$0xff]   ;;  %v16876_v59 = vld [vmem:[#allocation13 + $0x204] ss:$16 sps:$4 sm:$0xff]  }
 0x63b   : > { %11061 = vmatprep.subr.bf16.mxu0 %v16768_v45  ;;  %v16834_v47 = vld [vmem:[#allocation13 + $0x1cc] ss:$16 sps:$4 sm:$0xff]  }
 0x63c   : > { %v10253_v11 = vadd.f32 %v10236_v9, %v10227_v2  ;;  %v16832_v2 = vld [vmem:[#allocation13 + $0x1c8] ss:$16 sps:$4 sm:$0xff]   ;;  %v16837_v9 = vld [vmem:[#allocation13 + $0x1ac] ss:$16 sps:$4 sm:$0xff]  }
 0x63e   : > { %11062 = vmatpush1.bf16.msra.mxu0 %v16766_v27  ;;  %v10257_v39 = vmax.f32 %v10253_v11, 0.0  ;;  %v16882_v11 = vld [vmem:[#allocation13 + $0x3c4] ss:$16 sps:$4 sm:$0xff]  }
 0x63f   : > { %11063 = vmatprep.subr.bf16.mxu0 %v16771_v42  ;;  %v16811_v42 = vld [vmem:[#allocation13 + $0xa8] ss:$16 sps:$4 sm:$0xff]  }
 0x640   : > { %v18318_v21 = vpack.c.bf16 %v10257_v39, %v10257_v39  ;;  %v16880_v39 = vld [vmem:[#allocation13 + $0x3c0] ss:$16 sps:$4 sm:$0xff]  }
 0x642   : > { %11064 = vmatpush1.bf16.msra.mxu0 %v16769_v13 }
 0x643   : > { %11065 = vmatprep.subr.bf16.mxu0 %v16774_v31  ;;  %v16856_v31 = vld [vmem:[#allocation13 + $0x2c0] ss:$16 sps:$4 sm:$0xff]  }
 0x646   : > { %11066 = vmatpush1.bf16.msra.mxu0 %v16772_v51 }
 0x647   : > { %11067 = vmatprep.subr.bf16.mxu0 %v16777_v23  ;;  %v16819_v23 = vld [vmem:[#allocation13 + $0x6c] ss:$16 sps:$4 sm:$0xff]  }
 0x64a   : > { %11068 = vmatpush1.bf16.msra.mxu0 %v16775_v34  ;;  %v16859_v34 = vld [vmem:[#allocation13 + $0x2a0] ss:$16 sps:$4 sm:$0xff]  }
 0x64b   : > { %11069 = vmatprep.subr.bf16.mxu0 %v16780_v38  ;;  %v16864_v38 = vld [vmem:[#allocation13 + $0x284] ss:$16 sps:$4 sm:$0xff]  }
 0x64e   : > { %11070 = vmatpush1.bf16.msra.mxu0 %v16778_v40  ;;  %v16822_v40 = vld [vmem:[#allocation13 + $0x4c] ss:$16 sps:$4 sm:$0xff]  }
 0x64f   : > { %11071 = vmatprep.subr.bf16.mxu0 %v16783_v54  ;;  %v16820_v54 = vld [vmem:[#allocation13 + $0x48] ss:$16 sps:$4 sm:$0xff]  }
 0x652   : > { %11072 = vmatpush2.bf16.msra.mxu0 %v16781_v49  ;;  %v16867_v49 = vld [vmem:[#allocation13 + $0x264] ss:$16 sps:$4 sm:$0xff]  }
 0x653   : > { %11073 = vmatprep.subr.bf16.mxu0 %v16786_v41  ;;  %v16865_v41 = vld [vmem:[#allocation13 + $0x260] ss:$16 sps:$4 sm:$0xff]  }
 0x656   : > { %11074 = vmatpush2.bf16.msra.mxu0 %v16784_v48  ;;  %v16823_v48 = vld [vmem:[#allocation13 + $0x28] ss:$16 sps:$4 sm:$0xff]  }
 0x657   : > { %11075 = vmatprep.subr.bf16.mxu0 %v16789_v22  ;;  %v16870_v22 = vld [vmem:[#allocation13 + $0x244] ss:$16 sps:$4 sm:$0xff]  }
 0x65a   : > { %11076 = vmatpush2.bf16.msra.mxu0 %v16787_v37  ;;  %v16828_v37 = vld [vmem:[#allocation13 + $0xc] ss:$16 sps:$4 sm:$0xff]  }
 0x65b   : > { %11077 = vmatprep.subr.bf16.mxu0 %v16792_v60  ;;  %v16868_v60 = vld [vmem:[#allocation13 + $0x240] ss:$16 sps:$4 sm:$0xff]  }
 0x65e   : > { %11078 = vmatpush2.bf16.msra.mxu0 %v16790_v18  ;;  %v16826_v18 = vld [vmem:[#allocation13 + $0x8] ss:$16 sps:$4 sm:$0xff]  }
 0x65f   : > { %11079 = vmatprep.subr.bf16.mxu0 %v16795_v12  ;;  %v16873_v12 = vld [vmem:[#allocation13 + $0x224] ss:$16 sps:$4 sm:$0xff]  }
 0x662   : > { %11080 = vmatpush2.bf16.msra.mxu0 %v16793_v15  ;;  %v16871_v15 = vld [vmem:[#allocation13 + $0x220] ss:$16 sps:$4 sm:$0xff]  }
 0x663   : > { %11081 = vmatprep.subr.bf16.mxu0 %v16798_v6  ;;  %v16829_v6 = vld [vmem:[#allocation13 + $0x1e8] ss:$16 sps:$4 sm:$0xff]  }
 0x666   : > { %11082 = vmatpush2.bf16.msra.mxu0 %v16796_v7  ;;  %v16874_v7 = vld [vmem:[#allocation13 + $0x200] ss:$16 sps:$4 sm:$0xff]  }
 0x667   : > { %11083 = vmatprep.subr.bf16.mxu0 %v16801_v8  ;;  %v16879_v8 = vld [vmem:[#allocation13 + $0x3e4] ss:$16 sps:$4 sm:$0xff]  }
 0x66a   : > { %11084 = vmatpush2.bf16.msra.mxu0 %v16799_v50  ;;  %v16877_v50 = vld [vmem:[#allocation13 + $0x3e0] ss:$16 sps:$4 sm:$0xff]  }
 0x66b   : > { %11085 = vmatprep.subr.bf16.mxu0 %v16804_v17  ;;  %v16835_v17 = vld [vmem:[#allocation13 + $0x1a8] ss:$16 sps:$4 sm:$0xff]  }
 0x66e   : > { %11086 = vmatpush2.bf16.msra.mxu0 %v16802_v61  ;;  %v16840_v61 = vld [vmem:[#allocation13 + $0x18c] ss:$16 sps:$4 sm:$0xff]  }
 0x66f   : > { %11137 = vmatprep.subr.bf16.mxu0 %v16807_v4  ;;  %v16838_v4 = vld [vmem:[#allocation13 + $0x188] ss:$16 sps:$4 sm:$0xff]  }
 0x671   : > { %v9907_v46 = vpop.f32.mrf.mxu0  ;;  %11088 = vmatmul.mubr.bf16.vlgmr.msra.gmra.mxu0 %v18318_v21 }
 0x672   : > { %v9908_v5 = vadd.f32 %v9907_v46, %v18309_v63  ;;  %v9948_v58 = vpop.f32.mrf.mxu1  ;;  %11138 = vmatpush1.bf16.msra.mxu0 %v16805_v57  ;;  %11169 = vmatprep.mubr.bf16.mxu0 %v18303_v19  ;;  %v16858_v19 = vld [vmem:[#allocation13 + $0x2c4] ss:$16 sps:$4 sm:$0xff]   ;;  %v16883_v46 = vld [vmem:[#allocation13 + $0x3a0] ss:$16 sps:$4 sm:$0xff]  }
 0x673   : > { %v9909_v26 = vpop.f32.mrf.mxu0  ;;  %11139 = vmatprep.subr.bf16.mxu0 %v16810_v52  ;;  %11098 = vmatprep.subr.bf16.mxu1 %v16858_v19  ;;  %v16885_v57 = vld [vmem:[#allocation13 + $0x3a4] ss:$16 sps:$4 sm:$0xff]   ;;  %v16843_v52 = vld [vmem:[#allocation13 + $0x16c] ss:$16 sps:$4 sm:$0xff]   ;;  %v16850_v19 = vld [vmem:[#allocation13 + $0x108] ss:$16 sps:$4 sm:$0xff]  }
 0x674   : > { %v18323_v28 = vadd.f32 %v9948_v58, %v9908_v5  ;;  %v9910_v45 = vadd.f32 %v9909_v26, %v18311_v36  ;;  %v9950_v30 = vpop.f32.mrf.mxu1  ;;  %11099 = vmatpush1.bf16.msra.mxu1 %v16856_v31  ;;  %v16861_v36 = vld [vmem:[#allocation13 + $0x2a4] ss:$16 sps:$4 sm:$0xff]   ;;  %v16841_v5 = vld [vmem:[#allocation13 + $0x168] ss:$16 sps:$4 sm:$0xff]  }
 0x675   : > { %v9911_v27 = vpop.f32.mrf.mxu0  ;;  %11100 = vmatprep.subr.bf16.mxu1 %v16861_v36  ;;  %v16888_v58 = vld [vmem:[#allocation13 + $0x384] ss:$16 sps:$4 sm:$0xff]   ;;  %v16844_v26 = vld [vmem:[#allocation13 + $0x148] ss:$16 sps:$4 sm:$0xff]  }
 0x676   : > { %v18326_v16 = vadd.f32 %v9950_v30, %v9910_v45  ;;  %v9952_v63 = vpop.f32.mrf.mxu1  ;;  %11140 = vmatpush1.bf16.msra.mxu0 %v16808_v32  ;;  %v16846_v32 = vld [vmem:[#allocation13 + $0x14c] ss:$16 sps:$4 sm:$0xff]   ;;  %v16889_v45 = vld [vmem:[#allocation13 + $0x360] ss:$16 sps:$4 sm:$0xff]   ;;  %v16847_v30 = vld [vmem:[#allocation13 + $0x128] ss:$16 sps:$4 sm:$0xff]  }
 0x677   : > { %v9912_v13 = vpop.f32.mrf.mxu0  ;;  %11141 = vmatprep.subr.bf16.mxu0 %v16813_v56  ;;  %v16891_v56 = vld [vmem:[#allocation13 + $0x364] ss:$16 sps:$4 sm:$0xff]   ;;  %v16852_v63 = vld [vmem:[#allocation13 + $0x10c] ss:$16 sps:$4 sm:$0xff]  }
 0x678   : > { %v9953_v51 = vpop.f32.mrf.mxu1  ;;  %11101 = vmatpush1.bf16.msra.mxu1 %v16859_v34  ;;  %v16894_v27 = vld [vmem:[#allocation13 + $0x344] ss:$16 sps:$4 sm:$0xff]   ;;  %v16895_v13 = vld [vmem:[#allocation13 + $0x320] ss:$16 sps:$4 sm:$0xff]   ;;  %v16903_v34 = vld [vmem:[#allocation13 + $0x2ec] ss:$16 sps:$4 sm:$0xff]  }
 0x679   : > { %11102 = vmatprep.subr.bf16.mxu1 %v16864_v38  ;;  %v16900_v31 = vld [vmem:[#allocation13 + $0x304] ss:$16 sps:$4 sm:$0xff]   ;;  %v16898_v51 = vld [vmem:[#allocation13 + $0x300] ss:$16 sps:$4 sm:$0xff]  }
 0x67a   : > { %11142 = vmatpush1.bf16.msra.mxu0 %v16811_v42  ;;  %v16892_v42 = vld [vmem:[#allocation13 + $0x340] ss:$16 sps:$4 sm:$0xff]  }
 0x67b   : > { %11143 = vmatprep.subr.bf16.mxu0 %v16816_v29  ;;  %v16897_v29 = vld [vmem:[#allocation13 + $0x324] ss:$16 sps:$4 sm:$0xff]  }
 0x67c   : > { %11103 = vmatpush1.bf16.msra.mxu1 %v16862_v43 }
 0x67d   : > { %11104 = vmatprep.subr.bf16.mxu1 %v16867_v49 }
 0x67e   : > { %11144 = vmatpush1.bf16.msra.mxu0 %v16814_v3 }
 0x67f   : > { %11145 = vmatprep.subr.bf16.mxu0 %v16819_v23 }
 0x680   : > { %11105 = vmatpush1.bf16.msra.mxu1 %v16865_v41 }
 0x681   : > { %11106 = vmatprep.subr.bf16.mxu1 %v16870_v22 }
 0x682   : > { %11146 = vmatpush1.bf16.msra.mxu0 %v16817_v35 }
 0x683   : > { %11147 = vmatprep.subr.bf16.mxu0 %v16822_v40 }
 0x684   : > { %11107 = vmatpush1.bf16.msra.mxu1 %v16868_v60 }
 0x685   : > { %11108 = vmatprep.subr.bf16.mxu1 %v16873_v12 }
 0x686   : > { %11148 = vmatpush1.bf16.msra.mxu0 %v16820_v54 }
 0x687   : > { %11149 = vmatprep.subr.bf16.mxu0 %v16825_v55 }
 0x688   : > { %11109 = vmatpush1.bf16.msra.mxu1 %v16871_v15 }
 0x689   : > { %11110 = vmatprep.subr.bf16.mxu1 %v16876_v59 }
 0x68a   : > { %11150 = vmatpush1.bf16.msra.mxu0 %v16823_v48 }
 0x68b   : > { %11151 = vmatprep.subr.bf16.mxu0 %v16828_v37 }
 0x68c   : > { %11111 = vmatpush1.bf16.msra.mxu1 %v16874_v7 }
 0x68d   : > { %11112 = vmatprep.subr.bf16.mxu1 %v16879_v8 }
 0x68e   : > { %11152 = vmatpush1.bf16.msra.mxu0 %v16826_v18 }
 0x68f   : > { %11153 = vmatprep.subr.bf16.mxu0 %v16831_v62 }
 0x690   : > { %11113 = vmatpush2.bf16.msra.mxu1 %v16877_v50 }
 0x691   : > { %11114 = vmatprep.subr.bf16.mxu1 %v16882_v11 }
 0x692   : > { %11154 = vmatpush2.bf16.msra.mxu0 %v16829_v6 }
 0x693   : > { %11155 = vmatprep.subr.bf16.mxu0 %v16834_v47 }
 0x694   : > { %11115 = vmatpush2.bf16.msra.mxu1 %v16880_v39 }
 0x695   : > { %11116 = vmatprep.subr.bf16.mxu1 %v16885_v57 }
 0x696   : > { %11156 = vmatpush2.bf16.msra.mxu0 %v16832_v2 }
 0x697   : > { %11157 = vmatprep.subr.bf16.mxu0 %v16837_v9 }
 0x698   : > { %11117 = vmatpush2.bf16.msra.mxu1 %v16883_v46 }
 0x699   : > { %11118 = vmatprep.subr.bf16.mxu1 %v16888_v58 }
 0x69a   : > { %11158 = vmatpush2.bf16.msra.mxu0 %v16835_v17 }
 0x69b   : > { %11159 = vmatprep.subr.bf16.mxu0 %v16840_v61 }
 0x69c   : > { %11119 = vmatpush2.bf16.msra.mxu1 %v16886_v10 }
 0x69d   : > { %11120 = vmatprep.subr.bf16.mxu1 %v16891_v56 }
 0x69e   : > { %11160 = vmatpush2.bf16.msra.mxu0 %v16838_v4 }
 0x69f   : > { %11161 = vmatprep.subr.bf16.mxu0 %v16843_v52 }
 0x6a0   : > { %11121 = vmatpush2.bf16.msra.mxu1 %v16889_v45 }
 0x6a1   : > { %11122 = vmatprep.subr.bf16.mxu1 %v16894_v27 }
 0x6a2   : > { %11162 = vmatpush2.bf16.msra.mxu0 %v16841_v5 }
 0x6a3   : > { %11163 = vmatprep.subr.bf16.mxu0 %v16846_v32 }
 0x6a4   : > { %11123 = vmatpush2.bf16.msra.mxu1 %v16892_v42 }
 0x6a5   : > { %11124 = vmatprep.subr.bf16.mxu1 %v16897_v29 }
 0x6a6   : > { %11164 = vmatpush2.bf16.msra.mxu0 %v16844_v26 }
 0x6a7   : > { %11165 = vmatprep.subr.bf16.mxu0 %v16849_v20 }
 0x6a8   : > { %11125 = vmatpush2.bf16.msra.mxu1 %v16895_v13 }
 0x6a9   : > { %11126 = vmatprep.subr.bf16.mxu1 %v16900_v31 }
 0x6aa   : > { %11166 = vmatpush2.bf16.msra.mxu0 %v16847_v30 }
 0x6ab   : > { %11167 = vmatprep.subr.bf16.mxu0 %v16852_v63 }
 0x6ac   : > { %11127 = vmatpush2.bf16.msra.mxu1 %v16898_v51 }
 0x6ad   : > { %11178 = vmatprep.subr.bf16.mxu1 %v16903_v34 }
 0x6ae   : > { %11168 = vmatpush2.bf16.msra.mxu0 %v16850_v19 }
 0x6b1   : > { %v9989_v3 = vpop.f32.mrf.mxu0  ;;  %11170 = vmatmul.mubr.bf16.vlgmr.msra.gmra.mxu0 %v18318_v21 }
 0x6b2   : > { %v9990_v36 = vadd.f32 %v9989_v3, %v18323_v28  ;;  %v10030_v23 = vpop.f32.mrf.mxu1 }
 0x6b3   : > { %v9991_v35 = vpop.f32.mrf.mxu0 }
 0x6b4   : > { %v10031_v38 = vadd.f32 %v10030_v23, %v9990_v36  ;;  %v10032_v40 = vpop.f32.mrf.mxu1  ;;  %v9992_v41 = vadd.f32 %v9991_v35, %v18326_v16 }
 0x6b5   : > { %v9993_v43 = vpop.f32.mrf.mxu0 }
 0x6b6   : > { %v10034_v54 = vpop.f32.mrf.mxu1  ;;  %v10033_v22 = vadd.f32 %v10032_v40, %v9992_v41  ;;  %v10206_v43 = vrot.slane %v18281_v14, %v18294_v0 }
 0x6b7   : > { %v9994_v49 = vpop.f32.mrf.mxu0  ;;  %v10210_v54 = vrot.slane %v18281_v14, %v18299_v1 }
 0x6b8   : > { %v10035_v55 = vpop.f32.mrf.mxu1 }
 0x6b9   : > { %v10244_v55 = vrot.slane %v18285_v24, %v18294_v0 }
 0x6f1   : > { %v10071_v48 = vpop.f32.mrf.mxu0 }
 0x6f2   : > { %v10072_v37 = vadd.f32 %v10071_v48, %v10031_v38  ;;  %v10112_v60 = vpop.f32.mrf.mxu1 }
 0x6f3   : > { %v10073_v21 = vpop.f32.mrf.mxu0 }
 0x6f4   : > { %v10113_v18 = vadd.f32 %v10112_v60, %v10072_v37  ;;  %v10074_v12 = vadd.f32 %v10073_v21, %v10033_v22  ;;  %v10114_v28 = vpop.f32.mrf.mxu1  ;;  %v10248_v37 = vrot.slane %v18285_v24, %v18299_v1  ;;  %v16904_v24 = vld [vmem:[#allocation13 + $0x2c8] ss:$16 sps:$4 sm:$0xff]  }
 0x6f5   : > { %v10075_v62 = vpop.f32.mrf.mxu0 }
 0x6f6   : > { %v10134_v15 = vsel %vm10119_vm0, %v10113_v18, 0.0  ;;  %v10115_v6 = vadd.f32 %v10114_v28, %v10074_v12  ;;  %v10116_v59 = vpop.f32.mrf.mxu1 }
 0x6f7   : > { %v10135_v47 = vrot.slane %v10134_v15, 4  ;;  %v10076_v7 = vpop.f32.mrf.mxu0 }
 0x6f8   : > { %v10141_v2 = vsel %vm10119_vm0, %v10115_v6, 0.0  ;;  %v10117_v8 = vpop.f32.mrf.mxu1 }
 0x6f9   : > { %v10136_v9 = vadd.f32 %v10135_v47, %v10134_v15  ;;  %v10142_v16 = vrot.slane %v10141_v2, 4  ;;  %v16906_v47 = vld [vmem:[#allocation13 + $0x2cc] ss:$16 sps:$4 sm:$0xff]  }
 0x6fa   : > { %v16909_v8 = vld [vmem:[#allocation13 + $0x2ac] ss:$16 sps:$4 sm:$0xff]  }
 0x6fb   : > { %v10137_v50 = vrot.slane %v10136_v9, 2  ;;  %v10143_v17 = vadd.f32 %v10142_v16, %v10141_v2  ;;  %v16907_v16 = vld [vmem:[#allocation13 + $0x2a8] ss:$16 sps:$4 sm:$0xff]  }
 0x6fd   : > { %v10138_v11 = vadd.f32 %v10137_v50, %v10136_v9  ;;  %v10144_v61 = vrot.slane %v10143_v17, 2  ;;  %v16912_v50 = vld [vmem:[#allocation13 + $0x28c] ss:$16 sps:$4 sm:$0xff]  }
 0x6ff   : > { %v10139_v39 = vrot.slane %v10138_v11, 1  ;;  %v10145_v4 = vadd.f32 %v10144_v61, %v10143_v17  ;;  %v16910_v17 = vld [vmem:[#allocation13 + $0x288] ss:$16 sps:$4 sm:$0xff]  }
 0x700   : > { %v16913_v61 = vld [vmem:[#allocation13 + $0x268] ss:$16 sps:$4 sm:$0xff]  }
 0x701   : > { %v10140_v57 = vadd.f32 %v10139_v39, %v10138_v11  ;;  %v10146_v52 = vrot.slane %v10145_v4, 1  ;;  %v16915_v11 = vld [vmem:[#allocation13 + $0x26c] ss:$16 sps:$4 sm:$0xff]  }
 0x702   : > { %v16918_v39 = vld [vmem:[#allocation13 + $0x24c] ss:$16 sps:$4 sm:$0xff]  }
 0x703   : > { %v10151_v46 = vmul.f32 0.5, %v10140_v57  ;;  %v10147_v5 = vadd.f32 %v10146_v52, %v10145_v4  ;;  %v16916_v4 = vld [vmem:[#allocation13 + $0x248] ss:$16 sps:$4 sm:$0xff]   ;;  %v16921_v57 = vld [vmem:[#allocation13 + $0x22c] ss:$16 sps:$4 sm:$0xff]  }
 0x704   : > { %v16919_v52 = vld [vmem:[#allocation13 + $0x228] ss:$16 sps:$4 sm:$0xff]  }
 0x705   : > { %v10155_v58 = vsub.f32 %v10113_v18, %v10151_v46  ;;  %v10152_v32 = vmul.f32 0.5, %v10147_v5  ;;  %v16924_v46 = vld [vmem:[#allocation13 + $0x20c] ss:$16 sps:$4 sm:$0xff]   ;;  %v16922_v5 = vld [vmem:[#allocation13 + $0x208] ss:$16 sps:$4 sm:$0xff]  }
 0x707   : > { %v10159_v10 = vmul.f32 %v10155_v58, %v10155_v58  ;;  %v10156_v26 = vsub.f32 %v10115_v6, %v10152_v32  ;;  %v10217_v49 = vmul.f32 %v10206_v43, %v10155_v58  ;;  %v16901_v6 = vld [vmem:[#allocation13 + $0x2e8] ss:$16 sps:$4 sm:$0xff]   ;;  %v16927_v58 = vld [vmem:[#allocation13 + $0x3ec] ss:$16 sps:$4 sm:$0xff]  }
 0x708   : > { %v16925_v32 = vld [vmem:[#allocation13 + $0x3e8] ss:$16 sps:$4 sm:$0xff]  }
 0x709   : > { %v10175_v56 = vsel %vm10119_vm0, %v10159_v10, 0.0  ;;  %v10160_v20 = vmul.f32 %v10156_v26, %v10156_v26  ;;  %v10218_v22 = vmul.f32 %v10210_v54, %v10156_v26  ;;  %v16930_v10 = vld [vmem:[#allocation13 + $0x3cc] ss:$16 sps:$4 sm:$0xff]   ;;  %v16928_v26 = vld [vmem:[#allocation13 + $0x3c8] ss:$16 sps:$4 sm:$0xff]  }
 0x70a   : > { %v10176_v45 = vrot.slane %v10175_v56, 4  ;;  %v16952_v43 = vld [vmem:[#allocation19 + $0x90] ss:$12 sps:$4 sm:$0xff]  }
 0x70b   : > { %v10182_v30 = vsel %vm10119_vm0, %v10160_v20, 0.0  ;;  %v16931_v20 = vld [vmem:[#allocation13 + $0x3a8] ss:$16 sps:$4 sm:$0xff]  }
 0x70c   : > { %v10177_v27 = vadd.f32 %v10176_v45, %v10175_v56  ;;  %v10183_v63 = vrot.slane %v10182_v30, 4  ;;  %v16933_v56 = vld [vmem:[#allocation13 + $0x3ac] ss:$16 sps:$4 sm:$0xff]   ;;  %v16957_v54 = vld [vmem:[#allocation19 + $0x7c] ss:$12 sps:$4 sm:$0xff]  }
 0x70d   : > { %v16936_v45 = vld [vmem:[#allocation13 + $0x38c] ss:$16 sps:$4 sm:$0xff]  }
 0x70e   : > { %v10178_v42 = vrot.slane %v10177_v27, 2  ;;  %v10184_v19 = vadd.f32 %v10183_v63, %v10182_v30  ;;  %v16934_v30 = vld [vmem:[#allocation13 + $0x388] ss:$16 sps:$4 sm:$0xff]  }
 0x70f   : > { %v16937_v63 = vld [vmem:[#allocation13 + $0x368] ss:$16 sps:$4 sm:$0xff]  }
 0x710   : > { %v10179_v13 = vadd.f32 %v10178_v42, %v10177_v27  ;;  %v10185_v29 = vrot.slane %v10184_v19, 2  ;;  %v16939_v27 = vld [vmem:[#allocation13 + $0x36c] ss:$16 sps:$4 sm:$0xff]  }
 0x711   : > { %v16942_v42 = vld [vmem:[#allocation13 + $0x34c] ss:$16 sps:$4 sm:$0xff]  }
 0x712   : > { %v10180_v31 = vrot.slane %v10179_v13, 1  ;;  %v10186_v51 = vadd.f32 %v10185_v29, %v10184_v19  ;;  %v16940_v19 = vld [vmem:[#allocation13 + $0x348] ss:$16 sps:$4 sm:$0xff]  }
 0x713   : > { %v16943_v29 = vld [vmem:[#allocation13 + $0x328] ss:$16 sps:$4 sm:$0xff]  }
 0x714   : > { %v10181_v3 = vadd.f32 %v10180_v31, %v10179_v13  ;;  %v10187_v36 = vrot.slane %v10186_v51, 1  ;;  %v16945_v13 = vld [vmem:[#allocation13 + $0x32c] ss:$16 sps:$4 sm:$0xff]  }
 0x715   : > { %v16948_v31 = vld [vmem:[#allocation13 + $0x30c] ss:$16 sps:$4 sm:$0xff]  }
 0x716   : > { %v10191_v23 = vmul.f32 0.5, %v10181_v3  ;;  %v10188_v34 = vadd.f32 %v10187_v36, %v10186_v51  ;;  %v16946_v51 = vld [vmem:[#allocation13 + $0x308] ss:$16 sps:$4 sm:$0xff]  }
 0x718   : > { %v10221_v35 = vadd.f32 1e-05, %v10191_v23  ;;  %v10192_v38 = vmul.f32 0.5, %v10188_v34  ;;  %v16951_v23 = vld [vmem:[#allocation19 + $0xac] ss:$12 sps:$4 sm:$0xff]  }
 0x719   : > { %12047 = vmatprep.subr.bf16.mxu0 %v16951_v23  ;;  %v17040_v23 = vld [vmem:[#allocation19 + $0x2d0] ss:$12 sps:$4 sm:$0xff]  }
 0x71a   : > { %17082 = vrsqrt.f32 %v10221_v35  ;;  %v10222_v40 = vadd.f32 1e-05, %v10192_v38  ;;  %v16949_v35 = vld [vmem:[#allocation19 + $0xa8] ss:$12 sps:$4 sm:$0xff]  }
 0x71b   : > { %12048 = vmatpush1.bf16.msra.mxu0 %v16949_v35  ;;  %v17043_v35 = vld [vmem:[#allocation19 + $0x2b8] ss:$12 sps:$4 sm:$0xff]  }
 0x71c   : > { %17084 = vrsqrt.f32 %v10222_v40  ;;  %v16954_v40 = vld [vmem:[#allocation19 + $0x94] ss:$12 sps:$4 sm:$0xff]  }
 0x71d   : > { %12049 = vmatprep.subr.bf16.mxu0 %v16954_v40  ;;  %v17046_v40 = vld [vmem:[#allocation19 + $0x2a0] ss:$12 sps:$4 sm:$0xff]  }
 0x71f   : > { %12050 = vmatpush1.bf16.msra.mxu0 %v16952_v43  ;;  %v17051_v43 = vld [vmem:[#allocation19 + $0x28c] ss:$12 sps:$4 sm:$0xff]  }
 0x720   : > { %12051 = vmatprep.subr.bf16.mxu0 %v16957_v54  ;;  %v17049_v54 = vld [vmem:[#allocation19 + $0x288] ss:$12 sps:$4 sm:$0xff]  }
 0x727   : > { %v17083_v41 = vpop.eup %17082 }
 0x728   : > { %v10229_v48 = vmul.f32 %v17083_v41, %v10217_v49  ;;  %v16955_v49 = vld [vmem:[#allocation19 + $0x78] ss:$12 sps:$4 sm:$0xff]   ;;  %v16958_v41 = vld [vmem:[#allocation19 + $0x60] ss:$12 sps:$4 sm:$0xff]  }
 0x729   : > { %v17085_v60 = vpop.eup %17084  ;;  %12052 = vmatpush1.bf16.msra.mxu0 %v16955_v49  ;;  %v17054_v49 = vld [vmem:[#allocation19 + $0x274] ss:$12 sps:$4 sm:$0xff]  }
 0x72a   : > { %v10230_v21 = vmul.f32 %v17085_v60, %v10218_v22  ;;  %v10255_v18 = vadd.f32 %v10244_v55, %v10229_v48  ;;  %v16960_v55 = vld [vmem:[#allocation19 + $0x64] ss:$12 sps:$4 sm:$0xff]   ;;  %v16963_v48 = vld [vmem:[#allocation19 + $0x4c] ss:$12 sps:$4 sm:$0xff]   ;;  %v16961_v22 = vld [vmem:[#allocation19 + $0x48] ss:$12 sps:$4 sm:$0xff]  }
 0x72b   : > { %12053 = vmatprep.subr.bf16.mxu0 %v16960_v55  ;;  %v16964_v60 = vld [vmem:[#allocation19 + $0x30] ss:$12 sps:$4 sm:$0xff]  }
 0x72c   : > { %v10256_v12 = vadd.f32 %v10248_v37, %v10230_v21  ;;  %v10259_v28 = vmax.f32 %v10255_v18, 0.0  ;;  %v16966_v37 = vld [vmem:[#allocation19 + $0x34] ss:$12 sps:$4 sm:$0xff]   ;;  %v16969_v21 = vld [vmem:[#allocation19 + $0x1c] ss:$12 sps:$4 sm:$0xff]  }
 0x72d   : > { %12054 = vmatpush1.bf16.msra.mxu0 %v16958_v41  ;;  %v16967_v18 = vld [vmem:[#allocation19 + $0x18] ss:$12 sps:$4 sm:$0xff]   ;;  %v17052_v55 = vld [vmem:[#allocation19 + $0x270] ss:$12 sps:$4 sm:$0xff]   ;;  %v18355_v41 = vld [vmem:[#allocation14] sm:$0xf] }
 0x72e   : > { %v10260_v62 = vmax.f32 %v10256_v12, 0.0  ;;  %v18345_v14 = vpack.c.bf16 %v10259_v28, %v10259_v28  ;;  %12055 = vmatprep.subr.bf16.mxu0 %v16963_v48  ;;  %v16972_v12 = vld [vmem:[#allocation19 + $0x4] ss:$12 sps:$4 sm:$0xff]   ;;  %v16970_v28 = vld [vmem:[#allocation19] ss:$12 sps:$4 sm:$0xff]  }
 0x72f   : > { %v17057_v48 = vld [vmem:[#allocation19 + $0x25c] ss:$12 sps:$4 sm:$0xff]  }
 0x730   : > { %v10264_v15 = vpack.c.bf16 %v10260_v62, %v10260_v62  ;;  %v16975_v62 = vld [vmem:[#allocation19 + $0x16c] ss:$12 sps:$4 sm:$0xff]  }
 0x731   : > { %v18343_v59 = vpop.f32.mrf.mxu0  ;;  %12056 = vmatpush1.bf16.msra.mxu0 %v16961_v22  ;;  %v17055_v22 = vld [vmem:[#allocation19 + $0x258] ss:$12 sps:$4 sm:$0xff]  }
 0x732   : > { %11128 = vmatprep.mubr.bf16.mxu1 %v10264_v15  ;;  %12057 = vmatprep.subr.bf16.mxu0 %v16966_v37  ;;  %v17060_v37 = vld [vmem:[#allocation19 + $0x244] ss:$12 sps:$4 sm:$0xff]  }
 0x733   : > { %v18347_v7 = vpop.f32.mrf.mxu0  ;;  %11129 = vmatmul.mubr.bf16.vlgmr.msra.gmra.mxu1 %v18345_v14 }
 0x734   : > { %11179 = vmatpush1.bf16.msra.mxu1 %v16901_v6  ;;  %11210 = vmatprep.mubr.bf16.mxu1 %v10264_v15  ;;  %v16973_v15 = vld [vmem:[#allocation19 + $0x168] ss:$12 sps:$4 sm:$0xff]  }
 0x735   : > { %v11093_v2 = vpop.f32.mrf.mxu0  ;;  %11180 = vmatprep.subr.bf16.mxu1 %v16906_v47  ;;  %12058 = vmatpush1.bf16.msra.mxu0 %v16964_v60  ;;  %v16978_v6 = vld [vmem:[#allocation19 + $0x154] ss:$12 sps:$4 sm:$0xff]   ;;  %v16981_v47 = vld [vmem:[#allocation19 + $0x13c] ss:$12 sps:$4 sm:$0xff]   ;;  %v10398_v60 = vrot.slane %v18355_v41, %v18220_v33 }
 0x736   : > { %12059 = vmatprep.subr.bf16.mxu0 %v16969_v21  ;;  %v16984_v2 = vld [vmem:[#allocation19 + $0x124] ss:$12 sps:$4 sm:$0xff]   ;;  %v17058_v21 = vld [vmem:[#allocation19 + $0x240] ss:$12 sps:$4 sm:$0xff]  }
 0x737   : > { %v11094_v9 = vpop.f32.mrf.mxu0 }
 0x738   : > { %11181 = vmatpush1.bf16.msra.mxu1 %v16904_v24  ;;  %v16979_v24 = vld [vmem:[#allocation19 + $0x138] ss:$12 sps:$4 sm:$0xff]  }
 0x739   : > { %11182 = vmatprep.subr.bf16.mxu1 %v16909_v8  ;;  %12060 = vmatpush1.bf16.msra.mxu0 %v16967_v18  ;;  %v16982_v8 = vld [vmem:[#allocation19 + $0x120] ss:$12 sps:$4 sm:$0xff]   ;;  %v10402_v18 = vrot.slane %v18355_v41, %v18224_v25 }
 0x73a   : > { %12061 = vmatprep.subr.bf16.mxu0 %v16972_v12  ;;  %v16987_v9 = vld [vmem:[#allocation19 + $0x10c] ss:$12 sps:$4 sm:$0xff]   ;;  %v11090_v12 = vadd.f32 %v18343_v59, %v10398_v60 }
 0x73c   : > { %11183 = vmatpush1.bf16.msra.mxu1 %v16907_v16  ;;  %v16985_v16 = vld [vmem:[#allocation19 + $0x108] ss:$12 sps:$4 sm:$0xff]  }
 0x73d   : > { %11184 = vmatprep.subr.bf16.mxu1 %v16912_v50  ;;  %12062 = vmatpush1.bf16.msra.mxu0 %v16970_v28  ;;  %v16990_v50 = vld [vmem:[#allocation19 + $0xf4] ss:$12 sps:$4 sm:$0xff]  }
 0x73e   : > { %12063 = vmatprep.subr.bf16.mxu0 %v16975_v62  ;;  %v17062_v62 = vld [vmem:[#allocation19 + $0x2f0] ss:$12 sps:$4 sm:$0xff]  }
 0x740   : > { %11185 = vmatpush1.bf16.msra.mxu1 %v16910_v17  ;;  %v16988_v17 = vld [vmem:[#allocation19 + $0xf0] ss:$12 sps:$4 sm:$0xff]  }
 0x741   : > { %11186 = vmatprep.subr.bf16.mxu1 %v16915_v11  ;;  %12064 = vmatpush2.bf16.msra.mxu0 %v16973_v15  ;;  %v16991_v11 = vld [vmem:[#allocation19 + $0xd8] ss:$12 sps:$4 sm:$0xff]   ;;  %v11092_v15 = vadd.f32 %v18347_v7, %v10402_v18 }
 0x742   : > { %12065 = vmatprep.subr.bf16.mxu0 %v16978_v6 }
 0x744   : > { %11187 = vmatpush1.bf16.msra.mxu1 %v16913_v61  ;;  %v16993_v61 = vld [vmem:[#allocation19 + $0xdc] ss:$12 sps:$4 sm:$0xff]  }
 0x745   : > { %11188 = vmatprep.subr.bf16.mxu1 %v16918_v39  ;;  %v16996_v39 = vld [vmem:[#allocation19 + $0xc4] ss:$12 sps:$4 sm:$0xff]  }
 0x748   : > { %11189 = vmatpush1.bf16.msra.mxu1 %v16916_v4  ;;  %v16994_v4 = vld [vmem:[#allocation19 + $0xc0] ss:$12 sps:$4 sm:$0xff]  }
 0x749   : > { %11190 = vmatprep.subr.bf16.mxu1 %v16921_v57  ;;  %v16999_v57 = vld [vmem:[#allocation19 + $0x22c] ss:$12 sps:$4 sm:$0xff]  }
 0x74c   : > { %11191 = vmatpush1.bf16.msra.mxu1 %v16919_v52  ;;  %v16997_v52 = vld [vmem:[#allocation19 + $0x228] ss:$12 sps:$4 sm:$0xff]  }
 0x74d   : > { %11192 = vmatprep.subr.bf16.mxu1 %v16924_v46  ;;  %v17000_v46 = vld [vmem:[#allocation19 + $0x170] ss:$12 sps:$4 sm:$0xff]  }
 0x750   : > { %11193 = vmatpush1.bf16.msra.mxu1 %v16922_v5  ;;  %v17004_v5 = vld [vmem:[#allocation19 + $0x214] ss:$12 sps:$4 sm:$0xff]  }
 0x751   : > { %11194 = vmatprep.subr.bf16.mxu1 %v16927_v58  ;;  %v17002_v58 = vld [vmem:[#allocation19 + $0x210] ss:$12 sps:$4 sm:$0xff]  }
 0x754   : > { %11195 = vmatpush2.bf16.msra.mxu1 %v16925_v32  ;;  %v17009_v32 = vld [vmem:[#allocation19 + $0x1fc] ss:$12 sps:$4 sm:$0xff]  }
 0x755   : > { %11196 = vmatprep.subr.bf16.mxu1 %v16930_v10  ;;  %v17007_v10 = vld [vmem:[#allocation19 + $0x1f8] ss:$12 sps:$4 sm:$0xff]  }
 0x758   : > { %11197 = vmatpush2.bf16.msra.mxu1 %v16928_v26  ;;  %v17014_v26 = vld [vmem:[#allocation19 + $0x1e4] ss:$12 sps:$4 sm:$0xff]  }
 0x759   : > { %11198 = vmatprep.subr.bf16.mxu1 %v16933_v56  ;;  %v17012_v56 = vld [vmem:[#allocation19 + $0x1e0] ss:$12 sps:$4 sm:$0xff]  }
 0x75c   : > { %11199 = vmatpush2.bf16.msra.mxu1 %v16931_v20  ;;  %v17019_v20 = vld [vmem:[#allocation19 + $0x1cc] ss:$12 sps:$4 sm:$0xff]  }
 0x75d   : > { %11200 = vmatprep.subr.bf16.mxu1 %v16936_v45  ;;  %v17017_v45 = vld [vmem:[#allocation19 + $0x1c8] ss:$12 sps:$4 sm:$0xff]  }
 0x760   : > { %11201 = vmatpush2.bf16.msra.mxu1 %v16934_v30  ;;  %v17024_v30 = vld [vmem:[#allocation19 + $0x1b4] ss:$12 sps:$4 sm:$0xff]  }
 0x761   : > { %11202 = vmatprep.subr.bf16.mxu1 %v16939_v27  ;;  %v17022_v27 = vld [vmem:[#allocation19 + $0x1b0] ss:$12 sps:$4 sm:$0xff]  }
 0x764   : > { %11203 = vmatpush2.bf16.msra.mxu1 %v16937_v63  ;;  %v17029_v63 = vld [vmem:[#allocation19 + $0x19c] ss:$12 sps:$4 sm:$0xff]  }
 0x765   : > { %11204 = vmatprep.subr.bf16.mxu1 %v16942_v42  ;;  %v17027_v42 = vld [vmem:[#allocation19 + $0x198] ss:$12 sps:$4 sm:$0xff]  }
 0x768   : > { %11205 = vmatpush2.bf16.msra.mxu1 %v16940_v19  ;;  %v17034_v19 = vld [vmem:[#allocation19 + $0x184] ss:$12 sps:$4 sm:$0xff]  }
 0x769   : > { %11206 = vmatprep.subr.bf16.mxu1 %v16945_v13  ;;  %v17032_v13 = vld [vmem:[#allocation19 + $0x180] ss:$12 sps:$4 sm:$0xff]  }
 0x76c   : > { %11207 = vmatpush2.bf16.msra.mxu1 %v16943_v29  ;;  %v17039_v29 = vld [vmem:[#allocation19 + $0x2ec] ss:$12 sps:$4 sm:$0xff]  }
 0x76d   : > { %11208 = vmatprep.subr.bf16.mxu1 %v16948_v31  ;;  %v17037_v31 = vld [vmem:[#allocation19 + $0x2e8] ss:$12 sps:$4 sm:$0xff]  }
 0x770   : > { %11209 = vmatpush2.bf16.msra.mxu1 %v16946_v51  ;;  %v17042_v51 = vld [vmem:[#allocation19 + $0x2d4] ss:$12 sps:$4 sm:$0xff]  }
 0x771   : > { %v18350_v3 = vpop.f32.mrf.mxu0  ;;  %12088 = vmatprep.subr.bf16.mxu1 %v16999_v57 }
 0x773   : > { %11211 = vmatmul.mubr.bf16.vlgmr.msra.gmra.mxu1 %v18345_v14  ;;  %v18353_v36 = vpop.f32.mrf.mxu0  ;;  %v16976_v14 = vld [vmem:[#allocation19 + $0x150] ss:$12 sps:$4 sm:$0xff]  }
 0x774   : > { %12066 = vmatpush2.bf16.msra.mxu0 %v16976_v14  ;;  %12089 = vmatpush1.bf16.msra.mxu1 %v16997_v52 }
 0x775   : > { %v11175_v34 = vpop.f32.mrf.mxu0  ;;  %12067 = vmatprep.subr.bf16.mxu0 %v16981_v47  ;;  %12090 = vmatprep.subr.bf16.mxu1 %v17004_v5 }
 0x776   : > { %v17045_v34 = vld [vmem:[#allocation19 + $0x2bc] ss:$12 sps:$4 sm:$0xff]  }
 0x777   : > { %v11176_v38 = vpop.f32.mrf.mxu0 }
 0x778   : > { %12068 = vmatpush2.bf16.msra.mxu0 %v16979_v24  ;;  %12091 = vmatpush1.bf16.msra.mxu1 %v17002_v58  ;;  %v17048_v38 = vld [vmem:[#allocation19 + $0x2a4] ss:$12 sps:$4 sm:$0xff]  }
 0x779   : > { %12069 = vmatprep.subr.bf16.mxu0 %v16984_v2  ;;  %12092 = vmatprep.subr.bf16.mxu1 %v17009_v32 }
 0x77c   : > { %12070 = vmatpush2.bf16.msra.mxu0 %v16982_v8  ;;  %12093 = vmatpush1.bf16.msra.mxu1 %v17007_v10 }
 0x77d   : > { %12071 = vmatprep.subr.bf16.mxu0 %v16987_v9  ;;  %12094 = vmatprep.subr.bf16.mxu1 %v17014_v26 }
 0x780   : > { %12072 = vmatpush2.bf16.msra.mxu0 %v16985_v16  ;;  %12095 = vmatpush1.bf16.msra.mxu1 %v17012_v56 }
 0x781   : > { %12073 = vmatprep.subr.bf16.mxu0 %v16990_v50  ;;  %12096 = vmatprep.subr.bf16.mxu1 %v17019_v20 }
 0x784   : > { %12074 = vmatpush2.bf16.msra.mxu0 %v16988_v17  ;;  %12097 = vmatpush1.bf16.msra.mxu1 %v17017_v45 }
 0x785   : > { %12075 = vmatprep.subr.bf16.mxu0 %v16993_v61  ;;  %12098 = vmatprep.subr.bf16.mxu1 %v17024_v30 }
 0x788   : > { %12076 = vmatpush2.bf16.msra.mxu0 %v16991_v11  ;;  %12099 = vmatpush1.bf16.msra.mxu1 %v17022_v27 }
 0x789   : > { %12077 = vmatprep.subr.bf16.mxu0 %v16996_v39  ;;  %12100 = vmatprep.subr.bf16.mxu1 %v17029_v63 }
 0x78c   : > { %12078 = vmatpush2.bf16.msra.mxu0 %v16994_v4  ;;  %12101 = vmatpush1.bf16.msra.mxu1 %v17027_v42 }
 0x78d   : > { %15749 = vmatprep.subr.bf16.mxu0 %v17000_v46  ;;  %12102 = vmatprep.subr.bf16.mxu1 %v17034_v19 }
 0x790   : > { %12103 = vmatpush1.bf16.msra.mxu1 %v17032_v13 }
 0x791   : > { %12104 = vmatprep.subr.bf16.mxu1 %v17039_v29 }
 0x794   : > { %12105 = vmatpush2.bf16.msra.mxu1 %v17037_v31 }
 0x795   : > { %12106 = vmatprep.subr.bf16.mxu1 %v17042_v51 }
 0x798   : > { %12107 = vmatpush2.bf16.msra.mxu1 %v17040_v23 }
 0x799   : > { %12108 = vmatprep.subr.bf16.mxu1 %v17045_v34 }
 0x79c   : > { %12109 = vmatpush2.bf16.msra.mxu1 %v17043_v35 }
 0x79d   : > { %12110 = vmatprep.subr.bf16.mxu1 %v17048_v38 }
 0x7a0   : > { %12111 = vmatpush2.bf16.msra.mxu1 %v17046_v40 }
 0x7a1   : > { %12112 = vmatprep.subr.bf16.mxu1 %v17051_v43 }
 0x7a4   : > { %12113 = vmatpush2.bf16.msra.mxu1 %v17049_v54 }
 0x7a5   : > { %12114 = vmatprep.subr.bf16.mxu1 %v17054_v49  ;;  %v18367_v49 = vld [vmem:[#allocation16] sm:$0xf] }
 0x7a8   : > { %12115 = vmatpush2.bf16.msra.mxu1 %v17052_v55  ;;  %v11296_v55 = vrot.slane %v18367_v49, %v18220_v33 }
 0x7a9   : > { %12116 = vmatprep.subr.bf16.mxu1 %v17057_v48  ;;  %v18371_v48 = vld [vmem:[#allocation17] sm:$0xf] }
 0x7ac   : > { %12117 = vmatpush2.bf16.msra.mxu1 %v17055_v22  ;;  %v11300_v22 = vrot.slane %v18367_v49, %v18224_v25 }
 0x7ad   : > { %12118 = vmatprep.subr.bf16.mxu1 %v17060_v37  ;;  %v18376_v37 = vld [vmem:[%s17978_s23] sm:$0xff] }
 0x7b0   : > { %12119 = vmatpush2.bf16.msra.mxu1 %v17058_v21  ;;  %v11334_v21 = vrot.slane %v18371_v48, %v18220_v33 }
 0x7b1   : > { %15771 = vmatprep.subr.bf16.mxu1 %v17062_v62  ;;  %v11338_v62 = vrot.slane %v18371_v48, %v18224_v25 }
 0x7f3   : > { %v11130_v28 = vpop.f32.mrf.mxu1 }
 0x7f4   : > { %v11131_v6 = vadd.f32 %v11130_v28, %v11090_v12 }
 0x7f5   : > { %v11132_v14 = vpop.f32.mrf.mxu1 }
 0x7f6   : > { %v11219_v47 = vsel %vm10119_vm0, %v11131_v6, 0.0  ;;  %v11133_v24 = vadd.f32 %v11132_v14, %v11092_v15  ;;  %v11368_v15 = vrot.slane %v18376_v37, %v17987_v53 }
 0x7f7   : > { %v11220_v2 = vrot.slane %v11219_v47, 4  ;;  %v11134_v8 = vpop.f32.mrf.mxu1 }
 0x7f8   : > { %v11226_v9 = vsel %vm10119_vm0, %v11133_v24, 0.0  ;;  %v11376_v8 = vcombine.high %v11368_v15, %v11368_v15 }
 0x7f9   : > { %v11221_v16 = vadd.f32 %v11220_v2, %v11219_v47  ;;  %v11227_v50 = vrot.slane %v11226_v9, 4  ;;  %v11135_v17 = vpop.f32.mrf.mxu1 }
 0x7fa   : > { %v10410_v17 = vrot.slane %v18355_v41, %v18299_v1 }
 0x7fb   : > { %v11222_v11 = vrot.slane %v11221_v16, 2  ;;  %v11228_v59 = vadd.f32 %v11227_v50, %v11226_v9  ;;  %v10406_v9 = vrot.slane %v18355_v41, %v18294_v0  ;;  %v17006_v41 = vld [vmem:[#allocation19 + $0x98] ss:$12 sps:$4 sm:$0xff]  }
 0x7fd   : > { %v11223_v61 = vadd.f32 %v11222_v11, %v11221_v16  ;;  %v11229_v39 = vrot.slane %v11228_v59, 2 }
 0x7ff   : > { %v11224_v4 = vrot.slane %v11223_v61, 1  ;;  %v11230_v57 = vadd.f32 %v11229_v39, %v11228_v59  ;;  %v11172_v59 = vadd.f32 %v18350_v3, %v10406_v9  ;;  %v17001_v39 = vld [vmem:[#allocation19 + $0xb0] ss:$12 sps:$4 sm:$0xff]  }
 0x801   : > { %v11225_v7 = vadd.f32 %v11224_v4, %v11223_v61  ;;  %v11231_v52 = vrot.slane %v11230_v57, 1 }
 0x803   : > { %v11247_v46 = vmul.f32 0.5, %v11225_v7  ;;  %v11232_v5 = vadd.f32 %v11231_v52, %v11230_v57  ;;  %v17005_v7 = vld [vmem:[#allocation19 + $0x158] ss:$12 sps:$4 sm:$0xff]   ;;  %v11174_v52 = vadd.f32 %v18353_v36, %v10410_v17 }
 0x805   : > { %v11251_v58 = vsub.f32 %v11131_v6, %v11247_v46  ;;  %v11248_v32 = vmul.f32 0.5, %v11232_v5 }
 0x807   : > { %v11255_v10 = vmul.f32 %v11251_v58, %v11251_v58  ;;  %v11252_v26 = vsub.f32 %v11133_v24, %v11248_v32  ;;  %v11313_v60 = vmul.f32 %v11296_v55, %v11251_v58 }
 0x809   : > { %v11259_v56 = vsel %vm10119_vm0, %v11255_v10, 0.0  ;;  %v11256_v20 = vmul.f32 %v11252_v26, %v11252_v26  ;;  %v11314_v28 = vmul.f32 %v11300_v22, %v11252_v26  ;;  %v17010_v26 = vld [vmem:[#allocation19 + $0x140] ss:$12 sps:$4 sm:$0xff]  }
 0x80a   : > { %v11260_v45 = vrot.slane %v11259_v56, 4 }
 0x80b   : > { %v11266_v30 = vsel %vm10119_vm0, %v11256_v20, 0.0 }
 0x80c   : > { %v11261_v27 = vadd.f32 %v11260_v45, %v11259_v56  ;;  %v11267_v63 = vrot.slane %v11266_v30, 4 }
 0x80e   : > { %v11262_v42 = vrot.slane %v11261_v27, 2  ;;  %v11268_v19 = vadd.f32 %v11267_v63, %v11266_v30  ;;  %v17011_v30 = vld [vmem:[#allocation19 + $0x80] ss:$12 sps:$4 sm:$0xff]  }
 0x810   : > { %v11263_v13 = vadd.f32 %v11262_v42, %v11261_v27  ;;  %v11269_v29 = vrot.slane %v11268_v19, 2  ;;  %v17015_v42 = vld [vmem:[#allocation19 + $0x128] ss:$12 sps:$4 sm:$0xff]  }
 0x812   : > { %v11264_v31 = vrot.slane %v11263_v13, 1  ;;  %v11270_v51 = vadd.f32 %v11269_v29, %v11268_v19  ;;  %v17016_v29 = vld [vmem:[#allocation19 + $0x68] ss:$12 sps:$4 sm:$0xff]  }
 0x814   : > { %v11265_v23 = vadd.f32 %v11264_v31, %v11263_v13  ;;  %v11271_v34 = vrot.slane %v11270_v51, 1 }
 0x816   : > { %v11287_v35 = vmul.f32 0.5, %v11265_v23  ;;  %v11272_v38 = vadd.f32 %v11271_v34, %v11270_v51  ;;  %v17020_v23 = vld [vmem:[#allocation19 + $0x110] ss:$12 sps:$4 sm:$0xff]  }
 0x818   : > { %v11317_v40 = vadd.f32 1e-05, %v11287_v35  ;;  %v11288_v43 = vmul.f32 0.5, %v11272_v38  ;;  %v17021_v38 = vld [vmem:[#allocation19 + $0x50] ss:$12 sps:$4 sm:$0xff]  }
 0x81a   : > { %17086 = vrsqrt.f32 %v11317_v40  ;;  %v11318_v54 = vadd.f32 1e-05, %v11288_v43 }
 0x81c   : > { %17088 = vrsqrt.f32 %v11318_v54  ;;  %v17025_v54 = vld [vmem:[#allocation19 + $0xf8] ss:$12 sps:$4 sm:$0xff]  }
 0x827   : > { %v17087_v18 = vpop.eup %17086 }
 0x828   : > { %v11325_v12 = vmul.f32 %v17087_v18, %v11313_v60  ;;  %v17026_v60 = vld [vmem:[#allocation19 + $0x38] ss:$12 sps:$4 sm:$0xff]  }
 0x829   : > { %v17089_v6 = vpop.eup %17088 }
 0x82a   : > { %v11351_v14 = vadd.f32 %v11334_v21, %v11325_v12  ;;  %v11326_v47 = vmul.f32 %v17089_v6, %v11314_v28  ;;  %v17030_v12 = vld [vmem:[#allocation19 + $0xe0] ss:$12 sps:$4 sm:$0xff]  }
 0x82b   : > { %v17031_v6 = vld [vmem:[#allocation19 + $0x20] ss:$12 sps:$4 sm:$0xff]  }
 0x82c   : > { %v11355_v24 = vmax.f32 %v11351_v14, 0.0  ;;  %v11352_v2 = vadd.f32 %v11338_v62, %v11326_v47  ;;  %v17035_v47 = vld [vmem:[#allocation19 + $0xc8] ss:$12 sps:$4 sm:$0xff]  }
 0x82e   : > { %v11356_v16 = vmax.f32 %v11352_v2, 0.0  ;;  %v11382_v50 = vmul.f32 %v11368_v15, %v11355_v24 }
 0x830   : > { %v11383_v11 = vmul.f32 %v11376_v8, %v11356_v16  ;;  %v18389_v57 = vpack.c.bf16 %v11382_v50, %v11382_v50  ;;  %v17036_v16 = vld [vmem:[#allocation19 + $0x8] ss:$12 sps:$4 sm:$0xff]  }
 0x832   : > { %v11387_v61 = vpack.c.bf16 %v11383_v11, %v11383_v11 }
 0x833   : > { %v11212_v4 = vpop.f32.mrf.mxu1 }
 0x834   : > { %v11213_v46 = vadd.f32 %v11212_v4, %v11172_v59  ;;  %12079 = vmatprep.mubr.bf16.mxu0 %v11387_v61 }
 0x835   : > { %v11214_v5 = vpop.f32.mrf.mxu1  ;;  %12080 = vmatmul.mubr.bf16.vlgmr.msra.gmra.mxu0 %v18389_v57 }
 0x836   : > { %v11233_v58 = vsel %vm10119_vm0, %v11213_v46, 0.0  ;;  %v11215_v32 = vadd.f32 %v11214_v5, %v11174_v52  ;;  %15750 = vmatpush3.bf16.msra.mxu0 %v17001_v39  ;;  %12161 = vmatprep.mubr.bf16.mxu0 %v11387_v61 }
 0x837   : > { %v11234_v3 = vrot.slane %v11233_v58, 4  ;;  %v11216_v10 = vpop.f32.mrf.mxu1  ;;  %15751 = vmatprep.subr.bf16.mxu0 %v17005_v7 }
 0x838   : > { %v11240_v56 = vsel %vm10119_vm0, %v11215_v32, 0.0 }
 0x839   : > { %v11235_v20 = vadd.f32 %v11234_v3, %v11233_v58  ;;  %v11241_v45 = vrot.slane %v11240_v56, 4  ;;  %v11217_v36 = vpop.f32.mrf.mxu1  ;;  %v11304_v58 = vrot.slane %v18367_v49, %v18294_v0 }
 0x83a   : > { %15752 = vmatpush3.bf16.msra.mxu0 %v17006_v41  ;;  %v11361_v41 = vcombine.high %v18376_v37, %v18376_v37 }
 0x83b   : > { %v11236_v27 = vrot.slane %v11235_v20, 2  ;;  %v11242_v63 = vadd.f32 %v11241_v45, %v11240_v56  ;;  %15753 = vmatprep.subr.bf16.mxu0 %v17010_v26 }
 0x83c   : > { %v11375_v45 = vrot.slane %v11361_v41, %v17987_v53  ;;  %v17077_v41 = vld [vmem:[#allocation19 + $0x188] ss:$12 sps:$4 sm:$0xff]  }
 0x83d   : > { %v11237_v19 = vadd.f32 %v11236_v27, %v11235_v20  ;;  %v11243_v13 = vrot.slane %v11242_v63, 2  ;;  %v11346_v20 = vrot.slane %v18371_v48, %v18299_v1 }
 0x83e   : > { %15754 = vmatpush3.bf16.msra.mxu0 %v17011_v30 }
 0x83f   : > { %v11238_v31 = vrot.slane %v11237_v19, 1  ;;  %v11244_v51 = vadd.f32 %v11243_v13, %v11242_v63  ;;  %15755 = vmatprep.subr.bf16.mxu0 %v17015_v42  ;;  %v11377_v42 = vcombine.high %v11375_v45, %v11375_v45 }
 0x841   : > { %v11239_v34 = vadd.f32 %v11238_v31, %v11237_v19  ;;  %v11245_v35 = vrot.slane %v11244_v51, 1  ;;  %v17063_v31 = vld [vmem:[#allocation19 + $0x230] ss:$12 sps:$4 sm:$0xff]  }
 0x842   : > { %15756 = vmatpush3.bf16.msra.mxu0 %v17016_v29 }
 0x843   : > { %v11249_v40 = vmul.f32 0.5, %v11239_v34  ;;  %v11246_v43 = vadd.f32 %v11245_v35, %v11244_v51  ;;  %15757 = vmatprep.subr.bf16.mxu0 %v17020_v23  ;;  %v17064_v23 = vld [vmem:[#allocation19 + $0x2d8] ss:$12 sps:$4 sm:$0xff]   ;;  %v17066_v34 = vld [vmem:[#allocation19 + $0x2c0] ss:$12 sps:$4 sm:$0xff]  }
 0x844   : > { %v17067_v35 = vld [vmem:[#allocation19 + $0x200] ss:$12 sps:$4 sm:$0xff]  }
 0x845   : > { %v11253_v55 = vsub.f32 %v11213_v46, %v11249_v40  ;;  %v11250_v22 = vmul.f32 0.5, %v11246_v43  ;;  %v12272_v40 = vld [vmem:[#allocation22 + $0x1e0] sm:$0xff] }
 0x846   : > { %15758 = vmatpush3.bf16.msra.mxu0 %v17021_v38  ;;  %v12268_v38 = vld [vmem:[#allocation22 + $0x1c0] sm:$0xff] }
 0x847   : > { %v11257_v21 = vmul.f32 %v11253_v55, %v11253_v55  ;;  %v11254_v18 = vsub.f32 %v11215_v32, %v11250_v22  ;;  %15759 = vmatprep.subr.bf16.mxu0 %v17025_v54  ;;  %v11308_v32 = vrot.slane %v18367_v49, %v18299_v1  ;;  %v11315_v3 = vmul.f32 %v11304_v58, %v11253_v55  ;;  %v17068_v43 = vld [vmem:[#allocation19 + $0x2a8] ss:$12 sps:$4 sm:$0xff]  }
 0x848   : > { %v15606_v54 = vcombine.low %v12268_v38, %v12272_v40  ;;  %v15607_v55 = vcombine.high %v12268_v38, %v12272_v40  ;;  %v12260_v22 = vld [vmem:[#allocation22 + $0x180] sm:$0xff] }
 0x849   : > { %v11273_v28 = vsel %vm10119_vm0, %v11257_v21, 0.0  ;;  %v11258_v62 = vmul.f32 %v11254_v18, %v11254_v18  ;;  %v11316_v56 = vmul.f32 %v11308_v32, %v11254_v18  ;;  %v12252_v18 = vld [vmem:[#allocation22 + $0x140] sm:$0xff] }
 0x84a   : > { %v11274_v15 = vrot.slane %v11273_v28, 4  ;;  %15760 = vmatpush3.bf16.msra.mxu0 %v17026_v60  ;;  %v12264_v60 = vld [vmem:[#allocation22 + $0x1a0] sm:$0xff] }
 0x84b   : > { %v11280_v14 = vsel %vm10119_vm0, %v11258_v62, 0.0  ;;  %15761 = vmatprep.subr.bf16.mxu0 %v17030_v12  ;;  %v15599_v21 = vcombine.high %v12260_v22, %v12264_v60  ;;  %v12256_v12 = vld [vmem:[#allocation22 + $0x160] sm:$0xff]  ;;  %v15598_v62 = vcombine.low %v12260_v22, %v12264_v60 }
 0x84c   : > { %v11275_v24 = vadd.f32 %v11274_v15, %v11273_v28  ;;  %v11281_v2 = vrot.slane %v11280_v14, 4  ;;  %v17069_v28 = vld [vmem:[#allocation19 + $0x1e8] ss:$12 sps:$4 sm:$0xff]   ;;  %v17070_v15 = vld [vmem:[#allocation19 + $0x290] ss:$12 sps:$4 sm:$0xff]  }
 0x84d   : > { %v12220_v58 = vld [vmem:[#allocation22 + $0x40] sm:$0xff] }
 0x84e   : > { %v11276_v8 = vrot.slane %v11275_v24, 2  ;;  %v11282_v9 = vadd.f32 %v11281_v2, %v11280_v14  ;;  %15762 = vmatpush3.bf16.msra.mxu0 %v17031_v6  ;;  %v15591_v6 = vcombine.high %v12252_v18, %v12256_v12  ;;  %v12244_v14 = vld [vmem:[#allocation22 + $0x100] sm:$0xff]  ;;  %v15590_v2 = vcombine.low %v12252_v18, %v12256_v12 }
 0x84f   : > { %15763 = vmatprep.subr.bf16.mxu0 %v17035_v47  ;;  %v12248_v47 = vld [vmem:[#allocation22 + $0x120] sm:$0xff] }
 0x850   : > { %v11277_v50 = vadd.f32 %v11276_v8, %v11275_v24  ;;  %v11283_v17 = vrot.slane %v11282_v9, 2  ;;  %v17071_v24 = vld [vmem:[#allocation19 + $0x1d0] ss:$12 sps:$4 sm:$0xff]   ;;  %v17072_v8 = vld [vmem:[#allocation19 + $0x278] ss:$12 sps:$4 sm:$0xff]  }
 0x851   : > { %v12224_v32 = vld [vmem:[#allocation22 + $0x60] sm:$0xff] }
 0x852   : > { %v11278_v11 = vrot.slane %v11277_v50, 1  ;;  %v11284_v59 = vadd.f32 %v11283_v17, %v11282_v9  ;;  %15764 = vmatpush3.bf16.msra.mxu0 %v17036_v16  ;;  %v15583_v9 = vcombine.high %v12244_v14, %v12248_v47  ;;  %v12236_v16 = vld [vmem:[#allocation22 + $0xc0] sm:$0xff] }
 0x853   : > { %13406 = vmatprep.subr.bf16.mxu0 %v15607_v55  ;;  %v17073_v17 = vld [vmem:[#allocation19 + $0x1b8] ss:$12 sps:$4 sm:$0xff]  }
 0x854   : > { %v11279_v61 = vadd.f32 %v11278_v11, %v11277_v50  ;;  %v11285_v39 = vrot.slane %v11284_v59, 1  ;;  %v12240_v50 = vld [vmem:[#allocation22 + $0xe0] sm:$0xff]  ;;  %v15582_v11 = vcombine.low %v12244_v14, %v12248_v47 }
 0x855   : > { %12162 = vmatmul.mubr.bf16.vlgmr.msra.gmra.mxu0 %v18389_v57  ;;  %v11342_v57 = vrot.slane %v18371_v48, %v18294_v0  ;;  %v17065_v48 = vld [vmem:[#allocation19 + $0x218] ss:$12 sps:$4 sm:$0xff]  }
 0x856   : > { %v11289_v4 = vmul.f32 0.5, %v11279_v61  ;;  %v11286_v7 = vadd.f32 %v11285_v39, %v11284_v59  ;;  %13407 = vmatpush1.bf16.msra.mxu0 %v15606_v54  ;;  %v17074_v59 = vld [vmem:[#allocation19 + $0x260] ss:$12 sps:$4 sm:$0xff]   ;;  %v15575_v61 = vcombine.high %v12236_v16, %v12240_v50  ;;  %v12228_v39 = vld [vmem:[#allocation22 + $0x80] sm:$0xff] }
 0x857   : > { %13408 = vmatprep.subr.bf16.mxu0 %v15599_v21  ;;  %v12304_v38 = vld [vmem:[#allocation22 + $0x2e0] sm:$0xff] }
 0x858   : > { %v11319_v52 = vadd.f32 1e-05, %v11289_v4  ;;  %v11290_v46 = vmul.f32 0.5, %v11286_v7  ;;  %v12232_v4 = vld [vmem:[#allocation22 + $0xa0] sm:$0xff]  ;;  %v17075_v7 = vld [vmem:[#allocation19 + $0x1a0] ss:$12 sps:$4 sm:$0xff]  }
 0x859   : > { %v12292_v54 = vld [vmem:[#allocation22 + $0x280] sm:$0xff] }
 0x85a   : > { %17090 = vrsqrt.f32 %v11319_v52  ;;  %v11320_v5 = vadd.f32 1e-05, %v11290_v46  ;;  %13409 = vmatpush1.bf16.msra.mxu0 %v15598_v62  ;;  %v15574_v52 = vcombine.low %v12236_v16, %v12240_v50  ;;  %v17076_v46 = vld [vmem:[#allocation19 + $0x248] ss:$12 sps:$4 sm:$0xff]   ;;  %v18415_v16 = vld [vmem:[#allocation22 + $0x5e8] sm:$0xff] }
 0x85b   : > { %13410 = vmatprep.subr.bf16.mxu0 %v15591_v6  ;;  %v12296_v55 = vld [vmem:[#allocation22 + $0x2a0] sm:$0xff] }
 0x85c   : > { %17092 = vrsqrt.f32 %v11320_v5  ;;  %v15567_v5 = vcombine.high %v12228_v39, %v12232_v4  ;;  %v15631_v60 = vcombine.high %v12292_v54, %v12296_v55  ;;  %v12284_v21 = vld [vmem:[#allocation22 + $0x240] sm:$0xff]  ;;  %v15630_v12 = vcombine.low %v12292_v54, %v12296_v55 }
 0x85d   : > { %v12288_v18 = vld [vmem:[#allocation22 + $0x260] sm:$0xff] }
 0x85e   : > { %13411 = vmatpush1.bf16.msra.mxu0 %v15590_v2  ;;  %v15622_v62 = vcombine.low %v12284_v21, %v12288_v18  ;;  %v12280_v6 = vld [vmem:[#allocation22 + $0x220] sm:$0xff] }
 0x85f   : > { %13412 = vmatprep.subr.bf16.mxu0 %v15583_v9  ;;  %v12400_v2 = vld [vmem:[#allocation22 + $0x5e0] sm:$0xff] }
 0x862   : > { %13413 = vmatpush1.bf16.msra.mxu0 %v15582_v11 }
 0x863   : > { %13414 = vmatprep.subr.bf16.mxu0 %v15575_v61  ;;  %v12392_v61 = vld [vmem:[#allocation22 + $0x5a0] sm:$0xff] }
 0x866   : > { %13415 = vmatpush1.bf16.msra.mxu0 %v15574_v52  ;;  %v12384_v52 = vld [vmem:[#allocation22 + $0x560] sm:$0xff] }
 0x867   : > { %v17091_v10 = vpop.eup %17090  ;;  %13416 = vmatprep.subr.bf16.mxu0 %v15567_v5 }
 0x868   : > { %v11327_v26 = vmul.f32 %v17091_v10, %v11315_v3  ;;  %v15566_v3 = vcombine.low %v12228_v39, %v12232_v4  ;;  %v15558_v10 = vcombine.low %v12220_v58, %v12224_v32 }
 0x869   : > { %v17093_v36 = vpop.eup %17092 }
 0x86a   : > { %v11353_v30 = vadd.f32 %v11342_v57, %v11327_v26  ;;  %v11328_v27 = vmul.f32 %v17093_v36, %v11316_v56  ;;  %v15559_v57 = vcombine.high %v12220_v58, %v12224_v32  ;;  %13417 = vmatpush1.bf16.msra.mxu0 %v15566_v3  ;;  %v12212_v26 = vld [vmem:[#allocation22] sm:$0xff] }
 0x86b   : > { %v12216_v56 = vld [vmem:[#allocation22 + $0x20] sm:$0xff] }
 0x86c   : > { %v11357_v63 = vmax.f32 %v11353_v30, 0.0  ;;  %v11354_v49 = vadd.f32 %v11346_v20, %v11328_v27  ;;  %13418 = vmatprep.subr.bf16.mxu0 %v15559_v57  ;;  %v15551_v20 = vcombine.high %v12212_v26, %v12216_v56  ;;  %v12332_v36 = vld [vmem:[#allocation22 + $0x3c0] sm:$0xff] }
 0x86d   : > { %v12336_v30 = vld [vmem:[#allocation22 + $0x3e0] sm:$0xff] }
 0x86e   : > { %v11358_v19 = vmax.f32 %v11354_v49, 0.0  ;;  %v11384_v37 = vmul.f32 %v11375_v45, %v11357_v63  ;;  %13419 = vmatpush1.bf16.msra.mxu0 %v15558_v10  ;;  %v15550_v45 = vcombine.low %v12212_v26, %v12216_v56  ;;  %v15670_v27 = vcombine.low %v12332_v36, %v12336_v30  ;;  %v12324_v49 = vld [vmem:[#allocation22 + $0x380] sm:$0xff] }
 0x86f   : > { %13420 = vmatprep.subr.bf16.mxu0 %v15551_v20  ;;  %v15671_v63 = vcombine.high %v12332_v36, %v12336_v30  ;;  %v12372_v58 = vld [vmem:[#allocation22 + $0x500] sm:$0xff] }
 0x870   : > { %v11385_v13 = vmul.f32 %v11377_v42, %v11358_v19  ;;  %v18409_v51 = vpack.c.bf16 %v11384_v37, %v11384_v37  ;;  %v12328_v42 = vld [vmem:[#allocation22 + $0x3a0] sm:$0xff] }
 0x871   : > { %v15663_v19 = vcombine.high %v12324_v49, %v12328_v42  ;;  %v12316_v37 = vld [vmem:[#allocation22 + $0x340] sm:$0xff] }
 0x872   : > { %v11389_v29 = vpack.c.bf16 %v11385_v13, %v11385_v13  ;;  %13421 = vmatpush1.bf16.msra.mxu0 %v15550_v45  ;;  %v12320_v13 = vld [vmem:[#allocation22 + $0x360] sm:$0xff] }
 0x873   : > { %13422 = vmatprep.subr.bf16.mxu0 %v15671_v63  ;;  %v12376_v32 = vld [vmem:[#allocation22 + $0x520] sm:$0xff] }
 0x874   : > { %12120 = vmatprep.mubr.bf16.mxu1 %v11389_v29  ;;  %v15711_v3 = vcombine.high %v12372_v58, %v12376_v32  ;;  %v12364_v57 = vld [vmem:[#allocation22 + $0x4c0] sm:$0xff] }
 0x875   : > { %12121 = vmatmul.mubr.bf16.vlgmr.msra.gmra.mxu1 %v18409_v51  ;;  %v12368_v10 = vld [vmem:[#allocation22 + $0x4e0] sm:$0xff] }
 0x876   : > { %15772 = vmatpush3.bf16.msra.mxu1 %v17063_v31  ;;  %12201 = vmatprep.mubr.bf16.mxu1 %v11389_v29  ;;  %v15662_v29 = vcombine.low %v12324_v49, %v12328_v42  ;;  %v15655_v31 = vcombine.high %v12316_v37, %v12320_v13  ;;  %v15702_v26 = vcombine.low %v12364_v57, %v12368_v10  ;;  %v12356_v20 = vld [vmem:[#allocation22 + $0x480] sm:$0xff] }
 0x877   : > { %15773 = vmatprep.subr.bf16.mxu1 %v17064_v23  ;;  %13423 = vmatpush2.bf16.msra.mxu0 %v15670_v27  ;;  %v12312_v23 = vld [vmem:[#allocation22 + $0x320] sm:$0xff]  ;;  %v15703_v56 = vcombine.high %v12364_v57, %v12368_v10 }
 0x878   : > { %13424 = vmatprep.subr.bf16.mxu0 %v15663_v19  ;;  %v12360_v45 = vld [vmem:[#allocation22 + $0x4a0] sm:$0xff] }
 0x879   : > { %v15694_v36 = vcombine.low %v12356_v20, %v12360_v45  ;;  %v15695_v30 = vcombine.high %v12356_v20, %v12360_v45  ;;  %v12348_v27 = vld [vmem:[#allocation22 + $0x440] sm:$0xff]  ;;  %v12353_v20 = vld [vmem:[#allocation22 + $0x468] sm:$0xff] }
 0x87a   : > { %15774 = vmatpush3.bf16.msra.mxu1 %v17065_v48  ;;  %v15654_v48 = vcombine.low %v12316_v37, %v12320_v13  ;;  %v12352_v63 = vld [vmem:[#allocation22 + $0x460] sm:$0xff] }
 0x87b   : > { %15775 = vmatprep.subr.bf16.mxu1 %v17066_v34  ;;  %13425 = vmatpush2.bf16.msra.mxu0 %v15662_v29  ;;  %v15687_v49 = vcombine.high %v12348_v27, %v12352_v63  ;;  %v15686_v42 = vcombine.low %v12348_v27, %v12352_v63  ;;  %v12340_v19 = vld [vmem:[#allocation22 + $0x400] sm:$0xff]  ;;  %v12345_v27 = vld [vmem:[#allocation22 + $0x428] sm:$0xff] }
 0x87c   : > { %13426 = vmatprep.subr.bf16.mxu0 %v15655_v31  ;;  %v12344_v37 = vld [vmem:[#allocation22 + $0x420] sm:$0xff]  ;;  %v18421_v31 = vld [vmem:[#allocation22 + $0x1c8] sm:$0xff] }
 0x87d   : > { %v15679_v13 = vcombine.high %v12340_v19, %v12344_v37  ;;  %v15678_v29 = vcombine.low %v12340_v19, %v12344_v37  ;;  %v12270_v37 = vld [vmem:[#allocation22 + $0x1d0] sm:$0xff] }
 0x87e   : > { %15776 = vmatpush3.bf16.msra.mxu1 %v17067_v35  ;;  %v12300_v35 = vld [vmem:[#allocation22 + $0x2c0] sm:$0xff] }
 0x87f   : > { %15777 = vmatprep.subr.bf16.mxu1 %v17068_v43  ;;  %13427 = vmatpush2.bf16.msra.mxu0 %v15654_v48  ;;  %v15639_v43 = vcombine.high %v12300_v35, %v12304_v38  ;;  %v15638_v22 = vcombine.low %v12300_v35, %v12304_v38 }
 0x882   : > { %15778 = vmatpush3.bf16.msra.mxu1 %v17069_v28  ;;  %v15623_v28 = vcombine.high %v12284_v21, %v12288_v18  ;;  %v18430_v21 = vld [vmem:[#allocation20] sm:$0x7] }
 0x883   : > { %15779 = vmatprep.subr.bf16.mxu1 %v17070_v15  ;;  %v12276_v15 = vld [vmem:[#allocation22 + $0x200] sm:$0xff]  ;;  %v11523_v18 = vrot.slane %v18430_v21, %v18220_v33 }
 0x884   : > { %v15615_v14 = vcombine.high %v12276_v15, %v12280_v6  ;;  %v15614_v47 = vcombine.low %v12276_v15, %v12280_v6 }
 0x886   : > { %15780 = vmatpush3.bf16.msra.mxu1 %v17071_v24  ;;  %v12396_v24 = vld [vmem:[#allocation22 + $0x5c0] sm:$0xff] }
 0x887   : > { %15781 = vmatprep.subr.bf16.mxu1 %v17072_v8  ;;  %v18413_v8 = vld [vmem:[#allocation22 + $0x5c8] sm:$0xff]  ;;  %v15735_v9 = vcombine.high %v12396_v24, %v12400_v2  ;;  %v15734_v50 = vcombine.low %v12396_v24, %v12400_v2 }
 0x888   : > { %v15737_v11 = vcombine.high %v18413_v8, %v18415_v16  ;;  %v12389_v24 = vld [vmem:[#allocation22 + $0x588] sm:$0xff] }
 0x889   : > { %v12393_v2 = vld [vmem:[#allocation22 + $0x5a8] sm:$0xff] }
 0x88a   : > { %15782 = vmatpush3.bf16.msra.mxu1 %v17073_v17  ;;  %v15736_v17 = vcombine.low %v18413_v8, %v18415_v16  ;;  %v12361_v8 = vld [vmem:[#allocation22 + $0x4a8] sm:$0xff] }
 0x88b   : > { %15783 = vmatprep.subr.bf16.mxu1 %v17074_v59  ;;  %v12388_v59 = vld [vmem:[#allocation22 + $0x580] sm:$0xff] }
 0x88c   : > { %v15726_v39 = vcombine.low %v12388_v59, %v12392_v61  ;;  %v15727_v4 = vcombine.high %v12388_v59, %v12392_v61  ;;  %v15729_v61 = vcombine.high %v12389_v24, %v12393_v2 }
 0x88e   : > { %15784 = vmatpush3.bf16.msra.mxu1 %v17075_v7  ;;  %v12380_v7 = vld [vmem:[#allocation22 + $0x540] sm:$0xff] }
 0x88f   : > { %15785 = vmatprep.subr.bf16.mxu1 %v17076_v46  ;;  %v15718_v46 = vcombine.low %v12380_v7, %v12384_v52  ;;  %v15719_v5 = vcombine.high %v12380_v7, %v12384_v52  ;;  %v15728_v7 = vcombine.low %v12389_v24, %v12393_v2  ;;  %v12254_v24 = vld [vmem:[#allocation22 + $0x150] sm:$0xff] }
 0x890   : > { %v12258_v2 = vld [vmem:[#allocation22 + $0x170] sm:$0xff] }
 0x892   : > { %15786 = vmatpush3.bf16.msra.mxu1 %v17077_v41  ;;  %v15710_v41 = vcombine.low %v12372_v58, %v12376_v32 }
 0x893   : > { %13447 = vmatprep.subr.bf16.mxu1 %v15735_v9 }
 0x895   : > { %12202 = vmatmul.mubr.bf16.vlgmr.msra.gmra.mxu1 %v18409_v51  ;;  %v12308_v51 = vld [vmem:[#allocation22 + $0x300] sm:$0xff] }
 0x896   : > { %v15647_v34 = vcombine.high %v12308_v51, %v12312_v23  ;;  %v15646_v40 = vcombine.low %v12308_v51, %v12312_v23  ;;  %13448 = vmatpush1.bf16.msra.mxu1 %v15734_v50  ;;  %v18423_v51 = vld [vmem:[#allocation22 + $0x1e8] sm:$0xff] }
 0x897   : > { %13449 = vmatprep.subr.bf16.mxu1 %v15727_v4  ;;  %v15609_v23 = vcombine.high %v18421_v31, %v18423_v51  ;;  %v15608_v48 = vcombine.low %v18421_v31, %v18423_v51  ;;  %v12385_v4 = vld [vmem:[#allocation22 + $0x568] sm:$0xff]  ;;  %v15594_v31 = vcombine.low %v12254_v24, %v12258_v2 }
 0x898   : > { %13428 = vmatprep.subr.bf16.mxu0 %v15647_v34  ;;  %v17611_v34 = vmov 0  }
 0x899   : > { %13429 = vmatpush2.bf16.msra.mxu0 %v15646_v40  ;;  %13479 = vmatprep.mubr.bf16.mxu1 %v17611_v34 }
 0x89a   : > { %13430 = vmatprep.subr.bf16.mxu0 %v15639_v43  ;;  %13450 = vmatpush1.bf16.msra.mxu1 %v15726_v39  ;;  %v12381_v39 = vld [vmem:[#allocation22 + $0x548] sm:$0xff] }
 0x89b   : > { %13451 = vmatprep.subr.bf16.mxu1 %v15719_v5  ;;  %v15721_v52 = vcombine.high %v12381_v39, %v12385_v4  ;;  %v12377_v5 = vld [vmem:[#allocation22 + $0x528] sm:$0xff]  ;;  %v15720_v58 = vcombine.low %v12381_v39, %v12385_v4  ;;  %v15595_v39 = vcombine.high %v12254_v24, %v12258_v2 }
 0x89c   : > { %v12245_v4 = vld [vmem:[#allocation22 + $0x108] sm:$0xff] }
 0x89d   : > { %13431 = vmatpush2.bf16.msra.mxu0 %v15638_v22  ;;  %v12325_v24 = vld [vmem:[#allocation22 + $0x388] sm:$0xff] }
 0x89e   : > { %13432 = vmatprep.subr.bf16.mxu0 %v15631_v60  ;;  %13452 = vmatpush1.bf16.msra.mxu1 %v15718_v46  ;;  %v12373_v46 = vld [vmem:[#allocation22 + $0x508] sm:$0xff] }
 0x89f   : > { %13453 = vmatprep.subr.bf16.mxu1 %v15711_v3  ;;  %v15713_v32 = vcombine.high %v12373_v46, %v12377_v5  ;;  %v12369_v3 = vld [vmem:[#allocation22 + $0x4e8] sm:$0xff]  ;;  %v15712_v57 = vcombine.low %v12373_v46, %v12377_v5  ;;  %v12250_v46 = vld [vmem:[#allocation22 + $0x130] sm:$0xff] }
 0x8a0   : > { %v12329_v2 = vld [vmem:[#allocation22 + $0x3a8] sm:$0xff] }
 0x8a1   : > { %13433 = vmatpush2.bf16.msra.mxu0 %v15630_v12  ;;  %v11527_v12 = vrot.slane %v18430_v21, %v18224_v25 }
 0x8a2   : > { %13434 = vmatprep.subr.bf16.mxu0 %v15623_v28  ;;  %13454 = vmatpush1.bf16.msra.mxu1 %v15710_v41  ;;  %v12365_v41 = vld [vmem:[#allocation22 + $0x4c8] sm:$0xff] }
 0x8a3   : > { %13455 = vmatprep.subr.bf16.mxu1 %v15703_v56  ;;  %v15705_v10 = vcombine.high %v12365_v41, %v12369_v3  ;;  %v15704_v16 = vcombine.low %v12365_v41, %v12369_v3  ;;  %v12349_v56 = vld [vmem:[#allocation22 + $0x448] sm:$0xff]  ;;  %v12238_v41 = vld [vmem:[#allocation22 + $0xd0] sm:$0xff] }
 0x8a4   : > { %v15688_v63 = vcombine.low %v12349_v56, %v12353_v20  ;;  %v12242_v3 = vld [vmem:[#allocation22 + $0xf0] sm:$0xff] }
 0x8a5   : > { %13435 = vmatpush2.bf16.msra.mxu0 %v15622_v62 }
 0x8a6   : > { %13436 = vmatprep.subr.bf16.mxu0 %v15615_v14  ;;  %13456 = vmatpush1.bf16.msra.mxu1 %v15702_v26  ;;  %v12357_v26 = vld [vmem:[#allocation22 + $0x488] sm:$0xff] }
 0x8a7   : > { %13457 = vmatprep.subr.bf16.mxu1 %v15695_v30  ;;  %v15696_v45 = vcombine.low %v12357_v26, %v12361_v8  ;;  %v12341_v30 = vld [vmem:[#allocation22 + $0x408] sm:$0xff] }
 0x8a9   : > { %13437 = vmatpush2.bf16.msra.mxu0 %v15614_v47 }
 0x8aa   : > { %13529 = vmatprep.subr.bf16.mxu0 %v15737_v11  ;;  %13458 = vmatpush1.bf16.msra.mxu1 %v15694_v36  ;;  %v15689_v36 = vcombine.high %v12349_v56, %v12353_v20  ;;  %v12230_v56 = vld [vmem:[#allocation22 + $0x90] sm:$0xff] }
 0x8ab   : > { %13459 = vmatprep.subr.bf16.mxu1 %v15687_v49  ;;  %v15681_v49 = vcombine.high %v12341_v30, %v12345_v27  ;;  %v12234_v20 = vld [vmem:[#allocation22 + $0xb0] sm:$0xff] }
 0x8ae   : > { %13460 = vmatpush1.bf16.msra.mxu1 %v15686_v42  ;;  %v11531_v42 = vrot.slane %v18430_v21, %v18294_v0 }
 0x8af   : > { %13461 = vmatprep.subr.bf16.mxu1 %v15679_v13  ;;  %v12274_v13 = vld [vmem:[#allocation22 + $0x1f0] sm:$0xff] }
 0x8b0   : > { %v15610_v21 = vcombine.low %v12270_v37, %v12274_v13 }
 0x8b2   : > { %13462 = vmatpush1.bf16.msra.mxu1 %v15678_v29 }
 0x8b3   : > { %13488 = vmatprep.subr.bf16.mxu1 %v15609_v23  ;;  %v15680_v23 = vcombine.low %v12341_v30, %v12345_v27  ;;  %v15571_v27 = vcombine.high %v12230_v56, %v12234_v20 }
 0x8f5   : > { %v12081_v35 = vpop.f32.mrf.mxu0 }
 0x8f6   : > { %v12082_v28 = vadd.f32 %v12081_v35, %v11523_v18 }
 0x8f7   : > { %v12083_v38 = vpop.f32.mrf.mxu0 }
 0x8f8   : > { %v12084_v15 = vadd.f32 %v12083_v38, %v11527_v12  ;;  %v15611_v38 = vcombine.high %v12270_v37, %v12274_v13  ;;  %v12265_v12 = vld [vmem:[#allocation22 + $0x1a8] sm:$0xff]  ;;  %v15570_v13 = vcombine.low %v12230_v56, %v12234_v20 }
 0x8f9   : > { %v12085_v40 = vpop.f32.mrf.mxu0  ;;  %v12301_v56 = vld [vmem:[#allocation22 + $0x2c8] sm:$0xff] }
 0x8fa   : > { %v12305_v20 = vld [vmem:[#allocation22 + $0x2e8] sm:$0xff] }
 0x8fb   : > { %v12086_v43 = vpop.f32.mrf.mxu0 }
 0x915   : > { %v15765_v54 = vpop.f32.mrf.mxu0 }
 0x917   : > { %v15766_v55 = vpop.f32.mrf.mxu0 }
 0x918   : > { %v15767_v19 = vadd.f32 %v15766_v55, %v15765_v54  ;;  %v12253_v55 = vld [vmem:[#allocation22 + $0x148] sm:$0xff] }
 0x919   : > { %v15768_v22 = vpop.f32.mrf.mxu0 }
 0x91a   : > { %v12164_v40 = vadd.f32 %v15767_v19, %v11531_v42  ;;  %v12222_v42 = vld [vmem:[#allocation22 + $0x50] sm:$0xff] }
 0x91b   : > { %v15769_v60 = vpop.f32.mrf.mxu0  ;;  %v12226_v19 = vld [vmem:[#allocation22 + $0x70] sm:$0xff] }
 0x91c   : > { %v12261_v60 = vld [vmem:[#allocation22 + $0x188] sm:$0xff] }
 0x935   : > { %v12122_v62 = vpop.f32.mrf.mxu1 }
 0x936   : > { %v12123_v6 = vadd.f32 %v12122_v62, %v12082_v28  ;;  %v12262_v28 = vld [vmem:[#allocation22 + $0x190] sm:$0xff] }
 0x937   : > { %v12124_v14 = vpop.f32.mrf.mxu1  ;;  %v12266_v62 = vld [vmem:[#allocation22 + $0x1b0] sm:$0xff] }
 0x938   : > { %v12125_v47 = vadd.f32 %v12124_v14, %v12084_v15  ;;  %v18438_v11 = vpack.c.bf16 %v12123_v6, %v12123_v6  ;;  %v15601_v6 = vcombine.high %v12261_v60, %v12265_v12  ;;  %v15603_v14 = vcombine.high %v12262_v28, %v12266_v62 }
 0x939   : > { %v12126_v9 = vpop.f32.mrf.mxu1 }
 0x93a   : > { %v18436_v50 = vpack.c.bf16 %v12125_v47, %v12125_v47  ;;  %v12257_v47 = vld [vmem:[#allocation22 + $0x168] sm:$0xff]  ;;  %v15600_v9 = vcombine.low %v12261_v60, %v12265_v12  ;;  %v15562_v60 = vcombine.low %v12222_v42, %v12226_v19 }
 0x93b   : > { %v12127_v59 = vpop.f32.mrf.mxu1  ;;  %v15592_v5 = vcombine.low %v12253_v55, %v12257_v47 }
 0x93c   : > { %13438 = vmatprep.mubr.bf16.mxu0 %v18436_v50  ;;  %v15602_v59 = vcombine.low %v12262_v28, %v12266_v62  ;;  %v12333_v28 = vld [vmem:[#allocation22 + $0x3c8] sm:$0xff] }
 0x93d   : > { %13439 = vmatmul.mubr.bf16.vlgmr.msra.gmra.mxu0 %v18438_v11  ;;  %v12337_v62 = vld [vmem:[#allocation22 + $0x3e8] sm:$0xff] }
 0x93e   : > { %13530 = vmatpush1.bf16.msra.mxu0 %v15736_v17  ;;  %13561 = vmatprep.mubr.bf16.mxu0 %v17611_v34  ;;  %v15697_v17 = vcombine.high %v12357_v26, %v12361_v8  ;;  %v15579_v8 = vcombine.high %v12238_v41, %v12242_v3 }
 0x93f   : > { %13531 = vmatprep.subr.bf16.mxu0 %v15729_v61  ;;  %v15593_v61 = vcombine.high %v12253_v55, %v12257_v47 }
 0x942   : > { %13532 = vmatpush1.bf16.msra.mxu0 %v15728_v7  ;;  %v12249_v7 = vld [vmem:[#allocation22 + $0x128] sm:$0xff] }
 0x943   : > { %13533 = vmatprep.subr.bf16.mxu0 %v15721_v52  ;;  %v12246_v52 = vld [vmem:[#allocation22 + $0x110] sm:$0xff]  ;;  %v15585_v51 = vcombine.high %v12245_v4, %v12249_v7 }
 0x946   : > { %13534 = vmatpush1.bf16.msra.mxu0 %v15720_v58  ;;  %v12237_v58 = vld [vmem:[#allocation22 + $0xc8] sm:$0xff] }
 0x947   : > { %13535 = vmatprep.subr.bf16.mxu0 %v15713_v32  ;;  %v12241_v32 = vld [vmem:[#allocation22 + $0xe8] sm:$0xff] }
 0x948   : > { %v15577_v26 = vcombine.high %v12237_v58, %v12241_v32 }
 0x94a   : > { %13536 = vmatpush1.bf16.msra.mxu0 %v15712_v57  ;;  %v15584_v57 = vcombine.low %v12245_v4, %v12249_v7  ;;  %v15665_v4 = vcombine.high %v12325_v24, %v12329_v2 }
 0x94b   : > { %13537 = vmatprep.subr.bf16.mxu0 %v15705_v10  ;;  %v15586_v10 = vcombine.low %v12246_v52, %v12250_v46 }
 0x94e   : > { %13538 = vmatpush1.bf16.msra.mxu0 %v15704_v16  ;;  %v12229_v16 = vld [vmem:[#allocation22 + $0x88] sm:$0xff] }
 0x94f   : > { %13539 = vmatprep.subr.bf16.mxu0 %v15697_v17  ;;  %v12233_v17 = vld [vmem:[#allocation22 + $0xa8] sm:$0xff] }
 0x950   : > { %v15569_v30 = vcombine.high %v12229_v16, %v12233_v17  ;;  %v15568_v37 = vcombine.low %v12229_v16, %v12233_v17 }
 0x952   : > { %13540 = vmatpush1.bf16.msra.mxu0 %v15696_v45  ;;  %v15576_v45 = vcombine.low %v12237_v58, %v12241_v32 }
 0x953   : > { %13541 = vmatprep.subr.bf16.mxu0 %v15689_v36  ;;  %v15578_v36 = vcombine.low %v12238_v41, %v12242_v3  ;;  %v12309_v41 = vld [vmem:[#allocation22 + $0x308] sm:$0xff] }
 0x954   : > { %v12313_v3 = vld [vmem:[#allocation22 + $0x328] sm:$0xff] }
 0x955   : > { %v15787_v29 = vpop.f32.mrf.mxu1  ;;  %v15649_v16 = vcombine.high %v12309_v41, %v12313_v3 }
 0x956   : > { %13542 = vmatpush1.bf16.msra.mxu0 %v15688_v63  ;;  %v12221_v63 = vld [vmem:[#allocation22 + $0x48] sm:$0xff] }
 0x957   : > { %v15788_v35 = vpop.f32.mrf.mxu1  ;;  %13543 = vmatprep.subr.bf16.mxu0 %v15681_v49  ;;  %v12225_v49 = vld [vmem:[#allocation22 + $0x68] sm:$0xff] }
 0x958   : > { %v15789_v43 = vadd.f32 %v15788_v35, %v15787_v29  ;;  %v15561_v29 = vcombine.high %v12221_v63, %v12225_v49  ;;  %v12213_v35 = vld [vmem:[#allocation22 + $0x8] sm:$0xff] }
 0x959   : > { %v15790_v22 = vpop.f32.mrf.mxu1 }
 0x95a   : > { %v12204_v18 = vadd.f32 %v15789_v43, %v12164_v40  ;;  %13544 = vmatpush1.bf16.msra.mxu0 %v15680_v23  ;;  %v15563_v23 = vcombine.high %v12222_v42, %v12226_v19  ;;  %v12214_v40 = vld [vmem:[#allocation22 + $0x10] sm:$0xff]  ;;  %v15560_v22 = vcombine.low %v12221_v63, %v12225_v49  ;;  %v15641_v63 = vcombine.high %v12301_v56, %v12305_v20  ;;  %v12293_v42 = vld [vmem:[#allocation22 + $0x288] sm:$0xff] }
 0x95b   : > { %v15791_v15 = vpop.f32.mrf.mxu1  ;;  %13570 = vmatprep.subr.bf16.mxu0 %v15611_v38  ;;  %v12217_v38 = vld [vmem:[#allocation22 + $0x28] sm:$0xff]  ;;  %v12218_v43 = vld [vmem:[#allocation22 + $0x30] sm:$0xff] }
 0x95c   : > { %v18448_v54 = vpack.c.bf16 %v12204_v18, %v12204_v18  ;;  %v15553_v18 = vcombine.high %v12213_v35, %v12217_v38  ;;  %v15555_v12 = vcombine.high %v12214_v40, %v12218_v43  ;;  %v12334_v15 = vld [vmem:[#allocation22 + $0x3d0] sm:$0xff]  ;;  %v15552_v55 = vcombine.low %v12213_v35, %v12217_v38  ;;  %v12297_v19 = vld [vmem:[#allocation22 + $0x2a8] sm:$0xff] }
 0x95d   : > { %v15633_v35 = vcombine.high %v12293_v42, %v12297_v19 }
 0x95e   : > { %13480 = vmatmul.mubr.bf16.vlgmr.msra.gmra.mxu1 %v18448_v54  ;;  %13562 = vmatmul.mubr.bf16.vlgmr.msra.gmra.mxu0 %v18448_v54 }
 0x95f   : > { %13489 = vmatpush1.bf16.msra.mxu1 %v15608_v48  ;;  %13571 = vmatpush1.bf16.msra.mxu0 %v15610_v21  ;;  %v15587_v48 = vcombine.high %v12246_v52, %v12250_v46  ;;  %v12338_v21 = vld [vmem:[#allocation22 + $0x3f0] sm:$0xff]  ;;  %v12317_v52 = vld [vmem:[#allocation22 + $0x348] sm:$0xff] }
 0x960   : > { %13520 = vmatprep.mubr.bf16.mxu1 %v18436_v50  ;;  %13602 = vmatprep.mubr.bf16.mxu0 %v18436_v50  ;;  %v15675_v47 = vcombine.high %v12334_v15, %v12338_v21  ;;  %v12321_v46 = vld [vmem:[#allocation22 + $0x368] sm:$0xff] }
 0x961   : > { %13490 = vmatprep.subr.bf16.mxu1 %v15601_v6  ;;  %13572 = vmatprep.subr.bf16.mxu0 %v15603_v14  ;;  %v15554_v6 = vcombine.low %v12214_v40, %v12218_v43  ;;  %v15673_v14 = vcombine.high %v12333_v28, %v12337_v62  ;;  %v15657_v58 = vcombine.high %v12317_v52, %v12321_v46  ;;  %v12285_v40 = vld [vmem:[#allocation22 + $0x248] sm:$0xff] }
 0x962   : > { %v12289_v43 = vld [vmem:[#allocation22 + $0x268] sm:$0xff] }
 0x963   : > { %13491 = vmatpush1.bf16.msra.mxu1 %v15600_v9  ;;  %13573 = vmatpush1.bf16.msra.mxu0 %v15602_v59  ;;  %v12326_v9 = vld [vmem:[#allocation22 + $0x390] sm:$0xff] }
 0x964   : > { %13492 = vmatprep.subr.bf16.mxu1 %v15593_v61  ;;  %13574 = vmatprep.subr.bf16.mxu0 %v15595_v39  ;;  %v12330_v59 = vld [vmem:[#allocation22 + $0x3b0] sm:$0xff]  ;;  %v15672_v61 = vcombine.low %v12333_v28, %v12337_v62  ;;  %v15674_v39 = vcombine.low %v12334_v15, %v12338_v21  ;;  %v15625_v28 = vcombine.high %v12285_v40, %v12289_v43  ;;  %v12277_v15 = vld [vmem:[#allocation22 + $0x208] sm:$0xff] }
 0x965   : > { %v15667_v7 = vcombine.high %v12326_v9, %v12330_v59  ;;  %v12281_v21 = vld [vmem:[#allocation22 + $0x228] sm:$0xff] }
 0x967   : > { %13493 = vmatpush1.bf16.msra.mxu1 %v15592_v5  ;;  %13575 = vmatpush1.bf16.msra.mxu0 %v15594_v31  ;;  %v12318_v5 = vld [vmem:[#allocation22 + $0x350] sm:$0xff] }
 0x968   : > { %13494 = vmatprep.subr.bf16.mxu1 %v15585_v51  ;;  %13576 = vmatprep.subr.bf16.mxu0 %v15587_v48  ;;  %v12322_v31 = vld [vmem:[#allocation22 + $0x370] sm:$0xff]  ;;  %v15664_v51 = vcombine.low %v12325_v24, %v12329_v2  ;;  %v15666_v48 = vcombine.low %v12326_v9, %v12330_v59  ;;  %v15617_v24 = vcombine.high %v12277_v15, %v12281_v21 }
 0x969   : > { %v15659_v32 = vcombine.high %v12318_v5, %v12322_v31  ;;  %v12398_v9 = vld [vmem:[#allocation22 + $0x5d0] sm:$0xff] }
 0x96a   : > { %v12402_v59 = vld [vmem:[#allocation22 + $0x5f0] sm:$0xff] }
 0x96b   : > { %13495 = vmatpush1.bf16.msra.mxu1 %v15584_v57  ;;  %13577 = vmatpush1.bf16.msra.mxu0 %v15586_v10  ;;  %v12310_v57 = vld [vmem:[#allocation22 + $0x310] sm:$0xff] }
 0x96c   : > { %13496 = vmatprep.subr.bf16.mxu1 %v15577_v26  ;;  %13578 = vmatprep.subr.bf16.mxu0 %v15579_v8  ;;  %v12314_v10 = vld [vmem:[#allocation22 + $0x330] sm:$0xff]  ;;  %v15656_v26 = vcombine.low %v12317_v52, %v12321_v46  ;;  %v15658_v8 = vcombine.low %v12318_v5, %v12322_v31  ;;  %v15739_v52 = vcombine.high %v12398_v9, %v12402_v59 }
 0x96d   : > { %v15651_v17 = vcombine.high %v12310_v57, %v12314_v10  ;;  %v12390_v5 = vld [vmem:[#allocation22 + $0x590] sm:$0xff] }
 0x96e   : > { %v12394_v31 = vld [vmem:[#allocation22 + $0x5b0] sm:$0xff] }
 0x96f   : > { %13497 = vmatpush1.bf16.msra.mxu1 %v15576_v45  ;;  %13579 = vmatpush1.bf16.msra.mxu0 %v15578_v36  ;;  %v12302_v45 = vld [vmem:[#allocation22 + $0x2d0] sm:$0xff] }
 0x970   : > { %13498 = vmatprep.subr.bf16.mxu1 %v15569_v30  ;;  %13580 = vmatprep.subr.bf16.mxu0 %v15571_v27  ;;  %v12306_v36 = vld [vmem:[#allocation22 + $0x2f0] sm:$0xff]  ;;  %v15648_v30 = vcombine.low %v12309_v41, %v12313_v3  ;;  %v15650_v27 = vcombine.low %v12310_v57, %v12314_v10  ;;  %v15731_v41 = vcombine.high %v12390_v5, %v12394_v31 }
 0x971   : > { %v15643_v49 = vcombine.high %v12302_v45, %v12306_v36  ;;  %v12382_v57 = vld [vmem:[#allocation22 + $0x550] sm:$0xff] }
 0x972   : > { %v12386_v10 = vld [vmem:[#allocation22 + $0x570] sm:$0xff] }
 0x973   : > { %13499 = vmatpush1.bf16.msra.mxu1 %v15568_v37  ;;  %13581 = vmatpush1.bf16.msra.mxu0 %v15570_v13  ;;  %v12294_v37 = vld [vmem:[#allocation22 + $0x290] sm:$0xff] }
 0x974   : > { %13500 = vmatprep.subr.bf16.mxu1 %v15561_v29  ;;  %13582 = vmatprep.subr.bf16.mxu0 %v15563_v23  ;;  %v12298_v13 = vld [vmem:[#allocation22 + $0x2b0] sm:$0xff]  ;;  %v15640_v29 = vcombine.low %v12301_v56, %v12305_v20  ;;  %v15642_v23 = vcombine.low %v12302_v45, %v12306_v36  ;;  %v15723_v56 = vcombine.high %v12382_v57, %v12386_v10 }
 0x975   : > { %v15635_v38 = vcombine.high %v12294_v37, %v12298_v13  ;;  %v12374_v45 = vld [vmem:[#allocation22 + $0x510] sm:$0xff] }
 0x976   : > { %v12378_v36 = vld [vmem:[#allocation22 + $0x530] sm:$0xff] }
 0x977   : > { %13501 = vmatpush1.bf16.msra.mxu1 %v15560_v22  ;;  %13583 = vmatpush1.bf16.msra.mxu0 %v15562_v60  ;;  %v12286_v22 = vld [vmem:[#allocation22 + $0x250] sm:$0xff] }
 0x978   : > { %13502 = vmatprep.subr.bf16.mxu1 %v15553_v18  ;;  %13584 = vmatprep.subr.bf16.mxu0 %v15555_v12  ;;  %v12290_v60 = vld [vmem:[#allocation22 + $0x270] sm:$0xff]  ;;  %v15632_v18 = vcombine.low %v12293_v42, %v12297_v19  ;;  %v15634_v12 = vcombine.low %v12294_v37, %v12298_v13  ;;  %v15715_v42 = vcombine.high %v12374_v45, %v12378_v36 }
 0x979   : > { %v15627_v62 = vcombine.high %v12286_v22, %v12290_v60  ;;  %v12366_v37 = vld [vmem:[#allocation22 + $0x4d0] sm:$0xff] }
 0x97a   : > { %v12370_v13 = vld [vmem:[#allocation22 + $0x4f0] sm:$0xff] }
 0x97b   : > { %13503 = vmatpush1.bf16.msra.mxu1 %v15552_v55  ;;  %13585 = vmatpush1.bf16.msra.mxu0 %v15554_v6  ;;  %v12278_v55 = vld [vmem:[#allocation22 + $0x210] sm:$0xff] }
 0x97c   : > { %13504 = vmatprep.subr.bf16.mxu1 %v15673_v14  ;;  %13586 = vmatprep.subr.bf16.mxu0 %v15675_v47  ;;  %v12282_v6 = vld [vmem:[#allocation22 + $0x230] sm:$0xff]  ;;  %v15624_v14 = vcombine.low %v12285_v40, %v12289_v43  ;;  %v15626_v47 = vcombine.low %v12286_v22, %v12290_v60  ;;  %v15707_v40 = vcombine.high %v12366_v37, %v12370_v13  ;;  %v12359_v60 = vld [vmem:[#allocation22 + $0x498] sm:$0xff] }
 0x97d   : > { %v15619_v2 = vcombine.high %v12278_v55, %v12282_v6  ;;  %v12358_v43 = vld [vmem:[#allocation22 + $0x490] sm:$0xff] }
 0x97e   : > { %v12362_v22 = vld [vmem:[#allocation22 + $0x4b0] sm:$0xff] }
 0x97f   : > { %13505 = vmatpush2.bf16.msra.mxu1 %v15672_v61  ;;  %13587 = vmatpush2.bf16.msra.mxu0 %v15674_v39  ;;  %v12399_v61 = vld [vmem:[#allocation22 + $0x5d8] sm:$0xff] }
 0x980   : > { %13506 = vmatprep.subr.bf16.mxu1 %v15665_v4  ;;  %13588 = vmatprep.subr.bf16.mxu0 %v15667_v7  ;;  %v12403_v39 = vld [vmem:[#allocation22 + $0x5f8] sm:$0xff]  ;;  %v15616_v4 = vcombine.low %v12277_v15, %v12281_v21  ;;  %v15618_v7 = vcombine.low %v12278_v55, %v12282_v6  ;;  %v12350_v21 = vld [vmem:[#allocation22 + $0x450] sm:$0xff] }
 0x981   : > { %v15741_v46 = vcombine.high %v12399_v61, %v12403_v39  ;;  %v12354_v55 = vld [vmem:[#allocation22 + $0x470] sm:$0xff]  ;;  %v12351_v6 = vld [vmem:[#allocation22 + $0x458] sm:$0xff] }
 0x983   : > { %13507 = vmatpush2.bf16.msra.mxu1 %v15664_v51  ;;  %13589 = vmatpush2.bf16.msra.mxu0 %v15666_v48  ;;  %v12391_v51 = vld [vmem:[#allocation22 + $0x598] sm:$0xff] }
 0x984   : > { %13508 = vmatprep.subr.bf16.mxu1 %v15657_v58  ;;  %13590 = vmatprep.subr.bf16.mxu0 %v15659_v32  ;;  %v12395_v48 = vld [vmem:[#allocation22 + $0x5b8] sm:$0xff]  ;;  %v15738_v58 = vcombine.low %v12398_v9, %v12402_v59  ;;  %v15740_v32 = vcombine.low %v12399_v61, %v12403_v39  ;;  %v12342_v59 = vld [vmem:[#allocation22 + $0x410] sm:$0xff] }
 0x985   : > { %v15733_v3 = vcombine.high %v12391_v51, %v12395_v48  ;;  %v12346_v61 = vld [vmem:[#allocation22 + $0x430] sm:$0xff]  ;;  %v12343_v39 = vld [vmem:[#allocation22 + $0x418] sm:$0xff] }
 0x987   : > { %13509 = vmatpush2.bf16.msra.mxu1 %v15656_v26  ;;  %13591 = vmatpush2.bf16.msra.mxu0 %v15658_v8  ;;  %v12383_v26 = vld [vmem:[#allocation22 + $0x558] sm:$0xff] }
 0x988   : > { %13510 = vmatprep.subr.bf16.mxu1 %v15649_v16  ;;  %13592 = vmatprep.subr.bf16.mxu0 %v15651_v17  ;;  %v12387_v8 = vld [vmem:[#allocation22 + $0x578] sm:$0xff]  ;;  %v15730_v16 = vcombine.low %v12390_v5, %v12394_v31  ;;  %v15732_v17 = vcombine.low %v12391_v51, %v12395_v48  ;;  %v15682_v48 = vcombine.low %v12342_v59, %v12346_v61 }
 0x989   : > { %v15725_v20 = vcombine.high %v12383_v26, %v12387_v8  ;;  %v12271_v31 = vld [vmem:[#allocation22 + $0x1d8] sm:$0xff] }
 0x98a   : > { %v12275_v51 = vld [vmem:[#allocation22 + $0x1f8] sm:$0xff] }
 0x98b   : > { %13511 = vmatpush2.bf16.msra.mxu1 %v15648_v30  ;;  %13593 = vmatpush2.bf16.msra.mxu0 %v15650_v27  ;;  %v12375_v30 = vld [vmem:[#allocation22 + $0x518] sm:$0xff] }
 0x98c   : > { %13512 = vmatprep.subr.bf16.mxu1 %v15641_v63  ;;  %13594 = vmatprep.subr.bf16.mxu0 %v15643_v49  ;;  %v12379_v27 = vld [vmem:[#allocation22 + $0x538] sm:$0xff]  ;;  %v15722_v63 = vcombine.low %v12382_v57, %v12386_v10  ;;  %v15724_v49 = vcombine.low %v12383_v26, %v12387_v8  ;;  %v15612_v57 = vcombine.low %v12271_v31, %v12275_v51 }
 0x98d   : > { %v15717_v19 = vcombine.high %v12375_v30, %v12379_v27  ;;  %v12255_v26 = vld [vmem:[#allocation22 + $0x158] sm:$0xff] }
 0x98e   : > { %v12259_v8 = vld [vmem:[#allocation22 + $0x178] sm:$0xff] }
 0x98f   : > { %13513 = vmatpush2.bf16.msra.mxu1 %v15640_v29  ;;  %13595 = vmatpush2.bf16.msra.mxu0 %v15642_v23  ;;  %v12367_v29 = vld [vmem:[#allocation22 + $0x4d8] sm:$0xff] }
 0x990   : > { %13514 = vmatprep.subr.bf16.mxu1 %v15633_v35  ;;  %13596 = vmatprep.subr.bf16.mxu0 %v15635_v38  ;;  %v12371_v23 = vld [vmem:[#allocation22 + $0x4f8] sm:$0xff]  ;;  %v15714_v35 = vcombine.low %v12374_v45, %v12378_v36  ;;  %v15716_v38 = vcombine.low %v12375_v30, %v12379_v27  ;;  %v15596_v45 = vcombine.low %v12255_v26, %v12259_v8 }
 0x991   : > { %v12239_v30 = vld [vmem:[#allocation22 + $0xd8] sm:$0xff] }
 0x992   : > { %v12243_v27 = vld [vmem:[#allocation22 + $0xf8] sm:$0xff] }
 0x993   : > { %13515 = vmatpush2.bf16.msra.mxu1 %v15632_v18  ;;  %13597 = vmatpush2.bf16.msra.mxu0 %v15634_v12  ;;  %v12363_v18 = vld [vmem:[#allocation22 + $0x4b8] sm:$0xff]  ;;  %v15706_v12 = vcombine.low %v12366_v37, %v12370_v13 }
 0x994   : > { %13516 = vmatprep.subr.bf16.mxu1 %v15625_v28  ;;  %13598 = vmatprep.subr.bf16.mxu0 %v15627_v62  ;;  %v15708_v28 = vcombine.low %v12367_v29, %v12371_v23  ;;  %v15699_v62 = vcombine.high %v12358_v43, %v12362_v22  ;;  %v15701_v15 = vcombine.high %v12359_v60, %v12363_v18  ;;  %v12223_v37 = vld [vmem:[#allocation22 + $0x58] sm:$0xff] }
 0x995   : > { %v12227_v13 = vld [vmem:[#allocation22 + $0x78] sm:$0xff] }
 0x997   : > { %13517 = vmatpush2.bf16.msra.mxu1 %v15624_v14  ;;  %13599 = vmatpush2.bf16.msra.mxu0 %v15626_v47  ;;  %v12355_v14 = vld [vmem:[#allocation22 + $0x478] sm:$0xff]  ;;  %v15698_v47 = vcombine.low %v12358_v43, %v12362_v22 }
 0x998   : > { %13518 = vmatprep.subr.bf16.mxu1 %v15617_v24  ;;  %13600 = vmatprep.subr.bf16.mxu0 %v15619_v2  ;;  %v15700_v24 = vcombine.low %v12359_v60, %v12363_v18  ;;  %v15691_v2 = vcombine.high %v12350_v21, %v12354_v55  ;;  %v15693_v9 = vcombine.high %v12351_v6, %v12355_v14  ;;  %v12335_v43 = vld [vmem:[#allocation22 + $0x3d8] sm:$0xff] }
 0x999   : > { %v12339_v22 = vld [vmem:[#allocation22 + $0x3f8] sm:$0xff] }
 0x99a   : > { %v15677_v18 = vcombine.high %v12335_v43, %v12339_v22 }
 0x99b   : > { %13519 = vmatpush2.bf16.msra.mxu1 %v15616_v4  ;;  %13601 = vmatpush2.bf16.msra.mxu0 %v15618_v7  ;;  %v12347_v4 = vld [vmem:[#allocation22 + $0x438] sm:$0xff]  ;;  %v15690_v7 = vcombine.low %v12350_v21, %v12354_v55 }
 0x99c   : > { %13611 = vmatprep.subr.bf16.mxu1 %v15739_v52  ;;  %13693 = vmatprep.subr.bf16.mxu0 %v15741_v46  ;;  %v15692_v52 = vcombine.low %v12351_v6, %v12355_v14  ;;  %v15683_v46 = vcombine.high %v12342_v59, %v12346_v61  ;;  %v15685_v5 = vcombine.high %v12343_v39, %v12347_v4  ;;  %v12319_v21 = vld [vmem:[#allocation22 + $0x358] sm:$0xff] }
 0x99d   : > { %v12323_v55 = vld [vmem:[#allocation22 + $0x378] sm:$0xff] }
 0x99e   : > { %13521 = vmatmul.mubr.bf16.vlgmr.msra.gmra.mxu1 %v18438_v11  ;;  %13603 = vmatmul.mubr.bf16.vlgmr.msra.gmra.mxu0 %v18438_v11  ;;  %v15661_v14 = vcombine.high %v12319_v21, %v12323_v55  ;;  %v12303_v59 = vld [vmem:[#allocation22 + $0x2d8] sm:$0xff] }
 0x99f   : > { %13612 = vmatpush1.bf16.msra.mxu1 %v15738_v58  ;;  %13694 = vmatpush1.bf16.msra.mxu0 %v15740_v32  ;;  %v15684_v58 = vcombine.low %v12343_v39, %v12347_v4  ;;  %v15613_v32 = vcombine.high %v12271_v31, %v12275_v51  ;;  %v12307_v61 = vld [vmem:[#allocation22 + $0x2f8] sm:$0xff] }
 0x9a0   : > { %13613 = vmatprep.subr.bf16.mxu1 %v15731_v41  ;;  %13695 = vmatprep.subr.bf16.mxu0 %v15733_v3  ;;  %v12263_v41 = vld [vmem:[#allocation22 + $0x198] sm:$0xff]  ;;  %v15645_v4 = vcombine.high %v12303_v59, %v12307_v61 }
 0x9a1   : > { %13643 = vmatprep.mubr.bf16.mxu1 %v17611_v34  ;;  %13725 = vmatprep.mubr.bf16.mxu0 %v17611_v34  ;;  %v15709_v34 = vcombine.high %v12367_v29, %v12371_v23  ;;  %v12267_v3 = vld [vmem:[#allocation22 + $0x1b8] sm:$0xff]  ;;  %v15565_v23 = vcombine.high %v12223_v37, %v12227_v13 }
 0x9a2   : > { %v15605_v10 = vcombine.high %v12263_v41, %v12267_v3  ;;  %v12287_v31 = vld [vmem:[#allocation22 + $0x258] sm:$0xff] }
 0x9a3   : > { %13614 = vmatpush1.bf16.msra.mxu1 %v15730_v16  ;;  %13696 = vmatpush1.bf16.msra.mxu0 %v15732_v17  ;;  %v15604_v16 = vcombine.low %v12263_v41, %v12267_v3  ;;  %v15597_v17 = vcombine.high %v12255_v26, %v12259_v8  ;;  %v12291_v51 = vld [vmem:[#allocation22 + $0x278] sm:$0xff] }
 0x9a4   : > { %13615 = vmatprep.subr.bf16.mxu1 %v15723_v56  ;;  %13697 = vmatprep.subr.bf16.mxu0 %v15725_v20  ;;  %v12247_v56 = vld [vmem:[#allocation22 + $0x118] sm:$0xff]  ;;  %v15628_v3 = vcombine.low %v12287_v31, %v12291_v51 }
 0x9a5   : > { %v12251_v20 = vld [vmem:[#allocation22 + $0x138] sm:$0xff] }
 0x9a6   : > { %v15589_v36 = vcombine.high %v12247_v56, %v12251_v20  ;;  %v12283_v41 = vld [vmem:[#allocation22 + $0x238] sm:$0xff] }
 0x9a7   : > { %13616 = vmatpush1.bf16.msra.mxu1 %v15722_v63  ;;  %13698 = vmatpush1.bf16.msra.mxu0 %v15724_v49  ;;  %v15588_v63 = vcombine.low %v12247_v56, %v12251_v20  ;;  %v15581_v49 = vcombine.high %v12239_v30, %v12243_v27  ;;  %v12404_v56 = vld [vmem:[#allocation23] sm:$0xff] }
 0x9a8   : > { %13617 = vmatprep.subr.bf16.mxu1 %v15715_v42  ;;  %13699 = vmatprep.subr.bf16.mxu0 %v15717_v19  ;;  %v12231_v42 = vld [vmem:[#allocation22 + $0x98] sm:$0xff]  ;;  %v15580_v19 = vcombine.low %v12239_v30, %v12243_v27  ;;  %v12409_v20 = vrot.slane %v12404_v56, %v18220_v33  ;;  %v12421_v33 = vrot.slane %v12404_v56, %v18299_v1  ;;  %v12424_v1 = vsub.s32 4, %v17984_v44 }
 0x9ab   : > { %13618 = vmatpush1.bf16.msra.mxu1 %v15714_v35  ;;  %13700 = vmatpush1.bf16.msra.mxu0 %v15716_v38  ;;  %v12215_v35 = vld [vmem:[#allocation22 + $0x18] sm:$0xff] }
 0x9ac   : > { %13619 = vmatprep.subr.bf16.mxu1 %v15707_v40  ;;  %13701 = vmatprep.subr.bf16.mxu0 %v15709_v34  ;;  %v12219_v38 = vld [vmem:[#allocation22 + $0x38] sm:$0xff]  ;;  %v15564_v40 = vcombine.low %v12223_v37, %v12227_v13 }
 0x9ad   : > { %v15557_v34 = vcombine.high %v12215_v35, %v12219_v38  ;;  %v15556_v60 = vcombine.low %v12215_v35, %v12219_v38 }
 0x9af   : > { %13620 = vmatpush1.bf16.msra.mxu1 %v15706_v12  ;;  %13702 = vmatpush1.bf16.msra.mxu0 %v15708_v28  ;;  %v12327_v12 = vld [vmem:[#allocation22 + $0x398] sm:$0xff] }
 0x9b0   : > { %13621 = vmatprep.subr.bf16.mxu1 %v15699_v62  ;;  %13703 = vmatprep.subr.bf16.mxu0 %v15701_v15  ;;  %v12331_v28 = vld [vmem:[#allocation22 + $0x3b8] sm:$0xff]  ;;  %v15676_v62 = vcombine.low %v12335_v43, %v12339_v22 }
 0x9b1   : > { %v15669_v15 = vcombine.high %v12327_v12, %v12331_v28  ;;  %v15668_v6 = vcombine.low %v12327_v12, %v12331_v28 }
 0x9b3   : > { %13622 = vmatpush1.bf16.msra.mxu1 %v15698_v47  ;;  %13704 = vmatpush1.bf16.msra.mxu0 %v15700_v24  ;;  %v12311_v47 = vld [vmem:[#allocation22 + $0x318] sm:$0xff] }
 0x9b4   : > { %13623 = vmatprep.subr.bf16.mxu1 %v15691_v2  ;;  %13705 = vmatprep.subr.bf16.mxu0 %v15693_v9  ;;  %v12315_v24 = vld [vmem:[#allocation22 + $0x338] sm:$0xff]  ;;  %v15660_v2 = vcombine.low %v12319_v21, %v12323_v55 }
 0x9b5   : > { %v15653_v9 = vcombine.high %v12311_v47, %v12315_v24  ;;  %v15652_v39 = vcombine.low %v12311_v47, %v12315_v24 }
 0x9b7   : > { %13624 = vmatpush1.bf16.msra.mxu1 %v15690_v7  ;;  %13706 = vmatpush1.bf16.msra.mxu0 %v15692_v52  ;;  %v12295_v7 = vld [vmem:[#allocation22 + $0x298] sm:$0xff] }
 0x9b8   : > { %13625 = vmatprep.subr.bf16.mxu1 %v15683_v46  ;;  %13707 = vmatprep.subr.bf16.mxu0 %v15685_v5  ;;  %v12299_v52 = vld [vmem:[#allocation22 + $0x2b8] sm:$0xff]  ;;  %v15644_v46 = vcombine.low %v12303_v59, %v12307_v61 }
 0x9b9   : > { %v15637_v5 = vcombine.high %v12295_v7, %v12299_v52 }
 0x9bb   : > { %13626 = vmatpush1.bf16.msra.mxu1 %v15682_v48  ;;  %13708 = vmatpush1.bf16.msra.mxu0 %v15684_v58  ;;  %v15636_v48 = vcombine.low %v12295_v7, %v12299_v52  ;;  %v15629_v58 = vcombine.high %v12287_v31, %v12291_v51 }
 0x9bc   : > { %13652 = vmatprep.subr.bf16.mxu1 %v15613_v32  ;;  %v12279_v32 = vld [vmem:[#allocation22 + $0x218] sm:$0xff] }
 0x9be   : > { %13644 = vmatmul.mubr.bf16.vlgmr.msra.gmra.mxu1 %v18448_v54  ;;  %13726 = vmatmul.mubr.bf16.vlgmr.msra.gmra.mxu0 %v18448_v54  ;;  %v12235_v54 = vld [vmem:[#allocation22 + $0xb8] sm:$0xff] }
 0x9bf   : > { %13653 = vmatpush1.bf16.msra.mxu1 %v15612_v57  ;;  %13684 = vmatprep.mubr.bf16.mxu1 %v18436_v50  ;;  %v15573_v50 = vcombine.high %v12231_v42, %v12235_v54  ;;  %v15572_v29 = vcombine.low %v12231_v42, %v12235_v54  ;;  %v15621_v57 = vcombine.high %v12279_v32, %v12283_v41 }
 0x9c0   : > { %13654 = vmatprep.subr.bf16.mxu1 %v15605_v10  ;;  %v15620_v10 = vcombine.low %v12279_v32, %v12283_v41 }
 0x9c3   : > { %13655 = vmatpush1.bf16.msra.mxu1 %v15604_v16 }
 0x9c4   : > { %13656 = vmatprep.subr.bf16.mxu1 %v15597_v17 }
 0x9c7   : > { %13657 = vmatpush1.bf16.msra.mxu1 %v15596_v45  ;;  %v12413_v45 = vrot.slane %v12404_v56, %v18224_v25 }
 0x9c8   : > { %13658 = vmatprep.subr.bf16.mxu1 %v15589_v36 }
 0x9cb   : > { %13659 = vmatpush1.bf16.msra.mxu1 %v15588_v63 }
 0x9cc   : > { %13660 = vmatprep.subr.bf16.mxu1 %v15581_v49 }
 0x9cf   : > { %13661 = vmatpush1.bf16.msra.mxu1 %v15580_v19 }
 0x9d0   : > { %13662 = vmatprep.subr.bf16.mxu1 %v15573_v50 }
 0x9d3   : > { %13663 = vmatpush1.bf16.msra.mxu1 %v15572_v29 }
 0x9d4   : > { %13664 = vmatprep.subr.bf16.mxu1 %v15565_v23  ;;  %v12417_v23 = vrot.slane %v12404_v56, %v18294_v0 }
 0x9d7   : > { %13665 = vmatpush1.bf16.msra.mxu1 %v15564_v40 }
 0x9d8   : > { %13666 = vmatprep.subr.bf16.mxu1 %v15557_v34 }
 0x9db   : > { %13667 = vmatpush1.bf16.msra.mxu1 %v15556_v60 }
 0x9dc   : > { %13668 = vmatprep.subr.bf16.mxu1 %v15677_v18 }
 0x9df   : > { %13669 = vmatpush2.bf16.msra.mxu1 %v15676_v62 }
 0x9e0   : > { %13670 = vmatprep.subr.bf16.mxu1 %v15669_v15 }
 0x9e3   : > { %13671 = vmatpush2.bf16.msra.mxu1 %v15668_v6  ;;  %v12428_v6 = vsub.s32 5, %v17984_v44 }
 0x9e4   : > { %13672 = vmatprep.subr.bf16.mxu1 %v15661_v14  ;;  %v12425_v14 = vrot.slane %v12404_v56, %v12424_v1 }
 0x9e5   : > { %v12429_v47 = vrot.slane %v12404_v56, %v12428_v6 }
 0x9e7   : > { %13673 = vmatpush2.bf16.msra.mxu1 %v15660_v2 }
 0x9e8   : > { %13674 = vmatprep.subr.bf16.mxu1 %v15653_v9 }
 0x9eb   : > { %13675 = vmatpush2.bf16.msra.mxu1 %v15652_v39 }
 0x9ec   : > { %13676 = vmatprep.subr.bf16.mxu1 %v15645_v4 }
 0x9ef   : > { %13677 = vmatpush2.bf16.msra.mxu1 %v15644_v46 }
 0x9f0   : > { %13678 = vmatprep.subr.bf16.mxu1 %v15637_v5 }
 0x9f3   : > { %13679 = vmatpush2.bf16.msra.mxu1 %v15636_v48  ;;  %v12432_v48 = vsub.s32 6, %v17984_v44 }
 0x9f4   : > { %13680 = vmatprep.subr.bf16.mxu1 %v15629_v58  ;;  %v12436_v58 = vsub.s32 7, %v17984_v44 }
 0x9f5   : > { %v12433_v32 = vrot.slane %v12404_v56, %v12432_v48 }
 0x9f6   : > { %v12437_v41 = vrot.slane %v12404_v56, %v12436_v58 }
 0x9f7   : > { %13681 = vmatpush2.bf16.msra.mxu1 %v15628_v3 }
 0x9f8   : > { %13682 = vmatprep.subr.bf16.mxu1 %v15621_v57 }
 0x9fb   : > { %13683 = vmatpush2.bf16.msra.mxu1 %v15620_v10 }
 0x9fd   : > { %v13440_v26 = vpop.f32.mrf.mxu0 }
 0x9fe   : > { %13685 = vmatmul.mubr.bf16.vlgmr.msra.gmra.mxu1 %v18438_v11  ;;  %v13441_v36 = vadd.f32 %v13440_v26, %v12409_v20 }
 0x9ff   : > { %v13442_v8 = vpop.f32.mrf.mxu0 }
 0xa00   : > { %v13443_v63 = vadd.f32 %v13442_v8, %v12413_v45 }
 0xa01   : > { %v13444_v16 = vpop.f32.mrf.mxu0 }
 0xa03   : > { %v13445_v17 = vpop.f32.mrf.mxu0 }
 0xa1e   : > { %v13481_v30 = vpop.f32.mrf.mxu1  ;;  %v13563_v27 = vpop.f32.mrf.mxu0 }
 0xa1f   : > { %v13482_v49 = vadd.f32 %v13481_v30, %v13441_v36 }
 0xa20   : > { %v13483_v42 = vpop.f32.mrf.mxu1  ;;  %v13565_v54 = vpop.f32.mrf.mxu0 }
 0xa21   : > { %v13484_v19 = vadd.f32 %v13483_v42, %v13443_v63 }
 0xa22   : > { %v13485_v50 = vpop.f32.mrf.mxu1  ;;  %v13567_v37 = vpop.f32.mrf.mxu0 }
 0xa23   : > { %v13742_v13 = vcombine.low %v13482_v49, %v13484_v19 }
 0xa24   : > { %v13486_v11 = vpop.f32.mrf.mxu1  ;;  %v13568_v29 = vpop.f32.mrf.mxu0 }
 0xa25   : > { %v13750_v21 = vrot.slane %v13742_v13, %v17987_v53 }
 0xa5e   : > { %v13522_v35 = vpop.f32.mrf.mxu1  ;;  %v13604_v25 = vpop.f32.mrf.mxu0 }
 0xa5f   : > { %v13523_v38 = vadd.f32 %v13522_v35, %v12417_v23  ;;  %v13605_v24 = vadd.f32 %v13604_v25, %v12425_v14 }
 0xa60   : > { %v13524_v40 = vpop.f32.mrf.mxu1  ;;  %v13606_v34 = vpop.f32.mrf.mxu0 }
 0xa61   : > { %v13525_v43 = vadd.f32 %v13524_v40, %v12421_v33  ;;  %v13564_v18 = vadd.f32 %v13563_v27, %v13523_v38  ;;  %v13607_v59 = vadd.f32 %v13606_v34, %v12429_v47 }
 0xa62   : > { %v13526_v22 = vpop.f32.mrf.mxu1  ;;  %v13608_v60 = vpop.f32.mrf.mxu0 }
 0xa63   : > { %v13566_v12 = vadd.f32 %v13565_v54, %v13525_v43 }
 0xa64   : > { %v13527_v28 = vpop.f32.mrf.mxu1  ;;  %v13609_v62 = vpop.f32.mrf.mxu0 }
 0xa65   : > { %v13743_v15 = vcombine.low %v13564_v18, %v13566_v12 }
 0xa67   : > { %v13757_v0 = vrot.slane %v13743_v15, %v17987_v53 }
 0xa69   : > { %v13758_v55 = vcombine.low %v13750_v21, %v13757_v0 }
 0xa6b   : > { %13778 = vst [vmem:[%s18472_s14] sm:$0xff] %v13758_v55 }
 0xa7e   : > { %v13645_v2 = vpop.f32.mrf.mxu1  ;;  %v13727_v9 = vpop.f32.mrf.mxu0 }
 0xa7f   : > { %v13646_v61 = vadd.f32 %v13645_v2, %v13605_v24 }
 0xa80   : > { %v13647_v39 = vpop.f32.mrf.mxu1  ;;  %v13729_v4 = vpop.f32.mrf.mxu0 }
 0xa81   : > { %v13648_v7 = vadd.f32 %v13647_v39, %v13607_v59 }
 0xa82   : > { %v13649_v52 = vpop.f32.mrf.mxu1  ;;  %v13731_v46 = vpop.f32.mrf.mxu0 }
 0xa83   : > { %v13759_v5 = vcombine.low %v13646_v61, %v13648_v7 }
 0xa84   : > { %v13650_v31 = vpop.f32.mrf.mxu1  ;;  %v13732_v51 = vpop.f32.mrf.mxu0 }
 0xa85   : > { %v13767_v36 = vrot.slane %v13759_v5, %v17987_v53 }
 0xabe   : > { %v13686_v3 = vpop.f32.mrf.mxu1 }
 0xabf   : > { %v13687_v57 = vadd.f32 %v13686_v3, %v12433_v32 }
 0xac0   : > { %v13688_v10 = vpop.f32.mrf.mxu1 }
 0xac1   : > { %v13689_v26 = vadd.f32 %v13688_v10, %v12437_v41  ;;  %v13728_v16 = vadd.f32 %v13727_v9, %v13687_v57 }
 0xac2   : > { %v13690_v8 = vpop.f32.mrf.mxu1 }
 0xac3   : > { %v13730_v17 = vadd.f32 %v13729_v4, %v13689_v26 }
 0xac4   : > { %v13691_v20 = vpop.f32.mrf.mxu1 }
 0xac5   : > { %v13760_v45 = vcombine.low %v13728_v16, %v13730_v17 }
 0xac7   : > { %v13774_v44 = vrot.slane %v13760_v45, %v17987_v53 }
 0xac9   : > { %v13775_v30 = vcombine.low %v13767_v36, %v13774_v44 }
 0xacb   : > { %13779 = vst [vmem:[%s18472_s14 + $0x8] sm:$0xff] %v13775_v30 }
 0xacc   : > { %17502 = shalt.err (!%p17499_p0)
}
 0xacd   : > { %s17503_s5 = scalar_lea.hbm %s13793_s15, 256  ;;  %s17507_s25 = scalar_lea.hbm %s18600_s27, 768 }
 0xace   : > { %p17504_p8 = scmp.ne.s32.totalorder %s13793_s15, %s17503_s5  ;;  %p17508_p9 = scmp.lt.s32.totalorder %s13793_s15, %s18600_s27 }
 0xacf   : > { %p17509_p11 = scmp.lt.s32.totalorder %s17507_s25, %s17503_s5 }
 0xad0   : > { %p17505_p6 = pnand %p17504_p8, %p18601_p12 }
 0xad1   : > { %p17510_p3 = por %p17509_p11, %p17508_p9 }
 0xad2   : > { %p17506_p7 = pneg %p17505_p6 }
 0xad4   : > { %p17511_p5 = pnand %p17510_p3, %p17506_p7 }
 0xad6   : > { %17514 = shalt.err (!%p17511_p5)
}
 0xad7   : > { %15852 = dma.vmem_to_hbm [thread:$0]  (%p18601_p12), %s13796_s30, 256, %s13793_s15, %s13781_s11  }
 0xad8 PF: > { %p15932_p1 = scmp.ge.s32.totalorder %s17585_s21, 2  ;;  %s13807_s14 = sand.u32 1, %s17573_s18  }
 0xad9   : > { %p18602_p10 = scmp.ne.s32.totalorder %s18573_s17, 0  ;;  %s13808_s16 = scalar_lea.sflag [#allocation4], %s13807_s14 }
 0xadb   : > { %p15902_p13 = pnand %p15932_p1, %p18602_p10 }
 0xadd   : > { %p15903_p2 = pneg %p15902_p13 }
 0xadf   : > { %17568 = dma.done.wait (%p15903_p2), %s13808_s16, 256  }
 0xae0   : > { %17570 = vsyncadd (%p15903_p2), %s13808_s16, 4294967040  ;;  %s18603_s21 = sld [smem:[#allocation38_spill]]  ;;  %s18605_s18 = smov %s17577_s19 }
 0xae1   : > { %s18604_s3 = sld [smem:[#allocation39_spill]]  ;;  %s18606_s19 = smov %s17581_s20 }
 0xae6   : > { %p35_p4 = scmp.ge.s32.totalorder %s18603_s21, 5  }
 0xae7   : > { %s18607_s20 = smov %s18604_s3 }
 0xae8   :  { %37 = sbr.rel (!%p35_p4) target bundleno = 23 (0x17), region = 188 }
 0xaed   :  { %13813 = vsyncpa [#allocation3], 1 }
 0xaee   :  { %13815 = vsyncpa [#allocation3 + $0x1], 1 }
 0xaef   :  { %13816 = vsyncpa [#allocation6], 1 }
 0xaf0   :  { %13817 = vsyncpa [#allocation9], 1 }
 0xaf1   :  { %13818 = vsyncpa [#allocation12], 1 }
 0xaf2   :  { %13819 = vsyncpa [#allocation15], 1 }
 0xaf3   :  { %13820 = vsyncpa [#allocation18], 1 }
 0xaf4   :  { %13821 = vsyncpa [#allocation21], 1 }
 0xaf5   :  { %13822 = vsyncpa [#allocation24], 1 }
 0xaf6   :  { %13823 = vsyncpa [#allocation4], 1 }
 0xaf7   :  { %13825 = vsyncpa [#allocation4 + $0x1], 1 }

</bundles_post_ra>
